<compile_context>
chip_gen: v7x
topology: tpu7x:2x2x1
jax: 0.10.0
libtpu: 0.0.40
codegen_flags: <defaults>
</compile_context>

<pallas_src>
import functools

import jax
import jax.numpy as jnp
from jax import lax
from jax.experimental import pallas as pl
from jax.experimental.pallas import tpu as pltpu


# ---------------------------------------------------------------------------
# Kernel 1: single-K-block matmul + bias + optional ReLU (conv-as-im2col).
# No accumulator scratch: the whole K/N extent sits in one VMEM block.
# ---------------------------------------------------------------------------
def _mm_bias_act_kernel(a_ref, b_ref, bias_ref, o_ref, *, relu):
    out = jnp.dot(a_ref[...], b_ref[...], preferred_element_type=jnp.float32)
    out = out + bias_ref[...]                    # bias is (1, N), broadcasts
    if relu:
        out = jnp.maximum(out, 0.0)
    o_ref[...] = out.astype(o_ref.dtype)


def _pick_tm(m):
    """M tile: full M when small; otherwise a VMEM-friendly divisor."""
    if m <= 1024:
        return m
    for t in (1024, 512, 256):
        if m % t == 0:
            return t
    return m


def matmul_bias_act(a, b, bias, *, relu, out_dtype=jnp.float32):
    """relu?(a @ b + bias).  a:(M,K), b:(K,N), bias:(1,N) -> (M,N).

    K and N of the conv problems here fit a single VMEM block, so the only
    grid axis is a 'parallel' M axis (tiles only at larger batch; also lets
    v7x megacore split the work).
    """
    M, K = a.shape
    K2, N = b.shape
    assert K == K2 and bias.shape == (1, N)
    tm = _pick_tm(M)
    grid = (M // tm,)
    kernel = functools.partial(_mm_bias_act_kernel, relu=relu)
    return pl.pallas_call(
        kernel,
        out_shape=jax.ShapeDtypeStruct((M, N), out_dtype),
        grid_spec=pltpu.PrefetchScalarGridSpec(
            num_scalar_prefetch=0,
            grid=grid,
            in_specs=[
                pl.BlockSpec((tm, K), lambda i: (i, 0)),
                pl.BlockSpec((K, N), lambda i: (0, 0)),
                pl.BlockSpec((1, N), lambda i: (0, 0)),
            ],
            out_specs=pl.BlockSpec((tm, N), lambda i: (i, 0)),
        ),
        compiler_params=pltpu.CompilerParams(
            dimension_semantics=("parallel",)),
    )(a, b, bias)


# ---------------------------------------------------------------------------
# Kernel 2: fused FC1(+bias+ReLU) -> [Dropout = identity] -> FC2(+bias).
# Grid runs over FC1's output-feature axis (512 = n_blocks * tn).  FC2 is a
# contraction over that same axis, so each step accumulates its partial
# (M, 10) product into a tiny VMEM accumulator; only the final (M, 10) logits
# are written to HBM.  w3 streams from HBM in bf16 (the dominant traffic).
# ---------------------------------------------------------------------------
def _fc_fused_kernel(x_ref, w3_ref, b3_ref, w4_ref, b4_ref, o_ref, acc_ref):
    j = pl.program_id(0)

    @pl.when(j == 0)
    def _():
        acc_ref[...] = jnp.broadcast_to(b4_ref[...], acc_ref.shape)

    h = jnp.dot(x_ref[...], w3_ref[...], preferred_element_type=jnp.float32)
    h = jnp.maximum(h + b3_ref[...], 0.0)        # FC1 bias + ReLU
    # TODO(synk): Dropout(0.8) is identity here (eval-mode semantics).
    acc_ref[...] += jnp.dot(h, w4_ref[...], preferred_element_type=jnp.float32)

    @pl.when(j == pl.num_programs(0) - 1)
    def _():
        o_ref[...] = acc_ref[...].astype(o_ref.dtype)


def fc_fused(x, w3, b3, w4, b4, *, tn=256):
    M, K = x.shape
    K2, H = w3.shape
    H2, NOUT = w4.shape
    assert K == K2 and H == H2
    if H % tn:
        tn = H
    grid = (H // tn,)
    return pl.pallas_call(
        _fc_fused_kernel,
        out_shape=jax.ShapeDtypeStruct((M, NOUT), jnp.float32),
        grid_spec=pltpu.PrefetchScalarGridSpec(
            num_scalar_prefetch=0,
            grid=grid,
            in_specs=[
                pl.BlockSpec((M, K), lambda j: (0, 0)),     # resident, 25 KB
                pl.BlockSpec((K, tn), lambda j: (0, j)),    # bf16 weight stream
                pl.BlockSpec((1, tn), lambda j: (0, j)),
                pl.BlockSpec((tn, NOUT), lambda j: (j, 0)),
                pl.BlockSpec((1, NOUT), lambda j: (0, 0)),
            ],
            out_specs=pl.BlockSpec((M, NOUT), lambda j: (0, 0)),
            scratch_shapes=[pltpu.VMEM((M, NOUT), jnp.float32)],
        ),
        compiler_params=pltpu.CompilerParams(
            dimension_semantics=("arbitrary",)),
    )(x, w3, b3, w4, b4)


# ---------------------------------------------------------------------------
# Glue: 3x3 patch extraction (single XLA op per conv).  Output feature order
# is channel-major: index = c*9 + di*3 + dj (matches the weight reshape below).
# ---------------------------------------------------------------------------
def _patches_3x3(x_nhwc, stride, pad):
    return lax.conv_general_dilated_patches(
        x_nhwc, filter_shape=(3, 3), window_strides=(stride, stride),
        padding=((pad, pad), (pad, pad)),
        dimension_numbers=("NHWC", "HWIO", "NHWC"))


# ---------------------------------------------------------------------------
# Parameters: initialized in PyTorch layouts, converted ONCE (outside jit) to
# the layouts the kernels consume, so no transposes appear in the forward.
# ---------------------------------------------------------------------------
def init_params(key):
    ks = jax.random.split(key, 8)
    # PyTorch layouts
    w1 = 0.10 * jax.random.normal(ks[0], (64, 1, 3, 3), jnp.float32)     # OIHW
    b1 = 0.01 * jax.random.normal(ks[1], (64,), jnp.float32)
    w2 = 0.05 * jax.random.normal(ks[2], (128, 64, 3, 3), jnp.float32)   # OIHW
    b2 = 0.01 * jax.random.normal(ks[3], (128,), jnp.float32)
    w3 = 0.02 * jax.random.normal(ks[4], (512, 7 * 7 * 128), jnp.float32)  # (out,in), in=c*49+h*7+w
    b3 = 0.01 * jax.random.normal(ks[5], (512,), jnp.float32)
    w4 = 0.05 * jax.random.normal(ks[6], (10, 512), jnp.float32)
    b4 = 0.01 * jax.random.normal(ks[7], (10,), jnp.float32)

    # One-time conversion to kernel layouts (eager, not part of the jitted fwd)
    # conv weights -> (ci*3*3, co), row index = c*9 + di*3 + dj (patch order).
    w1m = jnp.transpose(w1, (1, 2, 3, 0)).reshape(1 * 9, 64)
    w2m = jnp.transpose(w2, (1, 2, 3, 0)).reshape(64 * 9, 128)
    # FC1 weight: permute rows from PyTorch's (C,H,W) flatten to the NHWC
    # flatten produced by the conv path, transpose to (K, N), cast to bf16.
    w3m = (w3.reshape(512, 128, 7, 7).transpose(2, 3, 1, 0)
             .reshape(7 * 7 * 128, 512).astype(jnp.bfloat16))
    w4m = w4.T                                                          # (512, 10)
    return {
        "w1m": w1m, "b1": b1.reshape(1, 64),
        "w2m": w2m, "b2": b2.reshape(1, 128),
        "w3m": w3m, "b3": b3.reshape(1, 512),
        "w4m": w4m, "b4": b4.reshape(1, 10),
    }


def model_forward(params, x_nchw):
    """Forward pass equivalent to Model.forward (inference mode)."""
    n, c, hh, ww = x_nchw.shape
    x = x_nchw.reshape(n, hh, ww, c)               # C==1: NCHW->NHWC is a reshape

    # conv1: patches + Pallas matmul (+bias+ReLU)
    p1 = _patches_3x3(x, stride=2, pad=1)          # (N,14,14,9)
    h1 = matmul_bias_act(p1.reshape(-1, 9), params["w1m"], params["b1"],
                         relu=True)                # (N*196, 64)
    h1 = h1.reshape(n, 14, 14, 64)

    # conv2: patches + Pallas matmul (+bias+ReLU), bf16 output feeds FC1
    p2 = _patches_3x3(h1, stride=2, pad=1)         # (N,7,7,576), feat = c*9+di*3+dj
    h2 = matmul_bias_act(p2.reshape(-1, 64 * 9), params["w2m"], params["b2"],
                         relu=True, out_dtype=jnp.bfloat16)   # (N*49, 128)

    # NHWC flatten (w3m rows were permuted at init to match), then fused FC.
    h2 = h2.reshape(n, 7 * 7 * 128)
    return fc_fused(h2, params["w3m"], params["b3"],
                    params["w4m"], params["b4"])


if __name__ == "__main__":
    key = jax.random.PRNGKey(0)
    pkey, xkey = jax.random.split(key)
    params = init_params(pkey)
    # The flatten to 7*7*128 implies 28x28 single-channel inputs (MNIST-like).
    x = jax.random.normal(xkey, (2, 1, 28, 28), jnp.float32)
    fwd = jax.jit(model_forward)
    out = fwd(params, x)
    jax.block_until_ready(out)
    assert out.shape == (2, 10) and out.dtype == jnp.float32
    print("KERNEL_OK")
</pallas_src>

<mosaic_0001>
module attributes {stable_mosaic.version = 11 : i64} {
  func.func @_mm_bias_act_kernel(%arg0: i32, %arg1: memref<392x9xf32, #tpu.memory_space<vmem>>, %arg2: memref<9x64xf32, #tpu.memory_space<vmem>>, %arg3: memref<1x64xf32, #tpu.memory_space<vmem>>, %arg4: memref<392x64xf32, #tpu.memory_space<vmem>>) attributes {dimension_semantics = [#tpu.dimension_semantics<parallel>], iteration_bounds = array<i64: 1>, scalar_prefetch = 0 : i64, scratch_operands = 0 : i64, tpu.core_type = #tpu.core_type<tc>, window_params = [{transform_indices = @transform_0, window_bounds = array<i64: 392, 9>}, {pipeline_mode = #tpu.pipeline_mode<synchronous>, transform_indices = @transform_1, window_bounds = array<i64: 9, 64>}, {pipeline_mode = #tpu.pipeline_mode<synchronous>, transform_indices = @transform_2, window_bounds = array<i64: 1, 64>}, {transform_indices = @transform_3, window_bounds = array<i64: 392, 64>}]} {
    %c0 = arith.constant 0 : index
    %c0_0 = arith.constant 0 : index
    %0 = vector.load %arg1[%c0, %c0_0] : memref<392x9xf32, #tpu.memory_space<vmem>>, vector<392x9xf32>
    %c0_1 = arith.constant 0 : index
    %c0_2 = arith.constant 0 : index
    %1 = vector.load %arg2[%c0_1, %c0_2] : memref<9x64xf32, #tpu.memory_space<vmem>>, vector<9x64xf32>
    %cst = arith.constant dense<0.000000e+00> : vector<392x64xf32>
    %2 = tpu.matmul %0, %1, %cst {dimension_numbers = #tpu.dot_dimension_numbers<[1], [0], [0], [1], [0, 0, 1, 1], [], []>} : vector<392x9xf32>, vector<9x64xf32>, vector<392x64xf32> -> vector<392x64xf32>
    %c0_3 = arith.constant 0 : index
    %c0_4 = arith.constant 0 : index
    %3 = vector.load %arg3[%c0_3, %c0_4] : memref<1x64xf32, #tpu.memory_space<vmem>>, vector<1x64xf32>
    %4 = vector.broadcast %3 : vector<1x64xf32> to vector<392x64xf32>
    %5 = arith.addf %2, %4 : vector<392x64xf32>
    %cst_5 = arith.constant 0.000000e+00 : f32
    %6 = vector.broadcast %cst_5 : f32 to vector<392x64xf32>
    %7 = arith.maximumf %5, %6 : vector<392x64xf32>
    %c0_6 = arith.constant 0 : index
    %c0_7 = arith.constant 0 : index
    %8 = vector.load %arg4[%c0_6, %c0_7] : memref<392x64xf32, #tpu.memory_space<vmem>>, vector<392x64xf32>
    tpu.vector_store %arg4[%c0_6, %c0_7], %7 {strides = array<i32>} : memref<392x64xf32, #tpu.memory_space<vmem>>, vector<392x64xf32>,
    return
  }
  func.func @transform_0(%arg0: i32) -> (i32, i32) {
    %c0_i32 = arith.constant 0 : i32
    %c0_i32_0 = arith.constant 0 : i32
    return %arg0, %c0_i32 : i32, i32
  }
  func.func @transform_1(%arg0: i32) -> (i32, i32) {
    %c0_i32 = arith.constant 0 : i32
    %c0_i32_0 = arith.constant 0 : i32
    %c0_i32_1 = arith.constant 0 : i32
    return %c0_i32, %c0_i32_0 : i32, i32
  }
  func.func @transform_2(%arg0: i32) -> (i32, i32) {
    %c0_i32 = arith.constant 0 : i32
    %c0_i32_0 = arith.constant 0 : i32
    %c0_i32_1 = arith.constant 0 : i32
    return %c0_i32, %c0_i32_0 : i32, i32
  }
  func.func @transform_3(%arg0: i32) -> (i32, i32) {
    %c0_i32 = arith.constant 0 : i32
    %c0_i32_0 = arith.constant 0 : i32
    return %arg0, %c0_i32 : i32, i32
  }
}

module attributes {stable_mosaic.version = 11 : i64} {
  func.func @_mm_bias_act_kernel(%arg0: i32, %arg1: memref<98x576xf32, #tpu.memory_space<vmem>>, %arg2: memref<576x128xf32, #tpu.memory_space<vmem>>, %arg3: memref<1x128xf32, #tpu.memory_space<vmem>>, %arg4: memref<98x128xbf16, #tpu.memory_space<vmem>>) attributes {dimension_semantics = [#tpu.dimension_semantics<parallel>], iteration_bounds = array<i64: 1>, scalar_prefetch = 0 : i64, scratch_operands = 0 : i64, tpu.core_type = #tpu.core_type<tc>, window_params = [{transform_indices = @transform_0, window_bounds = array<i64: 98, 576>}, {pipeline_mode = #tpu.pipeline_mode<synchronous>, transform_indices = @transform_1, window_bounds = array<i64: 576, 128>}, {pipeline_mode = #tpu.pipeline_mode<synchronous>, transform_indices = @transform_2, window_bounds = array<i64: 1, 128>}, {transform_indices = @transform_3, window_bounds = array<i64: 98, 128>}]} {
    %c0 = arith.constant 0 : index
    %c0_0 = arith.constant 0 : index
    %0 = vector.load %arg1[%c0, %c0_0] : memref<98x576xf32, #tpu.memory_space<vmem>>, vector<98x576xf32>
    %c0_1 = arith.constant 0 : index
    %c0_2 = arith.constant 0 : index
    %1 = vector.load %arg2[%c0_1, %c0_2] : memref<576x128xf32, #tpu.memory_space<vmem>>, vector<576x128xf32>
    %cst = arith.constant dense<0.000000e+00> : vector<98x128xf32>
    %2 = tpu.matmul %0, %1, %cst {dimension_numbers = #tpu.dot_dimension_numbers<[1], [0], [0], [1], [0, 0, 1, 1], [], []>} : vector<98x576xf32>, vector<576x128xf32>, vector<98x128xf32> -> vector<98x128xf32>
    %c0_3 = arith.constant 0 : index
    %c0_4 = arith.constant 0 : index
    %3 = vector.load %arg3[%c0_3, %c0_4] : memref<1x128xf32, #tpu.memory_space<vmem>>, vector<1x128xf32>
    %4 = vector.broadcast %3 : vector<1x128xf32> to vector<98x128xf32>
    %5 = arith.addf %2, %4 : vector<98x128xf32>
    %cst_5 = arith.constant 0.000000e+00 : f32
    %6 = vector.broadcast %cst_5 : f32 to vector<98x128xf32>
    %7 = arith.maximumf %5, %6 : vector<98x128xf32>
    %8 = arith.truncf %7 : vector<98x128xf32> to vector<98x128xbf16>
    %c0_6 = arith.constant 0 : index
    %c0_7 = arith.constant 0 : index
    %9 = vector.load %arg4[%c0_6, %c0_7] : memref<98x128xbf16, #tpu.memory_space<vmem>>, vector<98x128xbf16>
    tpu.vector_store %arg4[%c0_6, %c0_7], %8 {strides = array<i32>} : memref<98x128xbf16, #tpu.memory_space<vmem>>, vector<98x128xbf16>,
    return
  }
  func.func @transform_0(%arg0: i32) -> (i32, i32) {
    %c0_i32 = arith.constant 0 : i32
    %c0_i32_0 = arith.constant 0 : i32
    return %arg0, %c0_i32 : i32, i32
  }
  func.func @transform_1(%arg0: i32) -> (i32, i32) {
    %c0_i32 = arith.constant 0 : i32
    %c0_i32_0 = arith.constant 0 : i32
    %c0_i32_1 = arith.constant 0 : i32
    return %c0_i32, %c0_i32_0 : i32, i32
  }
  func.func @transform_2(%arg0: i32) -> (i32, i32) {
    %c0_i32 = arith.constant 0 : i32
    %c0_i32_0 = arith.constant 0 : i32
    %c0_i32_1 = arith.constant 0 : i32
    return %c0_i32, %c0_i32_0 : i32, i32
  }
  func.func @transform_3(%arg0: i32) -> (i32, i32) {
    %c0_i32 = arith.constant 0 : i32
    %c0_i32_0 = arith.constant 0 : i32
    return %arg0, %c0_i32 : i32, i32
  }
}

module attributes {stable_mosaic.version = 11 : i64} {
  func.func @_fc_fused_kernel(%arg0: i32, %arg1: memref<2x6272xbf16, #tpu.memory_space<vmem>>, %arg2: memref<6272x256xbf16, #tpu.memory_space<vmem>>, %arg3: memref<1x256xf32, #tpu.memory_space<vmem>>, %arg4: memref<256x10xf32, #tpu.memory_space<vmem>>, %arg5: memref<1x10xf32, #tpu.memory_space<vmem>>, %arg6: memref<2x10xf32, #tpu.memory_space<vmem>>, %arg7: memref<2x10xf32, #tpu.memory_space<vmem>>) attributes {dimension_semantics = [#tpu.dimension_semantics<arbitrary>], iteration_bounds = array<i64: 2>, scalar_prefetch = 0 : i64, scratch_operands = 1 : i64, tpu.core_type = #tpu.core_type<tc>, window_params = [{pipeline_mode = #tpu.pipeline_mode<synchronous>, transform_indices = @transform_0, window_bounds = array<i64: 2, 6272>}, {transform_indices = @transform_1, window_bounds = array<i64: 6272, 256>}, {transform_indices = @transform_2, window_bounds = array<i64: 1, 256>}, {transform_indices = @transform_3, window_bounds = array<i64: 256, 10>}, {pipeline_mode = #tpu.pipeline_mode<synchronous>, transform_indices = @transform_4, window_bounds = array<i64: 1, 10>}, {pipeline_mode = #tpu.pipeline_mode<synchronous>, transform_indices = @transform_5, window_bounds = array<i64: 2, 10>}]} {
    %c0_i32 = arith.constant 0 : i32
    %0 = arith.cmpi eq, %arg0, %c0_i32 : i32
    %1 = arith.extui %0 : i1 to i32
    %c0_i32_0 = arith.constant 0 : i32
    %2 = arith.cmpi ne, %1, %c0_i32_0 : i32
    scf.if %2 {
      %c0_15 = arith.constant 0 : index
      %c0_16 = arith.constant 0 : index
      %19 = vector.load %arg5[%c0_15, %c0_16] : memref<1x10xf32, #tpu.memory_space<vmem>>, vector<1x10xf32>
      %20 = vector.shape_cast %19 : vector<1x10xf32> to vector<1x10xf32>
      %21 = vector.broadcast %20 : vector<1x10xf32> to vector<2x10xf32>
      %c0_17 = arith.constant 0 : index
      %c0_18 = arith.constant 0 : index
      %22 = vector.load %arg7[%c0_17, %c0_18] : memref<2x10xf32, #tpu.memory_space<vmem>>, vector<2x10xf32>
      tpu.vector_store %arg7[%c0_17, %c0_18], %21 {strides = array<i32>} : memref<2x10xf32, #tpu.memory_space<vmem>>, vector<2x10xf32>,
    } else {
    }
    %c0 = arith.constant 0 : index
    %c0_1 = arith.constant 0 : index
    %3 = vector.load %arg1[%c0, %c0_1] : memref<2x6272xbf16, #tpu.memory_space<vmem>>, vector<2x6272xbf16>
    %c0_2 = arith.constant 0 : index
    %c0_3 = arith.constant 0 : index
    %4 = vector.load %arg2[%c0_2, %c0_3] : memref<6272x256xbf16, #tpu.memory_space<vmem>>, vector<6272x256xbf16>
    %cst = arith.constant dense<0.000000e+00> : vector<2x256xf32>
    %5 = tpu.matmul %3, %4, %cst {dimension_numbers = #tpu.dot_dimension_numbers<[1], [0], [0], [1], [0, 0, 1, 1], [], []>} : vector<2x6272xbf16>, vector<6272x256xbf16>, vector<2x256xf32> -> vector<2x256xf32>
    %c0_4 = arith.constant 0 : index
    %c0_5 = arith.constant 0 : index
    %6 = vector.load %arg3[%c0_4, %c0_5] : memref<1x256xf32, #tpu.memory_space<vmem>>, vector<1x256xf32>
    %7 = vector.broadcast %6 : vector<1x256xf32> to vector<2x256xf32>
    %8 = arith.addf %5, %7 : vector<2x256xf32>
    %cst_6 = arith.constant 0.000000e+00 : f32
    %9 = vector.broadcast %cst_6 : f32 to vector<2x256xf32>
    %10 = arith.maximumf %8, %9 : vector<2x256xf32>
    %c0_7 = arith.constant 0 : index
    %c0_8 = arith.constant 0 : index
    %11 = vector.load %arg7[%c0_7, %c0_8] : memref<2x10xf32, #tpu.memory_space<vmem>>, vector<2x10xf32>
    %c0_9 = arith.constant 0 : index
    %c0_10 = arith.constant 0 : index
    %12 = vector.load %arg4[%c0_9, %c0_10] : memref<256x10xf32, #tpu.memory_space<vmem>>, vector<256x10xf32>
    %cst_11 = arith.constant dense<0.000000e+00> : vector<2x10xf32>
    %13 = tpu.matmul %10, %12, %cst_11 {dimension_numbers = #tpu.dot_dimension_numbers<[1], [0], [0], [1], [0, 0, 1, 1], [], []>} : vector<2x256xf32>, vector<256x10xf32>, vector<2x10xf32> -> vector<2x10xf32>
    %14 = arith.addf %11, %13 : vector<2x10xf32>
    %c0_12 = arith.constant 0 : index
    %c0_13 = arith.constant 0 : index
    %15 = vector.load %arg7[%c0_12, %c0_13] : memref<2x10xf32, #tpu.memory_space<vmem>>, vector<2x10xf32>
    tpu.vector_store %arg7[%c0_12, %c0_13], %14 {strides = array<i32>} : memref<2x10xf32, #tpu.memory_space<vmem>>, vector<2x10xf32>,
    %c1_i32 = arith.constant 1 : i32
    %16 = arith.cmpi eq, %arg0, %c1_i32 : i32
    %17 = arith.extui %16 : i1 to i32
    %c0_i32_14 = arith.constant 0 : i32
    %18 = arith.cmpi ne, %17, %c0_i32_14 : i32
    scf.if %18 {
      %c0_15 = arith.constant 0 : index
      %c0_16 = arith.constant 0 : index
      %19 = vector.load %arg7[%c0_15, %c0_16] : memref<2x10xf32, #tpu.memory_space<vmem>>, vector<2x10xf32>
      %c0_17 = arith.constant 0 : index
      %c0_18 = arith.constant 0 : index
      %20 = vector.load %arg6[%c0_17, %c0_18] : memref<2x10xf32, #tpu.memory_space<vmem>>, vector<2x10xf32>
      tpu.vector_store %arg6[%c0_17, %c0_18], %19 {strides = array<i32>} : memref<2x10xf32, #tpu.memory_space<vmem>>, vector<2x10xf32>,
    } else {
    }
    return
  }
  func.func @transform_0(%arg0: i32) -> (i32, i32) {
    %c0_i32 = arith.constant 0 : i32
    %c0_i32_0 = arith.constant 0 : i32
    %c0_i32_1 = arith.constant 0 : i32
    return %c0_i32, %c0_i32_0 : i32, i32
  }
  func.func @transform_1(%arg0: i32) -> (i32, i32) {
    %c0_i32 = arith.constant 0 : i32
    %c0_i32_0 = arith.constant 0 : i32
    return %c0_i32, %arg0 : i32, i32
  }
  func.func @transform_2(%arg0: i32) -> (i32, i32) {
    %c0_i32 = arith.constant 0 : i32
    %c0_i32_0 = arith.constant 0 : i32
    return %c0_i32, %arg0 : i32, i32
  }
  func.func @transform_3(%arg0: i32) -> (i32, i32) {
    %c0_i32 = arith.constant 0 : i32
    %c0_i32_0 = arith.constant 0 : i32
    return %arg0, %c0_i32 : i32, i32
  }
  func.func @transform_4(%arg0: i32) -> (i32, i32) {
    %c0_i32 = arith.constant 0 : i32
    %c0_i32_0 = arith.constant 0 : i32
    %c0_i32_1 = arith.constant 0 : i32
    return %c0_i32, %c0_i32_0 : i32, i32
  }
  func.func @transform_5(%arg0: i32) -> (i32, i32) {
    %c0_i32 = arith.constant 0 : i32
    %c0_i32_0 = arith.constant 0 : i32
    %c0_i32_1 = arith.constant 0 : i32
    return %c0_i32, %c0_i32_0 : i32, i32
  }
}

</mosaic_0001>

<bundles_post_ra>
// kernel: model_forward.3
= control target key start
LH: loop header
LB: loop body
LE: loop exit
PB: predicated region body
PF: predicated region fallthrough
CT: control target
= control target key end

     0   :  { %vm220_vm0 = vcmask 1040384   ;;  %v900_v0 = vmov 0.0|0.0   ;;  %vm901_vm1 = vmmov 1   ;;  %vm902_vm3 = vmmov 0   ;;  %s1474_s1 = inlined_call_operand.vmem [shape: f32[9,64], index: 1, kind: input, shape index: {}]   ;;  %s1475_s0 = inlined_call_operand.vmem [shape: f32[392,9], index: 0, kind: input, shape index: {}]   ;;  %s1476_s2 = inlined_call_operand.vmem [shape: f32[1,64], index: 2, kind: input, shape index: {}]   ;;  %s1477_s3 = inlined_call_operand.vmem [shape: f32[392,64], index: 3, kind: output, shape index: {}]  }
   0x1   :  { %890 = vmatprep.subr.bf16.mxu0 %v900_v0  ;;  %v63_v1 = vld [vmem:[%s1474_s1] sm:$0xff]  ;;  %v64_v2 = vld [vmem:[%s1474_s1 + $0x8] sm:$0x1]  ;;  %vm892_vm2 = vmpackc.low %vm220_vm0, %vm901_vm1  ;;  %894 = vmatprep.subr.bf16.mxu1 %v900_v0  ;;  %v903_v4 = vmov 0.0   ;;  %vm72_vm4 = vcmask 72704   ;;  %vm583_vm5 = vcmask 523264  }
   0x2   :  { %v891_v3 = vpack.c.bf16 %v64_v2, %v63_v1  ;;  %743 = vmatprep.mubr.msk.f32.mxu0 %vm902_vm3, %v903_v4  ;;  %818 = vmatprep.mubr.msk.f32.mxu1 %vm902_vm3, %v903_v4  ;;  %v14_v5 = vld [vmem:[%s1475_s0] sm:$0xff]  ;;  %v39_v6 = vld [vmem:[%s1475_s0 + $0xc8] sm:$0xff]  ;;  %v40_v8 = vld [vmem:[%s1475_s0 + $0xd0] sm:$0xff] }
   0x3   :  { %v15_v7 = vld [vmem:[%s1475_s0 + $0x8] sm:$0xff]  ;;  %v16_v9 = vld [vmem:[%s1475_s0 + $0x10] sm:$0xff]  ;;  %v41_v10 = vld [vmem:[%s1475_s0 + $0xd8] sm:$0xff] }
   0x4   :  { %893 = vmatpush3.bf16.msk.msra.mxu0 %vm892_vm2, %v891_v3  ;;  %895 = vmatpush3.bf16.msk.msra.mxu1 %vm892_vm2, %v891_v3  ;;  %v17_v11 = vld [vmem:[%s1475_s0 + $0x18] sm:$0xff]  ;;  %v42_v12 = vld [vmem:[%s1475_s0 + $0xe0] sm:$0xff]  ;;  %v43_v14 = vld [vmem:[%s1475_s0 + $0xe8] sm:$0xff] }
   0x5   :  { %v18_v13 = vld [vmem:[%s1475_s0 + $0x20] sm:$0xff]  ;;  %v19_v15 = vld [vmem:[%s1475_s0 + $0x28] sm:$0xff]  ;;  %v44_v16 = vld [vmem:[%s1475_s0 + $0xf0] sm:$0xff] }
   0x6   :  { %v20_v17 = vld [vmem:[%s1475_s0 + $0x30] sm:$0xff]  ;;  %v45_v18 = vld [vmem:[%s1475_s0 + $0xf8] sm:$0xff]  ;;  %v46_v20 = vld [vmem:[%s1475_s0 + $0x100] sm:$0xff] }
   0x7   :  { %744 = vmatmul.mubr.msk.f32.vlgmr.msra.gmra.mrb[0].mxu0 %vm72_vm4, %v14_v5  ;;  %819 = vmatmul.mubr.msk.f32.vlgmr.msra.gmra.mrb[0].mxu1 %vm72_vm4, %v39_v6  ;;  %v21_v19 = vld [vmem:[%s1475_s0 + $0x38] sm:$0xff]  ;;  %v22_v21 = vld [vmem:[%s1475_s0 + $0x40] sm:$0xff]  ;;  %v47_v22 = vld [vmem:[%s1475_s0 + $0x108] sm:$0xff] }
   0x8   :  { %746 = vmatprep.mubr.msk.f32.mxu0 %vm902_vm3, %v903_v4  ;;  %821 = vmatprep.mubr.msk.f32.mxu1 %vm902_vm3, %v903_v4  ;;  %v23_v23 = vld [vmem:[%s1475_s0 + $0x48] sm:$0xff]  ;;  %v48_v24 = vld [vmem:[%s1475_s0 + $0x110] sm:$0xff]  ;;  %v49_v26 = vld [vmem:[%s1475_s0 + $0x118] sm:$0xff] }
   0x9   :  { %v24_v25 = vld [vmem:[%s1475_s0 + $0x50] sm:$0xff]  ;;  %v25_v27 = vld [vmem:[%s1475_s0 + $0x58] sm:$0xff]  ;;  %v50_v28 = vld [vmem:[%s1475_s0 + $0x120] sm:$0xff] }
   0xa   :  { %v26_v29 = vld [vmem:[%s1475_s0 + $0x60] sm:$0xff]  ;;  %v51_v30 = vld [vmem:[%s1475_s0 + $0x128] sm:$0xff]  ;;  %v52_v32 = vld [vmem:[%s1475_s0 + $0x130] sm:$0xff] }
   0xb   :  { %747 = vmatmul.mubr.msk.f32.gmra.mrb[2].mxu0 %vm72_vm4, %v15_v7  ;;  %822 = vmatmul.mubr.msk.f32.gmra.mrb[2].mxu1 %vm72_vm4, %v40_v8  ;;  %v27_v31 = vld [vmem:[%s1475_s0 + $0x68] sm:$0xff]  ;;  %v28_v33 = vld [vmem:[%s1475_s0 + $0x70] sm:$0xff]  ;;  %v53_v34 = vld [vmem:[%s1475_s0 + $0x138] sm:$0xff] }
   0xc   :  { %749 = vmatprep.mubr.msk.f32.mxu0 %vm902_vm3, %v903_v4  ;;  %824 = vmatprep.mubr.msk.f32.mxu1 %vm902_vm3, %v903_v4  ;;  %v29_v35 = vld [vmem:[%s1475_s0 + $0x78] sm:$0xff]  ;;  %v54_v36 = vld [vmem:[%s1475_s0 + $0x140] sm:$0xff]  ;;  %v55_v38 = vld [vmem:[%s1475_s0 + $0x148] sm:$0xff] }
   0xd   :  { %v30_v37 = vld [vmem:[%s1475_s0 + $0x80] sm:$0xff]  ;;  %v31_v39 = vld [vmem:[%s1475_s0 + $0x88] sm:$0xff]  ;;  %v56_v40 = vld [vmem:[%s1475_s0 + $0x150] sm:$0xff] }
   0xe   :  { %v32_v41 = vld [vmem:[%s1475_s0 + $0x90] sm:$0xff]  ;;  %v57_v42 = vld [vmem:[%s1475_s0 + $0x158] sm:$0xff]  ;;  %v58_v44 = vld [vmem:[%s1475_s0 + $0x160] sm:$0xff] }
   0xf   :  { %750 = vmatmul.mubr.msk.f32.gmra.mrb[4].mxu0 %vm72_vm4, %v16_v9  ;;  %825 = vmatmul.mubr.msk.f32.gmra.mrb[4].mxu1 %vm72_vm4, %v41_v10  ;;  %v33_v43 = vld [vmem:[%s1475_s0 + $0x98] sm:$0xff]  ;;  %v34_v45 = vld [vmem:[%s1475_s0 + $0xa0] sm:$0xff]  ;;  %v59_v46 = vld [vmem:[%s1475_s0 + $0x168] sm:$0xff] }
  0x10   :  { %752 = vmatprep.mubr.msk.f32.mxu0 %vm902_vm3, %v903_v4  ;;  %827 = vmatprep.mubr.msk.f32.mxu1 %vm902_vm3, %v903_v4  ;;  %v35_v47 = vld [vmem:[%s1475_s0 + $0xa8] sm:$0xff]  ;;  %v60_v48 = vld [vmem:[%s1475_s0 + $0x170] sm:$0xff]  ;;  %v61_v50 = vld [vmem:[%s1475_s0 + $0x178] sm:$0xff] }
  0x11   :  { %v36_v49 = vld [vmem:[%s1475_s0 + $0xb0] sm:$0xff]  ;;  %v37_v51 = vld [vmem:[%s1475_s0 + $0xb8] sm:$0xff]  ;;  %v62_v52 = vld [vmem:[%s1475_s0 + $0x180] sm:$0xff] }
  0x12   :  { %v38_v53 = vld [vmem:[%s1475_s0 + $0xc0] sm:$0xff] }
  0x13   :  { %753 = vmatmul.mubr.msk.f32.gmra.mrb[6].mxu0 %vm72_vm4, %v17_v11  ;;  %828 = vmatmul.mubr.msk.f32.gmra.mrb[6].mxu1 %vm72_vm4, %v42_v12  ;;  %v1227_v54 = vld [vmem:[%s1476_s2] ss:$0 sm:$0xff] }
  0x14   :  { %755 = vmatprep.mubr.msk.f32.mxu0 %vm902_vm3, %v903_v4  ;;  %830 = vmatprep.mubr.msk.f32.mxu1 %vm902_vm3, %v903_v4 }
  0x17   :  { %756 = vmatmul.mubr.msk.f32.gmra.mrb[8].mxu0 %vm72_vm4, %v18_v13  ;;  %831 = vmatmul.mubr.msk.f32.gmra.mrb[8].mxu1 %vm72_vm4, %v43_v14 }
  0x18   :  { %758 = vmatprep.mubr.msk.f32.mxu0 %vm902_vm3, %v903_v4  ;;  %833 = vmatprep.mubr.msk.f32.mxu1 %vm902_vm3, %v903_v4 }
  0x1b   :  { %759 = vmatmul.mubr.msk.f32.gmra.mrb[10].mxu0 %vm72_vm4, %v19_v15  ;;  %834 = vmatmul.mubr.msk.f32.gmra.mrb[10].mxu1 %vm72_vm4, %v44_v16 }
  0x1c   :  { %761 = vmatprep.mubr.msk.f32.mxu0 %vm902_vm3, %v903_v4  ;;  %836 = vmatprep.mubr.msk.f32.mxu1 %vm902_vm3, %v903_v4 }
  0x1f   :  { %762 = vmatmul.mubr.msk.f32.gmra.mrb[12].mxu0 %vm72_vm4, %v20_v17  ;;  %837 = vmatmul.mubr.msk.f32.gmra.mrb[12].mxu1 %vm72_vm4, %v45_v18 }
  0x20   :  { %764 = vmatprep.mubr.msk.f32.mxu0 %vm902_vm3, %v903_v4  ;;  %839 = vmatprep.mubr.msk.f32.mxu1 %vm902_vm3, %v903_v4 }
  0x23   :  { %765 = vmatmul.mubr.msk.f32.gmra.mrb[14].mxu0 %vm72_vm4, %v21_v19  ;;  %840 = vmatmul.mubr.msk.f32.gmra.mrb[14].mxu1 %vm72_vm4, %v46_v20 }
  0x24   :  { %767 = vmatprep.mubr.msk.f32.mxu0 %vm902_vm3, %v903_v4  ;;  %842 = vmatprep.mubr.msk.f32.mxu1 %vm902_vm3, %v903_v4 }
  0x27   :  { %768 = vmatmul.mubr.msk.f32.gmra.mrb[16].mxu0 %vm72_vm4, %v22_v21  ;;  %843 = vmatmul.mubr.msk.f32.gmra.mrb[16].mxu1 %vm72_vm4, %v47_v22 }
  0x28   :  { %770 = vmatprep.mubr.msk.f32.mxu0 %vm902_vm3, %v903_v4  ;;  %845 = vmatprep.mubr.msk.f32.mxu1 %vm902_vm3, %v903_v4 }
  0x2b   :  { %771 = vmatmul.mubr.msk.f32.gmra.mrb[18].mxu0 %vm72_vm4, %v23_v23  ;;  %846 = vmatmul.mubr.msk.f32.gmra.mrb[18].mxu1 %vm72_vm4, %v48_v24 }
  0x2c   :  { %773 = vmatprep.mubr.msk.f32.mxu0 %vm902_vm3, %v903_v4  ;;  %848 = vmatprep.mubr.msk.f32.mxu1 %vm902_vm3, %v903_v4 }
  0x2f   :  { %774 = vmatmul.mubr.msk.f32.gmra.mrb[20].mxu0 %vm72_vm4, %v24_v25  ;;  %849 = vmatmul.mubr.msk.f32.gmra.mrb[20].mxu1 %vm72_vm4, %v49_v26 }
  0x30   :  { %776 = vmatprep.mubr.msk.f32.mxu0 %vm902_vm3, %v903_v4  ;;  %851 = vmatprep.mubr.msk.f32.mxu1 %vm902_vm3, %v903_v4 }
  0x33   :  { %777 = vmatmul.mubr.msk.f32.gmra.mrb[22].mxu0 %vm72_vm4, %v25_v27  ;;  %852 = vmatmul.mubr.msk.f32.gmra.mrb[22].mxu1 %vm72_vm4, %v50_v28 }
  0x34   :  { %779 = vmatprep.mubr.msk.f32.mxu0 %vm902_vm3, %v903_v4  ;;  %854 = vmatprep.mubr.msk.f32.mxu1 %vm902_vm3, %v903_v4 }
  0x37   :  { %780 = vmatmul.mubr.msk.f32.gmra.mrb[24].mxu0 %vm72_vm4, %v26_v29  ;;  %855 = vmatmul.mubr.msk.f32.gmra.mrb[24].mxu1 %vm72_vm4, %v51_v30 }
  0x38   :  { %782 = vmatprep.mubr.msk.f32.mxu0 %vm902_vm3, %v903_v4  ;;  %857 = vmatprep.mubr.msk.f32.mxu1 %vm902_vm3, %v903_v4 }
  0x3b   :  { %783 = vmatmul.mubr.msk.f32.gmra.mrb[26].mxu0 %vm72_vm4, %v27_v31  ;;  %858 = vmatmul.mubr.msk.f32.gmra.mrb[26].mxu1 %vm72_vm4, %v52_v32 }
  0x3c   :  { %785 = vmatprep.mubr.msk.f32.mxu0 %vm902_vm3, %v903_v4  ;;  %860 = vmatprep.mubr.msk.f32.mxu1 %vm902_vm3, %v903_v4 }
  0x3f   :  { %786 = vmatmul.mubr.msk.f32.gmra.mrb[28].mxu0 %vm72_vm4, %v28_v33  ;;  %861 = vmatmul.mubr.msk.f32.gmra.mrb[28].mxu1 %vm72_vm4, %v53_v34 }
  0x40   :  { %788 = vmatprep.mubr.msk.f32.mxu0 %vm902_vm3, %v903_v4  ;;  %863 = vmatprep.mubr.msk.f32.mxu1 %vm902_vm3, %v903_v4 }
  0x43   :  { %789 = vmatmul.mubr.msk.f32.gmra.mrb[30].mxu0 %vm72_vm4, %v29_v35  ;;  %864 = vmatmul.mubr.msk.f32.gmra.mrb[30].mxu1 %vm72_vm4, %v54_v36 }
  0x44   :  { %791 = vmatprep.mubr.msk.f32.mxu0 %vm902_vm3, %v903_v4  ;;  %866 = vmatprep.mubr.msk.f32.mxu1 %vm902_vm3, %v903_v4 }
  0x47   :  { %792 = vmatmul.mubr.msk.f32.gmra.mrb[32].mxu0 %vm72_vm4, %v30_v37  ;;  %867 = vmatmul.mubr.msk.f32.gmra.mrb[32].mxu1 %vm72_vm4, %v55_v38 }
  0x48   :  { %794 = vmatprep.mubr.msk.f32.mxu0 %vm902_vm3, %v903_v4  ;;  %869 = vmatprep.mubr.msk.f32.mxu1 %vm902_vm3, %v903_v4 }
  0x4b   :  { %795 = vmatmul.mubr.msk.f32.gmra.mrb[34].mxu0 %vm72_vm4, %v31_v39  ;;  %870 = vmatmul.mubr.msk.f32.gmra.mrb[34].mxu1 %vm72_vm4, %v56_v40 }
  0x4c   :  { %797 = vmatprep.mubr.msk.f32.mxu0 %vm902_vm3, %v903_v4  ;;  %872 = vmatprep.mubr.msk.f32.mxu1 %vm902_vm3, %v903_v4 }
  0x4f   :  { %798 = vmatmul.mubr.msk.f32.gmra.mrb[36].mxu0 %vm72_vm4, %v32_v41  ;;  %873 = vmatmul.mubr.msk.f32.gmra.mrb[36].mxu1 %vm72_vm4, %v57_v42 }
  0x50   :  { %800 = vmatprep.mubr.msk.f32.mxu0 %vm902_vm3, %v903_v4  ;;  %875 = vmatprep.mubr.msk.f32.mxu1 %vm902_vm3, %v903_v4 }
  0x53   :  { %801 = vmatmul.mubr.msk.f32.gmra.mrb[38].mxu0 %vm72_vm4, %v33_v43  ;;  %876 = vmatmul.mubr.msk.f32.gmra.mrb[38].mxu1 %vm72_vm4, %v58_v44 }
  0x54   :  { %803 = vmatprep.mubr.msk.f32.mxu0 %vm902_vm3, %v903_v4  ;;  %878 = vmatprep.mubr.msk.f32.mxu1 %vm902_vm3, %v903_v4 }
  0x57   :  { %804 = vmatmul.mubr.msk.f32.gmra.mrb[40].mxu0 %vm72_vm4, %v34_v45  ;;  %879 = vmatmul.mubr.msk.f32.gmra.mrb[40].mxu1 %vm72_vm4, %v59_v46 }
  0x58   :  { %806 = vmatprep.mubr.msk.f32.mxu0 %vm902_vm3, %v903_v4  ;;  %881 = vmatprep.mubr.msk.f32.mxu1 %vm902_vm3, %v903_v4 }
  0x5b   :  { %807 = vmatmul.mubr.msk.f32.gmra.mrb[42].mxu0 %vm72_vm4, %v35_v47  ;;  %882 = vmatmul.mubr.msk.f32.gmra.mrb[42].mxu1 %vm72_vm4, %v60_v48 }
  0x5c   :  { %809 = vmatprep.mubr.msk.f32.mxu0 %vm902_vm3, %v903_v4  ;;  %884 = vmatprep.mubr.msk.f32.mxu1 %vm902_vm3, %v903_v4 }
  0x5f   :  { %810 = vmatmul.mubr.msk.f32.gmra.mrb[44].mxu0 %vm72_vm4, %v36_v49  ;;  %885 = vmatmul.mubr.msk.f32.gmra.mrb[44].mxu1 %vm72_vm4, %v61_v50 }
  0x60   :  { %812 = vmatprep.mubr.msk.f32.mxu0 %vm902_vm3, %v903_v4  ;;  %887 = vmatprep.mubr.msk.f32.mxu1 %vm902_vm3, %v903_v4 }
  0x63   :  { %813 = vmatmul.mubr.msk.f32.gmra.mrb[46].mxu0 %vm72_vm4, %v37_v51  ;;  %888 = vmatmul.mubr.msk.f32.gmra.mrb[46].mxu1 %vm72_vm4, %v62_v52 }
  0x64   :  { %815 = vmatprep.mubr.msk.f32.mxu0 %vm902_vm3, %v903_v4 }
  0x67   :  { %816 = vmatmul.mubr.msk.f32.gmra.mrb[48].mxu0 %vm72_vm4, %v38_v53 }
  0xda   :  { %v290_v55 = vpop.f32.mrb[0].mxu0  ;;  %v415_v56 = vpop.f32.mrb[0].mxu1 }
  0xdb   :  { %v291_v57 = vadd.f32 %v1227_v54, %v290_v55  ;;  %v745_v58 = vpop.f32.mrb[1].mxu0  ;;  %v416_v59 = vadd.f32 %v1227_v54, %v415_v56  ;;  %v820_v60 = vpop.f32.mrb[1].mxu1 }
  0xdd   :  { %v534_v61 = vmax.f32 %v291_v57, 0.0  ;;  %v559_v62 = vmax.f32 %v416_v59, 0.0 }
  0xde   :  { %v295_v63 = vpop.f32.mrb[2].mxu0  ;;  %v420_v0 = vpop.f32.mrb[2].mxu1 }
  0xdf   :  { %584 = vst.msk [vmem:[%s1477_s3] sm:$0xff] %vm583_vm5, %v534_v61  ;;  %609 = vst.msk [vmem:[%s1477_s3 + $0xc8] sm:$0xff] %vm583_vm5, %v559_v62  ;;  %v296_v1 = vadd.f32 %v1227_v54, %v295_v63  ;;  %v748_v2 = vpop.f32.mrb[3].mxu0  ;;  %v421_v3 = vadd.f32 %v1227_v54, %v420_v0  ;;  %v823_v4 = vpop.f32.mrb[3].mxu1 }
  0xe1   :  { %v535_v5 = vmax.f32 %v296_v1, 0.0  ;;  %v560_v6 = vmax.f32 %v421_v3, 0.0 }
  0xe2   :  { %v300_v7 = vpop.f32.mrb[4].mxu0  ;;  %v425_v8 = vpop.f32.mrb[4].mxu1 }
  0xe3   :  { %585 = vst.msk [vmem:[%s1477_s3 + $0x8] sm:$0xff] %vm583_vm5, %v535_v5  ;;  %610 = vst.msk [vmem:[%s1477_s3 + $0xd0] sm:$0xff] %vm583_vm5, %v560_v6  ;;  %v301_v9 = vadd.f32 %v1227_v54, %v300_v7  ;;  %v751_v10 = vpop.f32.mrb[5].mxu0  ;;  %v426_v11 = vadd.f32 %v1227_v54, %v425_v8  ;;  %v826_v12 = vpop.f32.mrb[5].mxu1 }
  0xe5   :  { %v536_v13 = vmax.f32 %v301_v9, 0.0  ;;  %v561_v14 = vmax.f32 %v426_v11, 0.0 }
  0xe6   :  { %v305_v15 = vpop.f32.mrb[6].mxu0  ;;  %v430_v16 = vpop.f32.mrb[6].mxu1 }
  0xe7   :  { %586 = vst.msk [vmem:[%s1477_s3 + $0x10] sm:$0xff] %vm583_vm5, %v536_v13  ;;  %611 = vst.msk [vmem:[%s1477_s3 + $0xd8] sm:$0xff] %vm583_vm5, %v561_v14  ;;  %v306_v17 = vadd.f32 %v1227_v54, %v305_v15  ;;  %v754_v18 = vpop.f32.mrb[7].mxu0  ;;  %v431_v19 = vadd.f32 %v1227_v54, %v430_v16  ;;  %v829_v20 = vpop.f32.mrb[7].mxu1 }
  0xe9   :  { %v537_v21 = vmax.f32 %v306_v17, 0.0  ;;  %v562_v22 = vmax.f32 %v431_v19, 0.0 }
  0xea   :  { %v310_v23 = vpop.f32.mrb[8].mxu0  ;;  %v435_v24 = vpop.f32.mrb[8].mxu1 }
  0xeb   :  { %587 = vst.msk [vmem:[%s1477_s3 + $0x18] sm:$0xff] %vm583_vm5, %v537_v21  ;;  %612 = vst.msk [vmem:[%s1477_s3 + $0xe0] sm:$0xff] %vm583_vm5, %v562_v22  ;;  %v311_v25 = vadd.f32 %v1227_v54, %v310_v23  ;;  %v757_v26 = vpop.f32.mrb[9].mxu0  ;;  %v436_v27 = vadd.f32 %v1227_v54, %v435_v24  ;;  %v832_v28 = vpop.f32.mrb[9].mxu1 }
  0xed   :  { %v538_v29 = vmax.f32 %v311_v25, 0.0  ;;  %v563_v30 = vmax.f32 %v436_v27, 0.0 }
  0xee   :  { %v315_v31 = vpop.f32.mrb[10].mxu0  ;;  %v440_v32 = vpop.f32.mrb[10].mxu1 }
  0xef   :  { %588 = vst.msk [vmem:[%s1477_s3 + $0x20] sm:$0xff] %vm583_vm5, %v538_v29  ;;  %613 = vst.msk [vmem:[%s1477_s3 + $0xe8] sm:$0xff] %vm583_vm5, %v563_v30  ;;  %v316_v33 = vadd.f32 %v1227_v54, %v315_v31  ;;  %v760_v34 = vpop.f32.mrb[11].mxu0  ;;  %v441_v35 = vadd.f32 %v1227_v54, %v440_v32  ;;  %v835_v36 = vpop.f32.mrb[11].mxu1 }
  0xf1   :  { %v539_v37 = vmax.f32 %v316_v33, 0.0  ;;  %v564_v38 = vmax.f32 %v441_v35, 0.0 }
  0xf2   :  { %v320_v39 = vpop.f32.mrb[12].mxu0  ;;  %v445_v40 = vpop.f32.mrb[12].mxu1 }
  0xf3   :  { %589 = vst.msk [vmem:[%s1477_s3 + $0x28] sm:$0xff] %vm583_vm5, %v539_v37  ;;  %614 = vst.msk [vmem:[%s1477_s3 + $0xf0] sm:$0xff] %vm583_vm5, %v564_v38  ;;  %v321_v41 = vadd.f32 %v1227_v54, %v320_v39  ;;  %v763_v42 = vpop.f32.mrb[13].mxu0  ;;  %v446_v43 = vadd.f32 %v1227_v54, %v445_v40  ;;  %v838_v44 = vpop.f32.mrb[13].mxu1 }
  0xf5   :  { %v540_v45 = vmax.f32 %v321_v41, 0.0  ;;  %v565_v46 = vmax.f32 %v446_v43, 0.0 }
  0xf6   :  { %v325_v47 = vpop.f32.mrb[14].mxu0  ;;  %v450_v48 = vpop.f32.mrb[14].mxu1 }
  0xf7   :  { %590 = vst.msk [vmem:[%s1477_s3 + $0x30] sm:$0xff] %vm583_vm5, %v540_v45  ;;  %615 = vst.msk [vmem:[%s1477_s3 + $0xf8] sm:$0xff] %vm583_vm5, %v565_v46  ;;  %v326_v49 = vadd.f32 %v1227_v54, %v325_v47  ;;  %v766_v50 = vpop.f32.mrb[15].mxu0  ;;  %v451_v51 = vadd.f32 %v1227_v54, %v450_v48  ;;  %v841_v52 = vpop.f32.mrb[15].mxu1 }
  0xf9   :  { %v541_v53 = vmax.f32 %v326_v49, 0.0  ;;  %v566_v55 = vmax.f32 %v451_v51, 0.0 }
  0xfa   :  { %v330_v56 = vpop.f32.mrb[16].mxu0  ;;  %v455_v57 = vpop.f32.mrb[16].mxu1 }
  0xfb   :  { %591 = vst.msk [vmem:[%s1477_s3 + $0x38] sm:$0xff] %vm583_vm5, %v541_v53  ;;  %616 = vst.msk [vmem:[%s1477_s3 + $0x100] sm:$0xff] %vm583_vm5, %v566_v55  ;;  %v331_v58 = vadd.f32 %v1227_v54, %v330_v56  ;;  %v769_v59 = vpop.f32.mrb[17].mxu0  ;;  %v456_v60 = vadd.f32 %v1227_v54, %v455_v57  ;;  %v844_v61 = vpop.f32.mrb[17].mxu1 }
  0xfd   :  { %v542_v62 = vmax.f32 %v331_v58, 0.0  ;;  %v567_v63 = vmax.f32 %v456_v60, 0.0 }
  0xfe   :  { %v335_v0 = vpop.f32.mrb[18].mxu0  ;;  %v460_v1 = vpop.f32.mrb[18].mxu1 }
  0xff   :  { %592 = vst.msk [vmem:[%s1477_s3 + $0x40] sm:$0xff] %vm583_vm5, %v542_v62  ;;  %617 = vst.msk [vmem:[%s1477_s3 + $0x108] sm:$0xff] %vm583_vm5, %v567_v63  ;;  %v336_v2 = vadd.f32 %v1227_v54, %v335_v0  ;;  %v772_v3 = vpop.f32.mrb[19].mxu0  ;;  %v461_v4 = vadd.f32 %v1227_v54, %v460_v1  ;;  %v847_v5 = vpop.f32.mrb[19].mxu1 }
 0x101   :  { %v543_v6 = vmax.f32 %v336_v2, 0.0  ;;  %v568_v7 = vmax.f32 %v461_v4, 0.0 }
 0x102   :  { %v340_v8 = vpop.f32.mrb[20].mxu0  ;;  %v465_v9 = vpop.f32.mrb[20].mxu1 }
 0x103   :  { %593 = vst.msk [vmem:[%s1477_s3 + $0x48] sm:$0xff] %vm583_vm5, %v543_v6  ;;  %618 = vst.msk [vmem:[%s1477_s3 + $0x110] sm:$0xff] %vm583_vm5, %v568_v7  ;;  %v341_v10 = vadd.f32 %v1227_v54, %v340_v8  ;;  %v775_v11 = vpop.f32.mrb[21].mxu0  ;;  %v466_v12 = vadd.f32 %v1227_v54, %v465_v9  ;;  %v850_v13 = vpop.f32.mrb[21].mxu1 }
 0x105   :  { %v544_v14 = vmax.f32 %v341_v10, 0.0  ;;  %v569_v15 = vmax.f32 %v466_v12, 0.0 }
 0x106   :  { %v345_v16 = vpop.f32.mrb[22].mxu0  ;;  %v470_v17 = vpop.f32.mrb[22].mxu1 }
 0x107   :  { %594 = vst.msk [vmem:[%s1477_s3 + $0x50] sm:$0xff] %vm583_vm5, %v544_v14  ;;  %619 = vst.msk [vmem:[%s1477_s3 + $0x118] sm:$0xff] %vm583_vm5, %v569_v15  ;;  %v346_v18 = vadd.f32 %v1227_v54, %v345_v16  ;;  %v778_v19 = vpop.f32.mrb[23].mxu0  ;;  %v471_v20 = vadd.f32 %v1227_v54, %v470_v17  ;;  %v853_v21 = vpop.f32.mrb[23].mxu1 }
 0x109   :  { %v545_v22 = vmax.f32 %v346_v18, 0.0  ;;  %v570_v23 = vmax.f32 %v471_v20, 0.0 }
 0x10a   :  { %v350_v24 = vpop.f32.mrb[24].mxu0  ;;  %v475_v25 = vpop.f32.mrb[24].mxu1 }
 0x10b   :  { %595 = vst.msk [vmem:[%s1477_s3 + $0x58] sm:$0xff] %vm583_vm5, %v545_v22  ;;  %620 = vst.msk [vmem:[%s1477_s3 + $0x120] sm:$0xff] %vm583_vm5, %v570_v23  ;;  %v351_v26 = vadd.f32 %v1227_v54, %v350_v24  ;;  %v781_v27 = vpop.f32.mrb[25].mxu0  ;;  %v476_v28 = vadd.f32 %v1227_v54, %v475_v25  ;;  %v856_v29 = vpop.f32.mrb[25].mxu1 }
 0x10d   :  { %v546_v30 = vmax.f32 %v351_v26, 0.0  ;;  %v571_v31 = vmax.f32 %v476_v28, 0.0 }
 0x10e   :  { %v355_v32 = vpop.f32.mrb[26].mxu0  ;;  %v480_v33 = vpop.f32.mrb[26].mxu1 }
 0x10f   :  { %596 = vst.msk [vmem:[%s1477_s3 + $0x60] sm:$0xff] %vm583_vm5, %v546_v30  ;;  %621 = vst.msk [vmem:[%s1477_s3 + $0x128] sm:$0xff] %vm583_vm5, %v571_v31  ;;  %v356_v34 = vadd.f32 %v1227_v54, %v355_v32  ;;  %v784_v35 = vpop.f32.mrb[27].mxu0  ;;  %v481_v36 = vadd.f32 %v1227_v54, %v480_v33  ;;  %v859_v37 = vpop.f32.mrb[27].mxu1 }
 0x111   :  { %v547_v38 = vmax.f32 %v356_v34, 0.0  ;;  %v572_v39 = vmax.f32 %v481_v36, 0.0 }
 0x112   :  { %v360_v40 = vpop.f32.mrb[28].mxu0  ;;  %v485_v41 = vpop.f32.mrb[28].mxu1 }
 0x113   :  { %597 = vst.msk [vmem:[%s1477_s3 + $0x68] sm:$0xff] %vm583_vm5, %v547_v38  ;;  %622 = vst.msk [vmem:[%s1477_s3 + $0x130] sm:$0xff] %vm583_vm5, %v572_v39  ;;  %v361_v42 = vadd.f32 %v1227_v54, %v360_v40  ;;  %v787_v43 = vpop.f32.mrb[29].mxu0  ;;  %v486_v44 = vadd.f32 %v1227_v54, %v485_v41  ;;  %v862_v45 = vpop.f32.mrb[29].mxu1 }
 0x115   :  { %v548_v46 = vmax.f32 %v361_v42, 0.0  ;;  %v573_v47 = vmax.f32 %v486_v44, 0.0 }
 0x116   :  { %v365_v48 = vpop.f32.mrb[30].mxu0  ;;  %v490_v49 = vpop.f32.mrb[30].mxu1 }
 0x117   :  { %598 = vst.msk [vmem:[%s1477_s3 + $0x70] sm:$0xff] %vm583_vm5, %v548_v46  ;;  %623 = vst.msk [vmem:[%s1477_s3 + $0x138] sm:$0xff] %vm583_vm5, %v573_v47  ;;  %v366_v50 = vadd.f32 %v1227_v54, %v365_v48  ;;  %v790_v51 = vpop.f32.mrb[31].mxu0  ;;  %v491_v52 = vadd.f32 %v1227_v54, %v490_v49  ;;  %v865_v53 = vpop.f32.mrb[31].mxu1 }
 0x119   :  { %v549_v55 = vmax.f32 %v366_v50, 0.0  ;;  %v574_v56 = vmax.f32 %v491_v52, 0.0 }
 0x11a   :  { %v370_v57 = vpop.f32.mrb[32].mxu0  ;;  %v495_v58 = vpop.f32.mrb[32].mxu1 }
 0x11b   :  { %599 = vst.msk [vmem:[%s1477_s3 + $0x78] sm:$0xff] %vm583_vm5, %v549_v55  ;;  %624 = vst.msk [vmem:[%s1477_s3 + $0x140] sm:$0xff] %vm583_vm5, %v574_v56  ;;  %v371_v59 = vadd.f32 %v1227_v54, %v370_v57  ;;  %v793_v60 = vpop.f32.mrb[33].mxu0  ;;  %v496_v61 = vadd.f32 %v1227_v54, %v495_v58  ;;  %v868_v62 = vpop.f32.mrb[33].mxu1 }
 0x11d   :  { %v550_v63 = vmax.f32 %v371_v59, 0.0  ;;  %v575_v0 = vmax.f32 %v496_v61, 0.0 }
 0x11e   :  { %v375_v1 = vpop.f32.mrb[34].mxu0  ;;  %v500_v2 = vpop.f32.mrb[34].mxu1 }
 0x11f   :  { %600 = vst.msk [vmem:[%s1477_s3 + $0x80] sm:$0xff] %vm583_vm5, %v550_v63  ;;  %625 = vst.msk [vmem:[%s1477_s3 + $0x148] sm:$0xff] %vm583_vm5, %v575_v0  ;;  %v376_v3 = vadd.f32 %v1227_v54, %v375_v1  ;;  %v796_v4 = vpop.f32.mrb[35].mxu0  ;;  %v501_v5 = vadd.f32 %v1227_v54, %v500_v2  ;;  %v871_v6 = vpop.f32.mrb[35].mxu1 }
 0x121   :  { %v551_v7 = vmax.f32 %v376_v3, 0.0  ;;  %v576_v8 = vmax.f32 %v501_v5, 0.0 }
 0x122   :  { %v380_v9 = vpop.f32.mrb[36].mxu0  ;;  %v505_v10 = vpop.f32.mrb[36].mxu1 }
 0x123   :  { %601 = vst.msk [vmem:[%s1477_s3 + $0x88] sm:$0xff] %vm583_vm5, %v551_v7  ;;  %626 = vst.msk [vmem:[%s1477_s3 + $0x150] sm:$0xff] %vm583_vm5, %v576_v8  ;;  %v381_v11 = vadd.f32 %v1227_v54, %v380_v9  ;;  %v799_v12 = vpop.f32.mrb[37].mxu0  ;;  %v506_v13 = vadd.f32 %v1227_v54, %v505_v10  ;;  %v874_v14 = vpop.f32.mrb[37].mxu1 }
 0x125   :  { %v552_v15 = vmax.f32 %v381_v11, 0.0  ;;  %v577_v16 = vmax.f32 %v506_v13, 0.0 }
 0x126   :  { %v385_v17 = vpop.f32.mrb[38].mxu0  ;;  %v510_v18 = vpop.f32.mrb[38].mxu1 }
 0x127   :  { %602 = vst.msk [vmem:[%s1477_s3 + $0x90] sm:$0xff] %vm583_vm5, %v552_v15  ;;  %627 = vst.msk [vmem:[%s1477_s3 + $0x158] sm:$0xff] %vm583_vm5, %v577_v16  ;;  %v386_v19 = vadd.f32 %v1227_v54, %v385_v17  ;;  %v802_v20 = vpop.f32.mrb[39].mxu0  ;;  %v511_v21 = vadd.f32 %v1227_v54, %v510_v18  ;;  %v877_v22 = vpop.f32.mrb[39].mxu1 }
 0x129   :  { %v553_v23 = vmax.f32 %v386_v19, 0.0  ;;  %v578_v24 = vmax.f32 %v511_v21, 0.0 }
 0x12a   :  { %v390_v25 = vpop.f32.mrb[40].mxu0  ;;  %v515_v26 = vpop.f32.mrb[40].mxu1 }
 0x12b   :  { %603 = vst.msk [vmem:[%s1477_s3 + $0x98] sm:$0xff] %vm583_vm5, %v553_v23  ;;  %628 = vst.msk [vmem:[%s1477_s3 + $0x160] sm:$0xff] %vm583_vm5, %v578_v24  ;;  %v391_v27 = vadd.f32 %v1227_v54, %v390_v25  ;;  %v805_v28 = vpop.f32.mrb[41].mxu0  ;;  %v516_v29 = vadd.f32 %v1227_v54, %v515_v26  ;;  %v880_v30 = vpop.f32.mrb[41].mxu1 }
 0x12d   :  { %v554_v31 = vmax.f32 %v391_v27, 0.0  ;;  %v579_v32 = vmax.f32 %v516_v29, 0.0 }
 0x12e   :  { %v395_v33 = vpop.f32.mrb[42].mxu0  ;;  %v520_v34 = vpop.f32.mrb[42].mxu1 }
 0x12f   :  { %604 = vst.msk [vmem:[%s1477_s3 + $0xa0] sm:$0xff] %vm583_vm5, %v554_v31  ;;  %629 = vst.msk [vmem:[%s1477_s3 + $0x168] sm:$0xff] %vm583_vm5, %v579_v32  ;;  %v396_v35 = vadd.f32 %v1227_v54, %v395_v33  ;;  %v808_v36 = vpop.f32.mrb[43].mxu0  ;;  %v521_v37 = vadd.f32 %v1227_v54, %v520_v34  ;;  %v883_v38 = vpop.f32.mrb[43].mxu1 }
 0x131   :  { %v555_v39 = vmax.f32 %v396_v35, 0.0  ;;  %v580_v40 = vmax.f32 %v521_v37, 0.0 }
 0x132   :  { %v400_v41 = vpop.f32.mrb[44].mxu0  ;;  %v525_v42 = vpop.f32.mrb[44].mxu1 }
 0x133   :  { %605 = vst.msk [vmem:[%s1477_s3 + $0xa8] sm:$0xff] %vm583_vm5, %v555_v39  ;;  %630 = vst.msk [vmem:[%s1477_s3 + $0x170] sm:$0xff] %vm583_vm5, %v580_v40  ;;  %v401_v43 = vadd.f32 %v1227_v54, %v400_v41  ;;  %v811_v44 = vpop.f32.mrb[45].mxu0  ;;  %v526_v45 = vadd.f32 %v1227_v54, %v525_v42  ;;  %v886_v46 = vpop.f32.mrb[45].mxu1 }
 0x135   :  { %v556_v47 = vmax.f32 %v401_v43, 0.0  ;;  %v581_v48 = vmax.f32 %v526_v45, 0.0 }
 0x136   :  { %v405_v49 = vpop.f32.mrb[46].mxu0  ;;  %v530_v50 = vpop.f32.mrb[46].mxu1 }
 0x137   :  { %606 = vst.msk [vmem:[%s1477_s3 + $0xb0] sm:$0xff] %vm583_vm5, %v556_v47  ;;  %631 = vst.msk [vmem:[%s1477_s3 + $0x178] sm:$0xff] %vm583_vm5, %v581_v48  ;;  %v406_v51 = vadd.f32 %v1227_v54, %v405_v49  ;;  %v814_v52 = vpop.f32.mrb[47].mxu0  ;;  %v531_v53 = vadd.f32 %v1227_v54, %v530_v50  ;;  %v889_v55 = vpop.f32.mrb[47].mxu1 }
 0x139   :  { %v557_v56 = vmax.f32 %v406_v51, 0.0  ;;  %v582_v57 = vmax.f32 %v531_v53, 0.0 }
 0x13a   :  { %v410_v58 = vpop.f32.mrb[48].mxu0 }
 0x13b   :  { %607 = vst.msk [vmem:[%s1477_s3 + $0xb8] sm:$0xff] %vm583_vm5, %v557_v56  ;;  %632 = vst.msk [vmem:[%s1477_s3 + $0x180] sm:$0xff] %vm583_vm5, %v582_v57  ;;  %v411_v59 = vadd.f32 %v1227_v54, %v410_v58  ;;  %v817_v60 = vpop.f32.mrb[49].mxu0 }
 0x13d   :  { %v558_v61 = vmax.f32 %v411_v59, 0.0 }
 0x13f   :  { %608 = vst.msk [vmem:[%s1477_s3 + $0xc0] sm:$0xff] %vm583_vm5, %v558_v61 }

// kernel: model_forward.4
= control target key start
LH: loop header
LB: loop body
LE: loop exit
PB: predicated region body
PF: predicated region fallthrough
CT: control target
= control target key end

     0   :  { %vm1052_vm0 = vmmov 0   ;;  %vm158_vm1 = vcmask 523264   ;;  %s1574_s1 = inlined_call_operand.vmem [shape: f32[576,128], index: 1, kind: input, shape index: {}]   ;;  %s1575_s0 = inlined_call_operand.vmem [shape: f32[98,576], index: 0, kind: input, shape index: {}]   ;;  %s1576_s2 = inlined_call_operand.vmem [shape: f32[1,128], index: 2, kind: input, shape index: {}]   ;;  %s1577_s3 = inlined_call_operand.vmem [shape: bf16[98,128], index: 3, kind: output, shape index: {}]  }
   0x1   :  { %v95_v0 = vld [vmem:[%s1574_s1 + $0x80] sm:$0xff]  ;;  %v96_v1 = vld [vmem:[%s1574_s1 + $0x88] sm:$0xff]  ;;  %v97_v11 = vld [vmem:[%s1574_s1 + $0x90] sm:$0xff] }
   0x2   :  { %v127_v2 = vld [vmem:[%s1574_s1 + $0x180] sm:$0xff]  ;;  %v964_v3 = vpack.c.bf16 %v96_v1, %v95_v0  ;;  %v128_v4 = vld [vmem:[%s1574_s1 + $0x188] sm:$0xff]  ;;  %v98_v13 = vld [vmem:[%s1574_s1 + $0x98] sm:$0xff] }
   0x3   :  { %v79_v5 = vld [vmem:[%s1574_s1] sm:$0xff]  ;;  %v80_v6 = vld [vmem:[%s1574_s1 + $0x8] sm:$0xff]  ;;  %v996_v7 = vpack.c.bf16 %v128_v4, %v127_v2  ;;  %v129_v14 = vld [vmem:[%s1574_s1 + $0x190] sm:$0xff]  ;;  %v968_v16 = vpack.c.bf16 %v98_v13, %v97_v11 }
   0x4   :  { %v966_v8 = vpack.c.bf16 %v80_v6, %v79_v5  ;;  %v111_v9 = vld [vmem:[%s1574_s1 + $0x100] sm:$0xff]  ;;  %v112_v10 = vld [vmem:[%s1574_s1 + $0x108] sm:$0xff]  ;;  %965 = vmatprep.subr.bf16.mxu0 %v964_v3  ;;  %v130_v15 = vld [vmem:[%s1574_s1 + $0x198] sm:$0xff] }
   0x5   :  { %v998_v12 = vpack.c.bf16 %v112_v10, %v111_v9  ;;  %997 = vmatprep.subr.bf16.mxu1 %v996_v7  ;;  %v1000_v17 = vpack.c.bf16 %v130_v15, %v129_v14  ;;  %v81_v18 = vld [vmem:[%s1574_s1 + $0x10] sm:$0xff]  ;;  %v82_v19 = vld [vmem:[%s1574_s1 + $0x18] sm:$0xff]  ;;  %v99_v23 = vld [vmem:[%s1574_s1 + $0xa0] sm:$0xff] }
   0x6   :  { %967 = vmatpush3.bf16.msra.mxu0 %v966_v8  ;;  %v113_v20 = vld [vmem:[%s1574_s1 + $0x110] sm:$0xff]  ;;  %v970_v21 = vpack.c.bf16 %v82_v19, %v81_v18  ;;  %v114_v22 = vld [vmem:[%s1574_s1 + $0x118] sm:$0xff]  ;;  %v100_v24 = vld [vmem:[%s1574_s1 + $0xa8] sm:$0xff] }
   0x7   :  { %999 = vmatpush3.bf16.msra.mxu1 %v998_v12  ;;  %969 = vmatprep.subr.bf16.mxu0 %v968_v16  ;;  %v1002_v25 = vpack.c.bf16 %v114_v22, %v113_v20  ;;  %v972_v26 = vpack.c.bf16 %v100_v24, %v99_v23  ;;  %v131_v27 = vld [vmem:[%s1574_s1 + $0x1a0] sm:$0xff]  ;;  %v132_v28 = vld [vmem:[%s1574_s1 + $0x1a8] sm:$0xff]  ;;  %v101_v35 = vld [vmem:[%s1574_s1 + $0xb0] sm:$0xff] }
   0x8   :  { %1001 = vmatprep.subr.bf16.mxu1 %v1000_v17  ;;  %v83_v29 = vld [vmem:[%s1574_s1 + $0x20] sm:$0xff]  ;;  %v1004_v30 = vpack.c.bf16 %v132_v28, %v131_v27  ;;  %v84_v31 = vld [vmem:[%s1574_s1 + $0x28] sm:$0xff]  ;;  %v102_v36 = vld [vmem:[%s1574_s1 + $0xb8] sm:$0xff] }
   0x9   :  { %v115_v32 = vld [vmem:[%s1574_s1 + $0x120] sm:$0xff]  ;;  %v116_v33 = vld [vmem:[%s1574_s1 + $0x128] sm:$0xff]  ;;  %v974_v34 = vpack.c.bf16 %v84_v31, %v83_v29  ;;  %v133_v37 = vld [vmem:[%s1574_s1 + $0x1b0] sm:$0xff]  ;;  %v976_v39 = vpack.c.bf16 %v102_v36, %v101_v35 }
   0xa   :  { %971 = vmatpush3.bf16.msra.mxu0 %v970_v21  ;;  %v1006_v38 = vpack.c.bf16 %v116_v33, %v115_v32  ;;  %v134_v40 = vld [vmem:[%s1574_s1 + $0x1b8] sm:$0xff]  ;;  %v85_v41 = vld [vmem:[%s1574_s1 + $0x30] sm:$0xff]  ;;  %v103_v46 = vld [vmem:[%s1574_s1 + $0xc0] sm:$0xff] }
   0xb   :  { %1003 = vmatpush3.bf16.msra.mxu1 %v1002_v25  ;;  %973 = vmatprep.subr.bf16.mxu0 %v972_v26  ;;  %v86_v42 = vld [vmem:[%s1574_s1 + $0x38] sm:$0xff]  ;;  %v1008_v43 = vpack.c.bf16 %v134_v40, %v133_v37  ;;  %v117_v44 = vld [vmem:[%s1574_s1 + $0x130] sm:$0xff]  ;;  %v104_v47 = vld [vmem:[%s1574_s1 + $0xc8] sm:$0xff] }
   0xc   :  { %1005 = vmatprep.subr.bf16.mxu1 %v1004_v30  ;;  %v118_v45 = vld [vmem:[%s1574_s1 + $0x138] sm:$0xff]  ;;  %v135_v48 = vld [vmem:[%s1574_s1 + $0x1c0] sm:$0xff]  ;;  %v136_v49 = vld [vmem:[%s1574_s1 + $0x1c8] sm:$0xff]  ;;  %v978_v50 = vpack.c.bf16 %v86_v42, %v85_v41  ;;  %v980_v52 = vpack.c.bf16 %v104_v47, %v103_v46 }
   0xd   :  { %v1010_v51 = vpack.c.bf16 %v118_v45, %v117_v44  ;;  %v87_v53 = vld [vmem:[%s1574_s1 + $0x40] sm:$0xff]  ;;  %v88_v54 = vld [vmem:[%s1574_s1 + $0x48] sm:$0xff]  ;;  %v1012_v56 = vpack.c.bf16 %v136_v49, %v135_v48  ;;  %v105_v58 = vld [vmem:[%s1574_s1 + $0xd0] sm:$0xff] }
   0xe   :  { %975 = vmatpush3.bf16.msra.mxu0 %v974_v34  ;;  %v119_v55 = vld [vmem:[%s1574_s1 + $0x140] sm:$0xff]  ;;  %v120_v57 = vld [vmem:[%s1574_s1 + $0x148] sm:$0xff]  ;;  %v106_v59 = vld [vmem:[%s1574_s1 + $0xd8] sm:$0xff]  ;;  %v982_v62 = vpack.c.bf16 %v88_v54, %v87_v53 }
   0xf   :  { %1007 = vmatpush3.bf16.msra.mxu1 %v1006_v38  ;;  %977 = vmatprep.subr.bf16.mxu0 %v976_v39  ;;  %v137_v60 = vld [vmem:[%s1574_s1 + $0x1d0] sm:$0xff]  ;;  %v138_v61 = vld [vmem:[%s1574_s1 + $0x1d8] sm:$0xff]  ;;  %v1014_v63 = vpack.c.bf16 %v120_v57, %v119_v55  ;;  %v984_v0 = vpack.c.bf16 %v106_v59, %v105_v58  ;;  %v107_v6 = vld [vmem:[%s1574_s1 + $0xe0] sm:$0xff]  ;;  %v1051_v39 = vmov 0.0|0.0  }
  0x10   :  { %1009 = vmatprep.subr.bf16.mxu1 %v1008_v43  ;;  %v89_v1 = vld [vmem:[%s1574_s1 + $0x50] sm:$0xff]  ;;  %v90_v2 = vld [vmem:[%s1574_s1 + $0x58] sm:$0xff]  ;;  %v1016_v4 = vpack.c.bf16 %v138_v61, %v137_v60  ;;  %v108_v7 = vld [vmem:[%s1574_s1 + $0xe8] sm:$0xff] }
  0x11   :  { %v121_v3 = vld [vmem:[%s1574_s1 + $0x150] sm:$0xff]  ;;  %v122_v5 = vld [vmem:[%s1574_s1 + $0x158] sm:$0xff]  ;;  %v139_v8 = vld [vmem:[%s1574_s1 + $0x1e0] sm:$0xff]  ;;  %v986_v10 = vpack.c.bf16 %v90_v2, %v89_v1  ;;  %v988_v14 = vpack.c.bf16 %v108_v7, %v107_v6 }
  0x12   :  { %979 = vmatpush3.bf16.msra.mxu0 %v978_v50  ;;  %v140_v9 = vld [vmem:[%s1574_s1 + $0x1e8] sm:$0xff]  ;;  %v91_v11 = vld [vmem:[%s1574_s1 + $0x60] sm:$0xff]  ;;  %v1018_v13 = vpack.c.bf16 %v122_v5, %v121_v3  ;;  %v17_v17 = vld [vmem:[%s1575_s0 + $0x18] sm:$0xff] }
  0x13   :  { %1011 = vmatpush3.bf16.msra.mxu1 %v1010_v51  ;;  %981 = vmatprep.subr.bf16.mxu0 %v980_v52  ;;  %v92_v12 = vld [vmem:[%s1574_s1 + $0x68] sm:$0xff]  ;;  %v123_v15 = vld [vmem:[%s1574_s1 + $0x160] sm:$0xff]  ;;  %v1020_v18 = vpack.c.bf16 %v140_v9, %v139_v8  ;;  %v109_v20 = vld [vmem:[%s1574_s1 + $0xf0] sm:$0xff] }
  0x14   :  { %1013 = vmatprep.subr.bf16.mxu1 %v1012_v56  ;;  %v15_v16 = vld [vmem:[%s1575_s0 + $0x8] sm:$0xff]  ;;  %v110_v21 = vld [vmem:[%s1574_s1 + $0xf8] sm:$0xff]  ;;  %v141_v22 = vld [vmem:[%s1574_s1 + $0x1f0] sm:$0xff]  ;;  %392 = vmatprep.mubr.f32.mxu1 %v17_v17  ;;  %v990_v24 = vpack.c.bf16 %v92_v12, %v91_v11 }
  0x15   :  { %v124_v19 = vld [vmem:[%s1574_s1 + $0x168] sm:$0xff]  ;;  %262 = vmatprep.mubr.f32.mxu0 %v15_v16  ;;  %v142_v23 = vld [vmem:[%s1574_s1 + $0x1f8] sm:$0xff]  ;;  %v992_v26 = vpack.c.bf16 %v110_v21, %v109_v20  ;;  %v93_v27 = vld [vmem:[%s1574_s1 + $0x70] sm:$0xff] }
  0x16   :  { %983 = vmatpush3.bf16.msra.mxu0 %v982_v62  ;;  %v1022_v25 = vpack.c.bf16 %v124_v19, %v123_v15  ;;  %v94_v28 = vld [vmem:[%s1574_s1 + $0x78] sm:$0xff]  ;;  %v1024_v29 = vpack.c.bf16 %v142_v23, %v141_v22  ;;  %v125_v30 = vld [vmem:[%s1574_s1 + $0x170] sm:$0xff]  ;;  %v143_v34 = vld [vmem:[%s1574_s1 + $0x200] sm:$0xff] }
  0x17   :  { %1015 = vmatpush3.bf16.msra.mxu1 %v1014_v63  ;;  %985 = vmatprep.subr.bf16.mxu0 %v984_v0  ;;  %v126_v31 = vld [vmem:[%s1574_s1 + $0x178] sm:$0xff]  ;;  %v994_v32 = vpack.c.bf16 %v94_v28, %v93_v27  ;;  %v144_v35 = vld [vmem:[%s1574_s1 + $0x208] sm:$0xff]  ;;  %v14_v36 = vld [vmem:[%s1575_s0] sm:$0xff] }
  0x18   :  { %1017 = vmatprep.subr.bf16.mxu1 %v1016_v4  ;;  %v1026_v33 = vpack.c.bf16 %v126_v31, %v125_v30  ;;  %v1029_v37 = vpack.c.bf16 %v144_v35, %v143_v34  ;;  %v16_v38 = vld [vmem:[%s1575_s0 + $0x10] sm:$0xff]  ;;  %v22_v41 = vld [vmem:[%s1575_s0 + $0x40] sm:$0xff]  ;;  %v146_v43 = vld [vmem:[%s1574_s1 + $0x218] sm:$0xff] }
  0x19   :  { %v20_v40 = vld [vmem:[%s1575_s0 + $0x30] sm:$0xff]  ;;  %v19_v44 = vld [vmem:[%s1575_s0 + $0x28] sm:$0xff]  ;;  %v21_v45 = vld [vmem:[%s1575_s0 + $0x38] sm:$0xff] }
  0x1a   :  { %987 = vmatpush3.bf16.msra.mxu0 %v986_v10  ;;  %v145_v42 = vld [vmem:[%s1574_s1 + $0x210] sm:$0xff]  ;;  %v25_v46 = vld [vmem:[%s1575_s0 + $0x58] sm:$0xff]  ;;  %v27_v48 = vld [vmem:[%s1575_s0 + $0x68] sm:$0xff] }
  0x1b   :  { %1019 = vmatpush3.bf16.msra.mxu1 %v1018_v13  ;;  %989 = vmatprep.subr.bf16.mxu0 %v988_v14  ;;  %v1032_v47 = vpack.c.bf16 %v146_v43, %v145_v42  ;;  %v147_v49 = vld [vmem:[%s1574_s1 + $0x220] sm:$0xff]  ;;  %v148_v50 = vld [vmem:[%s1574_s1 + $0x228] sm:$0xff]  ;;  %v24_v51 = vld [vmem:[%s1575_s0 + $0x50] sm:$0xff] }
  0x1c   :  { %1021 = vmatprep.subr.bf16.mxu1 %v1020_v18  ;;  %v26_v52 = vld [vmem:[%s1575_s0 + $0x60] sm:$0xff]  ;;  %v1035_v54 = vpack.c.bf16 %v148_v50, %v147_v49  ;;  %v32_v55 = vld [vmem:[%s1575_s0 + $0x90] sm:$0xff]  ;;  %v150_v57 = vld [vmem:[%s1574_s1 + $0x238] sm:$0xff] }
  0x1d   :  { %v30_v53 = vld [vmem:[%s1575_s0 + $0x80] sm:$0xff]  ;;  %v149_v56 = vld [vmem:[%s1574_s1 + $0x230] sm:$0xff]  ;;  %v29_v58 = vld [vmem:[%s1575_s0 + $0x78] sm:$0xff] }
  0x1e   :  { %991 = vmatpush3.bf16.msra.mxu0 %v990_v24  ;;  %v31_v59 = vld [vmem:[%s1575_s0 + $0x88] sm:$0xff]  ;;  %v1038_v61 = vpack.c.bf16 %v150_v57, %v149_v56  ;;  %v37_v62 = vld [vmem:[%s1575_s0 + $0xb8] sm:$0xff]  ;;  %v34_v63 = vld [vmem:[%s1575_s0 + $0xa0] sm:$0xff] }
  0x1f   :  { %1023 = vmatpush3.bf16.msra.mxu1 %v1022_v25  ;;  %993 = vmatprep.subr.bf16.mxu0 %v992_v26  ;;  %v35_v60 = vld [vmem:[%s1575_s0 + $0xa8] sm:$0xff]  ;;  %v36_v0 = vld [vmem:[%s1575_s0 + $0xb0] sm:$0xff]  ;;  %v42_v2 = vld [vmem:[%s1575_s0 + $0xe0] sm:$0xff] }
  0x20   :  { %1025 = vmatprep.subr.bf16.mxu1 %v1024_v29  ;;  %v40_v1 = vld [vmem:[%s1575_s0 + $0xd0] sm:$0xff]  ;;  %v39_v3 = vld [vmem:[%s1575_s0 + $0xc8] sm:$0xff]  ;;  %v41_v4 = vld [vmem:[%s1575_s0 + $0xd8] sm:$0xff] }
  0x21   :  { %v45_v5 = vld [vmem:[%s1575_s0 + $0xf8] sm:$0xff]  ;;  %v47_v6 = vld [vmem:[%s1575_s0 + $0x108] sm:$0xff]  ;;  %v44_v7 = vld [vmem:[%s1575_s0 + $0xf0] sm:$0xff] }
  0x22   :  { %995 = vmatpush3.bf16.msra.mxu0 %v994_v32  ;;  %v46_v8 = vld [vmem:[%s1575_s0 + $0x100] sm:$0xff]  ;;  %v52_v10 = vld [vmem:[%s1575_s0 + $0x130] sm:$0xff]  ;;  %v49_v11 = vld [vmem:[%s1575_s0 + $0x118] sm:$0xff] }
  0x23   :  { %1027 = vmatpush3.bf16.msra.mxu1 %v1026_v33  ;;  %1028 = vmatprep.subr.bf16.mxu0 %v1051_v39  ;;  %v50_v9 = vld [vmem:[%s1575_s0 + $0x120] sm:$0xff]  ;;  %v51_v12 = vld [vmem:[%s1575_s0 + $0x128] sm:$0xff]  ;;  %v57_v14 = vld [vmem:[%s1575_s0 + $0x158] sm:$0xff]  ;;  %v1053_v33 = vmov 0.0  }
  0x24   :  { %1040 = vmatprep.subr.bf16.mxu1 %v1051_v39  ;;  %v55_v13 = vld [vmem:[%s1575_s0 + $0x148] sm:$0xff]  ;;  %v54_v15 = vld [vmem:[%s1575_s0 + $0x140] sm:$0xff]  ;;  %v56_v16 = vld [vmem:[%s1575_s0 + $0x150] sm:$0xff] }
  0x25   :  { %263 = vmatmul.mubr.f32.vlgmr.msra.gmra.mrb[0].mxu0 %v14_v36  ;;  %v60_v17 = vld [vmem:[%s1575_s0 + $0x170] sm:$0xff]  ;;  %v62_v18 = vld [vmem:[%s1575_s0 + $0x180] sm:$0xff]  ;;  %v59_v19 = vld [vmem:[%s1575_s0 + $0x168] sm:$0xff] }
  0x26   :  { %393 = vmatmul.mubr.f32.vlgmr.msra.gmra.mrb[0].mxu1 %v16_v38  ;;  %1030 = vmatpush3.bf16.msra.mxu0 %v1029_v37  ;;  %v61_v20 = vld [vmem:[%s1575_s0 + $0x178] sm:$0xff]  ;;  %v67_v22 = vld [vmem:[%s1575_s0 + $0x1a8] sm:$0xff]  ;;  %v64_v23 = vld [vmem:[%s1575_s0 + $0x190] sm:$0xff] }
  0x27   :  { %267 = vmatprep.mubr.f32.mxu0 %v20_v40  ;;  %397 = vmatprep.mubr.f32.mxu1 %v22_v41  ;;  %v65_v21 = vld [vmem:[%s1575_s0 + $0x198] sm:$0xff]  ;;  %v66_v24 = vld [vmem:[%s1575_s0 + $0x1a0] sm:$0xff]  ;;  %v72_v26 = vld [vmem:[%s1575_s0 + $0x1d0] sm:$0xff] }
  0x28   :  { %1044 = vmatpush3.bf16.msra.mxu1 %v1029_v37  ;;  %1031 = vmatprep.subr.bf16.mxu0 %v1051_v39  ;;  %v70_v25 = vld [vmem:[%s1575_s0 + $0x1c0] sm:$0xff]  ;;  %v69_v27 = vld [vmem:[%s1575_s0 + $0x1b8] sm:$0xff]  ;;  %v71_v28 = vld [vmem:[%s1575_s0 + $0x1c8] sm:$0xff] }
  0x29   :  { %268 = vmatmul.mubr.f32.gmra.mrb[2].mxu0 %v19_v44  ;;  %1041 = vmatprep.subr.bf16.mxu1 %v1051_v39  ;;  %v75_v29 = vld [vmem:[%s1575_s0 + $0x1e8] sm:$0x3]  ;;  %v77_v30 = vld [vmem:[%s1575_s0 + $0x1f8] sm:$0x3]  ;;  %v74_v31 = vld [vmem:[%s1575_s0 + $0x1e0] sm:$0x3] }
  0x2a   :  { %398 = vmatmul.mubr.f32.gmra.mrb[2].mxu1 %v21_v45  ;;  %272 = vmatprep.mubr.f32.mxu0 %v25_v46  ;;  %v76_v32 = vld [vmem:[%s1575_s0 + $0x1f0] sm:$0x3]  ;;  %v18_v34 = vld [vmem:[%s1575_s0 + $0x20] sm:$0xff]  ;;  %v53_v35 = vld [vmem:[%s1575_s0 + $0x138] sm:$0xff] }
  0x2b   :  { %402 = vmatprep.mubr.f32.mxu1 %v27_v48  ;;  %1033 = vmatpush3.bf16.msra.mxu0 %v1032_v47  ;;  %v23_v36 = vld [vmem:[%s1575_s0 + $0x48] sm:$0xff]  ;;  %v58_v37 = vld [vmem:[%s1575_s0 + $0x160] sm:$0xff]  ;;  %v28_v38 = vld [vmem:[%s1575_s0 + $0x70] sm:$0xff] }
  0x2c   :  { %1045 = vmatpush3.bf16.msra.mxu1 %v1032_v47  ;;  %1034 = vmatprep.subr.bf16.mxu0 %v1051_v39  ;;  %v33_v40 = vld [vmem:[%s1575_s0 + $0x98] sm:$0xff]  ;;  %v68_v41 = vld [vmem:[%s1575_s0 + $0x1b0] sm:$0xff]  ;;  %v38_v42 = vld [vmem:[%s1575_s0 + $0xc0] sm:$0xff] }
  0x2d   :  { %273 = vmatmul.mubr.f32.gmra.mrb[4].mxu0 %v24_v51  ;;  %1042 = vmatprep.subr.bf16.mxu1 %v1051_v39  ;;  %v73_v43 = vld [vmem:[%s1575_s0 + $0x1d8] sm:$0xff]  ;;  %v43_v44 = vld [vmem:[%s1575_s0 + $0xe8] sm:$0xff]  ;;  %v78_v45 = vld [vmem:[%s1575_s0 + $0x200] sm:$0x3] }
  0x2e   :  { %403 = vmatmul.mubr.f32.gmra.mrb[4].mxu1 %v26_v52  ;;  %277 = vmatprep.mubr.f32.mxu0 %v30_v53  ;;  %v48_v46 = vld [vmem:[%s1575_s0 + $0x110] sm:$0xff]  ;;  %v1514_v48 = vld [vmem:[%s1576_s2] ss:$0 sm:$0xff] }
  0x2f   :  { %407 = vmatprep.mubr.f32.mxu1 %v32_v55  ;;  %1036 = vmatpush3.bf16.msra.mxu0 %v1035_v54 }
  0x30   :  { %1046 = vmatpush3.bf16.msra.mxu1 %v1035_v54  ;;  %1037 = vmatprep.subr.bf16.mxu0 %v1051_v39 }
  0x31   :  { %278 = vmatmul.mubr.f32.gmra.mrb[6].mxu0 %v29_v58  ;;  %1043 = vmatprep.subr.bf16.mxu1 %v1051_v39  ;;  %v63_v39 = vld [vmem:[%s1575_s0 + $0x188] sm:$0xff] }
  0x32   :  { %408 = vmatmul.mubr.f32.gmra.mrb[6].mxu1 %v31_v59  ;;  %282 = vmatprep.mubr.f32.mxu0 %v35_v60 }
  0x33   :  { %412 = vmatprep.mubr.f32.mxu1 %v37_v62  ;;  %1039 = vmatpush3.bf16.msra.mxu0 %v1038_v61 }
  0x34   :  { %1047 = vmatpush3.bf16.msra.mxu1 %v1038_v61 }
  0x35   :  { %283 = vmatmul.mubr.f32.gmra.mrb[8].mxu0 %v34_v63 }
  0x36   :  { %413 = vmatmul.mubr.f32.gmra.mrb[8].mxu1 %v36_v0  ;;  %287 = vmatprep.mubr.f32.mxu0 %v40_v1 }
  0x37   :  { %417 = vmatprep.mubr.f32.mxu1 %v42_v2 }
  0x39   :  { %288 = vmatmul.mubr.f32.gmra.mrb[10].mxu0 %v39_v3 }
  0x3a   :  { %418 = vmatmul.mubr.f32.gmra.mrb[10].mxu1 %v41_v4  ;;  %292 = vmatprep.mubr.f32.mxu0 %v45_v5 }
  0x3b   :  { %422 = vmatprep.mubr.f32.mxu1 %v47_v6 }
  0x3d   :  { %293 = vmatmul.mubr.f32.gmra.mrb[12].mxu0 %v44_v7 }
  0x3e   :  { %423 = vmatmul.mubr.f32.gmra.mrb[12].mxu1 %v46_v8  ;;  %297 = vmatprep.mubr.f32.mxu0 %v50_v9 }
  0x3f   :  { %427 = vmatprep.mubr.f32.mxu1 %v52_v10 }
  0x41   :  { %298 = vmatmul.mubr.f32.gmra.mrb[14].mxu0 %v49_v11 }
  0x42   :  { %428 = vmatmul.mubr.f32.gmra.mrb[14].mxu1 %v51_v12  ;;  %302 = vmatprep.mubr.f32.mxu0 %v55_v13 }
  0x43   :  { %432 = vmatprep.mubr.f32.mxu1 %v57_v14 }
  0x45   :  { %303 = vmatmul.mubr.f32.gmra.mrb[16].mxu0 %v54_v15 }
  0x46   :  { %433 = vmatmul.mubr.f32.gmra.mrb[16].mxu1 %v56_v16  ;;  %307 = vmatprep.mubr.f32.mxu0 %v60_v17 }
  0x47   :  { %437 = vmatprep.mubr.f32.mxu1 %v62_v18 }
  0x49   :  { %308 = vmatmul.mubr.f32.gmra.mrb[18].mxu0 %v59_v19 }
  0x4a   :  { %438 = vmatmul.mubr.f32.gmra.mrb[18].mxu1 %v61_v20  ;;  %312 = vmatprep.mubr.f32.mxu0 %v65_v21 }
  0x4b   :  { %442 = vmatprep.mubr.f32.mxu1 %v67_v22 }
  0x4d   :  { %313 = vmatmul.mubr.f32.gmra.mrb[20].mxu0 %v64_v23 }
  0x4e   :  { %443 = vmatmul.mubr.f32.gmra.mrb[20].mxu1 %v66_v24  ;;  %317 = vmatprep.mubr.f32.mxu0 %v70_v25 }
  0x4f   :  { %447 = vmatprep.mubr.f32.mxu1 %v72_v26 }
  0x51   :  { %318 = vmatmul.mubr.f32.gmra.mrb[22].mxu0 %v69_v27 }
  0x52   :  { %448 = vmatmul.mubr.f32.gmra.mrb[22].mxu1 %v71_v28  ;;  %322 = vmatprep.mubr.f32.mxu0 %v75_v29 }
  0x53   :  { %452 = vmatprep.mubr.f32.mxu1 %v77_v30 }
  0x55   :  { %323 = vmatmul.mubr.f32.gmra.mrb[24].mxu0 %v74_v31 }
  0x56   :  { %453 = vmatmul.mubr.f32.gmra.mrb[24].mxu1 %v76_v32  ;;  %925 = vmatprep.mubr.msk.f32.mxu0 %vm1052_vm0, %v1053_v33 }
  0x57   :  { %946 = vmatprep.mubr.msk.f32.mxu1 %vm1052_vm0, %v1053_v33 }
  0x59   :  { %926 = vmatmul.mubr.msk.f32.vlgmr.msra.gmra.mrb[26].mxu0 %vm158_vm1, %v18_v34 }
  0x5a   :  { %947 = vmatmul.mubr.msk.f32.vlgmr.msra.gmra.mrb[26].mxu1 %vm158_vm1, %v53_v35  ;;  %928 = vmatprep.mubr.msk.f32.mxu0 %vm1052_vm0, %v1053_v33 }
  0x5b   :  { %949 = vmatprep.mubr.msk.f32.mxu1 %vm1052_vm0, %v1053_v33 }
  0x5d   :  { %929 = vmatmul.mubr.msk.f32.gmra.mrb[28].mxu0 %vm158_vm1, %v23_v36 }
  0x5e   :  { %950 = vmatmul.mubr.msk.f32.gmra.mrb[28].mxu1 %vm158_vm1, %v58_v37  ;;  %931 = vmatprep.mubr.msk.f32.mxu0 %vm1052_vm0, %v1053_v33 }
  0x5f   :  { %952 = vmatprep.mubr.msk.f32.mxu1 %vm1052_vm0, %v1053_v33 }
  0x61   :  { %932 = vmatmul.mubr.msk.f32.gmra.mrb[30].mxu0 %vm158_vm1, %v28_v38 }
  0x62   :  { %953 = vmatmul.mubr.msk.f32.gmra.mrb[30].mxu1 %vm158_vm1, %v63_v39  ;;  %934 = vmatprep.mubr.msk.f32.mxu0 %vm1052_vm0, %v1053_v33 }
  0x63   :  { %955 = vmatprep.mubr.msk.f32.mxu1 %vm1052_vm0, %v1053_v33 }
  0x65   :  { %935 = vmatmul.mubr.msk.f32.gmra.mrb[32].mxu0 %vm158_vm1, %v33_v40 }
  0x66   :  { %956 = vmatmul.mubr.msk.f32.gmra.mrb[32].mxu1 %vm158_vm1, %v68_v41  ;;  %937 = vmatprep.mubr.msk.f32.mxu0 %vm1052_vm0, %v1053_v33 }
  0x67   :  { %958 = vmatprep.mubr.msk.f32.mxu1 %vm1052_vm0, %v1053_v33 }
  0x69   :  { %938 = vmatmul.mubr.msk.f32.gmra.mrb[34].mxu0 %vm158_vm1, %v38_v42 }
  0x6a   :  { %959 = vmatmul.mubr.msk.f32.gmra.mrb[34].mxu1 %vm158_vm1, %v73_v43  ;;  %940 = vmatprep.mubr.msk.f32.mxu0 %vm1052_vm0, %v1053_v33 }
  0x6b   :  { %961 = vmatprep.mubr.msk.f32.mxu1 %vm1052_vm0, %v1053_v33 }
  0x6d   :  { %941 = vmatmul.mubr.msk.f32.gmra.mrb[36].mxu0 %vm158_vm1, %v43_v44 }
  0x6e   :  { %962 = vmatmul.mubr.msk.f32.gmra.mrb[36].mxu1 %vm158_vm1, %v78_v45  ;;  %943 = vmatprep.mubr.msk.f32.mxu0 %vm1052_vm0, %v1053_v33 }
  0x71   :  { %944 = vmatmul.mubr.msk.f32.gmra.mrb[38].mxu0 %vm158_vm1, %v48_v46 }
  0xf8   :  { %v778_v47 = vpop.f32.mrb[0].mxu0 }
  0xf9   :  { %v779_v49 = vpop.f32.mrb[1].mxu0  ;;  %v849_v50 = vpop.f32.mrb[0].mxu1 }
  0xfa   :  { %v780_v51 = vadd.f32 %v779_v49, %v778_v47  ;;  %v850_v52 = vpop.f32.mrb[1].mxu1 }
  0xfb   :  { %v851_v53 = vadd.f32 %v850_v52, %v849_v50 }
  0xfc   :  { %v265_v54 = vadd.f32 %v780_v51, %v1514_v48  ;;  %v781_v55 = vpop.f32.mrb[2].mxu0 }
  0xfd   :  { %v782_v56 = vpop.f32.mrb[3].mxu0  ;;  %v852_v57 = vpop.f32.mrb[2].mxu1 }
  0xfe   :  { %v783_v58 = vadd.f32 %v782_v56, %v781_v55  ;;  %v853_v59 = vpop.f32.mrb[3].mxu1  ;;  %v1517_v60 = vadd.f32 %v851_v53, %v265_v54 }
  0xff   :  { %v854_v61 = vadd.f32 %v853_v59, %v852_v57 }
 0x100   :  { %v270_v62 = vadd.f32 %v783_v58, %v1514_v48  ;;  %v784_v63 = vpop.f32.mrb[4].mxu0 }
 0x101   :  { %v785_v0 = vpop.f32.mrb[5].mxu0  ;;  %v855_v1 = vpop.f32.mrb[4].mxu1 }
 0x102   :  { %v786_v2 = vadd.f32 %v785_v0, %v784_v63  ;;  %v856_v3 = vpop.f32.mrb[5].mxu1  ;;  %v1520_v4 = vadd.f32 %v854_v61, %v270_v62 }
 0x103   :  { %v857_v5 = vadd.f32 %v856_v3, %v855_v1 }
 0x104   :  { %v275_v6 = vadd.f32 %v786_v2, %v1514_v48  ;;  %v787_v7 = vpop.f32.mrb[6].mxu0 }
 0x105   :  { %v788_v8 = vpop.f32.mrb[7].mxu0  ;;  %v858_v9 = vpop.f32.mrb[6].mxu1 }
 0x106   :  { %v789_v10 = vadd.f32 %v788_v8, %v787_v7  ;;  %v859_v11 = vpop.f32.mrb[7].mxu1  ;;  %v1523_v12 = vadd.f32 %v857_v5, %v275_v6 }
 0x107   :  { %v860_v13 = vadd.f32 %v859_v11, %v858_v9 }
 0x108   :  { %v280_v14 = vadd.f32 %v789_v10, %v1514_v48  ;;  %v790_v15 = vpop.f32.mrb[8].mxu0 }
 0x109   :  { %v791_v16 = vpop.f32.mrb[9].mxu0  ;;  %v861_v17 = vpop.f32.mrb[8].mxu1 }
 0x10a   :  { %v792_v18 = vadd.f32 %v791_v16, %v790_v15  ;;  %v862_v19 = vpop.f32.mrb[9].mxu1  ;;  %v1526_v20 = vadd.f32 %v860_v13, %v280_v14 }
 0x10b   :  { %v863_v21 = vadd.f32 %v862_v19, %v861_v17 }
 0x10c   :  { %v285_v22 = vadd.f32 %v792_v18, %v1514_v48  ;;  %v793_v23 = vpop.f32.mrb[10].mxu0 }
 0x10d   :  { %v794_v24 = vpop.f32.mrb[11].mxu0  ;;  %v864_v25 = vpop.f32.mrb[10].mxu1 }
 0x10e   :  { %v795_v26 = vadd.f32 %v794_v24, %v793_v23  ;;  %v865_v27 = vpop.f32.mrb[11].mxu1  ;;  %v1529_v28 = vadd.f32 %v863_v21, %v285_v22 }
 0x10f   :  { %v866_v29 = vadd.f32 %v865_v27, %v864_v25 }
 0x110   :  { %v290_v30 = vadd.f32 %v795_v26, %v1514_v48  ;;  %v796_v31 = vpop.f32.mrb[12].mxu0 }
 0x111   :  { %v797_v32 = vpop.f32.mrb[13].mxu0  ;;  %v867_v33 = vpop.f32.mrb[12].mxu1 }
 0x112   :  { %v798_v34 = vadd.f32 %v797_v32, %v796_v31  ;;  %v868_v35 = vpop.f32.mrb[13].mxu1  ;;  %v1532_v36 = vadd.f32 %v866_v29, %v290_v30 }
 0x113   :  { %v869_v37 = vadd.f32 %v868_v35, %v867_v33 }
 0x114   :  { %v295_v38 = vadd.f32 %v798_v34, %v1514_v48  ;;  %v799_v39 = vpop.f32.mrb[14].mxu0 }
 0x115   :  { %v800_v40 = vpop.f32.mrb[15].mxu0  ;;  %v870_v41 = vpop.f32.mrb[14].mxu1 }
 0x116   :  { %v801_v42 = vadd.f32 %v800_v40, %v799_v39  ;;  %v871_v43 = vpop.f32.mrb[15].mxu1  ;;  %v1535_v44 = vadd.f32 %v869_v37, %v295_v38 }
 0x117   :  { %v872_v45 = vadd.f32 %v871_v43, %v870_v41 }
 0x118   :  { %v300_v46 = vadd.f32 %v801_v42, %v1514_v48  ;;  %v802_v47 = vpop.f32.mrb[16].mxu0 }
 0x119   :  { %v803_v49 = vpop.f32.mrb[17].mxu0  ;;  %v873_v50 = vpop.f32.mrb[16].mxu1 }
 0x11a   :  { %v804_v51 = vadd.f32 %v803_v49, %v802_v47  ;;  %v874_v52 = vpop.f32.mrb[17].mxu1  ;;  %v430_v53 = vadd.f32 %v872_v45, %v300_v46 }
 0x11b   :  { %v875_v54 = vadd.f32 %v874_v52, %v873_v50 }
 0x11c   :  { %v305_v55 = vadd.f32 %v804_v51, %v1514_v48  ;;  %v805_v56 = vpop.f32.mrb[18].mxu0 }
 0x11d   :  { %v806_v57 = vpop.f32.mrb[19].mxu0  ;;  %v876_v58 = vpop.f32.mrb[18].mxu1 }
 0x11e   :  { %v807_v59 = vadd.f32 %v806_v57, %v805_v56  ;;  %v877_v61 = vpop.f32.mrb[19].mxu1  ;;  %v435_v62 = vadd.f32 %v875_v54, %v305_v55 }
 0x11f   :  { %v878_v63 = vadd.f32 %v877_v61, %v876_v58 }
 0x120   :  { %v310_v0 = vadd.f32 %v807_v59, %v1514_v48  ;;  %v808_v1 = vpop.f32.mrb[20].mxu0 }
 0x121   :  { %v809_v2 = vpop.f32.mrb[21].mxu0  ;;  %v879_v3 = vpop.f32.mrb[20].mxu1 }
 0x122   :  { %v810_v5 = vadd.f32 %v809_v2, %v808_v1  ;;  %v880_v6 = vpop.f32.mrb[21].mxu1  ;;  %v440_v7 = vadd.f32 %v878_v63, %v310_v0 }
 0x123   :  { %v881_v8 = vadd.f32 %v880_v6, %v879_v3 }
 0x124   :  { %v315_v9 = vadd.f32 %v810_v5, %v1514_v48  ;;  %v811_v10 = vpop.f32.mrb[22].mxu0 }
 0x125   :  { %v812_v11 = vpop.f32.mrb[23].mxu0  ;;  %v882_v13 = vpop.f32.mrb[22].mxu1 }
 0x126   :  { %v813_v14 = vadd.f32 %v812_v11, %v811_v10  ;;  %v883_v15 = vpop.f32.mrb[23].mxu1  ;;  %v445_v16 = vadd.f32 %v881_v8, %v315_v9 }
 0x127   :  { %v884_v17 = vadd.f32 %v883_v15, %v882_v13 }
 0x128   :  { %v320_v18 = vadd.f32 %v813_v14, %v1514_v48  ;;  %v814_v19 = vpop.f32.mrb[24].mxu0 }
 0x129   :  { %v815_v21 = vpop.f32.mrb[25].mxu0  ;;  %v885_v22 = vpop.f32.mrb[24].mxu1 }
 0x12a   :  { %v816_v23 = vadd.f32 %v815_v21, %v814_v19  ;;  %v886_v24 = vpop.f32.mrb[25].mxu1  ;;  %v450_v25 = vadd.f32 %v884_v17, %v320_v18 }
 0x12b   :  { %v887_v26 = vadd.f32 %v886_v24, %v885_v22 }
 0x12c   :  { %v325_v27 = vadd.f32 %v816_v23, %v1514_v48  ;;  %v524_v29 = vpop.f32.mrb[26].mxu0 }
 0x12d   :  { %v525_v30 = vadd.f32 %v524_v29, %v1517_v60  ;;  %v559_v31 = vpop.f32.mrb[26].mxu1  ;;  %v927_v32 = vpop.f32.mrb[27].mxu0 }
 0x12e   :  { %v1544_v33 = vadd.f32 %v559_v31, %v430_v53  ;;  %v948_v34 = vpop.f32.mrb[27].mxu1  ;;  %v455_v35 = vadd.f32 %v887_v26, %v325_v27 }
 0x12f   :  { %v588_v43 = vmax.f32 %v525_v30, 0.0 }
 0x130   :  { %v529_v37 = vpop.f32.mrb[28].mxu0 }
 0x131   :  { %v530_v38 = vadd.f32 %v529_v37, %v1520_v4  ;;  %v564_v39 = vpop.f32.mrb[28].mxu1  ;;  %v930_v40 = vpop.f32.mrb[29].mxu0 }
 0x132   :  { %v565_v41 = vadd.f32 %v564_v39, %v435_v62  ;;  %v951_v42 = vpop.f32.mrb[29].mxu1 }
 0x133   :  { %v589_v45 = vmax.f32 %v530_v38, 0.0 }
 0x134   :  { %v534_v46 = vpop.f32.mrb[30].mxu0  ;;  %v596_v52 = vmax.f32 %v565_v41, 0.0 }
 0x135   :  { %v714_v48 = vpack.c.bf16 %v589_v45, %v588_v43  ;;  %v535_v47 = vadd.f32 %v534_v46, %v1523_v12  ;;  %v569_v60 = vpop.f32.mrb[30].mxu1  ;;  %v933_v49 = vpop.f32.mrb[31].mxu0 }
 0x136   :  { %v570_v50 = vadd.f32 %v569_v60, %v440_v7  ;;  %v954_v51 = vpop.f32.mrb[31].mxu1 }
 0x137   :  { %715 = vst [vmem:[%s1577_s3] sm:$0xff] %v714_v48   ;;  %v590_v61 = vmax.f32 %v535_v47, 0.0 }
 0x138   :  { %v597_v4 = vmax.f32 %v570_v50, 0.0  ;;  %v539_v53 = vpop.f32.mrb[32].mxu0 }
 0x139   :  { %v540_v54 = vadd.f32 %v539_v53, %v1526_v20  ;;  %v574_v55 = vpop.f32.mrb[32].mxu1  ;;  %v936_v56 = vpop.f32.mrb[33].mxu0 }
 0x13a   :  { %v734_v57 = vpack.c.bf16 %v597_v4, %v596_v52  ;;  %v575_v58 = vadd.f32 %v574_v55, %v445_v16  ;;  %v957_v59 = vpop.f32.mrb[33].mxu1 }
 0x13b   :  { %v591_v12 = vmax.f32 %v540_v54, 0.0 }
 0x13c   :  { %744 = vst [vmem:[%s1577_s3 + $0x20] sm:$0xff] %v734_v57   ;;  %v544_v62 = vpop.f32.mrb[34].mxu0  ;;  %v598_v20 = vmax.f32 %v575_v58, 0.0 }
 0x13d   :  { %v719_v63 = vpack.c.bf16 %v591_v12, %v590_v61  ;;  %v545_v0 = vadd.f32 %v544_v62, %v1529_v28  ;;  %v579_v1 = vpop.f32.mrb[34].mxu1  ;;  %v939_v2 = vpop.f32.mrb[35].mxu0 }
 0x13e   :  { %v580_v3 = vadd.f32 %v579_v1, %v450_v25  ;;  %v960_v5 = vpop.f32.mrb[35].mxu1 }
 0x13f   :  { %741 = vst [vmem:[%s1577_s3 + $0x8] sm:$0xff] %v719_v63   ;;  %v592_v15 = vmax.f32 %v545_v0, 0.0 }
 0x140   :  { %v599_v6 = vmax.f32 %v580_v3, 0.0  ;;  %v549_v7 = vpop.f32.mrb[36].mxu0 }
 0x141   :  { %v550_v8 = vadd.f32 %v549_v7, %v1532_v36  ;;  %v584_v9 = vpop.f32.mrb[36].mxu1  ;;  %v942_v10 = vpop.f32.mrb[37].mxu0  ;;  %v595_v36 = vmax.f32 %v1544_v33, 0.0 }
 0x142   :  { %v739_v11 = vpack.c.bf16 %v599_v6, %v598_v20  ;;  %v585_v13 = vadd.f32 %v584_v9, %v455_v35  ;;  %v963_v14 = vpop.f32.mrb[37].mxu1 }
 0x143   :  { %v593_v28 = vmax.f32 %v550_v8, 0.0 }
 0x144   :  { %745 = vst [vmem:[%s1577_s3 + $0x28] sm:$0xff] %v739_v11   ;;  %v600_v16 = vmax.f32 %v585_v13, 0.0  ;;  %v554_v17 = vpop.f32.mrb[38].mxu0 }
 0x145   :  { %v724_v18 = vpack.c.bf16 %v593_v28, %v592_v15  ;;  %v555_v19 = vadd.f32 %v554_v17, %v1535_v44  ;;  %v945_v21 = vpop.f32.mrb[39].mxu0 }
 0x146   :  { %v710_v22 = vpack.c.bf16 %v600_v16, %v600_v16 }
 0x147   :  { %742 = vst [vmem:[%s1577_s3 + $0x10] sm:$0xff] %v724_v18   ;;  %v594_v23 = vmax.f32 %v555_v19, 0.0 }
 0x148   :  { %666 = vst [vmem:[%s1577_s3 + $0x30] sm:$0x1] %v710_v22 }
 0x149   :  { %v729_v24 = vpack.c.bf16 %v595_v36, %v594_v23 }
 0x14b   :  { %743 = vst [vmem:[%s1577_s3 + $0x18] sm:$0xff] %v729_v24  }

// kernel: model_forward.5
= control target key start
LH: loop header
LB: loop body
LE: loop exit
PB: predicated region body
PF: predicated region fallthrough
CT: control target
= control target key end

     0   :  { %10 = vsyncpa [#allocation5], 0  ;;  %s15190_s18 = smov 0   ;;  %s15192_s19 = smov 0   ;;  %s17924_s0 = inlined_call_operand.vmem [shape: bf16[2,6272], index: 0, kind: input, shape index: {}]   ;;  %s17925_s1 = inlined_call_operand.vmem [shape: bf16[6272,512], index: 1, kind: input, shape index: {}]   ;;  %s17926_s2 = inlined_call_operand.vmem [shape: f32[1,512], index: 2, kind: input, shape index: {}]   ;;  %s17927_s3 = inlined_call_operand.vmem [shape: f32[512,10], index: 3, kind: input, shape index: {}]   ;;  %s17928_s4 = inlined_call_operand.vmem [shape: f32[1,10], index: 4, kind: input, shape index: {}]   ;;  %s17929_s5 = inlined_call_operand.hbm [shape: f32[2,10], index: 5, kind: output, shape index: {}]  }
   0x1   :  { %s15194_s20 = smov 0  }
   0x2 LB: > { %s15206_s21 = sadd.s32 4294967295, %s15155_s20   ;;  %s15209_s22 = sadd.s32 1, %s15155_s20   ;;  %s15155_s20 = sphi %s15194_s20, %s17932_s20   ;;  %s15151_s19 = sphi %s15192_s19, %s17931_s19   ;;  %s15147_s18 = sphi %s15190_s18, %s17930_s18  }
   0x3   : > { %s41_s23 = ssub.s32 %s15155_s20, %s15209_s22  ;;  %s44_s24 = sadd.s32 1, %s15151_s19 }
   0x4   : > { %p42_p0 = scmp.eq.s32.totalorder %s41_s23, 0  ;;  %p51_p1 = scmp.ne.s32.totalorder %s15151_s19, %s15147_s18 }
   0x5   : > { %p52_p2 = scmp.eq.s32.totalorder %s15155_s20, 0  ;;  %p12919_p4 = scmp.ge.s32.totalorder %s15155_s20, 2 }
   0x6   : > { %s15218_s25 = scalar_select %p42_p0, %s15151_s19, %s44_s24  }
   0x7   : > { %p53_p3 = por %p52_p2, %p51_p1  ;;  %177 = sbr.rel (%p12919_p4) target bundleno = 410 (0x19a), region = 24 }
   0xe   : > { %180 = sbr.rel (!%p53_p3) target bundleno = 410 (0x19a), region = 28  ;;  %s182_s26 = sand.u32 (%p53_p3), 1, %s15151_s19  }
   0xf   : > { %s13718_s27 = sshll.u32 (%p53_p3), %s15155_s20, 3  ;;  %s13882_s28 = smul.u32 (%p53_p3), 6272, %s182_s26 }
  0x10   : > { %s15226_s6 = scalar_lea.vmem (%p53_p3), %s17925_s1, %s13718_s27 }
  0x11   : > { %v1784_v0 = vld [vmem:[%s15226_s6] sm:$0xff] (%p53_p3)  ;;  %v1786_v1 = vld [vmem:[%s15226_s6 + $0x10] sm:$0xff] (%p53_p3)  ;;  %s15234_s7 = scalar_lea.vmem (%p53_p3), [#allocation3], %s13882_s28 }
  0x12   : > { %v1788_v2 = vld [vmem:[%s15226_s6 + $0x20] sm:$0xff] (%p53_p3)  ;;  %v1790_v3 = vld [vmem:[%s15226_s6 + $0x30] sm:$0xff] (%p53_p3)  ;;  %1785 = vst [vmem:[%s15234_s7] sm:$0xff] (%p53_p3), %v1784_v0  ;;  %1787 = vst [vmem:[%s15234_s7 + $0x8] sm:$0xff] (%p53_p3), %v1786_v1 }
  0x13   : > { %v1792_v4 = vld [vmem:[%s15226_s6 + $0x40] sm:$0xff] (%p53_p3)  ;;  %v1794_v5 = vld [vmem:[%s15226_s6 + $0x50] sm:$0xff] (%p53_p3)  ;;  %1789 = vst [vmem:[%s15234_s7 + $0x10] sm:$0xff] (%p53_p3), %v1788_v2  ;;  %1791 = vst [vmem:[%s15234_s7 + $0x18] sm:$0xff] (%p53_p3), %v1790_v3 }
  0x14   : > { %1793 = vst [vmem:[%s15234_s7 + $0x20] sm:$0xff] (%p53_p3), %v1792_v4  ;;  %1795 = vst [vmem:[%s15234_s7 + $0x28] sm:$0xff] (%p53_p3), %v1794_v5  ;;  %v1796_v6 = vld [vmem:[%s15226_s6 + $0x60] sm:$0xff] (%p53_p3)  ;;  %v1798_v7 = vld [vmem:[%s15226_s6 + $0x70] sm:$0xff] (%p53_p3) }
  0x15   : > { %v1800_v8 = vld [vmem:[%s15226_s6 + $0x80] sm:$0xff]  ;;  %1797 = vst [vmem:[%s15234_s7 + $0x30] sm:$0xff] %v1796_v6  ;;  %1799 = vst [vmem:[%s15234_s7 + $0x38] sm:$0xff] %v1798_v7  ;;  %v1802_v9 = vld [vmem:[%s15226_s6 + $0x90] sm:$0xff] }
  0x16   : > { %1801 = vst [vmem:[%s15234_s7 + $0x40] sm:$0xff] %v1800_v8  ;;  %v1804_v10 = vld [vmem:[%s15226_s6 + $0xa0] sm:$0xff]  ;;  %v1806_v11 = vld [vmem:[%s15226_s6 + $0xb0] sm:$0xff]  ;;  %1803 = vst [vmem:[%s15234_s7 + $0x48] sm:$0xff] %v1802_v9 }
  0x17   : > { %1805 = vst [vmem:[%s15234_s7 + $0x50] sm:$0xff] %v1804_v10  ;;  %1807 = vst [vmem:[%s15234_s7 + $0x58] sm:$0xff] %v1806_v11  ;;  %v1808_v12 = vld [vmem:[%s15226_s6 + $0xc0] sm:$0xff]  ;;  %v1810_v13 = vld [vmem:[%s15226_s6 + $0xd0] sm:$0xff] }
  0x18   : > { %v1812_v14 = vld [vmem:[%s15226_s6 + $0xe0] sm:$0xff]  ;;  %1809 = vst [vmem:[%s15234_s7 + $0x60] sm:$0xff] %v1808_v12  ;;  %1811 = vst [vmem:[%s15234_s7 + $0x68] sm:$0xff] %v1810_v13  ;;  %v1814_v15 = vld [vmem:[%s15226_s6 + $0xf0] sm:$0xff] }
  0x19   : > { %1813 = vst [vmem:[%s15234_s7 + $0x70] sm:$0xff] %v1812_v14  ;;  %v1816_v16 = vld [vmem:[%s15226_s6 + $0x100] sm:$0xff]  ;;  %v1818_v17 = vld [vmem:[%s15226_s6 + $0x110] sm:$0xff]  ;;  %1815 = vst [vmem:[%s15234_s7 + $0x78] sm:$0xff] %v1814_v15 }
  0x1a   : > { %1817 = vst [vmem:[%s15234_s7 + $0x80] sm:$0xff] %v1816_v16  ;;  %1819 = vst [vmem:[%s15234_s7 + $0x88] sm:$0xff] %v1818_v17  ;;  %v1820_v18 = vld [vmem:[%s15226_s6 + $0x120] sm:$0xff]  ;;  %v1822_v19 = vld [vmem:[%s15226_s6 + $0x130] sm:$0xff] }
  0x1b   : > { %v1824_v20 = vld [vmem:[%s15226_s6 + $0x140] sm:$0xff]  ;;  %1821 = vst [vmem:[%s15234_s7 + $0x90] sm:$0xff] %v1820_v18  ;;  %1823 = vst [vmem:[%s15234_s7 + $0x98] sm:$0xff] %v1822_v19  ;;  %v1826_v21 = vld [vmem:[%s15226_s6 + $0x150] sm:$0xff] }
  0x1c   : > { %1825 = vst [vmem:[%s15234_s7 + $0xa0] sm:$0xff] %v1824_v20  ;;  %v1828_v22 = vld [vmem:[%s15226_s6 + $0x160] sm:$0xff]  ;;  %v1830_v23 = vld [vmem:[%s15226_s6 + $0x170] sm:$0xff]  ;;  %1827 = vst [vmem:[%s15234_s7 + $0xa8] sm:$0xff] %v1826_v21 }
  0x1d   : > { %1829 = vst [vmem:[%s15234_s7 + $0xb0] sm:$0xff] %v1828_v22  ;;  %1831 = vst [vmem:[%s15234_s7 + $0xb8] sm:$0xff] %v1830_v23  ;;  %v1832_v24 = vld [vmem:[%s15226_s6 + $0x180] sm:$0xff]  ;;  %v1834_v25 = vld [vmem:[%s15226_s6 + $0x190] sm:$0xff] }
  0x1e   : > { %v1836_v26 = vld [vmem:[%s15226_s6 + $0x1a0] sm:$0xff]  ;;  %1833 = vst [vmem:[%s15234_s7 + $0xc0] sm:$0xff] %v1832_v24  ;;  %1835 = vst [vmem:[%s15234_s7 + $0xc8] sm:$0xff] %v1834_v25  ;;  %v1838_v27 = vld [vmem:[%s15226_s6 + $0x1b0] sm:$0xff] }
  0x1f   : > { %1837 = vst [vmem:[%s15234_s7 + $0xd0] sm:$0xff] %v1836_v26  ;;  %v1840_v28 = vld [vmem:[%s15226_s6 + $0x1c0] sm:$0xff]  ;;  %v1842_v29 = vld [vmem:[%s15226_s6 + $0x1d0] sm:$0xff]  ;;  %1839 = vst [vmem:[%s15234_s7 + $0xd8] sm:$0xff] %v1838_v27 }
  0x20   : > { %1841 = vst [vmem:[%s15234_s7 + $0xe0] sm:$0xff] %v1840_v28  ;;  %1843 = vst [vmem:[%s15234_s7 + $0xe8] sm:$0xff] %v1842_v29  ;;  %v1844_v30 = vld [vmem:[%s15226_s6 + $0x1e0] sm:$0xff]  ;;  %v1846_v31 = vld [vmem:[%s15226_s6 + $0x1f0] sm:$0xff] }
  0x21   : > { %v1848_v32 = vld [vmem:[%s15226_s6 + $0x200] sm:$0xff]  ;;  %1845 = vst [vmem:[%s15234_s7 + $0xf0] sm:$0xff] %v1844_v30  ;;  %1847 = vst [vmem:[%s15234_s7 + $0xf8] sm:$0xff] %v1846_v31  ;;  %v1850_v33 = vld [vmem:[%s15226_s6 + $0x210] sm:$0xff] }
  0x22   : > { %1849 = vst [vmem:[%s15234_s7 + $0x100] sm:$0xff] %v1848_v32  ;;  %v1852_v34 = vld [vmem:[%s15226_s6 + $0x220] sm:$0xff]  ;;  %v1854_v35 = vld [vmem:[%s15226_s6 + $0x230] sm:$0xff]  ;;  %1851 = vst [vmem:[%s15234_s7 + $0x108] sm:$0xff] %v1850_v33 }
  0x23   : > { %1853 = vst [vmem:[%s15234_s7 + $0x110] sm:$0xff] %v1852_v34  ;;  %1855 = vst [vmem:[%s15234_s7 + $0x118] sm:$0xff] %v1854_v35  ;;  %v1856_v36 = vld [vmem:[%s15226_s6 + $0x240] sm:$0xff]  ;;  %v1858_v37 = vld [vmem:[%s15226_s6 + $0x250] sm:$0xff] }
  0x24   : > { %v1860_v38 = vld [vmem:[%s15226_s6 + $0x260] sm:$0xff]  ;;  %1857 = vst [vmem:[%s15234_s7 + $0x120] sm:$0xff] %v1856_v36  ;;  %1859 = vst [vmem:[%s15234_s7 + $0x128] sm:$0xff] %v1858_v37  ;;  %v1862_v39 = vld [vmem:[%s15226_s6 + $0x270] sm:$0xff] }
  0x25   : > { %1861 = vst [vmem:[%s15234_s7 + $0x130] sm:$0xff] %v1860_v38  ;;  %v1864_v40 = vld [vmem:[%s15226_s6 + $0x280] sm:$0xff]  ;;  %v1866_v41 = vld [vmem:[%s15226_s6 + $0x290] sm:$0xff]  ;;  %1863 = vst [vmem:[%s15234_s7 + $0x138] sm:$0xff] %v1862_v39 }
  0x26   : > { %1865 = vst [vmem:[%s15234_s7 + $0x140] sm:$0xff] %v1864_v40  ;;  %1867 = vst [vmem:[%s15234_s7 + $0x148] sm:$0xff] %v1866_v41  ;;  %v1868_v42 = vld [vmem:[%s15226_s6 + $0x2a0] sm:$0xff]  ;;  %v1870_v43 = vld [vmem:[%s15226_s6 + $0x2b0] sm:$0xff] }
  0x27   : > { %v1872_v44 = vld [vmem:[%s15226_s6 + $0x2c0] sm:$0xff]  ;;  %1869 = vst [vmem:[%s15234_s7 + $0x150] sm:$0xff] %v1868_v42  ;;  %1871 = vst [vmem:[%s15234_s7 + $0x158] sm:$0xff] %v1870_v43  ;;  %v1874_v45 = vld [vmem:[%s15226_s6 + $0x2d0] sm:$0xff] }
  0x28   : > { %1873 = vst [vmem:[%s15234_s7 + $0x160] sm:$0xff] %v1872_v44  ;;  %v1876_v46 = vld [vmem:[%s15226_s6 + $0x2e0] sm:$0xff]  ;;  %v1878_v47 = vld [vmem:[%s15226_s6 + $0x2f0] sm:$0xff]  ;;  %1875 = vst [vmem:[%s15234_s7 + $0x168] sm:$0xff] %v1874_v45 }
  0x29   : > { %1877 = vst [vmem:[%s15234_s7 + $0x170] sm:$0xff] %v1876_v46  ;;  %1879 = vst [vmem:[%s15234_s7 + $0x178] sm:$0xff] %v1878_v47  ;;  %v1880_v48 = vld [vmem:[%s15226_s6 + $0x300] sm:$0xff]  ;;  %v1882_v49 = vld [vmem:[%s15226_s6 + $0x310] sm:$0xff] }
  0x2a   : > { %v1884_v50 = vld [vmem:[%s15226_s6 + $0x320] sm:$0xff]  ;;  %1881 = vst [vmem:[%s15234_s7 + $0x180] sm:$0xff] %v1880_v48  ;;  %1883 = vst [vmem:[%s15234_s7 + $0x188] sm:$0xff] %v1882_v49  ;;  %v1886_v51 = vld [vmem:[%s15226_s6 + $0x330] sm:$0xff] }
  0x2b   : > { %1885 = vst [vmem:[%s15234_s7 + $0x190] sm:$0xff] %v1884_v50  ;;  %v1888_v52 = vld [vmem:[%s15226_s6 + $0x340] sm:$0xff]  ;;  %v1890_v53 = vld [vmem:[%s15226_s6 + $0x350] sm:$0xff]  ;;  %1887 = vst [vmem:[%s15234_s7 + $0x198] sm:$0xff] %v1886_v51 }
  0x2c   : > { %1889 = vst [vmem:[%s15234_s7 + $0x1a0] sm:$0xff] %v1888_v52  ;;  %1891 = vst [vmem:[%s15234_s7 + $0x1a8] sm:$0xff] %v1890_v53  ;;  %v1892_v54 = vld [vmem:[%s15226_s6 + $0x360] sm:$0xff]  ;;  %v1894_v55 = vld [vmem:[%s15226_s6 + $0x370] sm:$0xff] }
  0x2d   : > { %v1896_v56 = vld [vmem:[%s15226_s6 + $0x380] sm:$0xff]  ;;  %1893 = vst [vmem:[%s15234_s7 + $0x1b0] sm:$0xff] %v1892_v54  ;;  %1895 = vst [vmem:[%s15234_s7 + $0x1b8] sm:$0xff] %v1894_v55  ;;  %v1898_v57 = vld [vmem:[%s15226_s6 + $0x390] sm:$0xff] }
  0x2e   : > { %1897 = vst [vmem:[%s15234_s7 + $0x1c0] sm:$0xff] %v1896_v56  ;;  %v1900_v58 = vld [vmem:[%s15226_s6 + $0x3a0] sm:$0xff]  ;;  %v1902_v59 = vld [vmem:[%s15226_s6 + $0x3b0] sm:$0xff]  ;;  %1899 = vst [vmem:[%s15234_s7 + $0x1c8] sm:$0xff] %v1898_v57 }
  0x2f   : > { %1901 = vst [vmem:[%s15234_s7 + $0x1d0] sm:$0xff] %v1900_v58  ;;  %1903 = vst [vmem:[%s15234_s7 + $0x1d8] sm:$0xff] %v1902_v59  ;;  %v1904_v60 = vld [vmem:[%s15226_s6 + $0x3c0] sm:$0xff]  ;;  %v1906_v61 = vld [vmem:[%s15226_s6 + $0x3d0] sm:$0xff] }
  0x30   : > { %v1908_v62 = vld [vmem:[%s15226_s6 + $0x3e0] sm:$0xff]  ;;  %1905 = vst [vmem:[%s15234_s7 + $0x1e0] sm:$0xff] %v1904_v60  ;;  %1907 = vst [vmem:[%s15234_s7 + $0x1e8] sm:$0xff] %v1906_v61  ;;  %v1910_v63 = vld [vmem:[%s15226_s6 + $0x3f0] sm:$0xff] }
  0x31   : > { %1909 = vst [vmem:[%s15234_s7 + $0x1f0] sm:$0xff] %v1908_v62  ;;  %v1912_v0 = vld [vmem:[%s15226_s6 + $0x400] sm:$0xff]  ;;  %v1914_v1 = vld [vmem:[%s15226_s6 + $0x410] sm:$0xff]  ;;  %1911 = vst [vmem:[%s15234_s7 + $0x1f8] sm:$0xff] %v1910_v63 }
  0x32   : > { %1913 = vst [vmem:[%s15234_s7 + $0x200] sm:$0xff] %v1912_v0  ;;  %1915 = vst [vmem:[%s15234_s7 + $0x208] sm:$0xff] %v1914_v1  ;;  %v1916_v2 = vld [vmem:[%s15226_s6 + $0x420] sm:$0xff]  ;;  %v1918_v3 = vld [vmem:[%s15226_s6 + $0x430] sm:$0xff] }
  0x33   : > { %v1920_v4 = vld [vmem:[%s15226_s6 + $0x440] sm:$0xff]  ;;  %1917 = vst [vmem:[%s15234_s7 + $0x210] sm:$0xff] %v1916_v2  ;;  %1919 = vst [vmem:[%s15234_s7 + $0x218] sm:$0xff] %v1918_v3  ;;  %v1922_v5 = vld [vmem:[%s15226_s6 + $0x450] sm:$0xff] }
  0x34   : > { %1921 = vst [vmem:[%s15234_s7 + $0x220] sm:$0xff] %v1920_v4  ;;  %v1924_v6 = vld [vmem:[%s15226_s6 + $0x460] sm:$0xff]  ;;  %v1926_v7 = vld [vmem:[%s15226_s6 + $0x470] sm:$0xff]  ;;  %1923 = vst [vmem:[%s15234_s7 + $0x228] sm:$0xff] %v1922_v5 }
  0x35   : > { %1925 = vst [vmem:[%s15234_s7 + $0x230] sm:$0xff] %v1924_v6  ;;  %1927 = vst [vmem:[%s15234_s7 + $0x238] sm:$0xff] %v1926_v7  ;;  %v1928_v8 = vld [vmem:[%s15226_s6 + $0x480] sm:$0xff]  ;;  %v1930_v9 = vld [vmem:[%s15226_s6 + $0x490] sm:$0xff] }
  0x36   : > { %v1932_v10 = vld [vmem:[%s15226_s6 + $0x4a0] sm:$0xff]  ;;  %1929 = vst [vmem:[%s15234_s7 + $0x240] sm:$0xff] %v1928_v8  ;;  %1931 = vst [vmem:[%s15234_s7 + $0x248] sm:$0xff] %v1930_v9  ;;  %v1934_v11 = vld [vmem:[%s15226_s6 + $0x4b0] sm:$0xff] }
  0x37   : > { %1933 = vst [vmem:[%s15234_s7 + $0x250] sm:$0xff] %v1932_v10  ;;  %v1936_v12 = vld [vmem:[%s15226_s6 + $0x4c0] sm:$0xff]  ;;  %v1938_v13 = vld [vmem:[%s15226_s6 + $0x4d0] sm:$0xff]  ;;  %1935 = vst [vmem:[%s15234_s7 + $0x258] sm:$0xff] %v1934_v11 }
  0x38   : > { %1937 = vst [vmem:[%s15234_s7 + $0x260] sm:$0xff] %v1936_v12  ;;  %1939 = vst [vmem:[%s15234_s7 + $0x268] sm:$0xff] %v1938_v13  ;;  %v1940_v14 = vld [vmem:[%s15226_s6 + $0x4e0] sm:$0xff]  ;;  %v1942_v15 = vld [vmem:[%s15226_s6 + $0x4f0] sm:$0xff] }
  0x39   : > { %v1944_v16 = vld [vmem:[%s15226_s6 + $0x500] sm:$0xff]  ;;  %1941 = vst [vmem:[%s15234_s7 + $0x270] sm:$0xff] %v1940_v14  ;;  %1943 = vst [vmem:[%s15234_s7 + $0x278] sm:$0xff] %v1942_v15  ;;  %v1946_v17 = vld [vmem:[%s15226_s6 + $0x510] sm:$0xff] }
  0x3a   : > { %1945 = vst [vmem:[%s15234_s7 + $0x280] sm:$0xff] %v1944_v16  ;;  %v1948_v18 = vld [vmem:[%s15226_s6 + $0x520] sm:$0xff]  ;;  %v1950_v19 = vld [vmem:[%s15226_s6 + $0x530] sm:$0xff]  ;;  %1947 = vst [vmem:[%s15234_s7 + $0x288] sm:$0xff] %v1946_v17 }
  0x3b   : > { %1949 = vst [vmem:[%s15234_s7 + $0x290] sm:$0xff] %v1948_v18  ;;  %1951 = vst [vmem:[%s15234_s7 + $0x298] sm:$0xff] %v1950_v19  ;;  %v1952_v20 = vld [vmem:[%s15226_s6 + $0x540] sm:$0xff]  ;;  %v1954_v21 = vld [vmem:[%s15226_s6 + $0x550] sm:$0xff] }
  0x3c   : > { %v1956_v22 = vld [vmem:[%s15226_s6 + $0x560] sm:$0xff]  ;;  %1953 = vst [vmem:[%s15234_s7 + $0x2a0] sm:$0xff] %v1952_v20  ;;  %1955 = vst [vmem:[%s15234_s7 + $0x2a8] sm:$0xff] %v1954_v21  ;;  %v1958_v23 = vld [vmem:[%s15226_s6 + $0x570] sm:$0xff] }
  0x3d   : > { %1957 = vst [vmem:[%s15234_s7 + $0x2b0] sm:$0xff] %v1956_v22  ;;  %v1960_v24 = vld [vmem:[%s15226_s6 + $0x580] sm:$0xff]  ;;  %v1962_v25 = vld [vmem:[%s15226_s6 + $0x590] sm:$0xff]  ;;  %1959 = vst [vmem:[%s15234_s7 + $0x2b8] sm:$0xff] %v1958_v23 }
  0x3e   : > { %1961 = vst [vmem:[%s15234_s7 + $0x2c0] sm:$0xff] %v1960_v24  ;;  %1963 = vst [vmem:[%s15234_s7 + $0x2c8] sm:$0xff] %v1962_v25  ;;  %v1964_v26 = vld [vmem:[%s15226_s6 + $0x5a0] sm:$0xff]  ;;  %v1966_v27 = vld [vmem:[%s15226_s6 + $0x5b0] sm:$0xff] }
  0x3f   : > { %v1968_v28 = vld [vmem:[%s15226_s6 + $0x5c0] sm:$0xff]  ;;  %1965 = vst [vmem:[%s15234_s7 + $0x2d0] sm:$0xff] %v1964_v26  ;;  %1967 = vst [vmem:[%s15234_s7 + $0x2d8] sm:$0xff] %v1966_v27  ;;  %v1970_v29 = vld [vmem:[%s15226_s6 + $0x5d0] sm:$0xff] }
  0x40   : > { %1969 = vst [vmem:[%s15234_s7 + $0x2e0] sm:$0xff] %v1968_v28  ;;  %v1972_v30 = vld [vmem:[%s15226_s6 + $0x5e0] sm:$0xff]  ;;  %v1974_v31 = vld [vmem:[%s15226_s6 + $0x5f0] sm:$0xff]  ;;  %1971 = vst [vmem:[%s15234_s7 + $0x2e8] sm:$0xff] %v1970_v29 }
  0x41   : > { %1973 = vst [vmem:[%s15234_s7 + $0x2f0] sm:$0xff] %v1972_v30  ;;  %1975 = vst [vmem:[%s15234_s7 + $0x2f8] sm:$0xff] %v1974_v31  ;;  %v1976_v32 = vld [vmem:[%s15226_s6 + $0x600] sm:$0xff]  ;;  %v1978_v33 = vld [vmem:[%s15226_s6 + $0x610] sm:$0xff] }
  0x42   : > { %v1980_v34 = vld [vmem:[%s15226_s6 + $0x620] sm:$0xff]  ;;  %1977 = vst [vmem:[%s15234_s7 + $0x300] sm:$0xff] %v1976_v32  ;;  %1979 = vst [vmem:[%s15234_s7 + $0x308] sm:$0xff] %v1978_v33  ;;  %v1982_v35 = vld [vmem:[%s15226_s6 + $0x630] sm:$0xff] }
  0x43   : > { %1981 = vst [vmem:[%s15234_s7 + $0x310] sm:$0xff] %v1980_v34  ;;  %v1984_v36 = vld [vmem:[%s15226_s6 + $0x640] sm:$0xff]  ;;  %v1986_v37 = vld [vmem:[%s15226_s6 + $0x650] sm:$0xff]  ;;  %1983 = vst [vmem:[%s15234_s7 + $0x318] sm:$0xff] %v1982_v35 }
  0x44   : > { %1985 = vst [vmem:[%s15234_s7 + $0x320] sm:$0xff] %v1984_v36  ;;  %1987 = vst [vmem:[%s15234_s7 + $0x328] sm:$0xff] %v1986_v37  ;;  %v1988_v38 = vld [vmem:[%s15226_s6 + $0x660] sm:$0xff]  ;;  %v1990_v39 = vld [vmem:[%s15226_s6 + $0x670] sm:$0xff] }
  0x45   : > { %v1992_v40 = vld [vmem:[%s15226_s6 + $0x680] sm:$0xff]  ;;  %1989 = vst [vmem:[%s15234_s7 + $0x330] sm:$0xff] %v1988_v38  ;;  %1991 = vst [vmem:[%s15234_s7 + $0x338] sm:$0xff] %v1990_v39  ;;  %v1994_v41 = vld [vmem:[%s15226_s6 + $0x690] sm:$0xff] }
  0x46   : > { %1993 = vst [vmem:[%s15234_s7 + $0x340] sm:$0xff] %v1992_v40  ;;  %v1996_v42 = vld [vmem:[%s15226_s6 + $0x6a0] sm:$0xff]  ;;  %v1998_v43 = vld [vmem:[%s15226_s6 + $0x6b0] sm:$0xff]  ;;  %1995 = vst [vmem:[%s15234_s7 + $0x348] sm:$0xff] %v1994_v41 }
  0x47   : > { %1997 = vst [vmem:[%s15234_s7 + $0x350] sm:$0xff] %v1996_v42  ;;  %1999 = vst [vmem:[%s15234_s7 + $0x358] sm:$0xff] %v1998_v43  ;;  %v2000_v44 = vld [vmem:[%s15226_s6 + $0x6c0] sm:$0xff]  ;;  %v2002_v45 = vld [vmem:[%s15226_s6 + $0x6d0] sm:$0xff] }
  0x48   : > { %v2004_v46 = vld [vmem:[%s15226_s6 + $0x6e0] sm:$0xff]  ;;  %2001 = vst [vmem:[%s15234_s7 + $0x360] sm:$0xff] %v2000_v44  ;;  %2003 = vst [vmem:[%s15234_s7 + $0x368] sm:$0xff] %v2002_v45  ;;  %v2006_v47 = vld [vmem:[%s15226_s6 + $0x6f0] sm:$0xff] }
  0x49   : > { %2005 = vst [vmem:[%s15234_s7 + $0x370] sm:$0xff] %v2004_v46  ;;  %v2008_v48 = vld [vmem:[%s15226_s6 + $0x700] sm:$0xff]  ;;  %v2010_v49 = vld [vmem:[%s15226_s6 + $0x710] sm:$0xff]  ;;  %2007 = vst [vmem:[%s15234_s7 + $0x378] sm:$0xff] %v2006_v47 }
  0x4a   : > { %2009 = vst [vmem:[%s15234_s7 + $0x380] sm:$0xff] %v2008_v48  ;;  %2011 = vst [vmem:[%s15234_s7 + $0x388] sm:$0xff] %v2010_v49  ;;  %v2012_v50 = vld [vmem:[%s15226_s6 + $0x720] sm:$0xff]  ;;  %v2014_v51 = vld [vmem:[%s15226_s6 + $0x730] sm:$0xff] }
  0x4b   : > { %v2016_v52 = vld [vmem:[%s15226_s6 + $0x740] sm:$0xff]  ;;  %2013 = vst [vmem:[%s15234_s7 + $0x390] sm:$0xff] %v2012_v50  ;;  %2015 = vst [vmem:[%s15234_s7 + $0x398] sm:$0xff] %v2014_v51  ;;  %v2018_v53 = vld [vmem:[%s15226_s6 + $0x750] sm:$0xff] }
  0x4c   : > { %2017 = vst [vmem:[%s15234_s7 + $0x3a0] sm:$0xff] %v2016_v52  ;;  %v2020_v54 = vld [vmem:[%s15226_s6 + $0x760] sm:$0xff]  ;;  %v2022_v55 = vld [vmem:[%s15226_s6 + $0x770] sm:$0xff]  ;;  %2019 = vst [vmem:[%s15234_s7 + $0x3a8] sm:$0xff] %v2018_v53 }
  0x4d   : > { %2021 = vst [vmem:[%s15234_s7 + $0x3b0] sm:$0xff] %v2020_v54  ;;  %2023 = vst [vmem:[%s15234_s7 + $0x3b8] sm:$0xff] %v2022_v55  ;;  %v2024_v56 = vld [vmem:[%s15226_s6 + $0x780] sm:$0xff]  ;;  %v2026_v57 = vld [vmem:[%s15226_s6 + $0x790] sm:$0xff] }
  0x4e   : > { %v2028_v58 = vld [vmem:[%s15226_s6 + $0x7a0] sm:$0xff]  ;;  %2025 = vst [vmem:[%s15234_s7 + $0x3c0] sm:$0xff] %v2024_v56  ;;  %2027 = vst [vmem:[%s15234_s7 + $0x3c8] sm:$0xff] %v2026_v57  ;;  %v2030_v59 = vld [vmem:[%s15226_s6 + $0x7b0] sm:$0xff] }
  0x4f   : > { %2029 = vst [vmem:[%s15234_s7 + $0x3d0] sm:$0xff] %v2028_v58  ;;  %v2032_v60 = vld [vmem:[%s15226_s6 + $0x7c0] sm:$0xff]  ;;  %v2034_v61 = vld [vmem:[%s15226_s6 + $0x7d0] sm:$0xff]  ;;  %2031 = vst [vmem:[%s15234_s7 + $0x3d8] sm:$0xff] %v2030_v59 }
  0x50   : > { %2033 = vst [vmem:[%s15234_s7 + $0x3e0] sm:$0xff] %v2032_v60  ;;  %2035 = vst [vmem:[%s15234_s7 + $0x3e8] sm:$0xff] %v2034_v61  ;;  %v2036_v62 = vld [vmem:[%s15226_s6 + $0x7e0] sm:$0xff]  ;;  %v2038_v63 = vld [vmem:[%s15226_s6 + $0x7f0] sm:$0xff] }
  0x51   : > { %v2040_v0 = vld [vmem:[%s15226_s6 + $0x800] sm:$0xff]  ;;  %2037 = vst [vmem:[%s15234_s7 + $0x3f0] sm:$0xff] %v2036_v62  ;;  %2039 = vst [vmem:[%s15234_s7 + $0x3f8] sm:$0xff] %v2038_v63  ;;  %v2042_v1 = vld [vmem:[%s15226_s6 + $0x810] sm:$0xff] }
  0x52   : > { %2041 = vst [vmem:[%s15234_s7 + $0x400] sm:$0xff] %v2040_v0  ;;  %v2044_v2 = vld [vmem:[%s15226_s6 + $0x820] sm:$0xff]  ;;  %v2046_v3 = vld [vmem:[%s15226_s6 + $0x830] sm:$0xff]  ;;  %2043 = vst [vmem:[%s15234_s7 + $0x408] sm:$0xff] %v2042_v1 }
  0x53   : > { %2045 = vst [vmem:[%s15234_s7 + $0x410] sm:$0xff] %v2044_v2  ;;  %2047 = vst [vmem:[%s15234_s7 + $0x418] sm:$0xff] %v2046_v3  ;;  %v2048_v4 = vld [vmem:[%s15226_s6 + $0x840] sm:$0xff]  ;;  %v2050_v5 = vld [vmem:[%s15226_s6 + $0x850] sm:$0xff] }
  0x54   : > { %v2052_v6 = vld [vmem:[%s15226_s6 + $0x860] sm:$0xff]  ;;  %2049 = vst [vmem:[%s15234_s7 + $0x420] sm:$0xff] %v2048_v4  ;;  %2051 = vst [vmem:[%s15234_s7 + $0x428] sm:$0xff] %v2050_v5  ;;  %v2054_v7 = vld [vmem:[%s15226_s6 + $0x870] sm:$0xff] }
  0x55   : > { %2053 = vst [vmem:[%s15234_s7 + $0x430] sm:$0xff] %v2052_v6  ;;  %v2056_v8 = vld [vmem:[%s15226_s6 + $0x880] sm:$0xff]  ;;  %v2058_v9 = vld [vmem:[%s15226_s6 + $0x890] sm:$0xff]  ;;  %2055 = vst [vmem:[%s15234_s7 + $0x438] sm:$0xff] %v2054_v7 }
  0x56   : > { %2057 = vst [vmem:[%s15234_s7 + $0x440] sm:$0xff] %v2056_v8  ;;  %2059 = vst [vmem:[%s15234_s7 + $0x448] sm:$0xff] %v2058_v9  ;;  %v2060_v10 = vld [vmem:[%s15226_s6 + $0x8a0] sm:$0xff]  ;;  %v2062_v11 = vld [vmem:[%s15226_s6 + $0x8b0] sm:$0xff] }
  0x57   : > { %v2064_v12 = vld [vmem:[%s15226_s6 + $0x8c0] sm:$0xff]  ;;  %2061 = vst [vmem:[%s15234_s7 + $0x450] sm:$0xff] %v2060_v10  ;;  %2063 = vst [vmem:[%s15234_s7 + $0x458] sm:$0xff] %v2062_v11  ;;  %v2066_v13 = vld [vmem:[%s15226_s6 + $0x8d0] sm:$0xff] }
  0x58   : > { %2065 = vst [vmem:[%s15234_s7 + $0x460] sm:$0xff] %v2064_v12  ;;  %v2068_v14 = vld [vmem:[%s15226_s6 + $0x8e0] sm:$0xff]  ;;  %v2070_v15 = vld [vmem:[%s15226_s6 + $0x8f0] sm:$0xff]  ;;  %2067 = vst [vmem:[%s15234_s7 + $0x468] sm:$0xff] %v2066_v13 }
  0x59   : > { %2069 = vst [vmem:[%s15234_s7 + $0x470] sm:$0xff] %v2068_v14  ;;  %2071 = vst [vmem:[%s15234_s7 + $0x478] sm:$0xff] %v2070_v15  ;;  %v2072_v16 = vld [vmem:[%s15226_s6 + $0x900] sm:$0xff]  ;;  %v2074_v17 = vld [vmem:[%s15226_s6 + $0x910] sm:$0xff] }
  0x5a   : > { %v2076_v18 = vld [vmem:[%s15226_s6 + $0x920] sm:$0xff]  ;;  %2073 = vst [vmem:[%s15234_s7 + $0x480] sm:$0xff] %v2072_v16  ;;  %2075 = vst [vmem:[%s15234_s7 + $0x488] sm:$0xff] %v2074_v17  ;;  %v2078_v19 = vld [vmem:[%s15226_s6 + $0x930] sm:$0xff] }
  0x5b   : > { %2077 = vst [vmem:[%s15234_s7 + $0x490] sm:$0xff] %v2076_v18  ;;  %v2080_v20 = vld [vmem:[%s15226_s6 + $0x940] sm:$0xff]  ;;  %v2082_v21 = vld [vmem:[%s15226_s6 + $0x950] sm:$0xff]  ;;  %2079 = vst [vmem:[%s15234_s7 + $0x498] sm:$0xff] %v2078_v19 }
  0x5c   : > { %2081 = vst [vmem:[%s15234_s7 + $0x4a0] sm:$0xff] %v2080_v20  ;;  %2083 = vst [vmem:[%s15234_s7 + $0x4a8] sm:$0xff] %v2082_v21  ;;  %v2084_v22 = vld [vmem:[%s15226_s6 + $0x960] sm:$0xff]  ;;  %v2086_v23 = vld [vmem:[%s15226_s6 + $0x970] sm:$0xff] }
  0x5d   : > { %v2088_v24 = vld [vmem:[%s15226_s6 + $0x980] sm:$0xff]  ;;  %2085 = vst [vmem:[%s15234_s7 + $0x4b0] sm:$0xff] %v2084_v22  ;;  %2087 = vst [vmem:[%s15234_s7 + $0x4b8] sm:$0xff] %v2086_v23  ;;  %v2090_v25 = vld [vmem:[%s15226_s6 + $0x990] sm:$0xff] }
  0x5e   : > { %2089 = vst [vmem:[%s15234_s7 + $0x4c0] sm:$0xff] %v2088_v24  ;;  %v2092_v26 = vld [vmem:[%s15226_s6 + $0x9a0] sm:$0xff]  ;;  %v2094_v27 = vld [vmem:[%s15226_s6 + $0x9b0] sm:$0xff]  ;;  %2091 = vst [vmem:[%s15234_s7 + $0x4c8] sm:$0xff] %v2090_v25 }
  0x5f   : > { %2093 = vst [vmem:[%s15234_s7 + $0x4d0] sm:$0xff] %v2092_v26  ;;  %2095 = vst [vmem:[%s15234_s7 + $0x4d8] sm:$0xff] %v2094_v27  ;;  %v2096_v28 = vld [vmem:[%s15226_s6 + $0x9c0] sm:$0xff]  ;;  %v2098_v29 = vld [vmem:[%s15226_s6 + $0x9d0] sm:$0xff] }
  0x60   : > { %v2100_v30 = vld [vmem:[%s15226_s6 + $0x9e0] sm:$0xff]  ;;  %2097 = vst [vmem:[%s15234_s7 + $0x4e0] sm:$0xff] %v2096_v28  ;;  %2099 = vst [vmem:[%s15234_s7 + $0x4e8] sm:$0xff] %v2098_v29  ;;  %v2102_v31 = vld [vmem:[%s15226_s6 + $0x9f0] sm:$0xff] }
  0x61   : > { %2101 = vst [vmem:[%s15234_s7 + $0x4f0] sm:$0xff] %v2100_v30  ;;  %v2104_v32 = vld [vmem:[%s15226_s6 + $0xa00] sm:$0xff]  ;;  %v2106_v33 = vld [vmem:[%s15226_s6 + $0xa10] sm:$0xff]  ;;  %2103 = vst [vmem:[%s15234_s7 + $0x4f8] sm:$0xff] %v2102_v31 }
  0x62   : > { %2105 = vst [vmem:[%s15234_s7 + $0x500] sm:$0xff] %v2104_v32  ;;  %2107 = vst [vmem:[%s15234_s7 + $0x508] sm:$0xff] %v2106_v33  ;;  %v2108_v34 = vld [vmem:[%s15226_s6 + $0xa20] sm:$0xff]  ;;  %v2110_v35 = vld [vmem:[%s15226_s6 + $0xa30] sm:$0xff] }
  0x63   : > { %v2112_v36 = vld [vmem:[%s15226_s6 + $0xa40] sm:$0xff]  ;;  %2109 = vst [vmem:[%s15234_s7 + $0x510] sm:$0xff] %v2108_v34  ;;  %2111 = vst [vmem:[%s15234_s7 + $0x518] sm:$0xff] %v2110_v35  ;;  %v2114_v37 = vld [vmem:[%s15226_s6 + $0xa50] sm:$0xff] }
  0x64   : > { %2113 = vst [vmem:[%s15234_s7 + $0x520] sm:$0xff] %v2112_v36  ;;  %v2116_v38 = vld [vmem:[%s15226_s6 + $0xa60] sm:$0xff]  ;;  %v2118_v39 = vld [vmem:[%s15226_s6 + $0xa70] sm:$0xff]  ;;  %2115 = vst [vmem:[%s15234_s7 + $0x528] sm:$0xff] %v2114_v37 }
  0x65   : > { %2117 = vst [vmem:[%s15234_s7 + $0x530] sm:$0xff] %v2116_v38  ;;  %2119 = vst [vmem:[%s15234_s7 + $0x538] sm:$0xff] %v2118_v39  ;;  %v2120_v40 = vld [vmem:[%s15226_s6 + $0xa80] sm:$0xff]  ;;  %v2122_v41 = vld [vmem:[%s15226_s6 + $0xa90] sm:$0xff] }
  0x66   : > { %v2124_v42 = vld [vmem:[%s15226_s6 + $0xaa0] sm:$0xff]  ;;  %2121 = vst [vmem:[%s15234_s7 + $0x540] sm:$0xff] %v2120_v40  ;;  %2123 = vst [vmem:[%s15234_s7 + $0x548] sm:$0xff] %v2122_v41  ;;  %v2126_v43 = vld [vmem:[%s15226_s6 + $0xab0] sm:$0xff] }
  0x67   : > { %2125 = vst [vmem:[%s15234_s7 + $0x550] sm:$0xff] %v2124_v42  ;;  %v2128_v44 = vld [vmem:[%s15226_s6 + $0xac0] sm:$0xff]  ;;  %v2130_v45 = vld [vmem:[%s15226_s6 + $0xad0] sm:$0xff]  ;;  %2127 = vst [vmem:[%s15234_s7 + $0x558] sm:$0xff] %v2126_v43 }
  0x68   : > { %2129 = vst [vmem:[%s15234_s7 + $0x560] sm:$0xff] %v2128_v44  ;;  %2131 = vst [vmem:[%s15234_s7 + $0x568] sm:$0xff] %v2130_v45  ;;  %v2132_v46 = vld [vmem:[%s15226_s6 + $0xae0] sm:$0xff]  ;;  %v2134_v47 = vld [vmem:[%s15226_s6 + $0xaf0] sm:$0xff] }
  0x69   : > { %v2136_v48 = vld [vmem:[%s15226_s6 + $0xb00] sm:$0xff]  ;;  %2133 = vst [vmem:[%s15234_s7 + $0x570] sm:$0xff] %v2132_v46  ;;  %2135 = vst [vmem:[%s15234_s7 + $0x578] sm:$0xff] %v2134_v47  ;;  %v2138_v49 = vld [vmem:[%s15226_s6 + $0xb10] sm:$0xff] }
  0x6a   : > { %2137 = vst [vmem:[%s15234_s7 + $0x580] sm:$0xff] %v2136_v48  ;;  %v2140_v50 = vld [vmem:[%s15226_s6 + $0xb20] sm:$0xff]  ;;  %v2142_v51 = vld [vmem:[%s15226_s6 + $0xb30] sm:$0xff]  ;;  %2139 = vst [vmem:[%s15234_s7 + $0x588] sm:$0xff] %v2138_v49 }
  0x6b   : > { %2141 = vst [vmem:[%s15234_s7 + $0x590] sm:$0xff] %v2140_v50  ;;  %2143 = vst [vmem:[%s15234_s7 + $0x598] sm:$0xff] %v2142_v51  ;;  %v2144_v52 = vld [vmem:[%s15226_s6 + $0xb40] sm:$0xff]  ;;  %v2146_v53 = vld [vmem:[%s15226_s6 + $0xb50] sm:$0xff] }
  0x6c   : > { %v2148_v54 = vld [vmem:[%s15226_s6 + $0xb60] sm:$0xff]  ;;  %2145 = vst [vmem:[%s15234_s7 + $0x5a0] sm:$0xff] %v2144_v52  ;;  %2147 = vst [vmem:[%s15234_s7 + $0x5a8] sm:$0xff] %v2146_v53  ;;  %v2150_v55 = vld [vmem:[%s15226_s6 + $0xb70] sm:$0xff] }
  0x6d   : > { %2149 = vst [vmem:[%s15234_s7 + $0x5b0] sm:$0xff] %v2148_v54  ;;  %v2152_v56 = vld [vmem:[%s15226_s6 + $0xb80] sm:$0xff]  ;;  %v2154_v57 = vld [vmem:[%s15226_s6 + $0xb90] sm:$0xff]  ;;  %2151 = vst [vmem:[%s15234_s7 + $0x5b8] sm:$0xff] %v2150_v55 }
  0x6e   : > { %2153 = vst [vmem:[%s15234_s7 + $0x5c0] sm:$0xff] %v2152_v56  ;;  %2155 = vst [vmem:[%s15234_s7 + $0x5c8] sm:$0xff] %v2154_v57  ;;  %v2156_v58 = vld [vmem:[%s15226_s6 + $0xba0] sm:$0xff]  ;;  %v2158_v59 = vld [vmem:[%s15226_s6 + $0xbb0] sm:$0xff] }
  0x6f   : > { %v2160_v60 = vld [vmem:[%s15226_s6 + $0xbc0] sm:$0xff]  ;;  %2157 = vst [vmem:[%s15234_s7 + $0x5d0] sm:$0xff] %v2156_v58  ;;  %2159 = vst [vmem:[%s15234_s7 + $0x5d8] sm:$0xff] %v2158_v59  ;;  %v2162_v61 = vld [vmem:[%s15226_s6 + $0xbd0] sm:$0xff] }
  0x70   : > { %2161 = vst [vmem:[%s15234_s7 + $0x5e0] sm:$0xff] %v2160_v60  ;;  %v2164_v62 = vld [vmem:[%s15226_s6 + $0xbe0] sm:$0xff]  ;;  %v2166_v63 = vld [vmem:[%s15226_s6 + $0xbf0] sm:$0xff]  ;;  %2163 = vst [vmem:[%s15234_s7 + $0x5e8] sm:$0xff] %v2162_v61 }
  0x71   : > { %2165 = vst [vmem:[%s15234_s7 + $0x5f0] sm:$0xff] %v2164_v62  ;;  %2167 = vst [vmem:[%s15234_s7 + $0x5f8] sm:$0xff] %v2166_v63  ;;  %v2168_v0 = vld [vmem:[%s15226_s6 + $0xc00] sm:$0xff]  ;;  %v2170_v1 = vld [vmem:[%s15226_s6 + $0xc10] sm:$0xff] }
  0x72   : > { %v2172_v2 = vld [vmem:[%s15226_s6 + $0xc20] sm:$0xff]  ;;  %2169 = vst [vmem:[%s15234_s7 + $0x600] sm:$0xff] %v2168_v0  ;;  %2171 = vst [vmem:[%s15234_s7 + $0x608] sm:$0xff] %v2170_v1  ;;  %v2174_v3 = vld [vmem:[%s15226_s6 + $0xc30] sm:$0xff] }
  0x73   : > { %2173 = vst [vmem:[%s15234_s7 + $0x610] sm:$0xff] %v2172_v2  ;;  %v2176_v4 = vld [vmem:[%s15226_s6 + $0xc40] sm:$0xff]  ;;  %v2178_v5 = vld [vmem:[%s15226_s6 + $0xc50] sm:$0xff]  ;;  %2175 = vst [vmem:[%s15234_s7 + $0x618] sm:$0xff] %v2174_v3 }
  0x74   : > { %2177 = vst [vmem:[%s15234_s7 + $0x620] sm:$0xff] %v2176_v4  ;;  %2179 = vst [vmem:[%s15234_s7 + $0x628] sm:$0xff] %v2178_v5  ;;  %v2180_v6 = vld [vmem:[%s15226_s6 + $0xc60] sm:$0xff]  ;;  %v2182_v7 = vld [vmem:[%s15226_s6 + $0xc70] sm:$0xff] }
  0x75   : > { %v2184_v8 = vld [vmem:[%s15226_s6 + $0xc80] sm:$0xff]  ;;  %2181 = vst [vmem:[%s15234_s7 + $0x630] sm:$0xff] %v2180_v6  ;;  %2183 = vst [vmem:[%s15234_s7 + $0x638] sm:$0xff] %v2182_v7  ;;  %v2186_v9 = vld [vmem:[%s15226_s6 + $0xc90] sm:$0xff] }
  0x76   : > { %2185 = vst [vmem:[%s15234_s7 + $0x640] sm:$0xff] %v2184_v8  ;;  %v2188_v10 = vld [vmem:[%s15226_s6 + $0xca0] sm:$0xff]  ;;  %v2190_v11 = vld [vmem:[%s15226_s6 + $0xcb0] sm:$0xff]  ;;  %2187 = vst [vmem:[%s15234_s7 + $0x648] sm:$0xff] %v2186_v9 }
  0x77   : > { %2189 = vst [vmem:[%s15234_s7 + $0x650] sm:$0xff] %v2188_v10  ;;  %2191 = vst [vmem:[%s15234_s7 + $0x658] sm:$0xff] %v2190_v11  ;;  %v2192_v12 = vld [vmem:[%s15226_s6 + $0xcc0] sm:$0xff]  ;;  %v2194_v13 = vld [vmem:[%s15226_s6 + $0xcd0] sm:$0xff] }
  0x78   : > { %v2196_v14 = vld [vmem:[%s15226_s6 + $0xce0] sm:$0xff]  ;;  %2193 = vst [vmem:[%s15234_s7 + $0x660] sm:$0xff] %v2192_v12  ;;  %2195 = vst [vmem:[%s15234_s7 + $0x668] sm:$0xff] %v2194_v13  ;;  %v2198_v15 = vld [vmem:[%s15226_s6 + $0xcf0] sm:$0xff] }
  0x79   : > { %2197 = vst [vmem:[%s15234_s7 + $0x670] sm:$0xff] %v2196_v14  ;;  %v2200_v16 = vld [vmem:[%s15226_s6 + $0xd00] sm:$0xff]  ;;  %v2202_v17 = vld [vmem:[%s15226_s6 + $0xd10] sm:$0xff]  ;;  %2199 = vst [vmem:[%s15234_s7 + $0x678] sm:$0xff] %v2198_v15 }
  0x7a   : > { %2201 = vst [vmem:[%s15234_s7 + $0x680] sm:$0xff] %v2200_v16  ;;  %2203 = vst [vmem:[%s15234_s7 + $0x688] sm:$0xff] %v2202_v17  ;;  %v2204_v18 = vld [vmem:[%s15226_s6 + $0xd20] sm:$0xff]  ;;  %v2206_v19 = vld [vmem:[%s15226_s6 + $0xd30] sm:$0xff] }
  0x7b   : > { %v2208_v20 = vld [vmem:[%s15226_s6 + $0xd40] sm:$0xff]  ;;  %2205 = vst [vmem:[%s15234_s7 + $0x690] sm:$0xff] %v2204_v18  ;;  %2207 = vst [vmem:[%s15234_s7 + $0x698] sm:$0xff] %v2206_v19  ;;  %v2210_v21 = vld [vmem:[%s15226_s6 + $0xd50] sm:$0xff] }
  0x7c   : > { %2209 = vst [vmem:[%s15234_s7 + $0x6a0] sm:$0xff] %v2208_v20  ;;  %v2212_v22 = vld [vmem:[%s15226_s6 + $0xd60] sm:$0xff]  ;;  %v2214_v23 = vld [vmem:[%s15226_s6 + $0xd70] sm:$0xff]  ;;  %2211 = vst [vmem:[%s15234_s7 + $0x6a8] sm:$0xff] %v2210_v21 }
  0x7d   : > { %2213 = vst [vmem:[%s15234_s7 + $0x6b0] sm:$0xff] %v2212_v22  ;;  %2215 = vst [vmem:[%s15234_s7 + $0x6b8] sm:$0xff] %v2214_v23  ;;  %v2216_v24 = vld [vmem:[%s15226_s6 + $0xd80] sm:$0xff]  ;;  %v2218_v25 = vld [vmem:[%s15226_s6 + $0xd90] sm:$0xff] }
  0x7e   : > { %v2220_v26 = vld [vmem:[%s15226_s6 + $0xda0] sm:$0xff]  ;;  %2217 = vst [vmem:[%s15234_s7 + $0x6c0] sm:$0xff] %v2216_v24  ;;  %2219 = vst [vmem:[%s15234_s7 + $0x6c8] sm:$0xff] %v2218_v25  ;;  %v2222_v27 = vld [vmem:[%s15226_s6 + $0xdb0] sm:$0xff] }
  0x7f   : > { %2221 = vst [vmem:[%s15234_s7 + $0x6d0] sm:$0xff] %v2220_v26  ;;  %v2224_v28 = vld [vmem:[%s15226_s6 + $0xdc0] sm:$0xff]  ;;  %v2226_v29 = vld [vmem:[%s15226_s6 + $0xdd0] sm:$0xff]  ;;  %2223 = vst [vmem:[%s15234_s7 + $0x6d8] sm:$0xff] %v2222_v27 }
  0x80   : > { %2225 = vst [vmem:[%s15234_s7 + $0x6e0] sm:$0xff] %v2224_v28  ;;  %2227 = vst [vmem:[%s15234_s7 + $0x6e8] sm:$0xff] %v2226_v29  ;;  %v2228_v30 = vld [vmem:[%s15226_s6 + $0xde0] sm:$0xff]  ;;  %v2230_v31 = vld [vmem:[%s15226_s6 + $0xdf0] sm:$0xff] }
  0x81   : > { %v2232_v32 = vld [vmem:[%s15226_s6 + $0xe00] sm:$0xff]  ;;  %2229 = vst [vmem:[%s15234_s7 + $0x6f0] sm:$0xff] %v2228_v30  ;;  %2231 = vst [vmem:[%s15234_s7 + $0x6f8] sm:$0xff] %v2230_v31  ;;  %v2234_v33 = vld [vmem:[%s15226_s6 + $0xe10] sm:$0xff] }
  0x82   : > { %2233 = vst [vmem:[%s15234_s7 + $0x700] sm:$0xff] %v2232_v32  ;;  %v2236_v34 = vld [vmem:[%s15226_s6 + $0xe20] sm:$0xff]  ;;  %v2238_v35 = vld [vmem:[%s15226_s6 + $0xe30] sm:$0xff]  ;;  %2235 = vst [vmem:[%s15234_s7 + $0x708] sm:$0xff] %v2234_v33 }
  0x83   : > { %2237 = vst [vmem:[%s15234_s7 + $0x710] sm:$0xff] %v2236_v34  ;;  %2239 = vst [vmem:[%s15234_s7 + $0x718] sm:$0xff] %v2238_v35  ;;  %v2240_v36 = vld [vmem:[%s15226_s6 + $0xe40] sm:$0xff]  ;;  %v2242_v37 = vld [vmem:[%s15226_s6 + $0xe50] sm:$0xff] }
  0x84   : > { %v2244_v38 = vld [vmem:[%s15226_s6 + $0xe60] sm:$0xff]  ;;  %2241 = vst [vmem:[%s15234_s7 + $0x720] sm:$0xff] %v2240_v36  ;;  %2243 = vst [vmem:[%s15234_s7 + $0x728] sm:$0xff] %v2242_v37  ;;  %v2246_v39 = vld [vmem:[%s15226_s6 + $0xe70] sm:$0xff] }
  0x85   : > { %2245 = vst [vmem:[%s15234_s7 + $0x730] sm:$0xff] %v2244_v38  ;;  %v2248_v40 = vld [vmem:[%s15226_s6 + $0xe80] sm:$0xff]  ;;  %v2250_v41 = vld [vmem:[%s15226_s6 + $0xe90] sm:$0xff]  ;;  %2247 = vst [vmem:[%s15234_s7 + $0x738] sm:$0xff] %v2246_v39 }
  0x86   : > { %2249 = vst [vmem:[%s15234_s7 + $0x740] sm:$0xff] %v2248_v40  ;;  %2251 = vst [vmem:[%s15234_s7 + $0x748] sm:$0xff] %v2250_v41  ;;  %v2252_v42 = vld [vmem:[%s15226_s6 + $0xea0] sm:$0xff]  ;;  %v2254_v43 = vld [vmem:[%s15226_s6 + $0xeb0] sm:$0xff] }
  0x87   : > { %v2256_v44 = vld [vmem:[%s15226_s6 + $0xec0] sm:$0xff]  ;;  %2253 = vst [vmem:[%s15234_s7 + $0x750] sm:$0xff] %v2252_v42  ;;  %2255 = vst [vmem:[%s15234_s7 + $0x758] sm:$0xff] %v2254_v43  ;;  %v2258_v45 = vld [vmem:[%s15226_s6 + $0xed0] sm:$0xff] }
  0x88   : > { %2257 = vst [vmem:[%s15234_s7 + $0x760] sm:$0xff] %v2256_v44  ;;  %v2260_v46 = vld [vmem:[%s15226_s6 + $0xee0] sm:$0xff]  ;;  %v2262_v47 = vld [vmem:[%s15226_s6 + $0xef0] sm:$0xff]  ;;  %2259 = vst [vmem:[%s15234_s7 + $0x768] sm:$0xff] %v2258_v45 }
  0x89   : > { %2261 = vst [vmem:[%s15234_s7 + $0x770] sm:$0xff] %v2260_v46  ;;  %2263 = vst [vmem:[%s15234_s7 + $0x778] sm:$0xff] %v2262_v47  ;;  %v2264_v48 = vld [vmem:[%s15226_s6 + $0xf00] sm:$0xff]  ;;  %v2266_v49 = vld [vmem:[%s15226_s6 + $0xf10] sm:$0xff] }
  0x8a   : > { %v2268_v50 = vld [vmem:[%s15226_s6 + $0xf20] sm:$0xff]  ;;  %2265 = vst [vmem:[%s15234_s7 + $0x780] sm:$0xff] %v2264_v48  ;;  %2267 = vst [vmem:[%s15234_s7 + $0x788] sm:$0xff] %v2266_v49  ;;  %v2270_v51 = vld [vmem:[%s15226_s6 + $0xf30] sm:$0xff] }
  0x8b   : > { %2269 = vst [vmem:[%s15234_s7 + $0x790] sm:$0xff] %v2268_v50  ;;  %v2272_v52 = vld [vmem:[%s15226_s6 + $0xf40] sm:$0xff]  ;;  %v2274_v53 = vld [vmem:[%s15226_s6 + $0xf50] sm:$0xff]  ;;  %2271 = vst [vmem:[%s15234_s7 + $0x798] sm:$0xff] %v2270_v51 }
  0x8c   : > { %2273 = vst [vmem:[%s15234_s7 + $0x7a0] sm:$0xff] %v2272_v52  ;;  %2275 = vst [vmem:[%s15234_s7 + $0x7a8] sm:$0xff] %v2274_v53  ;;  %v2276_v54 = vld [vmem:[%s15226_s6 + $0xf60] sm:$0xff]  ;;  %v2278_v55 = vld [vmem:[%s15226_s6 + $0xf70] sm:$0xff] }
  0x8d   : > { %v2280_v56 = vld [vmem:[%s15226_s6 + $0xf80] sm:$0xff]  ;;  %2277 = vst [vmem:[%s15234_s7 + $0x7b0] sm:$0xff] %v2276_v54  ;;  %2279 = vst [vmem:[%s15234_s7 + $0x7b8] sm:$0xff] %v2278_v55  ;;  %v2282_v57 = vld [vmem:[%s15226_s6 + $0xf90] sm:$0xff] }
  0x8e   : > { %2281 = vst [vmem:[%s15234_s7 + $0x7c0] sm:$0xff] %v2280_v56  ;;  %v2284_v58 = vld [vmem:[%s15226_s6 + $0xfa0] sm:$0xff]  ;;  %v2286_v59 = vld [vmem:[%s15226_s6 + $0xfb0] sm:$0xff]  ;;  %2283 = vst [vmem:[%s15234_s7 + $0x7c8] sm:$0xff] %v2282_v57 }
  0x8f   : > { %2285 = vst [vmem:[%s15234_s7 + $0x7d0] sm:$0xff] %v2284_v58  ;;  %2287 = vst [vmem:[%s15234_s7 + $0x7d8] sm:$0xff] %v2286_v59  ;;  %v2288_v60 = vld [vmem:[%s15226_s6 + $0xfc0] sm:$0xff]  ;;  %v2290_v61 = vld [vmem:[%s15226_s6 + $0xfd0] sm:$0xff] }
  0x90   : > { %v2292_v62 = vld [vmem:[%s15226_s6 + $0xfe0] sm:$0xff]  ;;  %2289 = vst [vmem:[%s15234_s7 + $0x7e0] sm:$0xff] %v2288_v60  ;;  %2291 = vst [vmem:[%s15234_s7 + $0x7e8] sm:$0xff] %v2290_v61  ;;  %v2294_v63 = vld [vmem:[%s15226_s6 + $0xff0] sm:$0xff] }
  0x91   : > { %2293 = vst [vmem:[%s15234_s7 + $0x7f0] sm:$0xff] %v2292_v62  ;;  %v2296_v0 = vld [vmem:[%s15226_s6 + $0x1000] sm:$0xff]  ;;  %v2298_v1 = vld [vmem:[%s15226_s6 + $0x1010] sm:$0xff]  ;;  %2295 = vst [vmem:[%s15234_s7 + $0x7f8] sm:$0xff] %v2294_v63 }
  0x92   : > { %2297 = vst [vmem:[%s15234_s7 + $0x800] sm:$0xff] %v2296_v0  ;;  %2299 = vst [vmem:[%s15234_s7 + $0x808] sm:$0xff] %v2298_v1  ;;  %v2300_v2 = vld [vmem:[%s15226_s6 + $0x1020] sm:$0xff]  ;;  %v2302_v3 = vld [vmem:[%s15226_s6 + $0x1030] sm:$0xff] }
  0x93   : > { %v2304_v4 = vld [vmem:[%s15226_s6 + $0x1040] sm:$0xff]  ;;  %2301 = vst [vmem:[%s15234_s7 + $0x810] sm:$0xff] %v2300_v2  ;;  %2303 = vst [vmem:[%s15234_s7 + $0x818] sm:$0xff] %v2302_v3  ;;  %v2306_v5 = vld [vmem:[%s15226_s6 + $0x1050] sm:$0xff] }
  0x94   : > { %2305 = vst [vmem:[%s15234_s7 + $0x820] sm:$0xff] %v2304_v4  ;;  %v2308_v6 = vld [vmem:[%s15226_s6 + $0x1060] sm:$0xff]  ;;  %v2310_v7 = vld [vmem:[%s15226_s6 + $0x1070] sm:$0xff]  ;;  %2307 = vst [vmem:[%s15234_s7 + $0x828] sm:$0xff] %v2306_v5 }
  0x95   : > { %2309 = vst [vmem:[%s15234_s7 + $0x830] sm:$0xff] %v2308_v6  ;;  %2311 = vst [vmem:[%s15234_s7 + $0x838] sm:$0xff] %v2310_v7  ;;  %v2312_v8 = vld [vmem:[%s15226_s6 + $0x1080] sm:$0xff]  ;;  %v2314_v9 = vld [vmem:[%s15226_s6 + $0x1090] sm:$0xff] }
  0x96   : > { %v2316_v10 = vld [vmem:[%s15226_s6 + $0x10a0] sm:$0xff]  ;;  %2313 = vst [vmem:[%s15234_s7 + $0x840] sm:$0xff] %v2312_v8  ;;  %2315 = vst [vmem:[%s15234_s7 + $0x848] sm:$0xff] %v2314_v9  ;;  %v2318_v11 = vld [vmem:[%s15226_s6 + $0x10b0] sm:$0xff] }
  0x97   : > { %2317 = vst [vmem:[%s15234_s7 + $0x850] sm:$0xff] %v2316_v10  ;;  %v2320_v12 = vld [vmem:[%s15226_s6 + $0x10c0] sm:$0xff]  ;;  %v2322_v13 = vld [vmem:[%s15226_s6 + $0x10d0] sm:$0xff]  ;;  %2319 = vst [vmem:[%s15234_s7 + $0x858] sm:$0xff] %v2318_v11 }
  0x98   : > { %2321 = vst [vmem:[%s15234_s7 + $0x860] sm:$0xff] %v2320_v12  ;;  %2323 = vst [vmem:[%s15234_s7 + $0x868] sm:$0xff] %v2322_v13  ;;  %v2324_v14 = vld [vmem:[%s15226_s6 + $0x10e0] sm:$0xff]  ;;  %v2326_v15 = vld [vmem:[%s15226_s6 + $0x10f0] sm:$0xff] }
  0x99   : > { %v2328_v16 = vld [vmem:[%s15226_s6 + $0x1100] sm:$0xff]  ;;  %2325 = vst [vmem:[%s15234_s7 + $0x870] sm:$0xff] %v2324_v14  ;;  %2327 = vst [vmem:[%s15234_s7 + $0x878] sm:$0xff] %v2326_v15  ;;  %v2330_v17 = vld [vmem:[%s15226_s6 + $0x1110] sm:$0xff] }
  0x9a   : > { %2329 = vst [vmem:[%s15234_s7 + $0x880] sm:$0xff] %v2328_v16  ;;  %v2332_v18 = vld [vmem:[%s15226_s6 + $0x1120] sm:$0xff]  ;;  %v2334_v19 = vld [vmem:[%s15226_s6 + $0x1130] sm:$0xff]  ;;  %2331 = vst [vmem:[%s15234_s7 + $0x888] sm:$0xff] %v2330_v17 }
  0x9b   : > { %2333 = vst [vmem:[%s15234_s7 + $0x890] sm:$0xff] %v2332_v18  ;;  %2335 = vst [vmem:[%s15234_s7 + $0x898] sm:$0xff] %v2334_v19  ;;  %v2336_v20 = vld [vmem:[%s15226_s6 + $0x1140] sm:$0xff]  ;;  %v2338_v21 = vld [vmem:[%s15226_s6 + $0x1150] sm:$0xff] }
  0x9c   : > { %v2340_v22 = vld [vmem:[%s15226_s6 + $0x1160] sm:$0xff]  ;;  %2337 = vst [vmem:[%s15234_s7 + $0x8a0] sm:$0xff] %v2336_v20  ;;  %2339 = vst [vmem:[%s15234_s7 + $0x8a8] sm:$0xff] %v2338_v21  ;;  %v2342_v23 = vld [vmem:[%s15226_s6 + $0x1170] sm:$0xff] }
  0x9d   : > { %2341 = vst [vmem:[%s15234_s7 + $0x8b0] sm:$0xff] %v2340_v22  ;;  %v2344_v24 = vld [vmem:[%s15226_s6 + $0x1180] sm:$0xff]  ;;  %v2346_v25 = vld [vmem:[%s15226_s6 + $0x1190] sm:$0xff]  ;;  %2343 = vst [vmem:[%s15234_s7 + $0x8b8] sm:$0xff] %v2342_v23 }
  0x9e   : > { %2345 = vst [vmem:[%s15234_s7 + $0x8c0] sm:$0xff] %v2344_v24  ;;  %2347 = vst [vmem:[%s15234_s7 + $0x8c8] sm:$0xff] %v2346_v25  ;;  %v2348_v26 = vld [vmem:[%s15226_s6 + $0x11a0] sm:$0xff]  ;;  %v2350_v27 = vld [vmem:[%s15226_s6 + $0x11b0] sm:$0xff] }
  0x9f   : > { %v2352_v28 = vld [vmem:[%s15226_s6 + $0x11c0] sm:$0xff]  ;;  %2349 = vst [vmem:[%s15234_s7 + $0x8d0] sm:$0xff] %v2348_v26  ;;  %2351 = vst [vmem:[%s15234_s7 + $0x8d8] sm:$0xff] %v2350_v27  ;;  %v2354_v29 = vld [vmem:[%s15226_s6 + $0x11d0] sm:$0xff] }
  0xa0   : > { %2353 = vst [vmem:[%s15234_s7 + $0x8e0] sm:$0xff] %v2352_v28  ;;  %v2356_v30 = vld [vmem:[%s15226_s6 + $0x11e0] sm:$0xff]  ;;  %v2358_v31 = vld [vmem:[%s15226_s6 + $0x11f0] sm:$0xff]  ;;  %2355 = vst [vmem:[%s15234_s7 + $0x8e8] sm:$0xff] %v2354_v29 }
  0xa1   : > { %2357 = vst [vmem:[%s15234_s7 + $0x8f0] sm:$0xff] %v2356_v30  ;;  %2359 = vst [vmem:[%s15234_s7 + $0x8f8] sm:$0xff] %v2358_v31  ;;  %v2360_v32 = vld [vmem:[%s15226_s6 + $0x1200] sm:$0xff]  ;;  %v2362_v33 = vld [vmem:[%s15226_s6 + $0x1210] sm:$0xff] }
  0xa2   : > { %v2364_v34 = vld [vmem:[%s15226_s6 + $0x1220] sm:$0xff]  ;;  %2361 = vst [vmem:[%s15234_s7 + $0x900] sm:$0xff] %v2360_v32  ;;  %2363 = vst [vmem:[%s15234_s7 + $0x908] sm:$0xff] %v2362_v33  ;;  %v2366_v35 = vld [vmem:[%s15226_s6 + $0x1230] sm:$0xff] }
  0xa3   : > { %2365 = vst [vmem:[%s15234_s7 + $0x910] sm:$0xff] %v2364_v34  ;;  %v2368_v36 = vld [vmem:[%s15226_s6 + $0x1240] sm:$0xff]  ;;  %v2370_v37 = vld [vmem:[%s15226_s6 + $0x1250] sm:$0xff]  ;;  %2367 = vst [vmem:[%s15234_s7 + $0x918] sm:$0xff] %v2366_v35 }
  0xa4   : > { %2369 = vst [vmem:[%s15234_s7 + $0x920] sm:$0xff] %v2368_v36  ;;  %2371 = vst [vmem:[%s15234_s7 + $0x928] sm:$0xff] %v2370_v37  ;;  %v2372_v38 = vld [vmem:[%s15226_s6 + $0x1260] sm:$0xff]  ;;  %v2374_v39 = vld [vmem:[%s15226_s6 + $0x1270] sm:$0xff] }
  0xa5   : > { %v2376_v40 = vld [vmem:[%s15226_s6 + $0x1280] sm:$0xff]  ;;  %2373 = vst [vmem:[%s15234_s7 + $0x930] sm:$0xff] %v2372_v38  ;;  %2375 = vst [vmem:[%s15234_s7 + $0x938] sm:$0xff] %v2374_v39  ;;  %v2378_v41 = vld [vmem:[%s15226_s6 + $0x1290] sm:$0xff] }
  0xa6   : > { %2377 = vst [vmem:[%s15234_s7 + $0x940] sm:$0xff] %v2376_v40  ;;  %v2380_v42 = vld [vmem:[%s15226_s6 + $0x12a0] sm:$0xff]  ;;  %v2382_v43 = vld [vmem:[%s15226_s6 + $0x12b0] sm:$0xff]  ;;  %2379 = vst [vmem:[%s15234_s7 + $0x948] sm:$0xff] %v2378_v41 }
  0xa7   : > { %2381 = vst [vmem:[%s15234_s7 + $0x950] sm:$0xff] %v2380_v42  ;;  %2383 = vst [vmem:[%s15234_s7 + $0x958] sm:$0xff] %v2382_v43  ;;  %v2384_v44 = vld [vmem:[%s15226_s6 + $0x12c0] sm:$0xff]  ;;  %v2386_v45 = vld [vmem:[%s15226_s6 + $0x12d0] sm:$0xff] }
  0xa8   : > { %v2388_v46 = vld [vmem:[%s15226_s6 + $0x12e0] sm:$0xff]  ;;  %2385 = vst [vmem:[%s15234_s7 + $0x960] sm:$0xff] %v2384_v44  ;;  %2387 = vst [vmem:[%s15234_s7 + $0x968] sm:$0xff] %v2386_v45  ;;  %v2390_v47 = vld [vmem:[%s15226_s6 + $0x12f0] sm:$0xff] }
  0xa9   : > { %2389 = vst [vmem:[%s15234_s7 + $0x970] sm:$0xff] %v2388_v46  ;;  %v2392_v48 = vld [vmem:[%s15226_s6 + $0x1300] sm:$0xff]  ;;  %v2394_v49 = vld [vmem:[%s15226_s6 + $0x1310] sm:$0xff]  ;;  %2391 = vst [vmem:[%s15234_s7 + $0x978] sm:$0xff] %v2390_v47 }
  0xaa   : > { %2393 = vst [vmem:[%s15234_s7 + $0x980] sm:$0xff] %v2392_v48  ;;  %2395 = vst [vmem:[%s15234_s7 + $0x988] sm:$0xff] %v2394_v49  ;;  %v2396_v50 = vld [vmem:[%s15226_s6 + $0x1320] sm:$0xff]  ;;  %v2398_v51 = vld [vmem:[%s15226_s6 + $0x1330] sm:$0xff] }
  0xab   : > { %v2400_v52 = vld [vmem:[%s15226_s6 + $0x1340] sm:$0xff]  ;;  %2397 = vst [vmem:[%s15234_s7 + $0x990] sm:$0xff] %v2396_v50  ;;  %2399 = vst [vmem:[%s15234_s7 + $0x998] sm:$0xff] %v2398_v51  ;;  %v2402_v53 = vld [vmem:[%s15226_s6 + $0x1350] sm:$0xff] }
  0xac   : > { %2401 = vst [vmem:[%s15234_s7 + $0x9a0] sm:$0xff] %v2400_v52  ;;  %v2404_v54 = vld [vmem:[%s15226_s6 + $0x1360] sm:$0xff]  ;;  %v2406_v55 = vld [vmem:[%s15226_s6 + $0x1370] sm:$0xff]  ;;  %2403 = vst [vmem:[%s15234_s7 + $0x9a8] sm:$0xff] %v2402_v53 }
  0xad   : > { %2405 = vst [vmem:[%s15234_s7 + $0x9b0] sm:$0xff] %v2404_v54  ;;  %2407 = vst [vmem:[%s15234_s7 + $0x9b8] sm:$0xff] %v2406_v55  ;;  %v2408_v56 = vld [vmem:[%s15226_s6 + $0x1380] sm:$0xff]  ;;  %v2410_v57 = vld [vmem:[%s15226_s6 + $0x1390] sm:$0xff] }
  0xae   : > { %v2412_v58 = vld [vmem:[%s15226_s6 + $0x13a0] sm:$0xff]  ;;  %2409 = vst [vmem:[%s15234_s7 + $0x9c0] sm:$0xff] %v2408_v56  ;;  %2411 = vst [vmem:[%s15234_s7 + $0x9c8] sm:$0xff] %v2410_v57  ;;  %v2414_v59 = vld [vmem:[%s15226_s6 + $0x13b0] sm:$0xff] }
  0xaf   : > { %2413 = vst [vmem:[%s15234_s7 + $0x9d0] sm:$0xff] %v2412_v58  ;;  %v2416_v60 = vld [vmem:[%s15226_s6 + $0x13c0] sm:$0xff]  ;;  %v2418_v61 = vld [vmem:[%s15226_s6 + $0x13d0] sm:$0xff]  ;;  %2415 = vst [vmem:[%s15234_s7 + $0x9d8] sm:$0xff] %v2414_v59 }
  0xb0   : > { %2417 = vst [vmem:[%s15234_s7 + $0x9e0] sm:$0xff] %v2416_v60  ;;  %2419 = vst [vmem:[%s15234_s7 + $0x9e8] sm:$0xff] %v2418_v61  ;;  %v2420_v62 = vld [vmem:[%s15226_s6 + $0x13e0] sm:$0xff]  ;;  %v2422_v63 = vld [vmem:[%s15226_s6 + $0x13f0] sm:$0xff] }
  0xb1   : > { %v2424_v0 = vld [vmem:[%s15226_s6 + $0x1400] sm:$0xff]  ;;  %2421 = vst [vmem:[%s15234_s7 + $0x9f0] sm:$0xff] %v2420_v62  ;;  %2423 = vst [vmem:[%s15234_s7 + $0x9f8] sm:$0xff] %v2422_v63  ;;  %v2426_v1 = vld [vmem:[%s15226_s6 + $0x1410] sm:$0xff] }
  0xb2   : > { %2425 = vst [vmem:[%s15234_s7 + $0xa00] sm:$0xff] %v2424_v0  ;;  %v2428_v2 = vld [vmem:[%s15226_s6 + $0x1420] sm:$0xff]  ;;  %v2430_v3 = vld [vmem:[%s15226_s6 + $0x1430] sm:$0xff]  ;;  %2427 = vst [vmem:[%s15234_s7 + $0xa08] sm:$0xff] %v2426_v1 }
  0xb3   : > { %2429 = vst [vmem:[%s15234_s7 + $0xa10] sm:$0xff] %v2428_v2  ;;  %2431 = vst [vmem:[%s15234_s7 + $0xa18] sm:$0xff] %v2430_v3  ;;  %v2432_v4 = vld [vmem:[%s15226_s6 + $0x1440] sm:$0xff]  ;;  %v2434_v5 = vld [vmem:[%s15226_s6 + $0x1450] sm:$0xff] }
  0xb4   : > { %v2436_v6 = vld [vmem:[%s15226_s6 + $0x1460] sm:$0xff]  ;;  %2433 = vst [vmem:[%s15234_s7 + $0xa20] sm:$0xff] %v2432_v4  ;;  %2435 = vst [vmem:[%s15234_s7 + $0xa28] sm:$0xff] %v2434_v5  ;;  %v2438_v7 = vld [vmem:[%s15226_s6 + $0x1470] sm:$0xff] }
  0xb5   : > { %2437 = vst [vmem:[%s15234_s7 + $0xa30] sm:$0xff] %v2436_v6  ;;  %v2440_v8 = vld [vmem:[%s15226_s6 + $0x1480] sm:$0xff]  ;;  %v2442_v9 = vld [vmem:[%s15226_s6 + $0x1490] sm:$0xff]  ;;  %2439 = vst [vmem:[%s15234_s7 + $0xa38] sm:$0xff] %v2438_v7 }
  0xb6   : > { %2441 = vst [vmem:[%s15234_s7 + $0xa40] sm:$0xff] %v2440_v8  ;;  %2443 = vst [vmem:[%s15234_s7 + $0xa48] sm:$0xff] %v2442_v9  ;;  %v2444_v10 = vld [vmem:[%s15226_s6 + $0x14a0] sm:$0xff]  ;;  %v2446_v11 = vld [vmem:[%s15226_s6 + $0x14b0] sm:$0xff] }
  0xb7   : > { %v2448_v12 = vld [vmem:[%s15226_s6 + $0x14c0] sm:$0xff]  ;;  %2445 = vst [vmem:[%s15234_s7 + $0xa50] sm:$0xff] %v2444_v10  ;;  %2447 = vst [vmem:[%s15234_s7 + $0xa58] sm:$0xff] %v2446_v11  ;;  %v2450_v13 = vld [vmem:[%s15226_s6 + $0x14d0] sm:$0xff] }
  0xb8   : > { %2449 = vst [vmem:[%s15234_s7 + $0xa60] sm:$0xff] %v2448_v12  ;;  %v2452_v14 = vld [vmem:[%s15226_s6 + $0x14e0] sm:$0xff]  ;;  %v2454_v15 = vld [vmem:[%s15226_s6 + $0x14f0] sm:$0xff]  ;;  %2451 = vst [vmem:[%s15234_s7 + $0xa68] sm:$0xff] %v2450_v13 }
  0xb9   : > { %2453 = vst [vmem:[%s15234_s7 + $0xa70] sm:$0xff] %v2452_v14  ;;  %2455 = vst [vmem:[%s15234_s7 + $0xa78] sm:$0xff] %v2454_v15  ;;  %v2456_v16 = vld [vmem:[%s15226_s6 + $0x1500] sm:$0xff]  ;;  %v2458_v17 = vld [vmem:[%s15226_s6 + $0x1510] sm:$0xff] }
  0xba   : > { %v2460_v18 = vld [vmem:[%s15226_s6 + $0x1520] sm:$0xff]  ;;  %2457 = vst [vmem:[%s15234_s7 + $0xa80] sm:$0xff] %v2456_v16  ;;  %2459 = vst [vmem:[%s15234_s7 + $0xa88] sm:$0xff] %v2458_v17  ;;  %v2462_v19 = vld [vmem:[%s15226_s6 + $0x1530] sm:$0xff] }
  0xbb   : > { %2461 = vst [vmem:[%s15234_s7 + $0xa90] sm:$0xff] %v2460_v18  ;;  %v2464_v20 = vld [vmem:[%s15226_s6 + $0x1540] sm:$0xff]  ;;  %v2466_v21 = vld [vmem:[%s15226_s6 + $0x1550] sm:$0xff]  ;;  %2463 = vst [vmem:[%s15234_s7 + $0xa98] sm:$0xff] %v2462_v19 }
  0xbc   : > { %2465 = vst [vmem:[%s15234_s7 + $0xaa0] sm:$0xff] %v2464_v20  ;;  %2467 = vst [vmem:[%s15234_s7 + $0xaa8] sm:$0xff] %v2466_v21  ;;  %v2468_v22 = vld [vmem:[%s15226_s6 + $0x1560] sm:$0xff]  ;;  %v2470_v23 = vld [vmem:[%s15226_s6 + $0x1570] sm:$0xff] }
  0xbd   : > { %v2472_v24 = vld [vmem:[%s15226_s6 + $0x1580] sm:$0xff]  ;;  %2469 = vst [vmem:[%s15234_s7 + $0xab0] sm:$0xff] %v2468_v22  ;;  %2471 = vst [vmem:[%s15234_s7 + $0xab8] sm:$0xff] %v2470_v23  ;;  %v2474_v25 = vld [vmem:[%s15226_s6 + $0x1590] sm:$0xff] }
  0xbe   : > { %2473 = vst [vmem:[%s15234_s7 + $0xac0] sm:$0xff] %v2472_v24  ;;  %v2476_v26 = vld [vmem:[%s15226_s6 + $0x15a0] sm:$0xff]  ;;  %v2478_v27 = vld [vmem:[%s15226_s6 + $0x15b0] sm:$0xff]  ;;  %2475 = vst [vmem:[%s15234_s7 + $0xac8] sm:$0xff] %v2474_v25 }
  0xbf   : > { %2477 = vst [vmem:[%s15234_s7 + $0xad0] sm:$0xff] %v2476_v26  ;;  %2479 = vst [vmem:[%s15234_s7 + $0xad8] sm:$0xff] %v2478_v27  ;;  %v2480_v28 = vld [vmem:[%s15226_s6 + $0x15c0] sm:$0xff]  ;;  %v2482_v29 = vld [vmem:[%s15226_s6 + $0x15d0] sm:$0xff] }
  0xc0   : > { %v2484_v30 = vld [vmem:[%s15226_s6 + $0x15e0] sm:$0xff]  ;;  %2481 = vst [vmem:[%s15234_s7 + $0xae0] sm:$0xff] %v2480_v28  ;;  %2483 = vst [vmem:[%s15234_s7 + $0xae8] sm:$0xff] %v2482_v29  ;;  %v2486_v31 = vld [vmem:[%s15226_s6 + $0x15f0] sm:$0xff] }
  0xc1   : > { %2485 = vst [vmem:[%s15234_s7 + $0xaf0] sm:$0xff] %v2484_v30  ;;  %v2488_v32 = vld [vmem:[%s15226_s6 + $0x1600] sm:$0xff]  ;;  %v2490_v33 = vld [vmem:[%s15226_s6 + $0x1610] sm:$0xff]  ;;  %2487 = vst [vmem:[%s15234_s7 + $0xaf8] sm:$0xff] %v2486_v31 }
  0xc2   : > { %2489 = vst [vmem:[%s15234_s7 + $0xb00] sm:$0xff] %v2488_v32  ;;  %2491 = vst [vmem:[%s15234_s7 + $0xb08] sm:$0xff] %v2490_v33  ;;  %v2492_v34 = vld [vmem:[%s15226_s6 + $0x1620] sm:$0xff]  ;;  %v2494_v35 = vld [vmem:[%s15226_s6 + $0x1630] sm:$0xff] }
  0xc3   : > { %v2496_v36 = vld [vmem:[%s15226_s6 + $0x1640] sm:$0xff]  ;;  %2493 = vst [vmem:[%s15234_s7 + $0xb10] sm:$0xff] %v2492_v34  ;;  %2495 = vst [vmem:[%s15234_s7 + $0xb18] sm:$0xff] %v2494_v35  ;;  %v2498_v37 = vld [vmem:[%s15226_s6 + $0x1650] sm:$0xff] }
  0xc4   : > { %2497 = vst [vmem:[%s15234_s7 + $0xb20] sm:$0xff] %v2496_v36  ;;  %v2500_v38 = vld [vmem:[%s15226_s6 + $0x1660] sm:$0xff]  ;;  %v2502_v39 = vld [vmem:[%s15226_s6 + $0x1670] sm:$0xff]  ;;  %2499 = vst [vmem:[%s15234_s7 + $0xb28] sm:$0xff] %v2498_v37 }
  0xc5   : > { %2501 = vst [vmem:[%s15234_s7 + $0xb30] sm:$0xff] %v2500_v38  ;;  %2503 = vst [vmem:[%s15234_s7 + $0xb38] sm:$0xff] %v2502_v39  ;;  %v2504_v40 = vld [vmem:[%s15226_s6 + $0x1680] sm:$0xff]  ;;  %v2506_v41 = vld [vmem:[%s15226_s6 + $0x1690] sm:$0xff] }
  0xc6   : > { %v2508_v42 = vld [vmem:[%s15226_s6 + $0x16a0] sm:$0xff]  ;;  %2505 = vst [vmem:[%s15234_s7 + $0xb40] sm:$0xff] %v2504_v40  ;;  %2507 = vst [vmem:[%s15234_s7 + $0xb48] sm:$0xff] %v2506_v41  ;;  %v2510_v43 = vld [vmem:[%s15226_s6 + $0x16b0] sm:$0xff] }
  0xc7   : > { %2509 = vst [vmem:[%s15234_s7 + $0xb50] sm:$0xff] %v2508_v42  ;;  %v2512_v44 = vld [vmem:[%s15226_s6 + $0x16c0] sm:$0xff]  ;;  %v2514_v45 = vld [vmem:[%s15226_s6 + $0x16d0] sm:$0xff]  ;;  %2511 = vst [vmem:[%s15234_s7 + $0xb58] sm:$0xff] %v2510_v43 }
  0xc8   : > { %2513 = vst [vmem:[%s15234_s7 + $0xb60] sm:$0xff] %v2512_v44  ;;  %2515 = vst [vmem:[%s15234_s7 + $0xb68] sm:$0xff] %v2514_v45  ;;  %v2516_v46 = vld [vmem:[%s15226_s6 + $0x16e0] sm:$0xff]  ;;  %v2518_v47 = vld [vmem:[%s15226_s6 + $0x16f0] sm:$0xff] }
  0xc9   : > { %v2520_v48 = vld [vmem:[%s15226_s6 + $0x1700] sm:$0xff]  ;;  %2517 = vst [vmem:[%s15234_s7 + $0xb70] sm:$0xff] %v2516_v46  ;;  %2519 = vst [vmem:[%s15234_s7 + $0xb78] sm:$0xff] %v2518_v47  ;;  %v2522_v49 = vld [vmem:[%s15226_s6 + $0x1710] sm:$0xff] }
  0xca   : > { %2521 = vst [vmem:[%s15234_s7 + $0xb80] sm:$0xff] %v2520_v48  ;;  %v2524_v50 = vld [vmem:[%s15226_s6 + $0x1720] sm:$0xff]  ;;  %v2526_v51 = vld [vmem:[%s15226_s6 + $0x1730] sm:$0xff]  ;;  %2523 = vst [vmem:[%s15234_s7 + $0xb88] sm:$0xff] %v2522_v49 }
  0xcb   : > { %2525 = vst [vmem:[%s15234_s7 + $0xb90] sm:$0xff] %v2524_v50  ;;  %2527 = vst [vmem:[%s15234_s7 + $0xb98] sm:$0xff] %v2526_v51  ;;  %v2528_v52 = vld [vmem:[%s15226_s6 + $0x1740] sm:$0xff]  ;;  %v2530_v53 = vld [vmem:[%s15226_s6 + $0x1750] sm:$0xff] }
  0xcc   : > { %v2532_v54 = vld [vmem:[%s15226_s6 + $0x1760] sm:$0xff]  ;;  %2529 = vst [vmem:[%s15234_s7 + $0xba0] sm:$0xff] %v2528_v52  ;;  %2531 = vst [vmem:[%s15234_s7 + $0xba8] sm:$0xff] %v2530_v53  ;;  %v2534_v55 = vld [vmem:[%s15226_s6 + $0x1770] sm:$0xff] }
  0xcd   : > { %2533 = vst [vmem:[%s15234_s7 + $0xbb0] sm:$0xff] %v2532_v54  ;;  %v2536_v56 = vld [vmem:[%s15226_s6 + $0x1780] sm:$0xff]  ;;  %v2538_v57 = vld [vmem:[%s15226_s6 + $0x1790] sm:$0xff]  ;;  %2535 = vst [vmem:[%s15234_s7 + $0xbb8] sm:$0xff] %v2534_v55 }
  0xce   : > { %2537 = vst [vmem:[%s15234_s7 + $0xbc0] sm:$0xff] %v2536_v56  ;;  %2539 = vst [vmem:[%s15234_s7 + $0xbc8] sm:$0xff] %v2538_v57  ;;  %v2540_v58 = vld [vmem:[%s15226_s6 + $0x17a0] sm:$0xff]  ;;  %v2542_v59 = vld [vmem:[%s15226_s6 + $0x17b0] sm:$0xff] }
  0xcf   : > { %v2544_v60 = vld [vmem:[%s15226_s6 + $0x17c0] sm:$0xff]  ;;  %2541 = vst [vmem:[%s15234_s7 + $0xbd0] sm:$0xff] %v2540_v58  ;;  %2543 = vst [vmem:[%s15234_s7 + $0xbd8] sm:$0xff] %v2542_v59  ;;  %v2546_v61 = vld [vmem:[%s15226_s6 + $0x17d0] sm:$0xff] }
  0xd0   : > { %2545 = vst [vmem:[%s15234_s7 + $0xbe0] sm:$0xff] %v2544_v60  ;;  %v2548_v62 = vld [vmem:[%s15226_s6 + $0x17e0] sm:$0xff]  ;;  %v2550_v63 = vld [vmem:[%s15226_s6 + $0x17f0] sm:$0xff]  ;;  %2547 = vst [vmem:[%s15234_s7 + $0xbe8] sm:$0xff] %v2546_v61 }
  0xd1   : > { %2549 = vst [vmem:[%s15234_s7 + $0xbf0] sm:$0xff] %v2548_v62  ;;  %2551 = vst [vmem:[%s15234_s7 + $0xbf8] sm:$0xff] %v2550_v63  ;;  %v2552_v0 = vld [vmem:[%s15226_s6 + $0x1800] sm:$0xff]  ;;  %v2554_v1 = vld [vmem:[%s15226_s6 + $0x1810] sm:$0xff] }
  0xd2   : > { %v2556_v2 = vld [vmem:[%s15226_s6 + $0x1820] sm:$0xff]  ;;  %2553 = vst [vmem:[%s15234_s7 + $0xc00] sm:$0xff] %v2552_v0  ;;  %2555 = vst [vmem:[%s15234_s7 + $0xc08] sm:$0xff] %v2554_v1  ;;  %v2558_v3 = vld [vmem:[%s15226_s6 + $0x1830] sm:$0xff] }
  0xd3   : > { %2557 = vst [vmem:[%s15234_s7 + $0xc10] sm:$0xff] %v2556_v2  ;;  %v2560_v4 = vld [vmem:[%s15226_s6 + $0x1840] sm:$0xff]  ;;  %v2562_v5 = vld [vmem:[%s15226_s6 + $0x1850] sm:$0xff]  ;;  %2559 = vst [vmem:[%s15234_s7 + $0xc18] sm:$0xff] %v2558_v3 }
  0xd4   : > { %2561 = vst [vmem:[%s15234_s7 + $0xc20] sm:$0xff] %v2560_v4  ;;  %2563 = vst [vmem:[%s15234_s7 + $0xc28] sm:$0xff] %v2562_v5  ;;  %v2564_v6 = vld [vmem:[%s15226_s6 + $0x1860] sm:$0xff]  ;;  %v2566_v7 = vld [vmem:[%s15226_s6 + $0x1870] sm:$0xff] }
  0xd5   : > { %v2568_v8 = vld [vmem:[%s15226_s6 + $0x1880] sm:$0xff]  ;;  %2565 = vst [vmem:[%s15234_s7 + $0xc30] sm:$0xff] %v2564_v6  ;;  %2567 = vst [vmem:[%s15234_s7 + $0xc38] sm:$0xff] %v2566_v7  ;;  %v2570_v9 = vld [vmem:[%s15226_s6 + $0x1890] sm:$0xff] }
  0xd6   : > { %2569 = vst [vmem:[%s15234_s7 + $0xc40] sm:$0xff] %v2568_v8  ;;  %v2572_v10 = vld [vmem:[%s15226_s6 + $0x18a0] sm:$0xff]  ;;  %v2574_v11 = vld [vmem:[%s15226_s6 + $0x18b0] sm:$0xff]  ;;  %2571 = vst [vmem:[%s15234_s7 + $0xc48] sm:$0xff] %v2570_v9 }
  0xd7   : > { %2573 = vst [vmem:[%s15234_s7 + $0xc50] sm:$0xff] %v2572_v10  ;;  %2575 = vst [vmem:[%s15234_s7 + $0xc58] sm:$0xff] %v2574_v11  ;;  %v2576_v12 = vld [vmem:[%s15226_s6 + $0x18c0] sm:$0xff]  ;;  %v2578_v13 = vld [vmem:[%s15226_s6 + $0x18d0] sm:$0xff] }
  0xd8   : > { %v2580_v14 = vld [vmem:[%s15226_s6 + $0x18e0] sm:$0xff]  ;;  %2577 = vst [vmem:[%s15234_s7 + $0xc60] sm:$0xff] %v2576_v12  ;;  %2579 = vst [vmem:[%s15234_s7 + $0xc68] sm:$0xff] %v2578_v13  ;;  %v2582_v15 = vld [vmem:[%s15226_s6 + $0x18f0] sm:$0xff] }
  0xd9   : > { %2581 = vst [vmem:[%s15234_s7 + $0xc70] sm:$0xff] %v2580_v14  ;;  %v2584_v16 = vld [vmem:[%s15226_s6 + $0x1900] sm:$0xff]  ;;  %v2586_v17 = vld [vmem:[%s15226_s6 + $0x1910] sm:$0xff]  ;;  %2583 = vst [vmem:[%s15234_s7 + $0xc78] sm:$0xff] %v2582_v15 }
  0xda   : > { %2585 = vst [vmem:[%s15234_s7 + $0xc80] sm:$0xff] %v2584_v16  ;;  %2587 = vst [vmem:[%s15234_s7 + $0xc88] sm:$0xff] %v2586_v17  ;;  %v2588_v18 = vld [vmem:[%s15226_s6 + $0x1920] sm:$0xff]  ;;  %v2590_v19 = vld [vmem:[%s15226_s6 + $0x1930] sm:$0xff] }
  0xdb   : > { %v2592_v20 = vld [vmem:[%s15226_s6 + $0x1940] sm:$0xff]  ;;  %2589 = vst [vmem:[%s15234_s7 + $0xc90] sm:$0xff] %v2588_v18  ;;  %2591 = vst [vmem:[%s15234_s7 + $0xc98] sm:$0xff] %v2590_v19  ;;  %v2594_v21 = vld [vmem:[%s15226_s6 + $0x1950] sm:$0xff] }
  0xdc   : > { %2593 = vst [vmem:[%s15234_s7 + $0xca0] sm:$0xff] %v2592_v20  ;;  %v2596_v22 = vld [vmem:[%s15226_s6 + $0x1960] sm:$0xff]  ;;  %v2598_v23 = vld [vmem:[%s15226_s6 + $0x1970] sm:$0xff]  ;;  %2595 = vst [vmem:[%s15234_s7 + $0xca8] sm:$0xff] %v2594_v21 }
  0xdd   : > { %2597 = vst [vmem:[%s15234_s7 + $0xcb0] sm:$0xff] %v2596_v22  ;;  %2599 = vst [vmem:[%s15234_s7 + $0xcb8] sm:$0xff] %v2598_v23  ;;  %v2600_v24 = vld [vmem:[%s15226_s6 + $0x1980] sm:$0xff]  ;;  %v2602_v25 = vld [vmem:[%s15226_s6 + $0x1990] sm:$0xff] }
  0xde   : > { %v2604_v26 = vld [vmem:[%s15226_s6 + $0x19a0] sm:$0xff]  ;;  %2601 = vst [vmem:[%s15234_s7 + $0xcc0] sm:$0xff] %v2600_v24  ;;  %2603 = vst [vmem:[%s15234_s7 + $0xcc8] sm:$0xff] %v2602_v25  ;;  %v2606_v27 = vld [vmem:[%s15226_s6 + $0x19b0] sm:$0xff] }
  0xdf   : > { %2605 = vst [vmem:[%s15234_s7 + $0xcd0] sm:$0xff] %v2604_v26  ;;  %v2608_v28 = vld [vmem:[%s15226_s6 + $0x19c0] sm:$0xff]  ;;  %v2610_v29 = vld [vmem:[%s15226_s6 + $0x19d0] sm:$0xff]  ;;  %2607 = vst [vmem:[%s15234_s7 + $0xcd8] sm:$0xff] %v2606_v27 }
  0xe0   : > { %2609 = vst [vmem:[%s15234_s7 + $0xce0] sm:$0xff] %v2608_v28  ;;  %2611 = vst [vmem:[%s15234_s7 + $0xce8] sm:$0xff] %v2610_v29  ;;  %v2612_v30 = vld [vmem:[%s15226_s6 + $0x19e0] sm:$0xff]  ;;  %v2614_v31 = vld [vmem:[%s15226_s6 + $0x19f0] sm:$0xff] }
  0xe1   : > { %v2616_v32 = vld [vmem:[%s15226_s6 + $0x1a00] sm:$0xff]  ;;  %2613 = vst [vmem:[%s15234_s7 + $0xcf0] sm:$0xff] %v2612_v30  ;;  %2615 = vst [vmem:[%s15234_s7 + $0xcf8] sm:$0xff] %v2614_v31  ;;  %v2618_v33 = vld [vmem:[%s15226_s6 + $0x1a10] sm:$0xff] }
  0xe2   : > { %2617 = vst [vmem:[%s15234_s7 + $0xd00] sm:$0xff] %v2616_v32  ;;  %v2620_v34 = vld [vmem:[%s15226_s6 + $0x1a20] sm:$0xff]  ;;  %v2622_v35 = vld [vmem:[%s15226_s6 + $0x1a30] sm:$0xff]  ;;  %2619 = vst [vmem:[%s15234_s7 + $0xd08] sm:$0xff] %v2618_v33 }
  0xe3   : > { %2621 = vst [vmem:[%s15234_s7 + $0xd10] sm:$0xff] %v2620_v34  ;;  %2623 = vst [vmem:[%s15234_s7 + $0xd18] sm:$0xff] %v2622_v35  ;;  %v2624_v36 = vld [vmem:[%s15226_s6 + $0x1a40] sm:$0xff]  ;;  %v2626_v37 = vld [vmem:[%s15226_s6 + $0x1a50] sm:$0xff] }
  0xe4   : > { %v2628_v38 = vld [vmem:[%s15226_s6 + $0x1a60] sm:$0xff]  ;;  %2625 = vst [vmem:[%s15234_s7 + $0xd20] sm:$0xff] %v2624_v36  ;;  %2627 = vst [vmem:[%s15234_s7 + $0xd28] sm:$0xff] %v2626_v37  ;;  %v2630_v39 = vld [vmem:[%s15226_s6 + $0x1a70] sm:$0xff] }
  0xe5   : > { %2629 = vst [vmem:[%s15234_s7 + $0xd30] sm:$0xff] %v2628_v38  ;;  %v2632_v40 = vld [vmem:[%s15226_s6 + $0x1a80] sm:$0xff]  ;;  %v2634_v41 = vld [vmem:[%s15226_s6 + $0x1a90] sm:$0xff]  ;;  %2631 = vst [vmem:[%s15234_s7 + $0xd38] sm:$0xff] %v2630_v39 }
  0xe6   : > { %2633 = vst [vmem:[%s15234_s7 + $0xd40] sm:$0xff] %v2632_v40  ;;  %2635 = vst [vmem:[%s15234_s7 + $0xd48] sm:$0xff] %v2634_v41  ;;  %v2636_v42 = vld [vmem:[%s15226_s6 + $0x1aa0] sm:$0xff]  ;;  %v2638_v43 = vld [vmem:[%s15226_s6 + $0x1ab0] sm:$0xff] }
  0xe7   : > { %v2640_v44 = vld [vmem:[%s15226_s6 + $0x1ac0] sm:$0xff]  ;;  %2637 = vst [vmem:[%s15234_s7 + $0xd50] sm:$0xff] %v2636_v42  ;;  %2639 = vst [vmem:[%s15234_s7 + $0xd58] sm:$0xff] %v2638_v43  ;;  %v2642_v45 = vld [vmem:[%s15226_s6 + $0x1ad0] sm:$0xff] }
  0xe8   : > { %2641 = vst [vmem:[%s15234_s7 + $0xd60] sm:$0xff] %v2640_v44  ;;  %v2644_v46 = vld [vmem:[%s15226_s6 + $0x1ae0] sm:$0xff]  ;;  %v2646_v47 = vld [vmem:[%s15226_s6 + $0x1af0] sm:$0xff]  ;;  %2643 = vst [vmem:[%s15234_s7 + $0xd68] sm:$0xff] %v2642_v45 }
  0xe9   : > { %2645 = vst [vmem:[%s15234_s7 + $0xd70] sm:$0xff] %v2644_v46  ;;  %2647 = vst [vmem:[%s15234_s7 + $0xd78] sm:$0xff] %v2646_v47  ;;  %v2648_v48 = vld [vmem:[%s15226_s6 + $0x1b00] sm:$0xff]  ;;  %v2650_v49 = vld [vmem:[%s15226_s6 + $0x1b10] sm:$0xff] }
  0xea   : > { %v2652_v50 = vld [vmem:[%s15226_s6 + $0x1b20] sm:$0xff]  ;;  %2649 = vst [vmem:[%s15234_s7 + $0xd80] sm:$0xff] %v2648_v48  ;;  %2651 = vst [vmem:[%s15234_s7 + $0xd88] sm:$0xff] %v2650_v49  ;;  %v2654_v51 = vld [vmem:[%s15226_s6 + $0x1b30] sm:$0xff] }
  0xeb   : > { %2653 = vst [vmem:[%s15234_s7 + $0xd90] sm:$0xff] %v2652_v50  ;;  %v2656_v52 = vld [vmem:[%s15226_s6 + $0x1b40] sm:$0xff]  ;;  %v2658_v53 = vld [vmem:[%s15226_s6 + $0x1b50] sm:$0xff]  ;;  %2655 = vst [vmem:[%s15234_s7 + $0xd98] sm:$0xff] %v2654_v51 }
  0xec   : > { %2657 = vst [vmem:[%s15234_s7 + $0xda0] sm:$0xff] %v2656_v52  ;;  %2659 = vst [vmem:[%s15234_s7 + $0xda8] sm:$0xff] %v2658_v53  ;;  %v2660_v54 = vld [vmem:[%s15226_s6 + $0x1b60] sm:$0xff]  ;;  %v2662_v55 = vld [vmem:[%s15226_s6 + $0x1b70] sm:$0xff] }
  0xed   : > { %v2664_v56 = vld [vmem:[%s15226_s6 + $0x1b80] sm:$0xff]  ;;  %2661 = vst [vmem:[%s15234_s7 + $0xdb0] sm:$0xff] %v2660_v54  ;;  %2663 = vst [vmem:[%s15234_s7 + $0xdb8] sm:$0xff] %v2662_v55  ;;  %v2666_v57 = vld [vmem:[%s15226_s6 + $0x1b90] sm:$0xff] }
  0xee   : > { %2665 = vst [vmem:[%s15234_s7 + $0xdc0] sm:$0xff] %v2664_v56  ;;  %v2668_v58 = vld [vmem:[%s15226_s6 + $0x1ba0] sm:$0xff]  ;;  %v2670_v59 = vld [vmem:[%s15226_s6 + $0x1bb0] sm:$0xff]  ;;  %2667 = vst [vmem:[%s15234_s7 + $0xdc8] sm:$0xff] %v2666_v57 }
  0xef   : > { %2669 = vst [vmem:[%s15234_s7 + $0xdd0] sm:$0xff] %v2668_v58  ;;  %2671 = vst [vmem:[%s15234_s7 + $0xdd8] sm:$0xff] %v2670_v59  ;;  %v2672_v60 = vld [vmem:[%s15226_s6 + $0x1bc0] sm:$0xff]  ;;  %v2674_v61 = vld [vmem:[%s15226_s6 + $0x1bd0] sm:$0xff] }
  0xf0   : > { %v2676_v62 = vld [vmem:[%s15226_s6 + $0x1be0] sm:$0xff]  ;;  %2673 = vst [vmem:[%s15234_s7 + $0xde0] sm:$0xff] %v2672_v60  ;;  %2675 = vst [vmem:[%s15234_s7 + $0xde8] sm:$0xff] %v2674_v61  ;;  %v2678_v63 = vld [vmem:[%s15226_s6 + $0x1bf0] sm:$0xff] }
  0xf1   : > { %2677 = vst [vmem:[%s15234_s7 + $0xdf0] sm:$0xff] %v2676_v62  ;;  %v2680_v0 = vld [vmem:[%s15226_s6 + $0x1c00] sm:$0xff]  ;;  %v2682_v1 = vld [vmem:[%s15226_s6 + $0x1c10] sm:$0xff]  ;;  %2679 = vst [vmem:[%s15234_s7 + $0xdf8] sm:$0xff] %v2678_v63 }
  0xf2   : > { %2681 = vst [vmem:[%s15234_s7 + $0xe00] sm:$0xff] %v2680_v0  ;;  %2683 = vst [vmem:[%s15234_s7 + $0xe08] sm:$0xff] %v2682_v1  ;;  %v2684_v2 = vld [vmem:[%s15226_s6 + $0x1c20] sm:$0xff]  ;;  %v2686_v3 = vld [vmem:[%s15226_s6 + $0x1c30] sm:$0xff] }
  0xf3   : > { %v2688_v4 = vld [vmem:[%s15226_s6 + $0x1c40] sm:$0xff]  ;;  %2685 = vst [vmem:[%s15234_s7 + $0xe10] sm:$0xff] %v2684_v2  ;;  %2687 = vst [vmem:[%s15234_s7 + $0xe18] sm:$0xff] %v2686_v3  ;;  %v2690_v5 = vld [vmem:[%s15226_s6 + $0x1c50] sm:$0xff] }
  0xf4   : > { %2689 = vst [vmem:[%s15234_s7 + $0xe20] sm:$0xff] %v2688_v4  ;;  %v2692_v6 = vld [vmem:[%s15226_s6 + $0x1c60] sm:$0xff]  ;;  %v2694_v7 = vld [vmem:[%s15226_s6 + $0x1c70] sm:$0xff]  ;;  %2691 = vst [vmem:[%s15234_s7 + $0xe28] sm:$0xff] %v2690_v5 }
  0xf5   : > { %2693 = vst [vmem:[%s15234_s7 + $0xe30] sm:$0xff] %v2692_v6  ;;  %2695 = vst [vmem:[%s15234_s7 + $0xe38] sm:$0xff] %v2694_v7  ;;  %v2696_v8 = vld [vmem:[%s15226_s6 + $0x1c80] sm:$0xff]  ;;  %v2698_v9 = vld [vmem:[%s15226_s6 + $0x1c90] sm:$0xff] }
  0xf6   : > { %v2700_v10 = vld [vmem:[%s15226_s6 + $0x1ca0] sm:$0xff]  ;;  %2697 = vst [vmem:[%s15234_s7 + $0xe40] sm:$0xff] %v2696_v8  ;;  %2699 = vst [vmem:[%s15234_s7 + $0xe48] sm:$0xff] %v2698_v9  ;;  %v2702_v11 = vld [vmem:[%s15226_s6 + $0x1cb0] sm:$0xff] }
  0xf7   : > { %2701 = vst [vmem:[%s15234_s7 + $0xe50] sm:$0xff] %v2700_v10  ;;  %v2704_v12 = vld [vmem:[%s15226_s6 + $0x1cc0] sm:$0xff]  ;;  %v2706_v13 = vld [vmem:[%s15226_s6 + $0x1cd0] sm:$0xff]  ;;  %2703 = vst [vmem:[%s15234_s7 + $0xe58] sm:$0xff] %v2702_v11 }
  0xf8   : > { %2705 = vst [vmem:[%s15234_s7 + $0xe60] sm:$0xff] %v2704_v12  ;;  %2707 = vst [vmem:[%s15234_s7 + $0xe68] sm:$0xff] %v2706_v13  ;;  %v2708_v14 = vld [vmem:[%s15226_s6 + $0x1ce0] sm:$0xff]  ;;  %v2710_v15 = vld [vmem:[%s15226_s6 + $0x1cf0] sm:$0xff] }
  0xf9   : > { %v2712_v16 = vld [vmem:[%s15226_s6 + $0x1d00] sm:$0xff]  ;;  %2709 = vst [vmem:[%s15234_s7 + $0xe70] sm:$0xff] %v2708_v14  ;;  %2711 = vst [vmem:[%s15234_s7 + $0xe78] sm:$0xff] %v2710_v15  ;;  %v2714_v17 = vld [vmem:[%s15226_s6 + $0x1d10] sm:$0xff] }
  0xfa   : > { %2713 = vst [vmem:[%s15234_s7 + $0xe80] sm:$0xff] %v2712_v16  ;;  %v2716_v18 = vld [vmem:[%s15226_s6 + $0x1d20] sm:$0xff]  ;;  %v2718_v19 = vld [vmem:[%s15226_s6 + $0x1d30] sm:$0xff]  ;;  %2715 = vst [vmem:[%s15234_s7 + $0xe88] sm:$0xff] %v2714_v17 }
  0xfb   : > { %2717 = vst [vmem:[%s15234_s7 + $0xe90] sm:$0xff] %v2716_v18  ;;  %2719 = vst [vmem:[%s15234_s7 + $0xe98] sm:$0xff] %v2718_v19  ;;  %v2720_v20 = vld [vmem:[%s15226_s6 + $0x1d40] sm:$0xff]  ;;  %v2722_v21 = vld [vmem:[%s15226_s6 + $0x1d50] sm:$0xff] }
  0xfc   : > { %v2724_v22 = vld [vmem:[%s15226_s6 + $0x1d60] sm:$0xff]  ;;  %2721 = vst [vmem:[%s15234_s7 + $0xea0] sm:$0xff] %v2720_v20  ;;  %2723 = vst [vmem:[%s15234_s7 + $0xea8] sm:$0xff] %v2722_v21  ;;  %v2726_v23 = vld [vmem:[%s15226_s6 + $0x1d70] sm:$0xff] }
  0xfd   : > { %2725 = vst [vmem:[%s15234_s7 + $0xeb0] sm:$0xff] %v2724_v22  ;;  %v2728_v24 = vld [vmem:[%s15226_s6 + $0x1d80] sm:$0xff]  ;;  %v2730_v25 = vld [vmem:[%s15226_s6 + $0x1d90] sm:$0xff]  ;;  %2727 = vst [vmem:[%s15234_s7 + $0xeb8] sm:$0xff] %v2726_v23 }
  0xfe   : > { %2729 = vst [vmem:[%s15234_s7 + $0xec0] sm:$0xff] %v2728_v24  ;;  %2731 = vst [vmem:[%s15234_s7 + $0xec8] sm:$0xff] %v2730_v25  ;;  %v2732_v26 = vld [vmem:[%s15226_s6 + $0x1da0] sm:$0xff]  ;;  %v2734_v27 = vld [vmem:[%s15226_s6 + $0x1db0] sm:$0xff] }
  0xff   : > { %v2736_v28 = vld [vmem:[%s15226_s6 + $0x1dc0] sm:$0xff]  ;;  %2733 = vst [vmem:[%s15234_s7 + $0xed0] sm:$0xff] %v2732_v26  ;;  %2735 = vst [vmem:[%s15234_s7 + $0xed8] sm:$0xff] %v2734_v27  ;;  %v2738_v29 = vld [vmem:[%s15226_s6 + $0x1dd0] sm:$0xff] }
 0x100   : > { %2737 = vst [vmem:[%s15234_s7 + $0xee0] sm:$0xff] %v2736_v28  ;;  %v2740_v30 = vld [vmem:[%s15226_s6 + $0x1de0] sm:$0xff]  ;;  %v2742_v31 = vld [vmem:[%s15226_s6 + $0x1df0] sm:$0xff]  ;;  %2739 = vst [vmem:[%s15234_s7 + $0xee8] sm:$0xff] %v2738_v29 }
 0x101   : > { %2741 = vst [vmem:[%s15234_s7 + $0xef0] sm:$0xff] %v2740_v30  ;;  %2743 = vst [vmem:[%s15234_s7 + $0xef8] sm:$0xff] %v2742_v31  ;;  %v2744_v32 = vld [vmem:[%s15226_s6 + $0x1e00] sm:$0xff]  ;;  %v2746_v33 = vld [vmem:[%s15226_s6 + $0x1e10] sm:$0xff] }
 0x102   : > { %v2748_v34 = vld [vmem:[%s15226_s6 + $0x1e20] sm:$0xff]  ;;  %2745 = vst [vmem:[%s15234_s7 + $0xf00] sm:$0xff] %v2744_v32  ;;  %2747 = vst [vmem:[%s15234_s7 + $0xf08] sm:$0xff] %v2746_v33  ;;  %v2750_v35 = vld [vmem:[%s15226_s6 + $0x1e30] sm:$0xff] }
 0x103   : > { %2749 = vst [vmem:[%s15234_s7 + $0xf10] sm:$0xff] %v2748_v34  ;;  %v2752_v36 = vld [vmem:[%s15226_s6 + $0x1e40] sm:$0xff]  ;;  %v2754_v37 = vld [vmem:[%s15226_s6 + $0x1e50] sm:$0xff]  ;;  %2751 = vst [vmem:[%s15234_s7 + $0xf18] sm:$0xff] %v2750_v35 }
 0x104   : > { %2753 = vst [vmem:[%s15234_s7 + $0xf20] sm:$0xff] %v2752_v36  ;;  %2755 = vst [vmem:[%s15234_s7 + $0xf28] sm:$0xff] %v2754_v37  ;;  %v2756_v38 = vld [vmem:[%s15226_s6 + $0x1e60] sm:$0xff]  ;;  %v2758_v39 = vld [vmem:[%s15226_s6 + $0x1e70] sm:$0xff] }
 0x105   : > { %v2760_v40 = vld [vmem:[%s15226_s6 + $0x1e80] sm:$0xff]  ;;  %2757 = vst [vmem:[%s15234_s7 + $0xf30] sm:$0xff] %v2756_v38  ;;  %2759 = vst [vmem:[%s15234_s7 + $0xf38] sm:$0xff] %v2758_v39  ;;  %v2762_v41 = vld [vmem:[%s15226_s6 + $0x1e90] sm:$0xff] }
 0x106   : > { %2761 = vst [vmem:[%s15234_s7 + $0xf40] sm:$0xff] %v2760_v40  ;;  %v2764_v42 = vld [vmem:[%s15226_s6 + $0x1ea0] sm:$0xff]  ;;  %v2766_v43 = vld [vmem:[%s15226_s6 + $0x1eb0] sm:$0xff]  ;;  %2763 = vst [vmem:[%s15234_s7 + $0xf48] sm:$0xff] %v2762_v41 }
 0x107   : > { %2765 = vst [vmem:[%s15234_s7 + $0xf50] sm:$0xff] %v2764_v42  ;;  %2767 = vst [vmem:[%s15234_s7 + $0xf58] sm:$0xff] %v2766_v43  ;;  %v2768_v44 = vld [vmem:[%s15226_s6 + $0x1ec0] sm:$0xff]  ;;  %v2770_v45 = vld [vmem:[%s15226_s6 + $0x1ed0] sm:$0xff] }
 0x108   : > { %v2772_v46 = vld [vmem:[%s15226_s6 + $0x1ee0] sm:$0xff]  ;;  %2769 = vst [vmem:[%s15234_s7 + $0xf60] sm:$0xff] %v2768_v44  ;;  %2771 = vst [vmem:[%s15234_s7 + $0xf68] sm:$0xff] %v2770_v45  ;;  %v2774_v47 = vld [vmem:[%s15226_s6 + $0x1ef0] sm:$0xff] }
 0x109   : > { %2773 = vst [vmem:[%s15234_s7 + $0xf70] sm:$0xff] %v2772_v46  ;;  %v2776_v48 = vld [vmem:[%s15226_s6 + $0x1f00] sm:$0xff]  ;;  %v2778_v49 = vld [vmem:[%s15226_s6 + $0x1f10] sm:$0xff]  ;;  %2775 = vst [vmem:[%s15234_s7 + $0xf78] sm:$0xff] %v2774_v47 }
 0x10a   : > { %2777 = vst [vmem:[%s15234_s7 + $0xf80] sm:$0xff] %v2776_v48  ;;  %2779 = vst [vmem:[%s15234_s7 + $0xf88] sm:$0xff] %v2778_v49  ;;  %v2780_v50 = vld [vmem:[%s15226_s6 + $0x1f20] sm:$0xff]  ;;  %v2782_v51 = vld [vmem:[%s15226_s6 + $0x1f30] sm:$0xff] }
 0x10b   : > { %v2784_v52 = vld [vmem:[%s15226_s6 + $0x1f40] sm:$0xff]  ;;  %2781 = vst [vmem:[%s15234_s7 + $0xf90] sm:$0xff] %v2780_v50  ;;  %2783 = vst [vmem:[%s15234_s7 + $0xf98] sm:$0xff] %v2782_v51  ;;  %v2786_v53 = vld [vmem:[%s15226_s6 + $0x1f50] sm:$0xff] }
 0x10c   : > { %2785 = vst [vmem:[%s15234_s7 + $0xfa0] sm:$0xff] %v2784_v52  ;;  %v2788_v54 = vld [vmem:[%s15226_s6 + $0x1f60] sm:$0xff]  ;;  %v2790_v55 = vld [vmem:[%s15226_s6 + $0x1f70] sm:$0xff]  ;;  %2787 = vst [vmem:[%s15234_s7 + $0xfa8] sm:$0xff] %v2786_v53 }
 0x10d   : > { %2789 = vst [vmem:[%s15234_s7 + $0xfb0] sm:$0xff] %v2788_v54  ;;  %2791 = vst [vmem:[%s15234_s7 + $0xfb8] sm:$0xff] %v2790_v55  ;;  %v2792_v56 = vld [vmem:[%s15226_s6 + $0x1f80] sm:$0xff]  ;;  %v2794_v57 = vld [vmem:[%s15226_s6 + $0x1f90] sm:$0xff] }
 0x10e   : > { %v2796_v58 = vld [vmem:[%s15226_s6 + $0x1fa0] sm:$0xff]  ;;  %2793 = vst [vmem:[%s15234_s7 + $0xfc0] sm:$0xff] %v2792_v56  ;;  %2795 = vst [vmem:[%s15234_s7 + $0xfc8] sm:$0xff] %v2794_v57  ;;  %v2798_v59 = vld [vmem:[%s15226_s6 + $0x1fb0] sm:$0xff] }
 0x10f   : > { %2797 = vst [vmem:[%s15234_s7 + $0xfd0] sm:$0xff] %v2796_v58  ;;  %v2800_v60 = vld [vmem:[%s15226_s6 + $0x1fc0] sm:$0xff]  ;;  %v2802_v61 = vld [vmem:[%s15226_s6 + $0x1fd0] sm:$0xff]  ;;  %2799 = vst [vmem:[%s15234_s7 + $0xfd8] sm:$0xff] %v2798_v59 }
 0x110   : > { %2801 = vst [vmem:[%s15234_s7 + $0xfe0] sm:$0xff] %v2800_v60  ;;  %2803 = vst [vmem:[%s15234_s7 + $0xfe8] sm:$0xff] %v2802_v61  ;;  %v2804_v62 = vld [vmem:[%s15226_s6 + $0x1fe0] sm:$0xff]  ;;  %v2806_v63 = vld [vmem:[%s15226_s6 + $0x1ff0] sm:$0xff] }
 0x111   : > { %v2808_v0 = vld [vmem:[%s15226_s6 + $0x2000] sm:$0xff]  ;;  %2805 = vst [vmem:[%s15234_s7 + $0xff0] sm:$0xff] %v2804_v62  ;;  %2807 = vst [vmem:[%s15234_s7 + $0xff8] sm:$0xff] %v2806_v63  ;;  %v2810_v1 = vld [vmem:[%s15226_s6 + $0x2010] sm:$0xff] }
 0x112   : > { %2809 = vst [vmem:[%s15234_s7 + $0x1000] sm:$0xff] %v2808_v0  ;;  %v2812_v2 = vld [vmem:[%s15226_s6 + $0x2020] sm:$0xff]  ;;  %v2814_v3 = vld [vmem:[%s15226_s6 + $0x2030] sm:$0xff]  ;;  %2811 = vst [vmem:[%s15234_s7 + $0x1008] sm:$0xff] %v2810_v1 }
 0x113   : > { %2813 = vst [vmem:[%s15234_s7 + $0x1010] sm:$0xff] %v2812_v2  ;;  %2815 = vst [vmem:[%s15234_s7 + $0x1018] sm:$0xff] %v2814_v3  ;;  %v2816_v4 = vld [vmem:[%s15226_s6 + $0x2040] sm:$0xff]  ;;  %v2818_v5 = vld [vmem:[%s15226_s6 + $0x2050] sm:$0xff] }
 0x114   : > { %v2820_v6 = vld [vmem:[%s15226_s6 + $0x2060] sm:$0xff]  ;;  %2817 = vst [vmem:[%s15234_s7 + $0x1020] sm:$0xff] %v2816_v4  ;;  %2819 = vst [vmem:[%s15234_s7 + $0x1028] sm:$0xff] %v2818_v5  ;;  %v2822_v7 = vld [vmem:[%s15226_s6 + $0x2070] sm:$0xff] }
 0x115   : > { %2821 = vst [vmem:[%s15234_s7 + $0x1030] sm:$0xff] %v2820_v6  ;;  %v2824_v8 = vld [vmem:[%s15226_s6 + $0x2080] sm:$0xff]  ;;  %v2826_v9 = vld [vmem:[%s15226_s6 + $0x2090] sm:$0xff]  ;;  %2823 = vst [vmem:[%s15234_s7 + $0x1038] sm:$0xff] %v2822_v7 }
 0x116   : > { %2825 = vst [vmem:[%s15234_s7 + $0x1040] sm:$0xff] %v2824_v8  ;;  %2827 = vst [vmem:[%s15234_s7 + $0x1048] sm:$0xff] %v2826_v9  ;;  %v2828_v10 = vld [vmem:[%s15226_s6 + $0x20a0] sm:$0xff]  ;;  %v2830_v11 = vld [vmem:[%s15226_s6 + $0x20b0] sm:$0xff] }
 0x117   : > { %v2832_v12 = vld [vmem:[%s15226_s6 + $0x20c0] sm:$0xff]  ;;  %2829 = vst [vmem:[%s15234_s7 + $0x1050] sm:$0xff] %v2828_v10  ;;  %2831 = vst [vmem:[%s15234_s7 + $0x1058] sm:$0xff] %v2830_v11  ;;  %v2834_v13 = vld [vmem:[%s15226_s6 + $0x20d0] sm:$0xff] }
 0x118   : > { %2833 = vst [vmem:[%s15234_s7 + $0x1060] sm:$0xff] %v2832_v12  ;;  %v2836_v14 = vld [vmem:[%s15226_s6 + $0x20e0] sm:$0xff]  ;;  %v2838_v15 = vld [vmem:[%s15226_s6 + $0x20f0] sm:$0xff]  ;;  %2835 = vst [vmem:[%s15234_s7 + $0x1068] sm:$0xff] %v2834_v13 }
 0x119   : > { %2837 = vst [vmem:[%s15234_s7 + $0x1070] sm:$0xff] %v2836_v14  ;;  %2839 = vst [vmem:[%s15234_s7 + $0x1078] sm:$0xff] %v2838_v15  ;;  %v2840_v16 = vld [vmem:[%s15226_s6 + $0x2100] sm:$0xff]  ;;  %v2842_v17 = vld [vmem:[%s15226_s6 + $0x2110] sm:$0xff] }
 0x11a   : > { %v2844_v18 = vld [vmem:[%s15226_s6 + $0x2120] sm:$0xff]  ;;  %2841 = vst [vmem:[%s15234_s7 + $0x1080] sm:$0xff] %v2840_v16  ;;  %2843 = vst [vmem:[%s15234_s7 + $0x1088] sm:$0xff] %v2842_v17  ;;  %v2846_v19 = vld [vmem:[%s15226_s6 + $0x2130] sm:$0xff] }
 0x11b   : > { %2845 = vst [vmem:[%s15234_s7 + $0x1090] sm:$0xff] %v2844_v18  ;;  %v2848_v20 = vld [vmem:[%s15226_s6 + $0x2140] sm:$0xff]  ;;  %v2850_v21 = vld [vmem:[%s15226_s6 + $0x2150] sm:$0xff]  ;;  %2847 = vst [vmem:[%s15234_s7 + $0x1098] sm:$0xff] %v2846_v19 }
 0x11c   : > { %2849 = vst [vmem:[%s15234_s7 + $0x10a0] sm:$0xff] %v2848_v20  ;;  %2851 = vst [vmem:[%s15234_s7 + $0x10a8] sm:$0xff] %v2850_v21  ;;  %v2852_v22 = vld [vmem:[%s15226_s6 + $0x2160] sm:$0xff]  ;;  %v2854_v23 = vld [vmem:[%s15226_s6 + $0x2170] sm:$0xff] }
 0x11d   : > { %v2856_v24 = vld [vmem:[%s15226_s6 + $0x2180] sm:$0xff]  ;;  %2853 = vst [vmem:[%s15234_s7 + $0x10b0] sm:$0xff] %v2852_v22  ;;  %2855 = vst [vmem:[%s15234_s7 + $0x10b8] sm:$0xff] %v2854_v23  ;;  %v2858_v25 = vld [vmem:[%s15226_s6 + $0x2190] sm:$0xff] }
 0x11e   : > { %2857 = vst [vmem:[%s15234_s7 + $0x10c0] sm:$0xff] %v2856_v24  ;;  %v2860_v26 = vld [vmem:[%s15226_s6 + $0x21a0] sm:$0xff]  ;;  %v2862_v27 = vld [vmem:[%s15226_s6 + $0x21b0] sm:$0xff]  ;;  %2859 = vst [vmem:[%s15234_s7 + $0x10c8] sm:$0xff] %v2858_v25 }
 0x11f   : > { %2861 = vst [vmem:[%s15234_s7 + $0x10d0] sm:$0xff] %v2860_v26  ;;  %2863 = vst [vmem:[%s15234_s7 + $0x10d8] sm:$0xff] %v2862_v27  ;;  %v2864_v28 = vld [vmem:[%s15226_s6 + $0x21c0] sm:$0xff]  ;;  %v2866_v29 = vld [vmem:[%s15226_s6 + $0x21d0] sm:$0xff] }
 0x120   : > { %v2868_v30 = vld [vmem:[%s15226_s6 + $0x21e0] sm:$0xff]  ;;  %2865 = vst [vmem:[%s15234_s7 + $0x10e0] sm:$0xff] %v2864_v28  ;;  %2867 = vst [vmem:[%s15234_s7 + $0x10e8] sm:$0xff] %v2866_v29  ;;  %v2870_v31 = vld [vmem:[%s15226_s6 + $0x21f0] sm:$0xff] }
 0x121   : > { %2869 = vst [vmem:[%s15234_s7 + $0x10f0] sm:$0xff] %v2868_v30  ;;  %v2872_v32 = vld [vmem:[%s15226_s6 + $0x2200] sm:$0xff]  ;;  %v2874_v33 = vld [vmem:[%s15226_s6 + $0x2210] sm:$0xff]  ;;  %2871 = vst [vmem:[%s15234_s7 + $0x10f8] sm:$0xff] %v2870_v31 }
 0x122   : > { %2873 = vst [vmem:[%s15234_s7 + $0x1100] sm:$0xff] %v2872_v32  ;;  %2875 = vst [vmem:[%s15234_s7 + $0x1108] sm:$0xff] %v2874_v33  ;;  %v2876_v34 = vld [vmem:[%s15226_s6 + $0x2220] sm:$0xff]  ;;  %v2878_v35 = vld [vmem:[%s15226_s6 + $0x2230] sm:$0xff] }
 0x123   : > { %v2880_v36 = vld [vmem:[%s15226_s6 + $0x2240] sm:$0xff]  ;;  %2877 = vst [vmem:[%s15234_s7 + $0x1110] sm:$0xff] %v2876_v34  ;;  %2879 = vst [vmem:[%s15234_s7 + $0x1118] sm:$0xff] %v2878_v35  ;;  %v2882_v37 = vld [vmem:[%s15226_s6 + $0x2250] sm:$0xff] }
 0x124   : > { %2881 = vst [vmem:[%s15234_s7 + $0x1120] sm:$0xff] %v2880_v36  ;;  %v2884_v38 = vld [vmem:[%s15226_s6 + $0x2260] sm:$0xff]  ;;  %v2886_v39 = vld [vmem:[%s15226_s6 + $0x2270] sm:$0xff]  ;;  %2883 = vst [vmem:[%s15234_s7 + $0x1128] sm:$0xff] %v2882_v37 }
 0x125   : > { %2885 = vst [vmem:[%s15234_s7 + $0x1130] sm:$0xff] %v2884_v38  ;;  %2887 = vst [vmem:[%s15234_s7 + $0x1138] sm:$0xff] %v2886_v39  ;;  %v2888_v40 = vld [vmem:[%s15226_s6 + $0x2280] sm:$0xff]  ;;  %v2890_v41 = vld [vmem:[%s15226_s6 + $0x2290] sm:$0xff] }
 0x126   : > { %v2892_v42 = vld [vmem:[%s15226_s6 + $0x22a0] sm:$0xff]  ;;  %2889 = vst [vmem:[%s15234_s7 + $0x1140] sm:$0xff] %v2888_v40  ;;  %2891 = vst [vmem:[%s15234_s7 + $0x1148] sm:$0xff] %v2890_v41  ;;  %v2894_v43 = vld [vmem:[%s15226_s6 + $0x22b0] sm:$0xff] }
 0x127   : > { %2893 = vst [vmem:[%s15234_s7 + $0x1150] sm:$0xff] %v2892_v42  ;;  %v2896_v44 = vld [vmem:[%s15226_s6 + $0x22c0] sm:$0xff]  ;;  %v2898_v45 = vld [vmem:[%s15226_s6 + $0x22d0] sm:$0xff]  ;;  %2895 = vst [vmem:[%s15234_s7 + $0x1158] sm:$0xff] %v2894_v43 }
 0x128   : > { %2897 = vst [vmem:[%s15234_s7 + $0x1160] sm:$0xff] %v2896_v44  ;;  %2899 = vst [vmem:[%s15234_s7 + $0x1168] sm:$0xff] %v2898_v45  ;;  %v2900_v46 = vld [vmem:[%s15226_s6 + $0x22e0] sm:$0xff]  ;;  %v2902_v47 = vld [vmem:[%s15226_s6 + $0x22f0] sm:$0xff] }
 0x129   : > { %v2904_v48 = vld [vmem:[%s15226_s6 + $0x2300] sm:$0xff]  ;;  %2901 = vst [vmem:[%s15234_s7 + $0x1170] sm:$0xff] %v2900_v46  ;;  %2903 = vst [vmem:[%s15234_s7 + $0x1178] sm:$0xff] %v2902_v47  ;;  %v2906_v49 = vld [vmem:[%s15226_s6 + $0x2310] sm:$0xff] }
 0x12a   : > { %2905 = vst [vmem:[%s15234_s7 + $0x1180] sm:$0xff] %v2904_v48  ;;  %v2908_v50 = vld [vmem:[%s15226_s6 + $0x2320] sm:$0xff]  ;;  %v2910_v51 = vld [vmem:[%s15226_s6 + $0x2330] sm:$0xff]  ;;  %2907 = vst [vmem:[%s15234_s7 + $0x1188] sm:$0xff] %v2906_v49 }
 0x12b   : > { %2909 = vst [vmem:[%s15234_s7 + $0x1190] sm:$0xff] %v2908_v50  ;;  %2911 = vst [vmem:[%s15234_s7 + $0x1198] sm:$0xff] %v2910_v51  ;;  %v2912_v52 = vld [vmem:[%s15226_s6 + $0x2340] sm:$0xff]  ;;  %v2914_v53 = vld [vmem:[%s15226_s6 + $0x2350] sm:$0xff] }
 0x12c   : > { %v2916_v54 = vld [vmem:[%s15226_s6 + $0x2360] sm:$0xff]  ;;  %2913 = vst [vmem:[%s15234_s7 + $0x11a0] sm:$0xff] %v2912_v52  ;;  %2915 = vst [vmem:[%s15234_s7 + $0x11a8] sm:$0xff] %v2914_v53  ;;  %v2918_v55 = vld [vmem:[%s15226_s6 + $0x2370] sm:$0xff] }
 0x12d   : > { %2917 = vst [vmem:[%s15234_s7 + $0x11b0] sm:$0xff] %v2916_v54  ;;  %v2920_v56 = vld [vmem:[%s15226_s6 + $0x2380] sm:$0xff]  ;;  %v2922_v57 = vld [vmem:[%s15226_s6 + $0x2390] sm:$0xff]  ;;  %2919 = vst [vmem:[%s15234_s7 + $0x11b8] sm:$0xff] %v2918_v55 }
 0x12e   : > { %2921 = vst [vmem:[%s15234_s7 + $0x11c0] sm:$0xff] %v2920_v56  ;;  %2923 = vst [vmem:[%s15234_s7 + $0x11c8] sm:$0xff] %v2922_v57  ;;  %v2924_v58 = vld [vmem:[%s15226_s6 + $0x23a0] sm:$0xff]  ;;  %v2926_v59 = vld [vmem:[%s15226_s6 + $0x23b0] sm:$0xff] }
 0x12f   : > { %v2928_v60 = vld [vmem:[%s15226_s6 + $0x23c0] sm:$0xff]  ;;  %2925 = vst [vmem:[%s15234_s7 + $0x11d0] sm:$0xff] %v2924_v58  ;;  %2927 = vst [vmem:[%s15234_s7 + $0x11d8] sm:$0xff] %v2926_v59  ;;  %v2930_v61 = vld [vmem:[%s15226_s6 + $0x23d0] sm:$0xff] }
 0x130   : > { %2929 = vst [vmem:[%s15234_s7 + $0x11e0] sm:$0xff] %v2928_v60  ;;  %v2932_v62 = vld [vmem:[%s15226_s6 + $0x23e0] sm:$0xff]  ;;  %v2934_v63 = vld [vmem:[%s15226_s6 + $0x23f0] sm:$0xff]  ;;  %2931 = vst [vmem:[%s15234_s7 + $0x11e8] sm:$0xff] %v2930_v61 }
 0x131   : > { %2933 = vst [vmem:[%s15234_s7 + $0x11f0] sm:$0xff] %v2932_v62  ;;  %2935 = vst [vmem:[%s15234_s7 + $0x11f8] sm:$0xff] %v2934_v63  ;;  %v2936_v0 = vld [vmem:[%s15226_s6 + $0x2400] sm:$0xff]  ;;  %v2938_v1 = vld [vmem:[%s15226_s6 + $0x2410] sm:$0xff] }
 0x132   : > { %v2940_v2 = vld [vmem:[%s15226_s6 + $0x2420] sm:$0xff]  ;;  %2937 = vst [vmem:[%s15234_s7 + $0x1200] sm:$0xff] %v2936_v0  ;;  %2939 = vst [vmem:[%s15234_s7 + $0x1208] sm:$0xff] %v2938_v1  ;;  %v2942_v3 = vld [vmem:[%s15226_s6 + $0x2430] sm:$0xff] }
 0x133   : > { %2941 = vst [vmem:[%s15234_s7 + $0x1210] sm:$0xff] %v2940_v2  ;;  %v2944_v4 = vld [vmem:[%s15226_s6 + $0x2440] sm:$0xff]  ;;  %v2946_v5 = vld [vmem:[%s15226_s6 + $0x2450] sm:$0xff]  ;;  %2943 = vst [vmem:[%s15234_s7 + $0x1218] sm:$0xff] %v2942_v3 }
 0x134   : > { %2945 = vst [vmem:[%s15234_s7 + $0x1220] sm:$0xff] %v2944_v4  ;;  %2947 = vst [vmem:[%s15234_s7 + $0x1228] sm:$0xff] %v2946_v5  ;;  %v2948_v6 = vld [vmem:[%s15226_s6 + $0x2460] sm:$0xff]  ;;  %v2950_v7 = vld [vmem:[%s15226_s6 + $0x2470] sm:$0xff] }
 0x135   : > { %v2952_v8 = vld [vmem:[%s15226_s6 + $0x2480] sm:$0xff]  ;;  %2949 = vst [vmem:[%s15234_s7 + $0x1230] sm:$0xff] %v2948_v6  ;;  %2951 = vst [vmem:[%s15234_s7 + $0x1238] sm:$0xff] %v2950_v7  ;;  %v2954_v9 = vld [vmem:[%s15226_s6 + $0x2490] sm:$0xff] }
 0x136   : > { %2953 = vst [vmem:[%s15234_s7 + $0x1240] sm:$0xff] %v2952_v8  ;;  %v2956_v10 = vld [vmem:[%s15226_s6 + $0x24a0] sm:$0xff]  ;;  %v2958_v11 = vld [vmem:[%s15226_s6 + $0x24b0] sm:$0xff]  ;;  %2955 = vst [vmem:[%s15234_s7 + $0x1248] sm:$0xff] %v2954_v9 }
 0x137   : > { %2957 = vst [vmem:[%s15234_s7 + $0x1250] sm:$0xff] %v2956_v10  ;;  %2959 = vst [vmem:[%s15234_s7 + $0x1258] sm:$0xff] %v2958_v11  ;;  %v2960_v12 = vld [vmem:[%s15226_s6 + $0x24c0] sm:$0xff]  ;;  %v2962_v13 = vld [vmem:[%s15226_s6 + $0x24d0] sm:$0xff] }
 0x138   : > { %v2964_v14 = vld [vmem:[%s15226_s6 + $0x24e0] sm:$0xff]  ;;  %2961 = vst [vmem:[%s15234_s7 + $0x1260] sm:$0xff] %v2960_v12  ;;  %2963 = vst [vmem:[%s15234_s7 + $0x1268] sm:$0xff] %v2962_v13  ;;  %v2966_v15 = vld [vmem:[%s15226_s6 + $0x24f0] sm:$0xff] }
 0x139   : > { %2965 = vst [vmem:[%s15234_s7 + $0x1270] sm:$0xff] %v2964_v14  ;;  %v2968_v16 = vld [vmem:[%s15226_s6 + $0x2500] sm:$0xff]  ;;  %v2970_v17 = vld [vmem:[%s15226_s6 + $0x2510] sm:$0xff]  ;;  %2967 = vst [vmem:[%s15234_s7 + $0x1278] sm:$0xff] %v2966_v15 }
 0x13a   : > { %2969 = vst [vmem:[%s15234_s7 + $0x1280] sm:$0xff] %v2968_v16  ;;  %2971 = vst [vmem:[%s15234_s7 + $0x1288] sm:$0xff] %v2970_v17  ;;  %v2972_v18 = vld [vmem:[%s15226_s6 + $0x2520] sm:$0xff]  ;;  %v2974_v19 = vld [vmem:[%s15226_s6 + $0x2530] sm:$0xff] }
 0x13b   : > { %v2976_v20 = vld [vmem:[%s15226_s6 + $0x2540] sm:$0xff]  ;;  %2973 = vst [vmem:[%s15234_s7 + $0x1290] sm:$0xff] %v2972_v18  ;;  %2975 = vst [vmem:[%s15234_s7 + $0x1298] sm:$0xff] %v2974_v19  ;;  %v2978_v21 = vld [vmem:[%s15226_s6 + $0x2550] sm:$0xff] }
 0x13c   : > { %2977 = vst [vmem:[%s15234_s7 + $0x12a0] sm:$0xff] %v2976_v20  ;;  %v2980_v22 = vld [vmem:[%s15226_s6 + $0x2560] sm:$0xff]  ;;  %v2982_v23 = vld [vmem:[%s15226_s6 + $0x2570] sm:$0xff]  ;;  %2979 = vst [vmem:[%s15234_s7 + $0x12a8] sm:$0xff] %v2978_v21 }
 0x13d   : > { %2981 = vst [vmem:[%s15234_s7 + $0x12b0] sm:$0xff] %v2980_v22  ;;  %2983 = vst [vmem:[%s15234_s7 + $0x12b8] sm:$0xff] %v2982_v23  ;;  %v2984_v24 = vld [vmem:[%s15226_s6 + $0x2580] sm:$0xff]  ;;  %v2986_v25 = vld [vmem:[%s15226_s6 + $0x2590] sm:$0xff] }
 0x13e   : > { %v2988_v26 = vld [vmem:[%s15226_s6 + $0x25a0] sm:$0xff]  ;;  %2985 = vst [vmem:[%s15234_s7 + $0x12c0] sm:$0xff] %v2984_v24  ;;  %2987 = vst [vmem:[%s15234_s7 + $0x12c8] sm:$0xff] %v2986_v25  ;;  %v2990_v27 = vld [vmem:[%s15226_s6 + $0x25b0] sm:$0xff] }
 0x13f   : > { %2989 = vst [vmem:[%s15234_s7 + $0x12d0] sm:$0xff] %v2988_v26  ;;  %v2992_v28 = vld [vmem:[%s15226_s6 + $0x25c0] sm:$0xff]  ;;  %v2994_v29 = vld [vmem:[%s15226_s6 + $0x25d0] sm:$0xff]  ;;  %2991 = vst [vmem:[%s15234_s7 + $0x12d8] sm:$0xff] %v2990_v27 }
 0x140   : > { %2993 = vst [vmem:[%s15234_s7 + $0x12e0] sm:$0xff] %v2992_v28  ;;  %2995 = vst [vmem:[%s15234_s7 + $0x12e8] sm:$0xff] %v2994_v29  ;;  %v2996_v30 = vld [vmem:[%s15226_s6 + $0x25e0] sm:$0xff]  ;;  %v2998_v31 = vld [vmem:[%s15226_s6 + $0x25f0] sm:$0xff] }
 0x141   : > { %v3000_v32 = vld [vmem:[%s15226_s6 + $0x2600] sm:$0xff]  ;;  %2997 = vst [vmem:[%s15234_s7 + $0x12f0] sm:$0xff] %v2996_v30  ;;  %2999 = vst [vmem:[%s15234_s7 + $0x12f8] sm:$0xff] %v2998_v31  ;;  %v3002_v33 = vld [vmem:[%s15226_s6 + $0x2610] sm:$0xff] }
 0x142   : > { %3001 = vst [vmem:[%s15234_s7 + $0x1300] sm:$0xff] %v3000_v32  ;;  %v3004_v34 = vld [vmem:[%s15226_s6 + $0x2620] sm:$0xff]  ;;  %v3006_v35 = vld [vmem:[%s15226_s6 + $0x2630] sm:$0xff]  ;;  %3003 = vst [vmem:[%s15234_s7 + $0x1308] sm:$0xff] %v3002_v33 }
 0x143   : > { %3005 = vst [vmem:[%s15234_s7 + $0x1310] sm:$0xff] %v3004_v34  ;;  %3007 = vst [vmem:[%s15234_s7 + $0x1318] sm:$0xff] %v3006_v35  ;;  %v3008_v36 = vld [vmem:[%s15226_s6 + $0x2640] sm:$0xff]  ;;  %v3010_v37 = vld [vmem:[%s15226_s6 + $0x2650] sm:$0xff] }
 0x144   : > { %v3012_v38 = vld [vmem:[%s15226_s6 + $0x2660] sm:$0xff]  ;;  %3009 = vst [vmem:[%s15234_s7 + $0x1320] sm:$0xff] %v3008_v36  ;;  %3011 = vst [vmem:[%s15234_s7 + $0x1328] sm:$0xff] %v3010_v37  ;;  %v3014_v39 = vld [vmem:[%s15226_s6 + $0x2670] sm:$0xff] }
 0x145   : > { %3013 = vst [vmem:[%s15234_s7 + $0x1330] sm:$0xff] %v3012_v38  ;;  %v3016_v40 = vld [vmem:[%s15226_s6 + $0x2680] sm:$0xff]  ;;  %v3018_v41 = vld [vmem:[%s15226_s6 + $0x2690] sm:$0xff]  ;;  %3015 = vst [vmem:[%s15234_s7 + $0x1338] sm:$0xff] %v3014_v39 }
 0x146   : > { %3017 = vst [vmem:[%s15234_s7 + $0x1340] sm:$0xff] %v3016_v40  ;;  %3019 = vst [vmem:[%s15234_s7 + $0x1348] sm:$0xff] %v3018_v41  ;;  %v3020_v42 = vld [vmem:[%s15226_s6 + $0x26a0] sm:$0xff]  ;;  %v3022_v43 = vld [vmem:[%s15226_s6 + $0x26b0] sm:$0xff] }
 0x147   : > { %v3024_v44 = vld [vmem:[%s15226_s6 + $0x26c0] sm:$0xff]  ;;  %3021 = vst [vmem:[%s15234_s7 + $0x1350] sm:$0xff] %v3020_v42  ;;  %3023 = vst [vmem:[%s15234_s7 + $0x1358] sm:$0xff] %v3022_v43  ;;  %v3026_v45 = vld [vmem:[%s15226_s6 + $0x26d0] sm:$0xff] }
 0x148   : > { %3025 = vst [vmem:[%s15234_s7 + $0x1360] sm:$0xff] %v3024_v44  ;;  %v3028_v46 = vld [vmem:[%s15226_s6 + $0x26e0] sm:$0xff]  ;;  %v3030_v47 = vld [vmem:[%s15226_s6 + $0x26f0] sm:$0xff]  ;;  %3027 = vst [vmem:[%s15234_s7 + $0x1368] sm:$0xff] %v3026_v45 }
 0x149   : > { %3029 = vst [vmem:[%s15234_s7 + $0x1370] sm:$0xff] %v3028_v46  ;;  %3031 = vst [vmem:[%s15234_s7 + $0x1378] sm:$0xff] %v3030_v47  ;;  %v3032_v48 = vld [vmem:[%s15226_s6 + $0x2700] sm:$0xff]  ;;  %v3034_v49 = vld [vmem:[%s15226_s6 + $0x2710] sm:$0xff] }
 0x14a   : > { %v3036_v50 = vld [vmem:[%s15226_s6 + $0x2720] sm:$0xff]  ;;  %3033 = vst [vmem:[%s15234_s7 + $0x1380] sm:$0xff] %v3032_v48  ;;  %3035 = vst [vmem:[%s15234_s7 + $0x1388] sm:$0xff] %v3034_v49  ;;  %v3038_v51 = vld [vmem:[%s15226_s6 + $0x2730] sm:$0xff] }
 0x14b   : > { %3037 = vst [vmem:[%s15234_s7 + $0x1390] sm:$0xff] %v3036_v50  ;;  %v3040_v52 = vld [vmem:[%s15226_s6 + $0x2740] sm:$0xff]  ;;  %v3042_v53 = vld [vmem:[%s15226_s6 + $0x2750] sm:$0xff]  ;;  %3039 = vst [vmem:[%s15234_s7 + $0x1398] sm:$0xff] %v3038_v51 }
 0x14c   : > { %3041 = vst [vmem:[%s15234_s7 + $0x13a0] sm:$0xff] %v3040_v52  ;;  %3043 = vst [vmem:[%s15234_s7 + $0x13a8] sm:$0xff] %v3042_v53  ;;  %v3044_v54 = vld [vmem:[%s15226_s6 + $0x2760] sm:$0xff]  ;;  %v3046_v55 = vld [vmem:[%s15226_s6 + $0x2770] sm:$0xff] }
 0x14d   : > { %v3048_v56 = vld [vmem:[%s15226_s6 + $0x2780] sm:$0xff]  ;;  %3045 = vst [vmem:[%s15234_s7 + $0x13b0] sm:$0xff] %v3044_v54  ;;  %3047 = vst [vmem:[%s15234_s7 + $0x13b8] sm:$0xff] %v3046_v55  ;;  %v3050_v57 = vld [vmem:[%s15226_s6 + $0x2790] sm:$0xff] }
 0x14e   : > { %3049 = vst [vmem:[%s15234_s7 + $0x13c0] sm:$0xff] %v3048_v56  ;;  %v3052_v58 = vld [vmem:[%s15226_s6 + $0x27a0] sm:$0xff]  ;;  %v3054_v59 = vld [vmem:[%s15226_s6 + $0x27b0] sm:$0xff]  ;;  %3051 = vst [vmem:[%s15234_s7 + $0x13c8] sm:$0xff] %v3050_v57 }
 0x14f   : > { %3053 = vst [vmem:[%s15234_s7 + $0x13d0] sm:$0xff] %v3052_v58  ;;  %3055 = vst [vmem:[%s15234_s7 + $0x13d8] sm:$0xff] %v3054_v59  ;;  %v3056_v60 = vld [vmem:[%s15226_s6 + $0x27c0] sm:$0xff]  ;;  %v3058_v61 = vld [vmem:[%s15226_s6 + $0x27d0] sm:$0xff] }
 0x150   : > { %v3060_v62 = vld [vmem:[%s15226_s6 + $0x27e0] sm:$0xff]  ;;  %3057 = vst [vmem:[%s15234_s7 + $0x13e0] sm:$0xff] %v3056_v60  ;;  %3059 = vst [vmem:[%s15234_s7 + $0x13e8] sm:$0xff] %v3058_v61  ;;  %v3062_v63 = vld [vmem:[%s15226_s6 + $0x27f0] sm:$0xff] }
 0x151   : > { %3061 = vst [vmem:[%s15234_s7 + $0x13f0] sm:$0xff] %v3060_v62  ;;  %v3064_v0 = vld [vmem:[%s15226_s6 + $0x2800] sm:$0xff]  ;;  %v3066_v1 = vld [vmem:[%s15226_s6 + $0x2810] sm:$0xff]  ;;  %3063 = vst [vmem:[%s15234_s7 + $0x13f8] sm:$0xff] %v3062_v63 }
 0x152   : > { %3065 = vst [vmem:[%s15234_s7 + $0x1400] sm:$0xff] %v3064_v0  ;;  %3067 = vst [vmem:[%s15234_s7 + $0x1408] sm:$0xff] %v3066_v1  ;;  %v3068_v2 = vld [vmem:[%s15226_s6 + $0x2820] sm:$0xff]  ;;  %v3070_v3 = vld [vmem:[%s15226_s6 + $0x2830] sm:$0xff] }
 0x153   : > { %v3072_v4 = vld [vmem:[%s15226_s6 + $0x2840] sm:$0xff]  ;;  %3069 = vst [vmem:[%s15234_s7 + $0x1410] sm:$0xff] %v3068_v2  ;;  %3071 = vst [vmem:[%s15234_s7 + $0x1418] sm:$0xff] %v3070_v3  ;;  %v3074_v5 = vld [vmem:[%s15226_s6 + $0x2850] sm:$0xff] }
 0x154   : > { %3073 = vst [vmem:[%s15234_s7 + $0x1420] sm:$0xff] %v3072_v4  ;;  %v3076_v6 = vld [vmem:[%s15226_s6 + $0x2860] sm:$0xff]  ;;  %v3078_v7 = vld [vmem:[%s15226_s6 + $0x2870] sm:$0xff]  ;;  %3075 = vst [vmem:[%s15234_s7 + $0x1428] sm:$0xff] %v3074_v5 }
 0x155   : > { %3077 = vst [vmem:[%s15234_s7 + $0x1430] sm:$0xff] %v3076_v6  ;;  %3079 = vst [vmem:[%s15234_s7 + $0x1438] sm:$0xff] %v3078_v7  ;;  %v3080_v8 = vld [vmem:[%s15226_s6 + $0x2880] sm:$0xff]  ;;  %v3082_v9 = vld [vmem:[%s15226_s6 + $0x2890] sm:$0xff] }
 0x156   : > { %v3084_v10 = vld [vmem:[%s15226_s6 + $0x28a0] sm:$0xff]  ;;  %3081 = vst [vmem:[%s15234_s7 + $0x1440] sm:$0xff] %v3080_v8  ;;  %3083 = vst [vmem:[%s15234_s7 + $0x1448] sm:$0xff] %v3082_v9  ;;  %v3086_v11 = vld [vmem:[%s15226_s6 + $0x28b0] sm:$0xff] }
 0x157   : > { %3085 = vst [vmem:[%s15234_s7 + $0x1450] sm:$0xff] %v3084_v10  ;;  %v3088_v12 = vld [vmem:[%s15226_s6 + $0x28c0] sm:$0xff]  ;;  %v3090_v13 = vld [vmem:[%s15226_s6 + $0x28d0] sm:$0xff]  ;;  %3087 = vst [vmem:[%s15234_s7 + $0x1458] sm:$0xff] %v3086_v11 }
 0x158   : > { %3089 = vst [vmem:[%s15234_s7 + $0x1460] sm:$0xff] %v3088_v12  ;;  %3091 = vst [vmem:[%s15234_s7 + $0x1468] sm:$0xff] %v3090_v13  ;;  %v3092_v14 = vld [vmem:[%s15226_s6 + $0x28e0] sm:$0xff]  ;;  %v3094_v15 = vld [vmem:[%s15226_s6 + $0x28f0] sm:$0xff] }
 0x159   : > { %v3096_v16 = vld [vmem:[%s15226_s6 + $0x2900] sm:$0xff]  ;;  %3093 = vst [vmem:[%s15234_s7 + $0x1470] sm:$0xff] %v3092_v14  ;;  %3095 = vst [vmem:[%s15234_s7 + $0x1478] sm:$0xff] %v3094_v15  ;;  %v3098_v17 = vld [vmem:[%s15226_s6 + $0x2910] sm:$0xff] }
 0x15a   : > { %3097 = vst [vmem:[%s15234_s7 + $0x1480] sm:$0xff] %v3096_v16  ;;  %v3100_v18 = vld [vmem:[%s15226_s6 + $0x2920] sm:$0xff]  ;;  %v3102_v19 = vld [vmem:[%s15226_s6 + $0x2930] sm:$0xff]  ;;  %3099 = vst [vmem:[%s15234_s7 + $0x1488] sm:$0xff] %v3098_v17 }
 0x15b   : > { %3101 = vst [vmem:[%s15234_s7 + $0x1490] sm:$0xff] %v3100_v18  ;;  %3103 = vst [vmem:[%s15234_s7 + $0x1498] sm:$0xff] %v3102_v19  ;;  %v3104_v20 = vld [vmem:[%s15226_s6 + $0x2940] sm:$0xff]  ;;  %v3106_v21 = vld [vmem:[%s15226_s6 + $0x2950] sm:$0xff] }
 0x15c   : > { %v3108_v22 = vld [vmem:[%s15226_s6 + $0x2960] sm:$0xff]  ;;  %3105 = vst [vmem:[%s15234_s7 + $0x14a0] sm:$0xff] %v3104_v20  ;;  %3107 = vst [vmem:[%s15234_s7 + $0x14a8] sm:$0xff] %v3106_v21  ;;  %v3110_v23 = vld [vmem:[%s15226_s6 + $0x2970] sm:$0xff] }
 0x15d   : > { %3109 = vst [vmem:[%s15234_s7 + $0x14b0] sm:$0xff] %v3108_v22  ;;  %v3112_v24 = vld [vmem:[%s15226_s6 + $0x2980] sm:$0xff]  ;;  %v3114_v25 = vld [vmem:[%s15226_s6 + $0x2990] sm:$0xff]  ;;  %3111 = vst [vmem:[%s15234_s7 + $0x14b8] sm:$0xff] %v3110_v23 }
 0x15e   : > { %3113 = vst [vmem:[%s15234_s7 + $0x14c0] sm:$0xff] %v3112_v24  ;;  %3115 = vst [vmem:[%s15234_s7 + $0x14c8] sm:$0xff] %v3114_v25  ;;  %v3116_v26 = vld [vmem:[%s15226_s6 + $0x29a0] sm:$0xff]  ;;  %v3118_v27 = vld [vmem:[%s15226_s6 + $0x29b0] sm:$0xff] }
 0x15f   : > { %v3120_v28 = vld [vmem:[%s15226_s6 + $0x29c0] sm:$0xff]  ;;  %3117 = vst [vmem:[%s15234_s7 + $0x14d0] sm:$0xff] %v3116_v26  ;;  %3119 = vst [vmem:[%s15234_s7 + $0x14d8] sm:$0xff] %v3118_v27  ;;  %v3122_v29 = vld [vmem:[%s15226_s6 + $0x29d0] sm:$0xff] }
 0x160   : > { %3121 = vst [vmem:[%s15234_s7 + $0x14e0] sm:$0xff] %v3120_v28  ;;  %v3124_v30 = vld [vmem:[%s15226_s6 + $0x29e0] sm:$0xff]  ;;  %v3126_v31 = vld [vmem:[%s15226_s6 + $0x29f0] sm:$0xff]  ;;  %3123 = vst [vmem:[%s15234_s7 + $0x14e8] sm:$0xff] %v3122_v29 }
 0x161   : > { %3125 = vst [vmem:[%s15234_s7 + $0x14f0] sm:$0xff] %v3124_v30  ;;  %3127 = vst [vmem:[%s15234_s7 + $0x14f8] sm:$0xff] %v3126_v31  ;;  %v3128_v32 = vld [vmem:[%s15226_s6 + $0x2a00] sm:$0xff]  ;;  %v3130_v33 = vld [vmem:[%s15226_s6 + $0x2a10] sm:$0xff] }
 0x162   : > { %v3132_v34 = vld [vmem:[%s15226_s6 + $0x2a20] sm:$0xff]  ;;  %3129 = vst [vmem:[%s15234_s7 + $0x1500] sm:$0xff] %v3128_v32  ;;  %3131 = vst [vmem:[%s15234_s7 + $0x1508] sm:$0xff] %v3130_v33  ;;  %v3134_v35 = vld [vmem:[%s15226_s6 + $0x2a30] sm:$0xff] }
 0x163   : > { %3133 = vst [vmem:[%s15234_s7 + $0x1510] sm:$0xff] %v3132_v34  ;;  %v3136_v36 = vld [vmem:[%s15226_s6 + $0x2a40] sm:$0xff]  ;;  %v3138_v37 = vld [vmem:[%s15226_s6 + $0x2a50] sm:$0xff]  ;;  %3135 = vst [vmem:[%s15234_s7 + $0x1518] sm:$0xff] %v3134_v35 }
 0x164   : > { %3137 = vst [vmem:[%s15234_s7 + $0x1520] sm:$0xff] %v3136_v36  ;;  %3139 = vst [vmem:[%s15234_s7 + $0x1528] sm:$0xff] %v3138_v37  ;;  %v3140_v38 = vld [vmem:[%s15226_s6 + $0x2a60] sm:$0xff]  ;;  %v3142_v39 = vld [vmem:[%s15226_s6 + $0x2a70] sm:$0xff] }
 0x165   : > { %v3144_v40 = vld [vmem:[%s15226_s6 + $0x2a80] sm:$0xff]  ;;  %3141 = vst [vmem:[%s15234_s7 + $0x1530] sm:$0xff] %v3140_v38  ;;  %3143 = vst [vmem:[%s15234_s7 + $0x1538] sm:$0xff] %v3142_v39  ;;  %v3146_v41 = vld [vmem:[%s15226_s6 + $0x2a90] sm:$0xff] }
 0x166   : > { %3145 = vst [vmem:[%s15234_s7 + $0x1540] sm:$0xff] %v3144_v40  ;;  %v3148_v42 = vld [vmem:[%s15226_s6 + $0x2aa0] sm:$0xff]  ;;  %v3150_v43 = vld [vmem:[%s15226_s6 + $0x2ab0] sm:$0xff]  ;;  %3147 = vst [vmem:[%s15234_s7 + $0x1548] sm:$0xff] %v3146_v41 }
 0x167   : > { %3149 = vst [vmem:[%s15234_s7 + $0x1550] sm:$0xff] %v3148_v42  ;;  %3151 = vst [vmem:[%s15234_s7 + $0x1558] sm:$0xff] %v3150_v43  ;;  %v3152_v44 = vld [vmem:[%s15226_s6 + $0x2ac0] sm:$0xff]  ;;  %v3154_v45 = vld [vmem:[%s15226_s6 + $0x2ad0] sm:$0xff] }
 0x168   : > { %v3156_v46 = vld [vmem:[%s15226_s6 + $0x2ae0] sm:$0xff]  ;;  %3153 = vst [vmem:[%s15234_s7 + $0x1560] sm:$0xff] %v3152_v44  ;;  %3155 = vst [vmem:[%s15234_s7 + $0x1568] sm:$0xff] %v3154_v45  ;;  %v3158_v47 = vld [vmem:[%s15226_s6 + $0x2af0] sm:$0xff] }
 0x169   : > { %3157 = vst [vmem:[%s15234_s7 + $0x1570] sm:$0xff] %v3156_v46  ;;  %v3160_v48 = vld [vmem:[%s15226_s6 + $0x2b00] sm:$0xff]  ;;  %v3162_v49 = vld [vmem:[%s15226_s6 + $0x2b10] sm:$0xff]  ;;  %3159 = vst [vmem:[%s15234_s7 + $0x1578] sm:$0xff] %v3158_v47 }
 0x16a   : > { %3161 = vst [vmem:[%s15234_s7 + $0x1580] sm:$0xff] %v3160_v48  ;;  %3163 = vst [vmem:[%s15234_s7 + $0x1588] sm:$0xff] %v3162_v49  ;;  %v3164_v50 = vld [vmem:[%s15226_s6 + $0x2b20] sm:$0xff]  ;;  %v3166_v51 = vld [vmem:[%s15226_s6 + $0x2b30] sm:$0xff] }
 0x16b   : > { %v3168_v52 = vld [vmem:[%s15226_s6 + $0x2b40] sm:$0xff]  ;;  %3165 = vst [vmem:[%s15234_s7 + $0x1590] sm:$0xff] %v3164_v50  ;;  %3167 = vst [vmem:[%s15234_s7 + $0x1598] sm:$0xff] %v3166_v51  ;;  %v3170_v53 = vld [vmem:[%s15226_s6 + $0x2b50] sm:$0xff] }
 0x16c   : > { %3169 = vst [vmem:[%s15234_s7 + $0x15a0] sm:$0xff] %v3168_v52  ;;  %v3172_v54 = vld [vmem:[%s15226_s6 + $0x2b60] sm:$0xff]  ;;  %v3174_v55 = vld [vmem:[%s15226_s6 + $0x2b70] sm:$0xff]  ;;  %3171 = vst [vmem:[%s15234_s7 + $0x15a8] sm:$0xff] %v3170_v53 }
 0x16d   : > { %3173 = vst [vmem:[%s15234_s7 + $0x15b0] sm:$0xff] %v3172_v54  ;;  %3175 = vst [vmem:[%s15234_s7 + $0x15b8] sm:$0xff] %v3174_v55  ;;  %v3176_v56 = vld [vmem:[%s15226_s6 + $0x2b80] sm:$0xff]  ;;  %v3178_v57 = vld [vmem:[%s15226_s6 + $0x2b90] sm:$0xff] }
 0x16e   : > { %v3180_v58 = vld [vmem:[%s15226_s6 + $0x2ba0] sm:$0xff]  ;;  %3177 = vst [vmem:[%s15234_s7 + $0x15c0] sm:$0xff] %v3176_v56  ;;  %3179 = vst [vmem:[%s15234_s7 + $0x15c8] sm:$0xff] %v3178_v57  ;;  %v3182_v59 = vld [vmem:[%s15226_s6 + $0x2bb0] sm:$0xff] }
 0x16f   : > { %3181 = vst [vmem:[%s15234_s7 + $0x15d0] sm:$0xff] %v3180_v58  ;;  %v3184_v60 = vld [vmem:[%s15226_s6 + $0x2bc0] sm:$0xff]  ;;  %v3186_v61 = vld [vmem:[%s15226_s6 + $0x2bd0] sm:$0xff]  ;;  %3183 = vst [vmem:[%s15234_s7 + $0x15d8] sm:$0xff] %v3182_v59 }
 0x170   : > { %3185 = vst [vmem:[%s15234_s7 + $0x15e0] sm:$0xff] %v3184_v60  ;;  %3187 = vst [vmem:[%s15234_s7 + $0x15e8] sm:$0xff] %v3186_v61  ;;  %v3188_v62 = vld [vmem:[%s15226_s6 + $0x2be0] sm:$0xff]  ;;  %v3190_v63 = vld [vmem:[%s15226_s6 + $0x2bf0] sm:$0xff] }
 0x171   : > { %v3192_v0 = vld [vmem:[%s15226_s6 + $0x2c00] sm:$0xff]  ;;  %3189 = vst [vmem:[%s15234_s7 + $0x15f0] sm:$0xff] %v3188_v62  ;;  %3191 = vst [vmem:[%s15234_s7 + $0x15f8] sm:$0xff] %v3190_v63  ;;  %v3194_v1 = vld [vmem:[%s15226_s6 + $0x2c10] sm:$0xff] }
 0x172   : > { %3193 = vst [vmem:[%s15234_s7 + $0x1600] sm:$0xff] %v3192_v0  ;;  %v3196_v2 = vld [vmem:[%s15226_s6 + $0x2c20] sm:$0xff]  ;;  %v3198_v3 = vld [vmem:[%s15226_s6 + $0x2c30] sm:$0xff]  ;;  %3195 = vst [vmem:[%s15234_s7 + $0x1608] sm:$0xff] %v3194_v1 }
 0x173   : > { %3197 = vst [vmem:[%s15234_s7 + $0x1610] sm:$0xff] %v3196_v2  ;;  %3199 = vst [vmem:[%s15234_s7 + $0x1618] sm:$0xff] %v3198_v3  ;;  %v3200_v4 = vld [vmem:[%s15226_s6 + $0x2c40] sm:$0xff]  ;;  %v3202_v5 = vld [vmem:[%s15226_s6 + $0x2c50] sm:$0xff] }
 0x174   : > { %v3204_v6 = vld [vmem:[%s15226_s6 + $0x2c60] sm:$0xff]  ;;  %3201 = vst [vmem:[%s15234_s7 + $0x1620] sm:$0xff] %v3200_v4  ;;  %3203 = vst [vmem:[%s15234_s7 + $0x1628] sm:$0xff] %v3202_v5  ;;  %v3206_v7 = vld [vmem:[%s15226_s6 + $0x2c70] sm:$0xff] }
 0x175   : > { %3205 = vst [vmem:[%s15234_s7 + $0x1630] sm:$0xff] %v3204_v6  ;;  %v3208_v8 = vld [vmem:[%s15226_s6 + $0x2c80] sm:$0xff]  ;;  %v3210_v9 = vld [vmem:[%s15226_s6 + $0x2c90] sm:$0xff]  ;;  %3207 = vst [vmem:[%s15234_s7 + $0x1638] sm:$0xff] %v3206_v7 }
 0x176   : > { %3209 = vst [vmem:[%s15234_s7 + $0x1640] sm:$0xff] %v3208_v8  ;;  %3211 = vst [vmem:[%s15234_s7 + $0x1648] sm:$0xff] %v3210_v9  ;;  %v3212_v10 = vld [vmem:[%s15226_s6 + $0x2ca0] sm:$0xff]  ;;  %v3214_v11 = vld [vmem:[%s15226_s6 + $0x2cb0] sm:$0xff] }
 0x177   : > { %v3216_v12 = vld [vmem:[%s15226_s6 + $0x2cc0] sm:$0xff]  ;;  %3213 = vst [vmem:[%s15234_s7 + $0x1650] sm:$0xff] %v3212_v10  ;;  %3215 = vst [vmem:[%s15234_s7 + $0x1658] sm:$0xff] %v3214_v11  ;;  %v3218_v13 = vld [vmem:[%s15226_s6 + $0x2cd0] sm:$0xff] }
 0x178   : > { %3217 = vst [vmem:[%s15234_s7 + $0x1660] sm:$0xff] %v3216_v12  ;;  %v3220_v14 = vld [vmem:[%s15226_s6 + $0x2ce0] sm:$0xff]  ;;  %v3222_v15 = vld [vmem:[%s15226_s6 + $0x2cf0] sm:$0xff]  ;;  %3219 = vst [vmem:[%s15234_s7 + $0x1668] sm:$0xff] %v3218_v13 }
 0x179   : > { %3221 = vst [vmem:[%s15234_s7 + $0x1670] sm:$0xff] %v3220_v14  ;;  %3223 = vst [vmem:[%s15234_s7 + $0x1678] sm:$0xff] %v3222_v15  ;;  %v3224_v16 = vld [vmem:[%s15226_s6 + $0x2d00] sm:$0xff]  ;;  %v3226_v17 = vld [vmem:[%s15226_s6 + $0x2d10] sm:$0xff] }
 0x17a   : > { %v3228_v18 = vld [vmem:[%s15226_s6 + $0x2d20] sm:$0xff]  ;;  %3225 = vst [vmem:[%s15234_s7 + $0x1680] sm:$0xff] %v3224_v16  ;;  %3227 = vst [vmem:[%s15234_s7 + $0x1688] sm:$0xff] %v3226_v17  ;;  %v3230_v19 = vld [vmem:[%s15226_s6 + $0x2d30] sm:$0xff] }
 0x17b   : > { %3229 = vst [vmem:[%s15234_s7 + $0x1690] sm:$0xff] %v3228_v18  ;;  %v3232_v20 = vld [vmem:[%s15226_s6 + $0x2d40] sm:$0xff]  ;;  %v3234_v21 = vld [vmem:[%s15226_s6 + $0x2d50] sm:$0xff]  ;;  %3231 = vst [vmem:[%s15234_s7 + $0x1698] sm:$0xff] %v3230_v19 }
 0x17c   : > { %3233 = vst [vmem:[%s15234_s7 + $0x16a0] sm:$0xff] %v3232_v20  ;;  %3235 = vst [vmem:[%s15234_s7 + $0x16a8] sm:$0xff] %v3234_v21  ;;  %v3236_v22 = vld [vmem:[%s15226_s6 + $0x2d60] sm:$0xff]  ;;  %v3238_v23 = vld [vmem:[%s15226_s6 + $0x2d70] sm:$0xff] }
 0x17d   : > { %v3240_v24 = vld [vmem:[%s15226_s6 + $0x2d80] sm:$0xff]  ;;  %3237 = vst [vmem:[%s15234_s7 + $0x16b0] sm:$0xff] %v3236_v22  ;;  %3239 = vst [vmem:[%s15234_s7 + $0x16b8] sm:$0xff] %v3238_v23  ;;  %v3242_v25 = vld [vmem:[%s15226_s6 + $0x2d90] sm:$0xff] }
 0x17e   : > { %3241 = vst [vmem:[%s15234_s7 + $0x16c0] sm:$0xff] %v3240_v24  ;;  %v3244_v26 = vld [vmem:[%s15226_s6 + $0x2da0] sm:$0xff]  ;;  %v3246_v27 = vld [vmem:[%s15226_s6 + $0x2db0] sm:$0xff]  ;;  %3243 = vst [vmem:[%s15234_s7 + $0x16c8] sm:$0xff] %v3242_v25 }
 0x17f   : > { %3245 = vst [vmem:[%s15234_s7 + $0x16d0] sm:$0xff] %v3244_v26  ;;  %3247 = vst [vmem:[%s15234_s7 + $0x16d8] sm:$0xff] %v3246_v27  ;;  %v3248_v28 = vld [vmem:[%s15226_s6 + $0x2dc0] sm:$0xff]  ;;  %v3250_v29 = vld [vmem:[%s15226_s6 + $0x2dd0] sm:$0xff] }
 0x180   : > { %v3252_v30 = vld [vmem:[%s15226_s6 + $0x2de0] sm:$0xff]  ;;  %3249 = vst [vmem:[%s15234_s7 + $0x16e0] sm:$0xff] %v3248_v28  ;;  %3251 = vst [vmem:[%s15234_s7 + $0x16e8] sm:$0xff] %v3250_v29  ;;  %v3254_v31 = vld [vmem:[%s15226_s6 + $0x2df0] sm:$0xff] }
 0x181   : > { %3253 = vst [vmem:[%s15234_s7 + $0x16f0] sm:$0xff] %v3252_v30  ;;  %v3256_v32 = vld [vmem:[%s15226_s6 + $0x2e00] sm:$0xff]  ;;  %v3258_v33 = vld [vmem:[%s15226_s6 + $0x2e10] sm:$0xff]  ;;  %3255 = vst [vmem:[%s15234_s7 + $0x16f8] sm:$0xff] %v3254_v31 }
 0x182   : > { %3257 = vst [vmem:[%s15234_s7 + $0x1700] sm:$0xff] %v3256_v32  ;;  %3259 = vst [vmem:[%s15234_s7 + $0x1708] sm:$0xff] %v3258_v33  ;;  %v3260_v34 = vld [vmem:[%s15226_s6 + $0x2e20] sm:$0xff]  ;;  %v3262_v35 = vld [vmem:[%s15226_s6 + $0x2e30] sm:$0xff] }
 0x183   : > { %v3264_v36 = vld [vmem:[%s15226_s6 + $0x2e40] sm:$0xff]  ;;  %3261 = vst [vmem:[%s15234_s7 + $0x1710] sm:$0xff] %v3260_v34  ;;  %3263 = vst [vmem:[%s15234_s7 + $0x1718] sm:$0xff] %v3262_v35  ;;  %v3266_v37 = vld [vmem:[%s15226_s6 + $0x2e50] sm:$0xff] }
 0x184   : > { %3265 = vst [vmem:[%s15234_s7 + $0x1720] sm:$0xff] %v3264_v36  ;;  %v3268_v38 = vld [vmem:[%s15226_s6 + $0x2e60] sm:$0xff]  ;;  %v3270_v39 = vld [vmem:[%s15226_s6 + $0x2e70] sm:$0xff]  ;;  %3267 = vst [vmem:[%s15234_s7 + $0x1728] sm:$0xff] %v3266_v37 }
 0x185   : > { %3269 = vst [vmem:[%s15234_s7 + $0x1730] sm:$0xff] %v3268_v38  ;;  %3271 = vst [vmem:[%s15234_s7 + $0x1738] sm:$0xff] %v3270_v39  ;;  %v3272_v40 = vld [vmem:[%s15226_s6 + $0x2e80] sm:$0xff]  ;;  %v3274_v41 = vld [vmem:[%s15226_s6 + $0x2e90] sm:$0xff] }
 0x186   : > { %v3276_v42 = vld [vmem:[%s15226_s6 + $0x2ea0] sm:$0xff]  ;;  %3273 = vst [vmem:[%s15234_s7 + $0x1740] sm:$0xff] %v3272_v40  ;;  %3275 = vst [vmem:[%s15234_s7 + $0x1748] sm:$0xff] %v3274_v41  ;;  %v3278_v43 = vld [vmem:[%s15226_s6 + $0x2eb0] sm:$0xff] }
 0x187   : > { %3277 = vst [vmem:[%s15234_s7 + $0x1750] sm:$0xff] %v3276_v42  ;;  %v3280_v44 = vld [vmem:[%s15226_s6 + $0x2ec0] sm:$0xff]  ;;  %v3282_v45 = vld [vmem:[%s15226_s6 + $0x2ed0] sm:$0xff]  ;;  %3279 = vst [vmem:[%s15234_s7 + $0x1758] sm:$0xff] %v3278_v43 }
 0x188   : > { %3281 = vst [vmem:[%s15234_s7 + $0x1760] sm:$0xff] %v3280_v44  ;;  %3283 = vst [vmem:[%s15234_s7 + $0x1768] sm:$0xff] %v3282_v45  ;;  %v3284_v46 = vld [vmem:[%s15226_s6 + $0x2ee0] sm:$0xff]  ;;  %v3286_v47 = vld [vmem:[%s15226_s6 + $0x2ef0] sm:$0xff] }
 0x189   : > { %v3288_v48 = vld [vmem:[%s15226_s6 + $0x2f00] sm:$0xff]  ;;  %3285 = vst [vmem:[%s15234_s7 + $0x1770] sm:$0xff] %v3284_v46  ;;  %3287 = vst [vmem:[%s15234_s7 + $0x1778] sm:$0xff] %v3286_v47  ;;  %v3290_v49 = vld [vmem:[%s15226_s6 + $0x2f10] sm:$0xff] }
 0x18a   : > { %3289 = vst [vmem:[%s15234_s7 + $0x1780] sm:$0xff] %v3288_v48  ;;  %v3292_v50 = vld [vmem:[%s15226_s6 + $0x2f20] sm:$0xff]  ;;  %v3294_v51 = vld [vmem:[%s15226_s6 + $0x2f30] sm:$0xff]  ;;  %3291 = vst [vmem:[%s15234_s7 + $0x1788] sm:$0xff] %v3290_v49 }
 0x18b   : > { %3293 = vst [vmem:[%s15234_s7 + $0x1790] sm:$0xff] %v3292_v50  ;;  %3295 = vst [vmem:[%s15234_s7 + $0x1798] sm:$0xff] %v3294_v51  ;;  %v3296_v52 = vld [vmem:[%s15226_s6 + $0x2f40] sm:$0xff]  ;;  %v3298_v53 = vld [vmem:[%s15226_s6 + $0x2f50] sm:$0xff] }
 0x18c   : > { %v3300_v54 = vld [vmem:[%s15226_s6 + $0x2f60] sm:$0xff]  ;;  %3297 = vst [vmem:[%s15234_s7 + $0x17a0] sm:$0xff] %v3296_v52  ;;  %3299 = vst [vmem:[%s15234_s7 + $0x17a8] sm:$0xff] %v3298_v53  ;;  %v3302_v55 = vld [vmem:[%s15226_s6 + $0x2f70] sm:$0xff] }
 0x18d   : > { %3301 = vst [vmem:[%s15234_s7 + $0x17b0] sm:$0xff] %v3300_v54  ;;  %v3304_v56 = vld [vmem:[%s15226_s6 + $0x2f80] sm:$0xff]  ;;  %v3306_v57 = vld [vmem:[%s15226_s6 + $0x2f90] sm:$0xff]  ;;  %3303 = vst [vmem:[%s15234_s7 + $0x17b8] sm:$0xff] %v3302_v55 }
 0x18e   : > { %3305 = vst [vmem:[%s15234_s7 + $0x17c0] sm:$0xff] %v3304_v56  ;;  %3307 = vst [vmem:[%s15234_s7 + $0x17c8] sm:$0xff] %v3306_v57  ;;  %v3308_v58 = vld [vmem:[%s15226_s6 + $0x2fa0] sm:$0xff]  ;;  %v3310_v59 = vld [vmem:[%s15226_s6 + $0x2fb0] sm:$0xff] }
 0x18f   : > { %v3312_v60 = vld [vmem:[%s15226_s6 + $0x2fc0] sm:$0xff]  ;;  %3309 = vst [vmem:[%s15234_s7 + $0x17d0] sm:$0xff] %v3308_v58  ;;  %3311 = vst [vmem:[%s15234_s7 + $0x17d8] sm:$0xff] %v3310_v59  ;;  %v3314_v61 = vld [vmem:[%s15226_s6 + $0x2fd0] sm:$0xff] }
 0x190   : > { %3313 = vst [vmem:[%s15234_s7 + $0x17e0] sm:$0xff] %v3312_v60  ;;  %v3316_v62 = vld [vmem:[%s15226_s6 + $0x2fe0] sm:$0xff]  ;;  %v3318_v63 = vld [vmem:[%s15226_s6 + $0x2ff0] sm:$0xff]  ;;  %3315 = vst [vmem:[%s15234_s7 + $0x17e8] sm:$0xff] %v3314_v61 }
 0x191   : > { %3317 = vst [vmem:[%s15234_s7 + $0x17f0] sm:$0xff] %v3316_v62  ;;  %3319 = vst [vmem:[%s15234_s7 + $0x17f8] sm:$0xff] %v3318_v63  ;;  %v3320_v0 = vld [vmem:[%s15226_s6 + $0x3000] sm:$0xff]  ;;  %v3322_v1 = vld [vmem:[%s15226_s6 + $0x3010] sm:$0xff] }
 0x192   : > { %v3324_v2 = vld [vmem:[%s15226_s6 + $0x3020] sm:$0xff]  ;;  %3321 = vst [vmem:[%s15234_s7 + $0x1800] sm:$0xff] %v3320_v0  ;;  %3323 = vst [vmem:[%s15234_s7 + $0x1808] sm:$0xff] %v3322_v1  ;;  %v3326_v3 = vld [vmem:[%s15226_s6 + $0x3030] sm:$0xff] }
 0x193   : > { %3325 = vst [vmem:[%s15234_s7 + $0x1810] sm:$0xff] %v3324_v2  ;;  %v3328_v4 = vld [vmem:[%s15226_s6 + $0x3040] sm:$0xff]  ;;  %v3330_v5 = vld [vmem:[%s15226_s6 + $0x3050] sm:$0xff]  ;;  %3327 = vst [vmem:[%s15234_s7 + $0x1818] sm:$0xff] %v3326_v3 }
 0x194   : > { %3329 = vst [vmem:[%s15234_s7 + $0x1820] sm:$0xff] %v3328_v4  ;;  %3331 = vst [vmem:[%s15234_s7 + $0x1828] sm:$0xff] %v3330_v5  ;;  %v3332_v6 = vld [vmem:[%s15226_s6 + $0x3060] sm:$0xff]  ;;  %v3334_v7 = vld [vmem:[%s15226_s6 + $0x3070] sm:$0xff] }
 0x195   : > { %v3336_v8 = vld [vmem:[%s15226_s6 + $0x3080] sm:$0xff]  ;;  %3333 = vst [vmem:[%s15234_s7 + $0x1830] sm:$0xff] %v3332_v6  ;;  %3335 = vst [vmem:[%s15234_s7 + $0x1838] sm:$0xff] %v3334_v7  ;;  %v3338_v9 = vld [vmem:[%s15226_s6 + $0x3090] sm:$0xff] }
 0x196   : > { %3337 = vst [vmem:[%s15234_s7 + $0x1840] sm:$0xff] %v3336_v8  ;;  %v3340_v10 = vld [vmem:[%s15226_s6 + $0x30a0] sm:$0xff]  ;;  %v3342_v11 = vld [vmem:[%s15226_s6 + $0x30b0] sm:$0xff]  ;;  %3339 = vst [vmem:[%s15234_s7 + $0x1848] sm:$0xff] %v3338_v9 }
 0x197   : > { %3341 = vst [vmem:[%s15234_s7 + $0x1850] sm:$0xff] %v3340_v10  ;;  %3343 = vst [vmem:[%s15234_s7 + $0x1858] sm:$0xff] %v3342_v11  ;;  %v3344_v12 = vld [vmem:[%s15226_s6 + $0x30c0] sm:$0xff]  ;;  %v3346_v13 = vld [vmem:[%s15226_s6 + $0x30d0] sm:$0xff] }
 0x198   : > { %v3348_v14 = vld [vmem:[%s15226_s6 + $0x30e0] sm:$0xff]  ;;  %3345 = vst [vmem:[%s15234_s7 + $0x1860] sm:$0xff] %v3344_v12  ;;  %3347 = vst [vmem:[%s15234_s7 + $0x1868] sm:$0xff] %v3346_v13  ;;  %v3350_v15 = vld [vmem:[%s15226_s6 + $0x30f0] sm:$0xff] }
 0x199   : > { %3349 = vst [vmem:[%s15234_s7 + $0x1870] sm:$0xff] %v3348_v14  ;;  %3351 = vst [vmem:[%s15234_s7 + $0x1878] sm:$0xff] %v3350_v15 }
 0x19a PF: > { %p12922_p5 = scmp.ge.s32.totalorder %s15155_s20, 1  ;;  %p6545_p6 = scmp.lt.s32.totalorder %s15155_s20, 3 }
 0x19c   : > { %p6546_p7 = pnand %p12922_p5, %p6545_p6 }
 0x19d   : > { %s6552_s8 = sand.u32 (!%p6546_p7), 1, %s15147_s18   ;;  %s12923_s9 = sshll.u32 (!%p6546_p7), %s15206_s21, 1 }
 0x19e   : > { %6549 = sbr.rel (%p6546_p7) target bundleno = 1701 (0x6a5), region = 88  ;;  %p6585_p8 = scmp.lt.s32.totalorder (!%p6546_p7), %s12923_s9, 3 }
 0x19f   : > { %s13883_s10 = smul.u32 (!%p6546_p7), 6272, %s6552_s8  ;;  %s12924_s11 = sshll.u32 (!%p6546_p7), %s15206_s21, 5 }
 0x1a0   : > { %p6590_p9 = scmp.lt.s32.totalorder (!%p6546_p7), %s12924_s11, 63  ;;  %p12926_p10 = scmp.ne.s32.totalorder (!%p6546_p7), %s15206_s21, 0 }
 0x1a1   : > { %s16814_s18 = scalar_lea.vmem (!%p6546_p7), [#allocation3], %s13883_s10 }
 0x1a5   : > { %s17934_s9 = smov (!%p6585_p8, %s12923_s9), 3  ;;  %s17936_s11 = smov (!%p6590_p9, %s12924_s11), 63 }
 0x1a6   : > { %s6587_s14 = scalar_lea.vmem %s17926_s2, %s17934_s9  ;;  %s12925_s15 = sshll.u32 %s17936_s11, 3  ;;  %v12927_v16 = vld [vmem:[%s17928_s4] ss:$0 sm:$0xff] (!%p12926_p10)  ;;  %vm6607_vm0 = vcmask (!%p12926_p10), 74752  }
 0x1a7   : > { %s16812_s20 = scalar_lea.vmem %s17927_s3, %s12925_s15  ;;  %6599 = sbr.rel (%p12926_p10) target bundleno = 430 (0x1ae), region = 96  ;;  %6608 = vst.msk [vmem:[#allocation2] sm:$0x3] (!%p12926_p10), %vm6607_vm0, %v12927_v16 }
 0x1ae PF: > { %v13917_v17 = vld [vmem:[%s16814_s18 + $0x4] ss:$8 sps:$4 sm:$0xff]   ;;  %v13921_v19 = vld [vmem:[%s16814_s18] ss:$8 sps:$4 sm:$0xff]   ;;  %v13923_v21 = vld [vmem:[%s16814_s18 + $0x14] ss:$8 sps:$4 sm:$0xff]   ;;  %v7402_v53 = vlaneseq }
 0x1af   : > { %v13919_v18 = vld [vmem:[%s16814_s18 + $0xc04] ss:$8 sps:$4 sm:$0xff]   ;;  %11696 = vmatprep.subr.bf16.mxu1 %v13917_v17  ;;  %v13922_v20 = vld [vmem:[%s16814_s18 + $0xc00] ss:$8 sps:$4 sm:$0xff]   ;;  %v13925_v22 = vld [vmem:[%s16814_s18 + $0xc14] ss:$8 sps:$4 sm:$0xff]  }
 0x1b0   : > { %12188 = vmatprep.subr.bf16.mxu0 %v13919_v18  ;;  %11697 = vmatpush1.bf16.msra.mxu1 %v13921_v19  ;;  %v13927_v23 = vld [vmem:[%s16814_s18 + $0x10] ss:$8 sps:$4 sm:$0xff]   ;;  %v13929_v25 = vld [vmem:[%s16814_s18 + $0x24] ss:$8 sps:$4 sm:$0xff]   ;;  %v13933_v27 = vld [vmem:[%s16814_s18 + $0x20] ss:$8 sps:$4 sm:$0xff]  }
 0x1b1   : > { %12189 = vmatpush1.bf16.msra.mxu0 %v13922_v20  ;;  %11698 = vmatprep.subr.bf16.mxu1 %v13923_v21  ;;  %v13928_v24 = vld [vmem:[%s16814_s18 + $0xc10] ss:$8 sps:$4 sm:$0xff]   ;;  %v13931_v26 = vld [vmem:[%s16814_s18 + $0xc24] ss:$8 sps:$4 sm:$0xff]   ;;  %v13934_v28 = vld [vmem:[%s16814_s18 + $0xc20] ss:$8 sps:$4 sm:$0xff]  }
 0x1b2   : > { %12190 = vmatprep.subr.bf16.mxu0 %v13925_v22  ;;  %v13935_v29 = vld [vmem:[%s16814_s18 + $0x34] ss:$8 sps:$4 sm:$0xff]   ;;  %v13939_v31 = vld [vmem:[%s16814_s18 + $0x30] ss:$8 sps:$4 sm:$0xff]   ;;  %v13941_v33 = vld [vmem:[%s16814_s18 + $0x44] ss:$8 sps:$4 sm:$0xff]  }
 0x1b3   : > { %v13937_v30 = vld [vmem:[%s16814_s18 + $0xc34] ss:$8 sps:$4 sm:$0xff]   ;;  %v13940_v32 = vld [vmem:[%s16814_s18 + $0xc30] ss:$8 sps:$4 sm:$0xff]   ;;  %v13943_v34 = vld [vmem:[%s16814_s18 + $0xc44] ss:$8 sps:$4 sm:$0xff]  }
 0x1b4   : > { %11699 = vmatpush1.bf16.msra.mxu1 %v13927_v23  ;;  %v13945_v35 = vld [vmem:[%s16814_s18 + $0x40] ss:$8 sps:$4 sm:$0xff]   ;;  %v13947_v37 = vld [vmem:[%s16814_s18 + $0x54] ss:$8 sps:$4 sm:$0xff]   ;;  %v13951_v39 = vld [vmem:[%s16814_s18 + $0x50] ss:$8 sps:$4 sm:$0xff]  }
 0x1b5   : > { %12191 = vmatpush1.bf16.msra.mxu0 %v13928_v24  ;;  %11700 = vmatprep.subr.bf16.mxu1 %v13929_v25  ;;  %v13946_v36 = vld [vmem:[%s16814_s18 + $0xc40] ss:$8 sps:$4 sm:$0xff]   ;;  %v13949_v38 = vld [vmem:[%s16814_s18 + $0xc54] ss:$8 sps:$4 sm:$0xff]   ;;  %v13952_v40 = vld [vmem:[%s16814_s18 + $0xc50] ss:$8 sps:$4 sm:$0xff]  }
 0x1b6   : > { %12192 = vmatprep.subr.bf16.mxu0 %v13931_v26  ;;  %v13953_v41 = vld [vmem:[%s16814_s18 + $0x64] ss:$8 sps:$4 sm:$0xff]   ;;  %v13957_v43 = vld [vmem:[%s16814_s18 + $0x60] ss:$8 sps:$4 sm:$0xff]   ;;  %v13959_v45 = vld [vmem:[%s16814_s18 + $0x74] ss:$8 sps:$4 sm:$0xff]  }
 0x1b7   : > { %v13955_v42 = vld [vmem:[%s16814_s18 + $0xc64] ss:$8 sps:$4 sm:$0xff]   ;;  %v13958_v44 = vld [vmem:[%s16814_s18 + $0xc60] ss:$8 sps:$4 sm:$0xff]   ;;  %v13961_v46 = vld [vmem:[%s16814_s18 + $0xc74] ss:$8 sps:$4 sm:$0xff]  }
 0x1b8   : > { %11701 = vmatpush1.bf16.msra.mxu1 %v13933_v27  ;;  %v13963_v47 = vld [vmem:[%s16814_s18 + $0x70] ss:$8 sps:$4 sm:$0xff]   ;;  %v13965_v49 = vld [vmem:[%s16814_s18 + $0x84] ss:$8 sps:$4 sm:$0xff]   ;;  %v13969_v51 = vld [vmem:[%s16814_s18 + $0x80] ss:$8 sps:$4 sm:$0xff]  }
 0x1b9   : > { %12193 = vmatpush1.bf16.msra.mxu0 %v13934_v28  ;;  %11702 = vmatprep.subr.bf16.mxu1 %v13935_v29  ;;  %v13964_v48 = vld [vmem:[%s16814_s18 + $0xc70] ss:$8 sps:$4 sm:$0xff]   ;;  %v13967_v50 = vld [vmem:[%s16814_s18 + $0xc84] ss:$8 sps:$4 sm:$0xff]   ;;  %v13970_v52 = vld [vmem:[%s16814_s18 + $0xc80] ss:$8 sps:$4 sm:$0xff]  }
 0x1ba   : > { %12194 = vmatprep.subr.bf16.mxu0 %v13937_v30  ;;  %v15157_v54 = vmov 1966171168   ;;  %v13971_v56 = vld [vmem:[%s16814_s18 + $0x94] ss:$8 sps:$4 sm:$0xff]   ;;  %v13975_v58 = vld [vmem:[%s16814_s18 + $0x90] ss:$8 sps:$4 sm:$0xff]  }
 0x1bb   : > { %v7421_v55 = vunpack.c.l.s4 %v15157_v54  ;;  %v13973_v57 = vld [vmem:[%s16814_s18 + $0xc94] ss:$8 sps:$4 sm:$0xff]   ;;  %v16859_v59 = vshrl.u32 %v7402_v53, 7  ;;  %v13976_v61 = vld [vmem:[%s16814_s18 + $0xc90] ss:$8 sps:$4 sm:$0xff]   ;;  %vm12827_vm1 = vcmask 74752  }
 0x1bc   : > { %11703 = vmatpush1.bf16.msra.mxu1 %v13939_v31  ;;  %v13977_v62 = vld [vmem:[%s16814_s18 + $0xa4] ss:$8 sps:$4 sm:$0xff]   ;;  %v13981_v0 = vld [vmem:[%s16814_s18 + $0xa0] ss:$8 sps:$4 sm:$0xff]   ;;  %v13983_v3 = vld [vmem:[%s16814_s18 + $0xb4] ss:$8 sps:$4 sm:$0xff]  }
 0x1bd   : > { %12195 = vmatpush1.bf16.msra.mxu0 %v13940_v32  ;;  %11704 = vmatprep.subr.bf16.mxu1 %v13941_v33  ;;  %v7422_v60 = vunpack.c.0.s8 %v7421_v55  ;;  %v13979_v63 = vld [vmem:[%s16814_s18 + $0xca4] ss:$8 sps:$4 sm:$0xff]   ;;  %v13982_v1 = vld [vmem:[%s16814_s18 + $0xca0] ss:$8 sps:$4 sm:$0xff]   ;;  %v13985_v4 = vld [vmem:[%s16814_s18 + $0xcb4] ss:$8 sps:$4 sm:$0xff]  }
 0x1be   : > { %12196 = vmatprep.subr.bf16.mxu0 %v13943_v34  ;;  %v16874_v5 = vld [vmem:[%s17924_s0] sm:$0xff]  ;;  %v13987_v6 = vld [vmem:[%s16814_s18 + $0xb0] ss:$8 sps:$4 sm:$0xff]   ;;  %p13713_p11 = scmp.ne.s32.totalorder %s15206_s21, 1 }
 0x1bf   : > { %v16867_v2 = vsub.s32 %v7422_v60, %v16859_v59  ;;  %v13988_v8 = vld [vmem:[%s16814_s18 + $0xcb0] ss:$8 sps:$4 sm:$0xff]   ;;  %v13989_v10 = vld [vmem:[%s16814_s18 + $0xc4] ss:$8 sps:$4 sm:$0xff]   ;;  %v13993_v16 = vld [vmem:[%s16814_s18 + $0xc0] ss:$8 sps:$4 sm:$0xff]  }
 0x1c0   : > { %11705 = vmatpush1.bf16.msra.mxu1 %v13945_v35  ;;  %v16883_v9 = vld [vmem:[%s17924_s0 + $0x18] sm:$0xff]  ;;  %v13991_v11 = vld [vmem:[%s16814_s18 + $0xcc4] ss:$8 sps:$4 sm:$0xff]   ;;  %v13994_v17 = vld [vmem:[%s16814_s18 + $0xcc0] ss:$8 sps:$4 sm:$0xff]  }
 0x1c1   : > { %12197 = vmatpush1.bf16.msra.mxu0 %v13946_v36  ;;  %11706 = vmatprep.subr.bf16.mxu1 %v13947_v37  ;;  %v7426_v7 = vrot.slane %v16874_v5, %v16867_v2  ;;  %v7573_v13 = vrot.slane %v16883_v9, %v16867_v2  ;;  %v13995_v18 = vld [vmem:[%s16814_s18 + $0xd4] ss:$8 sps:$4 sm:$0xff]   ;;  %v13999_v21 = vld [vmem:[%s16814_s18 + $0xd0] ss:$8 sps:$4 sm:$0xff]   ;;  %v14001_v23 = vld [vmem:[%s16814_s18 + $0xe4] ss:$8 sps:$4 sm:$0xff]  }
 0x1c2   : > { %12198 = vmatprep.subr.bf16.mxu0 %v13949_v38  ;;  %v13997_v19 = vld [vmem:[%s16814_s18 + $0xcd4] ss:$8 sps:$4 sm:$0xff]   ;;  %v14000_v22 = vld [vmem:[%s16814_s18 + $0xcd0] ss:$8 sps:$4 sm:$0xff]   ;;  %v14003_v24 = vld [vmem:[%s16814_s18 + $0xce4] ss:$8 sps:$4 sm:$0xff]  }
 0x1c3   : > { %v7434_v12 = vcombine.high %v7426_v7, %v7426_v7  ;;  %v7581_v15 = vcombine.high %v7573_v13, %v7573_v13  ;;  %v14005_v25 = vld [vmem:[%s16814_s18 + $0xe0] ss:$8 sps:$4 sm:$0xff]   ;;  %v14007_v27 = vld [vmem:[%s16814_s18 + $0xf4] ss:$8 sps:$4 sm:$0xff]   ;;  %v14011_v29 = vld [vmem:[%s16814_s18 + $0xf0] ss:$8 sps:$4 sm:$0xff]   ;;  %v16908_v33 = vrot.slane %v7426_v7, %v16867_v2  ;;  %v16911_v34 = vrot.slane %v7573_v13, %v16867_v2 }
 0x1c4   : > { %11707 = vmatpush1.bf16.msra.mxu1 %v13951_v39  ;;  %v14006_v26 = vld [vmem:[%s16814_s18 + $0xce0] ss:$8 sps:$4 sm:$0xff]   ;;  %v14009_v28 = vld [vmem:[%s16814_s18 + $0xcf4] ss:$8 sps:$4 sm:$0xff]   ;;  %v14012_v30 = vld [vmem:[%s16814_s18 + $0xcf0] ss:$8 sps:$4 sm:$0xff]  }
 0x1c5   : > { %12199 = vmatpush1.bf16.msra.mxu0 %v13952_v40  ;;  %11708 = vmatprep.subr.bf16.mxu1 %v13953_v41  ;;  %v7456_v14 = vrot.slane %v7434_v12, %v16867_v2  ;;  %v7603_v20 = vrot.slane %v7581_v15, %v16867_v2  ;;  %v14016_v31 = vld [vmem:[%s16814_s18 + $0x104] ss:$8 sps:$4 sm:$0xff]   ;;  %v14014_v35 = vld [vmem:[%s16814_s18 + $0x100] ss:$8 sps:$4 sm:$0xff]   ;;  %v14023_v37 = vld [vmem:[%s16814_s18 + $0x114] ss:$8 sps:$4 sm:$0xff]  }
 0x1c6   : > { %12200 = vmatprep.subr.bf16.mxu0 %v13955_v42  ;;  %v14020_v32 = vld [vmem:[%s16814_s18 + $0xd04] ss:$8 sps:$4 sm:$0xff]   ;;  %v14018_v36 = vld [vmem:[%s16814_s18 + $0xd00] ss:$8 sps:$4 sm:$0xff]   ;;  %v14026_v38 = vld [vmem:[%s16814_s18 + $0xd14] ss:$8 sps:$4 sm:$0xff]  }
 0x1c7   : > { %11728 = vmatprep.mubr.bf16.mxu1 %v7456_v14  ;;  %12220 = vmatprep.mubr.bf16.mxu0 %v7603_v20  ;;  %v7466_v39 = vcombine.high %v7456_v14, %v7456_v14  ;;  %v7613_v40 = vcombine.high %v7603_v20, %v7603_v20  ;;  %v14021_v41 = vld [vmem:[%s16814_s18 + $0x110] ss:$8 sps:$4 sm:$0xff]   ;;  %v14039_v53 = vld [vmem:[%s16814_s18 + $0x140] ss:$8 sps:$4 sm:$0xff]   ;;  %v14047_v55 = vld [vmem:[%s16814_s18 + $0x154] ss:$8 sps:$4 sm:$0xff]  }
 0x1c8   : > { %11709 = vmatpush1.bf16.msra.mxu1 %v13957_v43  ;;  %v14024_v42 = vld [vmem:[%s16814_s18 + $0xd10] ss:$8 sps:$4 sm:$0xff]   ;;  %v14029_v43 = vld [vmem:[%s16814_s18 + $0x124] ss:$8 sps:$4 sm:$0xff]   ;;  %v14042_v54 = vld [vmem:[%s16814_s18 + $0xd40] ss:$8 sps:$4 sm:$0xff]  }
 0x1c9   : > { %12201 = vmatpush1.bf16.msra.mxu0 %v13958_v44  ;;  %11710 = vmatprep.subr.bf16.mxu1 %v13959_v45  ;;  %v14032_v44 = vld [vmem:[%s16814_s18 + $0xd24] ss:$8 sps:$4 sm:$0xff]   ;;  %v14027_v45 = vld [vmem:[%s16814_s18 + $0x120] ss:$8 sps:$4 sm:$0xff]   ;;  %v14074_v12 = vld [vmem:[%s16814_s18 + $0xd94] ss:$8 sps:$4 sm:$0xff]  }
 0x1ca   : > { %12202 = vmatprep.subr.bf16.mxu0 %v13961_v46  ;;  %v14030_v46 = vld [vmem:[%s16814_s18 + $0xd20] ss:$8 sps:$4 sm:$0xff]   ;;  %v14053_v60 = vld [vmem:[%s16814_s18 + $0x164] ss:$8 sps:$4 sm:$0xff]   ;;  %v14069_v13 = vld [vmem:[%s16814_s18 + $0x190] ss:$8 sps:$4 sm:$0xff]  }
 0x1cb   : > { %v14068_v7 = vld [vmem:[%s16814_s18 + $0xd84] ss:$8 sps:$4 sm:$0xff]   ;;  %v14072_v14 = vld [vmem:[%s16814_s18 + $0xd90] ss:$8 sps:$4 sm:$0xff]   ;;  %v14086_v20 = vld [vmem:[%s16814_s18 + $0xdb4] ss:$8 sps:$4 sm:$0xff]  }
 0x1cc   : > { %11711 = vmatpush1.bf16.msra.mxu1 %v13963_v47  ;;  %v14035_v47 = vld [vmem:[%s16814_s18 + $0x134] ss:$8 sps:$4 sm:$0xff]   ;;  %v14077_v15 = vld [vmem:[%s16814_s18 + $0x1a4] ss:$8 sps:$4 sm:$0xff]  }
 0x1cd   : > { %12203 = vmatpush1.bf16.msra.mxu0 %v13964_v48  ;;  %11712 = vmatprep.subr.bf16.mxu1 %v13965_v49  ;;  %v14038_v48 = vld [vmem:[%s16814_s18 + $0xd34] ss:$8 sps:$4 sm:$0xff]   ;;  %v14033_v49 = vld [vmem:[%s16814_s18 + $0x130] ss:$8 sps:$4 sm:$0xff]  }
 0x1ce   : > { %12204 = vmatprep.subr.bf16.mxu0 %v13967_v50  ;;  %v14036_v50 = vld [vmem:[%s16814_s18 + $0xd30] ss:$8 sps:$4 sm:$0xff]  }
 0x1d0   : > { %11713 = vmatpush1.bf16.msra.mxu1 %v13969_v51  ;;  %v14041_v51 = vld [vmem:[%s16814_s18 + $0x144] ss:$8 sps:$4 sm:$0xff]  }
 0x1d1   : > { %12205 = vmatpush1.bf16.msra.mxu0 %v13970_v52  ;;  %11714 = vmatprep.subr.bf16.mxu1 %v13971_v56  ;;  %v14044_v52 = vld [vmem:[%s16814_s18 + $0xd44] ss:$8 sps:$4 sm:$0xff]   ;;  %v14050_v56 = vld [vmem:[%s16814_s18 + $0xd54] ss:$8 sps:$4 sm:$0xff]  }
 0x1d2   : > { %12206 = vmatprep.subr.bf16.mxu0 %v13973_v57  ;;  %v14045_v57 = vld [vmem:[%s16814_s18 + $0x150] ss:$8 sps:$4 sm:$0xff]  }
 0x1d4   : > { %11715 = vmatpush1.bf16.msra.mxu1 %v13975_v58  ;;  %v14048_v58 = vld [vmem:[%s16814_s18 + $0xd50] ss:$8 sps:$4 sm:$0xff]  }
 0x1d5   : > { %12207 = vmatpush1.bf16.msra.mxu0 %v13976_v61  ;;  %11716 = vmatprep.subr.bf16.mxu1 %v13977_v62  ;;  %v14056_v61 = vld [vmem:[%s16814_s18 + $0xd64] ss:$8 sps:$4 sm:$0xff]   ;;  %v14051_v62 = vld [vmem:[%s16814_s18 + $0x160] ss:$8 sps:$4 sm:$0xff]  }
 0x1d6   : > { %12208 = vmatprep.subr.bf16.mxu0 %v13979_v63  ;;  %v14054_v63 = vld [vmem:[%s16814_s18 + $0xd60] ss:$8 sps:$4 sm:$0xff]  }
 0x1d8   : > { %11717 = vmatpush1.bf16.msra.mxu1 %v13981_v0  ;;  %v14059_v0 = vld [vmem:[%s16814_s18 + $0x174] ss:$8 sps:$4 sm:$0xff]  }
 0x1d9   : > { %12209 = vmatpush1.bf16.msra.mxu0 %v13982_v1  ;;  %11718 = vmatprep.subr.bf16.mxu1 %v13983_v3  ;;  %v14062_v1 = vld [vmem:[%s16814_s18 + $0xd74] ss:$8 sps:$4 sm:$0xff]   ;;  %v14057_v3 = vld [vmem:[%s16814_s18 + $0x170] ss:$8 sps:$4 sm:$0xff]  }
 0x1da   : > { %12210 = vmatprep.subr.bf16.mxu0 %v13985_v4  ;;  %v14060_v4 = vld [vmem:[%s16814_s18 + $0xd70] ss:$8 sps:$4 sm:$0xff]  }
 0x1dc   : > { %11719 = vmatpush1.bf16.msra.mxu1 %v13987_v6  ;;  %v14065_v6 = vld [vmem:[%s16814_s18 + $0x184] ss:$8 sps:$4 sm:$0xff]  }
 0x1dd   : > { %12211 = vmatpush1.bf16.msra.mxu0 %v13988_v8  ;;  %11720 = vmatprep.subr.bf16.mxu1 %v13989_v10  ;;  %v14063_v8 = vld [vmem:[%s16814_s18 + $0x180] ss:$8 sps:$4 sm:$0xff]  }
 0x1de   : > { %12212 = vmatprep.subr.bf16.mxu0 %v13991_v11  ;;  %v14066_v10 = vld [vmem:[%s16814_s18 + $0xd80] ss:$8 sps:$4 sm:$0xff]   ;;  %v14071_v11 = vld [vmem:[%s16814_s18 + $0x194] ss:$8 sps:$4 sm:$0xff]  }
 0x1e0   : > { %11721 = vmatpush1.bf16.msra.mxu1 %v13993_v16  ;;  %v14080_v16 = vld [vmem:[%s16814_s18 + $0xda4] ss:$8 sps:$4 sm:$0xff]  }
 0x1e1   : > { %12213 = vmatpush1.bf16.msra.mxu0 %v13994_v17  ;;  %11722 = vmatprep.subr.bf16.mxu1 %v13995_v18  ;;  %v14075_v17 = vld [vmem:[%s16814_s18 + $0x1a0] ss:$8 sps:$4 sm:$0xff]  }
 0x1e2   : > { %12214 = vmatprep.subr.bf16.mxu0 %v13997_v19  ;;  %v14078_v18 = vld [vmem:[%s16814_s18 + $0xda0] ss:$8 sps:$4 sm:$0xff]   ;;  %v14083_v19 = vld [vmem:[%s16814_s18 + $0x1b4] ss:$8 sps:$4 sm:$0xff]  }
 0x1e4   : > { %11723 = vmatpush1.bf16.msra.mxu1 %v13999_v21  ;;  %v14081_v21 = vld [vmem:[%s16814_s18 + $0x1b0] ss:$8 sps:$4 sm:$0xff]  }
 0x1e5   : > { %12215 = vmatpush1.bf16.msra.mxu0 %v14000_v22  ;;  %11724 = vmatprep.subr.bf16.mxu1 %v14001_v23  ;;  %v14084_v22 = vld [vmem:[%s16814_s18 + $0xdb0] ss:$8 sps:$4 sm:$0xff]   ;;  %v14089_v23 = vld [vmem:[%s16814_s18 + $0x1c4] ss:$8 sps:$4 sm:$0xff]  }
 0x1e6   : > { %12216 = vmatprep.subr.bf16.mxu0 %v14003_v24  ;;  %v14092_v24 = vld [vmem:[%s16814_s18 + $0xdc4] ss:$8 sps:$4 sm:$0xff]  }
 0x1e8   : > { %11725 = vmatpush1.bf16.msra.mxu1 %v14005_v25  ;;  %v14087_v25 = vld [vmem:[%s16814_s18 + $0x1c0] ss:$8 sps:$4 sm:$0xff]  }
 0x1e9   : > { %12217 = vmatpush1.bf16.msra.mxu0 %v14006_v26  ;;  %11726 = vmatprep.subr.bf16.mxu1 %v14007_v27  ;;  %v14090_v26 = vld [vmem:[%s16814_s18 + $0xdc0] ss:$8 sps:$4 sm:$0xff]   ;;  %v14095_v27 = vld [vmem:[%s16814_s18 + $0x1d4] ss:$8 sps:$4 sm:$0xff]  }
 0x1ea   : > { %12218 = vmatprep.subr.bf16.mxu0 %v14009_v28  ;;  %v14098_v28 = vld [vmem:[%s16814_s18 + $0xdd4] ss:$8 sps:$4 sm:$0xff]  }
 0x1ec   : > { %11727 = vmatpush1.bf16.msra.mxu1 %v14011_v29  ;;  %v14093_v29 = vld [vmem:[%s16814_s18 + $0x1d0] ss:$8 sps:$4 sm:$0xff]  }
 0x1ed   : > { %12219 = vmatpush1.bf16.msra.mxu0 %v14012_v30  ;;  %11737 = vmatprep.subr.bf16.mxu1 %v14016_v31  ;;  %v14096_v30 = vld [vmem:[%s16814_s18 + $0xdd0] ss:$8 sps:$4 sm:$0xff]   ;;  %v14101_v31 = vld [vmem:[%s16814_s18 + $0x1e4] ss:$8 sps:$4 sm:$0xff]  }
 0x1ee   : > { %12229 = vmatprep.subr.bf16.mxu0 %v14020_v32  ;;  %v14104_v32 = vld [vmem:[%s16814_s18 + $0xde4] ss:$8 sps:$4 sm:$0xff]  }
 0x1ef   : > { %11729 = vmatmul.mubr.bf16.vlgmr.msra.gmra.mrb[0].mxu1 %v16908_v33 }
 0x1f0   : > { %12221 = vmatmul.mubr.bf16.vlgmr.msra.gmra.mrb[0].mxu0 %v16911_v34  ;;  %11738 = vmatpush1.bf16.msra.mxu1 %v14014_v35  ;;  %v7419_v35 = vcombine.high %v16874_v5, %v16874_v5  ;;  %v14105_v5 = vld [vmem:[%s16814_s18 + $0x1f0] ss:$8 sps:$4 sm:$0xff]  }
 0x1f1   : > { %12230 = vmatpush1.bf16.msra.mxu0 %v14018_v36  ;;  %11739 = vmatprep.subr.bf16.mxu1 %v14023_v37  ;;  %v7566_v36 = vcombine.high %v16883_v9, %v16883_v9  ;;  %v14099_v37 = vld [vmem:[%s16814_s18 + $0x1e0] ss:$8 sps:$4 sm:$0xff]   ;;  %v14108_v9 = vld [vmem:[%s16814_s18 + $0xdf0] ss:$8 sps:$4 sm:$0xff]  }
 0x1f2   : > { %12231 = vmatprep.subr.bf16.mxu0 %v14026_v38  ;;  %11769 = vmatprep.mubr.bf16.mxu1 %v7466_v39  ;;  %v14102_v38 = vld [vmem:[%s16814_s18 + $0xde0] ss:$8 sps:$4 sm:$0xff]   ;;  %v14107_v39 = vld [vmem:[%s16814_s18 + $0x1f4] ss:$8 sps:$4 sm:$0xff]  }
 0x1f3   : > { %12261 = vmatprep.mubr.bf16.mxu0 %v7613_v40  ;;  %v14110_v40 = vld [vmem:[%s16814_s18 + $0xdf4] ss:$8 sps:$4 sm:$0xff]  }
 0x1f4   : > { %11740 = vmatpush1.bf16.msra.mxu1 %v14021_v41  ;;  %v16980_v41 = vrot.slane %v7419_v35, %v16867_v2  ;;  %v14177_v35 = vld [vmem:[%s16814_s18 + $0x2b0] ss:$8 sps:$4 sm:$0xff]  }
 0x1f5   : > { %12232 = vmatpush1.bf16.msra.mxu0 %v14024_v42  ;;  %11741 = vmatprep.subr.bf16.mxu1 %v14029_v43  ;;  %v16983_v42 = vrot.slane %v7566_v36, %v16867_v2  ;;  %v14113_v43 = vld [vmem:[%s16814_s18 + $0x204] ss:$8 sps:$4 sm:$0xff]   ;;  %v14180_v36 = vld [vmem:[%s16814_s18 + $0xeb0] ss:$8 sps:$4 sm:$0xff]  }
 0x1f6   : > { %12233 = vmatprep.subr.bf16.mxu0 %v14032_v44  ;;  %v14116_v44 = vld [vmem:[%s16814_s18 + $0xe04] ss:$8 sps:$4 sm:$0xff]  }
 0x1f8   : > { %11742 = vmatpush1.bf16.msra.mxu1 %v14027_v45  ;;  %v7435_v45 = vcombine.high %v16980_v41, %v16980_v41 }
 0x1f9   : > { %12234 = vmatpush1.bf16.msra.mxu0 %v14030_v46  ;;  %11743 = vmatprep.subr.bf16.mxu1 %v14035_v47  ;;  %v7582_v46 = vcombine.high %v16983_v42, %v16983_v42  ;;  %v7464_v47 = vcombine.high %v16908_v33, %v16908_v33 }
 0x1fa   : > { %12235 = vmatprep.subr.bf16.mxu0 %v14038_v48  ;;  %v7611_v48 = vcombine.high %v16911_v34, %v16911_v34  ;;  %v14117_v34 = vld [vmem:[%s16814_s18 + $0x210] ss:$8 sps:$4 sm:$0xff]  }
 0x1fb   : > { %v17005_v33 = vrot.slane %v7582_v46, %v16867_v2  ;;  %v14200_v46 = vld [vmem:[%s16814_s18 + $0xee4] ss:$8 sps:$4 sm:$0xff]  }
 0x1fc   : > { %11744 = vmatpush1.bf16.msra.mxu1 %v14033_v49  ;;  %v14111_v49 = vld [vmem:[%s16814_s18 + $0x200] ss:$8 sps:$4 sm:$0xff]  }
 0x1fd   : > { %12236 = vmatpush1.bf16.msra.mxu0 %v14036_v50  ;;  %11745 = vmatprep.subr.bf16.mxu1 %v14041_v51  ;;  %v14114_v50 = vld [vmem:[%s16814_s18 + $0xe00] ss:$8 sps:$4 sm:$0xff]   ;;  %v14119_v51 = vld [vmem:[%s16814_s18 + $0x214] ss:$8 sps:$4 sm:$0xff]  }
 0x1fe   : > { %12237 = vmatprep.subr.bf16.mxu0 %v14044_v52  ;;  %v14122_v52 = vld [vmem:[%s16814_s18 + $0xe14] ss:$8 sps:$4 sm:$0xff]  }
 0x200   : > { %11746 = vmatpush1.bf16.msra.mxu1 %v14039_v53  ;;  %v17002_v53 = vrot.slane %v7435_v45, %v16867_v2  ;;  %v14197_v45 = vld [vmem:[%s16814_s18 + $0x2e4] ss:$8 sps:$4 sm:$0xff]  }
 0x201   : > { %12238 = vmatpush1.bf16.msra.mxu0 %v14042_v54  ;;  %11747 = vmatprep.subr.bf16.mxu1 %v14047_v55  ;;  %v14120_v54 = vld [vmem:[%s16814_s18 + $0xe10] ss:$8 sps:$4 sm:$0xff]   ;;  %v14125_v55 = vld [vmem:[%s16814_s18 + $0x224] ss:$8 sps:$4 sm:$0xff]  }
 0x202   : > { %12239 = vmatprep.subr.bf16.mxu0 %v14050_v56  ;;  %v14128_v56 = vld [vmem:[%s16814_s18 + $0xe24] ss:$8 sps:$4 sm:$0xff]  }
 0x204   : > { %11748 = vmatpush1.bf16.msra.mxu1 %v14045_v57  ;;  %v14123_v57 = vld [vmem:[%s16814_s18 + $0x220] ss:$8 sps:$4 sm:$0xff]  }
 0x205   : > { %12240 = vmatpush1.bf16.msra.mxu0 %v14048_v58  ;;  %11749 = vmatprep.subr.bf16.mxu1 %v14053_v60  ;;  %v14126_v58 = vld [vmem:[%s16814_s18 + $0xe20] ss:$8 sps:$4 sm:$0xff]   ;;  %v14131_v60 = vld [vmem:[%s16814_s18 + $0x234] ss:$8 sps:$4 sm:$0xff]  }
 0x206   : > { %12241 = vmatprep.subr.bf16.mxu0 %v14056_v61  ;;  %v14134_v61 = vld [vmem:[%s16814_s18 + $0xe34] ss:$8 sps:$4 sm:$0xff]  }
 0x208   : > { %11750 = vmatpush1.bf16.msra.mxu1 %v14051_v62  ;;  %v14129_v62 = vld [vmem:[%s16814_s18 + $0x230] ss:$8 sps:$4 sm:$0xff]  }
 0x209   : > { %12242 = vmatpush1.bf16.msra.mxu0 %v14054_v63  ;;  %11751 = vmatprep.subr.bf16.mxu1 %v14059_v0  ;;  %v14132_v63 = vld [vmem:[%s16814_s18 + $0xe30] ss:$8 sps:$4 sm:$0xff]   ;;  %v14137_v0 = vld [vmem:[%s16814_s18 + $0x244] ss:$8 sps:$4 sm:$0xff]  }
 0x20a   : > { %12243 = vmatprep.subr.bf16.mxu0 %v14062_v1  ;;  %v14140_v1 = vld [vmem:[%s16814_s18 + $0xe44] ss:$8 sps:$4 sm:$0xff]  }
 0x20c   : > { %11752 = vmatpush1.bf16.msra.mxu1 %v14057_v3  ;;  %v14135_v3 = vld [vmem:[%s16814_s18 + $0x240] ss:$8 sps:$4 sm:$0xff]  }
 0x20d   : > { %12244 = vmatpush1.bf16.msra.mxu0 %v14060_v4  ;;  %11753 = vmatprep.subr.bf16.mxu1 %v14065_v6  ;;  %v14138_v4 = vld [vmem:[%s16814_s18 + $0xe40] ss:$8 sps:$4 sm:$0xff]   ;;  %v14143_v6 = vld [vmem:[%s16814_s18 + $0x254] ss:$8 sps:$4 sm:$0xff]  }
 0x20e   : > { %12245 = vmatprep.subr.bf16.mxu0 %v14068_v7  ;;  %v14146_v7 = vld [vmem:[%s16814_s18 + $0xe54] ss:$8 sps:$4 sm:$0xff]  }
 0x210   : > { %11754 = vmatpush1.bf16.msra.mxu1 %v14063_v8  ;;  %v14141_v8 = vld [vmem:[%s16814_s18 + $0x250] ss:$8 sps:$4 sm:$0xff]  }
 0x211   : > { %12246 = vmatpush1.bf16.msra.mxu0 %v14066_v10  ;;  %11755 = vmatprep.subr.bf16.mxu1 %v14071_v11  ;;  %v14144_v10 = vld [vmem:[%s16814_s18 + $0xe50] ss:$8 sps:$4 sm:$0xff]   ;;  %v14149_v11 = vld [vmem:[%s16814_s18 + $0x264] ss:$8 sps:$4 sm:$0xff]  }
 0x212   : > { %12247 = vmatprep.subr.bf16.mxu0 %v14074_v12  ;;  %v14152_v12 = vld [vmem:[%s16814_s18 + $0xe64] ss:$8 sps:$4 sm:$0xff]  }
 0x214   : > { %11756 = vmatpush1.bf16.msra.mxu1 %v14069_v13  ;;  %v14147_v13 = vld [vmem:[%s16814_s18 + $0x260] ss:$8 sps:$4 sm:$0xff]  }
 0x215   : > { %12248 = vmatpush1.bf16.msra.mxu0 %v14072_v14  ;;  %11757 = vmatprep.subr.bf16.mxu1 %v14077_v15  ;;  %v14150_v14 = vld [vmem:[%s16814_s18 + $0xe60] ss:$8 sps:$4 sm:$0xff]   ;;  %v14155_v15 = vld [vmem:[%s16814_s18 + $0x274] ss:$8 sps:$4 sm:$0xff]  }
 0x216   : > { %12249 = vmatprep.subr.bf16.mxu0 %v14080_v16  ;;  %v14158_v16 = vld [vmem:[%s16814_s18 + $0xe74] ss:$8 sps:$4 sm:$0xff]  }
 0x218   : > { %11758 = vmatpush1.bf16.msra.mxu1 %v14075_v17  ;;  %v14153_v17 = vld [vmem:[%s16814_s18 + $0x270] ss:$8 sps:$4 sm:$0xff]  }
 0x219   : > { %12250 = vmatpush1.bf16.msra.mxu0 %v14078_v18  ;;  %11759 = vmatprep.subr.bf16.mxu1 %v14083_v19  ;;  %v14156_v18 = vld [vmem:[%s16814_s18 + $0xe70] ss:$8 sps:$4 sm:$0xff]   ;;  %v14161_v19 = vld [vmem:[%s16814_s18 + $0x284] ss:$8 sps:$4 sm:$0xff]  }
 0x21a   : > { %12251 = vmatprep.subr.bf16.mxu0 %v14086_v20  ;;  %v14164_v20 = vld [vmem:[%s16814_s18 + $0xe84] ss:$8 sps:$4 sm:$0xff]  }
 0x21c   : > { %11760 = vmatpush1.bf16.msra.mxu1 %v14081_v21  ;;  %v14159_v21 = vld [vmem:[%s16814_s18 + $0x280] ss:$8 sps:$4 sm:$0xff]  }
 0x21d   : > { %12252 = vmatpush1.bf16.msra.mxu0 %v14084_v22  ;;  %11761 = vmatprep.subr.bf16.mxu1 %v14089_v23  ;;  %v14162_v22 = vld [vmem:[%s16814_s18 + $0xe80] ss:$8 sps:$4 sm:$0xff]   ;;  %v14167_v23 = vld [vmem:[%s16814_s18 + $0x294] ss:$8 sps:$4 sm:$0xff]  }
 0x21e   : > { %12253 = vmatprep.subr.bf16.mxu0 %v14092_v24  ;;  %v14170_v24 = vld [vmem:[%s16814_s18 + $0xe94] ss:$8 sps:$4 sm:$0xff]  }
 0x220   : > { %11762 = vmatpush1.bf16.msra.mxu1 %v14087_v25  ;;  %v14165_v25 = vld [vmem:[%s16814_s18 + $0x290] ss:$8 sps:$4 sm:$0xff]  }
 0x221   : > { %12254 = vmatpush1.bf16.msra.mxu0 %v14090_v26  ;;  %11763 = vmatprep.subr.bf16.mxu1 %v14095_v27  ;;  %v14168_v26 = vld [vmem:[%s16814_s18 + $0xe90] ss:$8 sps:$4 sm:$0xff]   ;;  %v14173_v27 = vld [vmem:[%s16814_s18 + $0x2a4] ss:$8 sps:$4 sm:$0xff]  }
 0x222   : > { %12255 = vmatprep.subr.bf16.mxu0 %v14098_v28  ;;  %v14176_v28 = vld [vmem:[%s16814_s18 + $0xea4] ss:$8 sps:$4 sm:$0xff]  }
 0x224   : > { %11764 = vmatpush1.bf16.msra.mxu1 %v14093_v29  ;;  %v14171_v29 = vld [vmem:[%s16814_s18 + $0x2a0] ss:$8 sps:$4 sm:$0xff]  }
 0x225   : > { %12256 = vmatpush1.bf16.msra.mxu0 %v14096_v30  ;;  %11765 = vmatprep.subr.bf16.mxu1 %v14101_v31  ;;  %v14174_v30 = vld [vmem:[%s16814_s18 + $0xea0] ss:$8 sps:$4 sm:$0xff]   ;;  %v14179_v31 = vld [vmem:[%s16814_s18 + $0x2b4] ss:$8 sps:$4 sm:$0xff]  }
 0x226   : > { %12257 = vmatprep.subr.bf16.mxu0 %v14104_v32  ;;  %v14182_v32 = vld [vmem:[%s16814_s18 + $0xeb4] ss:$8 sps:$4 sm:$0xff]  }
 0x228   : > { %11766 = vmatpush1.bf16.msra.mxu1 %v14099_v37  ;;  %v14185_v37 = vld [vmem:[%s16814_s18 + $0x2c4] ss:$8 sps:$4 sm:$0xff]  }
 0x229   : > { %12258 = vmatpush1.bf16.msra.mxu0 %v14102_v38  ;;  %11767 = vmatprep.subr.bf16.mxu1 %v14107_v39  ;;  %v14188_v38 = vld [vmem:[%s16814_s18 + $0xec4] ss:$8 sps:$4 sm:$0xff]   ;;  %v14183_v39 = vld [vmem:[%s16814_s18 + $0x2c0] ss:$8 sps:$4 sm:$0xff]  }
 0x22a   : > { %12259 = vmatprep.subr.bf16.mxu0 %v14110_v40  ;;  %v14186_v40 = vld [vmem:[%s16814_s18 + $0xec0] ss:$8 sps:$4 sm:$0xff]  }
 0x22c   : > { %11768 = vmatpush1.bf16.msra.mxu1 %v14105_v5  ;;  %v14191_v5 = vld [vmem:[%s16814_s18 + $0x2d4] ss:$8 sps:$4 sm:$0xff]  }
 0x22d   : > { %12260 = vmatpush1.bf16.msra.mxu0 %v14108_v9  ;;  %11778 = vmatprep.subr.bf16.mxu1 %v14113_v43  ;;  %v14194_v9 = vld [vmem:[%s16814_s18 + $0xed4] ss:$8 sps:$4 sm:$0xff]   ;;  %v14189_v43 = vld [vmem:[%s16814_s18 + $0x2d0] ss:$8 sps:$4 sm:$0xff]  }
 0x22e   : > { %12270 = vmatprep.subr.bf16.mxu0 %v14116_v44  ;;  %v14192_v44 = vld [vmem:[%s16814_s18 + $0xed0] ss:$8 sps:$4 sm:$0xff]  }
 0x22f   : > { %11770 = vmatmul.mubr.bf16.vlgmr.msra.gmra.mrb[0].mxu1 %v7464_v47  ;;  %v14195_v47 = vld [vmem:[%s16814_s18 + $0x2e0] ss:$8 sps:$4 sm:$0xff]  }
 0x230   : > { %12262 = vmatmul.mubr.bf16.vlgmr.msra.gmra.mrb[0].mxu0 %v7611_v48  ;;  %11779 = vmatpush1.bf16.msra.mxu1 %v14111_v49  ;;  %v14198_v48 = vld [vmem:[%s16814_s18 + $0xee0] ss:$8 sps:$4 sm:$0xff]   ;;  %v14203_v49 = vld [vmem:[%s16814_s18 + $0x2f4] ss:$8 sps:$4 sm:$0xff]  }
 0x231   : > { %12271 = vmatpush1.bf16.msra.mxu0 %v14114_v50  ;;  %11780 = vmatprep.subr.bf16.mxu1 %v14119_v51  ;;  %v14206_v50 = vld [vmem:[%s16814_s18 + $0xef4] ss:$8 sps:$4 sm:$0xff]   ;;  %v14201_v51 = vld [vmem:[%s16814_s18 + $0x2f0] ss:$8 sps:$4 sm:$0xff]  }
 0x232   : > { %12272 = vmatprep.subr.bf16.mxu0 %v14122_v52  ;;  %11810 = vmatprep.mubr.bf16.mxu1 %v17002_v53  ;;  %v14204_v52 = vld [vmem:[%s16814_s18 + $0xef0] ss:$8 sps:$4 sm:$0xff]  }
 0x233   : > { %12302 = vmatprep.mubr.bf16.mxu0 %v17005_v33 }
 0x234   : > { %11781 = vmatpush1.bf16.msra.mxu1 %v14117_v34  ;;  %v14209_v34 = vld [vmem:[%s16814_s18 + $0x304] ss:$8 sps:$4 sm:$0xff]  }
 0x235   : > { %12273 = vmatpush1.bf16.msra.mxu0 %v14120_v54  ;;  %11782 = vmatprep.subr.bf16.mxu1 %v14125_v55  ;;  %v14212_v54 = vld [vmem:[%s16814_s18 + $0xf04] ss:$8 sps:$4 sm:$0xff]   ;;  %v17071_v55 = vrot.slane %v16980_v41, %v16867_v2  ;;  %v7467_v41 = vcombine.high %v17002_v53, %v17002_v53 }
 0x236   : > { %12274 = vmatprep.subr.bf16.mxu0 %v14128_v56  ;;  %v17075_v56 = vrot.slane %v16983_v42, %v16867_v2  ;;  %v14213_v42 = vld [vmem:[%s16814_s18 + $0x310] ss:$8 sps:$4 sm:$0xff]   ;;  %v14221_v53 = vld [vmem:[%s16814_s18 + $0x324] ss:$8 sps:$4 sm:$0xff]  }
 0x238   : > { %11783 = vmatpush1.bf16.msra.mxu1 %v14123_v57  ;;  %v14207_v57 = vld [vmem:[%s16814_s18 + $0x300] ss:$8 sps:$4 sm:$0xff]  }
 0x239   : > { %12275 = vmatpush1.bf16.msra.mxu0 %v14126_v58  ;;  %11784 = vmatprep.subr.bf16.mxu1 %v14131_v60  ;;  %v14210_v58 = vld [vmem:[%s16814_s18 + $0xf00] ss:$8 sps:$4 sm:$0xff]   ;;  %v14215_v60 = vld [vmem:[%s16814_s18 + $0x314] ss:$8 sps:$4 sm:$0xff]  }
 0x23a   : > { %12276 = vmatprep.subr.bf16.mxu0 %v14134_v61  ;;  %v14218_v61 = vld [vmem:[%s16814_s18 + $0xf14] ss:$8 sps:$4 sm:$0xff]  }
 0x23c   : > { %11785 = vmatpush1.bf16.msra.mxu1 %v14129_v62  ;;  %v7614_v62 = vcombine.high %v17005_v33, %v17005_v33  ;;  %v14219_v33 = vld [vmem:[%s16814_s18 + $0x320] ss:$8 sps:$4 sm:$0xff]  }
 0x23d   : > { %12277 = vmatpush1.bf16.msra.mxu0 %v14132_v63  ;;  %11786 = vmatprep.subr.bf16.mxu1 %v14137_v0  ;;  %v14216_v63 = vld [vmem:[%s16814_s18 + $0xf10] ss:$8 sps:$4 sm:$0xff]   ;;  %v14224_v0 = vld [vmem:[%s16814_s18 + $0xf24] ss:$8 sps:$4 sm:$0xff]  }
 0x23e   : > { %12278 = vmatprep.subr.bf16.mxu0 %v14140_v1  ;;  %v14222_v1 = vld [vmem:[%s16814_s18 + $0xf20] ss:$8 sps:$4 sm:$0xff]  }
 0x240   : > { %11787 = vmatpush1.bf16.msra.mxu1 %v14135_v3  ;;  %v14227_v3 = vld [vmem:[%s16814_s18 + $0x334] ss:$8 sps:$4 sm:$0xff]  }
 0x241   : > { %12279 = vmatpush1.bf16.msra.mxu0 %v14138_v4  ;;  %11788 = vmatprep.subr.bf16.mxu1 %v14143_v6  ;;  %v14230_v4 = vld [vmem:[%s16814_s18 + $0xf34] ss:$8 sps:$4 sm:$0xff]   ;;  %v14225_v6 = vld [vmem:[%s16814_s18 + $0x330] ss:$8 sps:$4 sm:$0xff]  }
 0x242   : > { %12280 = vmatprep.subr.bf16.mxu0 %v14146_v7  ;;  %v14228_v7 = vld [vmem:[%s16814_s18 + $0xf30] ss:$8 sps:$4 sm:$0xff]  }
 0x244   : > { %11789 = vmatpush1.bf16.msra.mxu1 %v14141_v8  ;;  %v14233_v8 = vld [vmem:[%s16814_s18 + $0x344] ss:$8 sps:$4 sm:$0xff]  }
 0x245   : > { %12281 = vmatpush1.bf16.msra.mxu0 %v14144_v10  ;;  %11790 = vmatprep.subr.bf16.mxu1 %v14149_v11  ;;  %v14236_v10 = vld [vmem:[%s16814_s18 + $0xf44] ss:$8 sps:$4 sm:$0xff]   ;;  %v14231_v11 = vld [vmem:[%s16814_s18 + $0x340] ss:$8 sps:$4 sm:$0xff]  }
 0x246   : > { %12282 = vmatprep.subr.bf16.mxu0 %v14152_v12  ;;  %v14234_v12 = vld [vmem:[%s16814_s18 + $0xf40] ss:$8 sps:$4 sm:$0xff]  }
 0x248   : > { %11791 = vmatpush1.bf16.msra.mxu1 %v14147_v13  ;;  %v14239_v13 = vld [vmem:[%s16814_s18 + $0x354] ss:$8 sps:$4 sm:$0xff]  }
 0x249   : > { %12283 = vmatpush1.bf16.msra.mxu0 %v14150_v14  ;;  %11792 = vmatprep.subr.bf16.mxu1 %v14155_v15  ;;  %v14242_v14 = vld [vmem:[%s16814_s18 + $0xf54] ss:$8 sps:$4 sm:$0xff]   ;;  %v14237_v15 = vld [vmem:[%s16814_s18 + $0x350] ss:$8 sps:$4 sm:$0xff]  }
 0x24a   : > { %12284 = vmatprep.subr.bf16.mxu0 %v14158_v16  ;;  %v14240_v16 = vld [vmem:[%s16814_s18 + $0xf50] ss:$8 sps:$4 sm:$0xff]  }
 0x24c   : > { %11793 = vmatpush1.bf16.msra.mxu1 %v14153_v17  ;;  %v14245_v17 = vld [vmem:[%s16814_s18 + $0x364] ss:$8 sps:$4 sm:$0xff]  }
 0x24d   : > { %12285 = vmatpush1.bf16.msra.mxu0 %v14156_v18  ;;  %11794 = vmatprep.subr.bf16.mxu1 %v14161_v19  ;;  %v14248_v18 = vld [vmem:[%s16814_s18 + $0xf64] ss:$8 sps:$4 sm:$0xff]   ;;  %v14243_v19 = vld [vmem:[%s16814_s18 + $0x360] ss:$8 sps:$4 sm:$0xff]  }
 0x24e   : > { %12286 = vmatprep.subr.bf16.mxu0 %v14164_v20  ;;  %v14246_v20 = vld [vmem:[%s16814_s18 + $0xf60] ss:$8 sps:$4 sm:$0xff]  }
 0x250   : > { %11795 = vmatpush1.bf16.msra.mxu1 %v14159_v21  ;;  %v14251_v21 = vld [vmem:[%s16814_s18 + $0x374] ss:$8 sps:$4 sm:$0xff]  }
 0x251   : > { %12287 = vmatpush1.bf16.msra.mxu0 %v14162_v22  ;;  %11796 = vmatprep.subr.bf16.mxu1 %v14167_v23  ;;  %v14254_v22 = vld [vmem:[%s16814_s18 + $0xf74] ss:$8 sps:$4 sm:$0xff]   ;;  %v14249_v23 = vld [vmem:[%s16814_s18 + $0x370] ss:$8 sps:$4 sm:$0xff]  }
 0x252   : > { %12288 = vmatprep.subr.bf16.mxu0 %v14170_v24  ;;  %v14252_v24 = vld [vmem:[%s16814_s18 + $0xf70] ss:$8 sps:$4 sm:$0xff]  }
 0x254   : > { %11797 = vmatpush1.bf16.msra.mxu1 %v14165_v25  ;;  %v14257_v25 = vld [vmem:[%s16814_s18 + $0x384] ss:$8 sps:$4 sm:$0xff]  }
 0x255   : > { %12289 = vmatpush1.bf16.msra.mxu0 %v14168_v26  ;;  %11798 = vmatprep.subr.bf16.mxu1 %v14173_v27  ;;  %v14260_v26 = vld [vmem:[%s16814_s18 + $0xf84] ss:$8 sps:$4 sm:$0xff]   ;;  %v14255_v27 = vld [vmem:[%s16814_s18 + $0x380] ss:$8 sps:$4 sm:$0xff]  }
 0x256   : > { %12290 = vmatprep.subr.bf16.mxu0 %v14176_v28  ;;  %v14258_v28 = vld [vmem:[%s16814_s18 + $0xf80] ss:$8 sps:$4 sm:$0xff]  }
 0x258   : > { %11799 = vmatpush1.bf16.msra.mxu1 %v14171_v29  ;;  %v14263_v29 = vld [vmem:[%s16814_s18 + $0x394] ss:$8 sps:$4 sm:$0xff]  }
 0x259   : > { %12291 = vmatpush1.bf16.msra.mxu0 %v14174_v30  ;;  %11800 = vmatprep.subr.bf16.mxu1 %v14179_v31  ;;  %v14266_v30 = vld [vmem:[%s16814_s18 + $0xf94] ss:$8 sps:$4 sm:$0xff]   ;;  %v14261_v31 = vld [vmem:[%s16814_s18 + $0x390] ss:$8 sps:$4 sm:$0xff]  }
 0x25a   : > { %12292 = vmatprep.subr.bf16.mxu0 %v14182_v32  ;;  %v14264_v32 = vld [vmem:[%s16814_s18 + $0xf90] ss:$8 sps:$4 sm:$0xff]  }
 0x25c   : > { %11801 = vmatpush1.bf16.msra.mxu1 %v14177_v35  ;;  %v14269_v35 = vld [vmem:[%s16814_s18 + $0x3a4] ss:$8 sps:$4 sm:$0xff]  }
 0x25d   : > { %12293 = vmatpush1.bf16.msra.mxu0 %v14180_v36  ;;  %11802 = vmatprep.subr.bf16.mxu1 %v14185_v37  ;;  %v14272_v36 = vld [vmem:[%s16814_s18 + $0xfa4] ss:$8 sps:$4 sm:$0xff]   ;;  %v14267_v37 = vld [vmem:[%s16814_s18 + $0x3a0] ss:$8 sps:$4 sm:$0xff]  }
 0x25e   : > { %12294 = vmatprep.subr.bf16.mxu0 %v14188_v38  ;;  %v14270_v38 = vld [vmem:[%s16814_s18 + $0xfa0] ss:$8 sps:$4 sm:$0xff]  }
 0x260   : > { %11803 = vmatpush1.bf16.msra.mxu1 %v14183_v39  ;;  %v14275_v39 = vld [vmem:[%s16814_s18 + $0x3b4] ss:$8 sps:$4 sm:$0xff]  }
 0x261   : > { %12295 = vmatpush1.bf16.msra.mxu0 %v14186_v40  ;;  %11804 = vmatprep.subr.bf16.mxu1 %v14191_v5  ;;  %v14278_v40 = vld [vmem:[%s16814_s18 + $0xfb4] ss:$8 sps:$4 sm:$0xff]   ;;  %v14273_v5 = vld [vmem:[%s16814_s18 + $0x3b0] ss:$8 sps:$4 sm:$0xff]  }
 0x262   : > { %12296 = vmatprep.subr.bf16.mxu0 %v14194_v9  ;;  %v14276_v9 = vld [vmem:[%s16814_s18 + $0xfb0] ss:$8 sps:$4 sm:$0xff]  }
 0x264   : > { %11805 = vmatpush1.bf16.msra.mxu1 %v14189_v43  ;;  %v14281_v43 = vld [vmem:[%s16814_s18 + $0x3c4] ss:$8 sps:$4 sm:$0xff]  }
 0x265   : > { %12297 = vmatpush1.bf16.msra.mxu0 %v14192_v44  ;;  %11806 = vmatprep.subr.bf16.mxu1 %v14197_v45  ;;  %v14284_v44 = vld [vmem:[%s16814_s18 + $0xfc4] ss:$8 sps:$4 sm:$0xff]   ;;  %v14279_v45 = vld [vmem:[%s16814_s18 + $0x3c0] ss:$8 sps:$4 sm:$0xff]  }
 0x266   : > { %12298 = vmatprep.subr.bf16.mxu0 %v14200_v46  ;;  %v14282_v46 = vld [vmem:[%s16814_s18 + $0xfc0] ss:$8 sps:$4 sm:$0xff]  }
 0x268   : > { %11807 = vmatpush1.bf16.msra.mxu1 %v14195_v47  ;;  %v14287_v47 = vld [vmem:[%s16814_s18 + $0x3d4] ss:$8 sps:$4 sm:$0xff]  }
 0x269   : > { %12299 = vmatpush1.bf16.msra.mxu0 %v14198_v48  ;;  %11808 = vmatprep.subr.bf16.mxu1 %v14203_v49  ;;  %v14290_v48 = vld [vmem:[%s16814_s18 + $0xfd4] ss:$8 sps:$4 sm:$0xff]   ;;  %v14285_v49 = vld [vmem:[%s16814_s18 + $0x3d0] ss:$8 sps:$4 sm:$0xff]  }
 0x26a   : > { %12300 = vmatprep.subr.bf16.mxu0 %v14206_v50  ;;  %v14288_v50 = vld [vmem:[%s16814_s18 + $0xfd0] ss:$8 sps:$4 sm:$0xff]  }
 0x26c   : > { %11809 = vmatpush1.bf16.msra.mxu1 %v14201_v51  ;;  %v14293_v51 = vld [vmem:[%s16814_s18 + $0x3e4] ss:$8 sps:$4 sm:$0xff]  }
 0x26d   : > { %12301 = vmatpush1.bf16.msra.mxu0 %v14204_v52  ;;  %11819 = vmatprep.subr.bf16.mxu1 %v14209_v34  ;;  %v14296_v52 = vld [vmem:[%s16814_s18 + $0xfe4] ss:$8 sps:$4 sm:$0xff]   ;;  %v14291_v34 = vld [vmem:[%s16814_s18 + $0x3e0] ss:$8 sps:$4 sm:$0xff]  }
 0x26e   : > { %12311 = vmatprep.subr.bf16.mxu0 %v14212_v54  ;;  %v14294_v54 = vld [vmem:[%s16814_s18 + $0xfe0] ss:$8 sps:$4 sm:$0xff]  }
 0x26f   : > { %11811 = vmatmul.mubr.bf16.vlgmr.msra.gmra.mrb[0].mxu1 %v17071_v55 }
 0x270   : > { %12303 = vmatmul.mubr.bf16.vlgmr.msra.gmra.mrb[0].mxu0 %v17075_v56  ;;  %11820 = vmatpush1.bf16.msra.mxu1 %v14207_v57  ;;  %v17144_v57 = vld.sshfl [vmem:[%s17924_s0 + $0x8] sm:$0xff pattern:$0x75316420] }
 0x271   : > { %12312 = vmatpush1.bf16.msra.mxu0 %v14210_v58  ;;  %11821 = vmatprep.subr.bf16.mxu1 %v14215_v60  ;;  %v17149_v58 = vld.sshfl [vmem:[%s17924_s0 + $0x20] sm:$0xff pattern:$0x75316420] }
 0x272   : > { %12313 = vmatprep.subr.bf16.mxu0 %v14218_v61  ;;  %11851 = vmatprep.mubr.bf16.mxu1 %v7467_v41  ;;  %v14299_v60 = vld [vmem:[%s16814_s18 + $0x3f4] ss:$8 sps:$4 sm:$0xff]   ;;  %v14297_v41 = vld [vmem:[%s16814_s18 + $0x3f0] ss:$8 sps:$4 sm:$0xff]  }
 0x273   : > { %12343 = vmatprep.mubr.bf16.mxu0 %v7614_v62  ;;  %v14302_v61 = vld [vmem:[%s16814_s18 + $0xff4] ss:$8 sps:$4 sm:$0xff]   ;;  %v14300_v62 = vld [vmem:[%s16814_s18 + $0xff0] ss:$8 sps:$4 sm:$0xff]  }
 0x274   : > { %11822 = vmatpush1.bf16.msra.mxu1 %v14213_v42  ;;  %v14305_v42 = vld [vmem:[%s16814_s18 + $0x404] ss:$8 sps:$4 sm:$0xff]  }
 0x275   : > { %12314 = vmatpush1.bf16.msra.mxu0 %v14216_v63  ;;  %11823 = vmatprep.subr.bf16.mxu1 %v14221_v53  ;;  %v14308_v63 = vld [vmem:[%s16814_s18 + $0x1004] ss:$8 sps:$4 sm:$0xff]   ;;  %v7483_v53 = vcombine.high %v17144_v57, %v17144_v57 }
 0x276   : > { %12315 = vmatprep.subr.bf16.mxu0 %v14224_v0  ;;  %v7630_v0 = vcombine.high %v17149_v58, %v17149_v58 }
 0x278   : > { %11824 = vmatpush1.bf16.msra.mxu1 %v14219_v33  ;;  %v14303_v33 = vld [vmem:[%s16814_s18 + $0x400] ss:$8 sps:$4 sm:$0xff]  }
 0x279   : > { %12316 = vmatpush1.bf16.msra.mxu0 %v14222_v1  ;;  %11825 = vmatprep.subr.bf16.mxu1 %v14227_v3  ;;  %v14306_v1 = vld [vmem:[%s16814_s18 + $0x1000] ss:$8 sps:$4 sm:$0xff]   ;;  %v7465_v3 = vcombine.high %v17071_v55, %v17071_v55  ;;  %v14309_v55 = vld [vmem:[%s16814_s18 + $0x410] ss:$8 sps:$4 sm:$0xff]  }
 0x27a   : > { %12317 = vmatprep.subr.bf16.mxu0 %v14230_v4  ;;  %v7612_v4 = vcombine.high %v17075_v56, %v17075_v56  ;;  %v14312_v56 = vld [vmem:[%s16814_s18 + $0x1010] ss:$8 sps:$4 sm:$0xff]  }
 0x27c   : > { %11826 = vmatpush1.bf16.msra.mxu1 %v14225_v6  ;;  %v14311_v6 = vld [vmem:[%s16814_s18 + $0x414] ss:$8 sps:$4 sm:$0xff]  }
 0x27d   : > { %12318 = vmatpush1.bf16.msra.mxu0 %v14228_v7  ;;  %11827 = vmatprep.subr.bf16.mxu1 %v14233_v8  ;;  %v14314_v7 = vld [vmem:[%s16814_s18 + $0x1014] ss:$8 sps:$4 sm:$0xff]   ;;  %v17170_v8 = vrot.slane %v7483_v53, %v16867_v2  ;;  %v14389_v53 = vld [vmem:[%s16814_s18 + $0x4e4] ss:$8 sps:$4 sm:$0xff]  }
 0x27e   : > { %12319 = vmatprep.subr.bf16.mxu0 %v14236_v10  ;;  %v17173_v10 = vrot.slane %v7630_v0, %v16867_v2  ;;  %v14392_v0 = vld [vmem:[%s16814_s18 + $0x10e4] ss:$8 sps:$4 sm:$0xff]  }
 0x280   : > { %11828 = vmatpush1.bf16.msra.mxu1 %v14231_v11  ;;  %v14317_v11 = vld [vmem:[%s16814_s18 + $0x424] ss:$8 sps:$4 sm:$0xff]  }
 0x281   : > { %12320 = vmatpush1.bf16.msra.mxu0 %v14234_v12  ;;  %11829 = vmatprep.subr.bf16.mxu1 %v14239_v13  ;;  %v14320_v12 = vld [vmem:[%s16814_s18 + $0x1024] ss:$8 sps:$4 sm:$0xff]   ;;  %v14315_v13 = vld [vmem:[%s16814_s18 + $0x420] ss:$8 sps:$4 sm:$0xff]  }
 0x282   : > { %12321 = vmatprep.subr.bf16.mxu0 %v14242_v14  ;;  %v14318_v14 = vld [vmem:[%s16814_s18 + $0x1020] ss:$8 sps:$4 sm:$0xff]  }
 0x284   : > { %11830 = vmatpush1.bf16.msra.mxu1 %v14237_v15  ;;  %v14323_v15 = vld [vmem:[%s16814_s18 + $0x434] ss:$8 sps:$4 sm:$0xff]  }
 0x285   : > { %12322 = vmatpush1.bf16.msra.mxu0 %v14240_v16  ;;  %11831 = vmatprep.subr.bf16.mxu1 %v14245_v17  ;;  %v14326_v16 = vld [vmem:[%s16814_s18 + $0x1034] ss:$8 sps:$4 sm:$0xff]   ;;  %v14321_v17 = vld [vmem:[%s16814_s18 + $0x430] ss:$8 sps:$4 sm:$0xff]  }
 0x286   : > { %12323 = vmatprep.subr.bf16.mxu0 %v14248_v18  ;;  %v14324_v18 = vld [vmem:[%s16814_s18 + $0x1030] ss:$8 sps:$4 sm:$0xff]  }
 0x288   : > { %11832 = vmatpush1.bf16.msra.mxu1 %v14243_v19  ;;  %v14329_v19 = vld [vmem:[%s16814_s18 + $0x444] ss:$8 sps:$4 sm:$0xff]  }
 0x289   : > { %12324 = vmatpush1.bf16.msra.mxu0 %v14246_v20  ;;  %11833 = vmatprep.subr.bf16.mxu1 %v14251_v21  ;;  %v14332_v20 = vld [vmem:[%s16814_s18 + $0x1044] ss:$8 sps:$4 sm:$0xff]   ;;  %v14327_v21 = vld [vmem:[%s16814_s18 + $0x440] ss:$8 sps:$4 sm:$0xff]  }
 0x28a   : > { %12325 = vmatprep.subr.bf16.mxu0 %v14254_v22  ;;  %v14330_v22 = vld [vmem:[%s16814_s18 + $0x1040] ss:$8 sps:$4 sm:$0xff]  }
 0x28c   : > { %11834 = vmatpush1.bf16.msra.mxu1 %v14249_v23  ;;  %v14335_v23 = vld [vmem:[%s16814_s18 + $0x454] ss:$8 sps:$4 sm:$0xff]  }
 0x28d   : > { %12326 = vmatpush1.bf16.msra.mxu0 %v14252_v24  ;;  %11835 = vmatprep.subr.bf16.mxu1 %v14257_v25  ;;  %v14338_v24 = vld [vmem:[%s16814_s18 + $0x1054] ss:$8 sps:$4 sm:$0xff]   ;;  %v14333_v25 = vld [vmem:[%s16814_s18 + $0x450] ss:$8 sps:$4 sm:$0xff]  }
 0x28e   : > { %12327 = vmatprep.subr.bf16.mxu0 %v14260_v26  ;;  %v14336_v26 = vld [vmem:[%s16814_s18 + $0x1050] ss:$8 sps:$4 sm:$0xff]  }
 0x290   : > { %11836 = vmatpush1.bf16.msra.mxu1 %v14255_v27  ;;  %v14341_v27 = vld [vmem:[%s16814_s18 + $0x464] ss:$8 sps:$4 sm:$0xff]  }
 0x291   : > { %12328 = vmatpush1.bf16.msra.mxu0 %v14258_v28  ;;  %11837 = vmatprep.subr.bf16.mxu1 %v14263_v29  ;;  %v14344_v28 = vld [vmem:[%s16814_s18 + $0x1064] ss:$8 sps:$4 sm:$0xff]   ;;  %v14339_v29 = vld [vmem:[%s16814_s18 + $0x460] ss:$8 sps:$4 sm:$0xff]  }
 0x292   : > { %12329 = vmatprep.subr.bf16.mxu0 %v14266_v30  ;;  %v14342_v30 = vld [vmem:[%s16814_s18 + $0x1060] ss:$8 sps:$4 sm:$0xff]  }
 0x294   : > { %11838 = vmatpush1.bf16.msra.mxu1 %v14261_v31  ;;  %v14347_v31 = vld [vmem:[%s16814_s18 + $0x474] ss:$8 sps:$4 sm:$0xff]  }
 0x295   : > { %12330 = vmatpush1.bf16.msra.mxu0 %v14264_v32  ;;  %11839 = vmatprep.subr.bf16.mxu1 %v14269_v35  ;;  %v14350_v32 = vld [vmem:[%s16814_s18 + $0x1074] ss:$8 sps:$4 sm:$0xff]   ;;  %v14345_v35 = vld [vmem:[%s16814_s18 + $0x470] ss:$8 sps:$4 sm:$0xff]  }
 0x296   : > { %12331 = vmatprep.subr.bf16.mxu0 %v14272_v36  ;;  %v14348_v36 = vld [vmem:[%s16814_s18 + $0x1070] ss:$8 sps:$4 sm:$0xff]  }
 0x298   : > { %11840 = vmatpush1.bf16.msra.mxu1 %v14267_v37  ;;  %v14353_v37 = vld [vmem:[%s16814_s18 + $0x484] ss:$8 sps:$4 sm:$0xff]  }
 0x299   : > { %12332 = vmatpush1.bf16.msra.mxu0 %v14270_v38  ;;  %11841 = vmatprep.subr.bf16.mxu1 %v14275_v39  ;;  %v14356_v38 = vld [vmem:[%s16814_s18 + $0x1084] ss:$8 sps:$4 sm:$0xff]   ;;  %v14351_v39 = vld [vmem:[%s16814_s18 + $0x480] ss:$8 sps:$4 sm:$0xff]  }
 0x29a   : > { %12333 = vmatprep.subr.bf16.mxu0 %v14278_v40  ;;  %v14354_v40 = vld [vmem:[%s16814_s18 + $0x1080] ss:$8 sps:$4 sm:$0xff]  }
 0x29c   : > { %11842 = vmatpush1.bf16.msra.mxu1 %v14273_v5  ;;  %v14359_v5 = vld [vmem:[%s16814_s18 + $0x494] ss:$8 sps:$4 sm:$0xff]  }
 0x29d   : > { %12334 = vmatpush1.bf16.msra.mxu0 %v14276_v9  ;;  %11843 = vmatprep.subr.bf16.mxu1 %v14281_v43  ;;  %v14362_v9 = vld [vmem:[%s16814_s18 + $0x1094] ss:$8 sps:$4 sm:$0xff]   ;;  %v14357_v43 = vld [vmem:[%s16814_s18 + $0x490] ss:$8 sps:$4 sm:$0xff]  }
 0x29e   : > { %12335 = vmatprep.subr.bf16.mxu0 %v14284_v44  ;;  %v14360_v44 = vld [vmem:[%s16814_s18 + $0x1090] ss:$8 sps:$4 sm:$0xff]  }
 0x2a0   : > { %11844 = vmatpush1.bf16.msra.mxu1 %v14279_v45  ;;  %v14365_v45 = vld [vmem:[%s16814_s18 + $0x4a4] ss:$8 sps:$4 sm:$0xff]  }
 0x2a1   : > { %12336 = vmatpush1.bf16.msra.mxu0 %v14282_v46  ;;  %11845 = vmatprep.subr.bf16.mxu1 %v14287_v47  ;;  %v14368_v46 = vld [vmem:[%s16814_s18 + $0x10a4] ss:$8 sps:$4 sm:$0xff]   ;;  %v14363_v47 = vld [vmem:[%s16814_s18 + $0x4a0] ss:$8 sps:$4 sm:$0xff]  }
 0x2a2   : > { %12337 = vmatprep.subr.bf16.mxu0 %v14290_v48  ;;  %v14366_v48 = vld [vmem:[%s16814_s18 + $0x10a0] ss:$8 sps:$4 sm:$0xff]  }
 0x2a4   : > { %11846 = vmatpush1.bf16.msra.mxu1 %v14285_v49  ;;  %v14371_v49 = vld [vmem:[%s16814_s18 + $0x4b4] ss:$8 sps:$4 sm:$0xff]  }
 0x2a5   : > { %12338 = vmatpush1.bf16.msra.mxu0 %v14288_v50  ;;  %11847 = vmatprep.subr.bf16.mxu1 %v14293_v51  ;;  %v14374_v50 = vld [vmem:[%s16814_s18 + $0x10b4] ss:$8 sps:$4 sm:$0xff]   ;;  %v14369_v51 = vld [vmem:[%s16814_s18 + $0x4b0] ss:$8 sps:$4 sm:$0xff]  }
 0x2a6   : > { %12339 = vmatprep.subr.bf16.mxu0 %v14296_v52  ;;  %v14372_v52 = vld [vmem:[%s16814_s18 + $0x10b0] ss:$8 sps:$4 sm:$0xff]  }
 0x2a8   : > { %11848 = vmatpush1.bf16.msra.mxu1 %v14291_v34  ;;  %v14377_v34 = vld [vmem:[%s16814_s18 + $0x4c4] ss:$8 sps:$4 sm:$0xff]  }
 0x2a9   : > { %12340 = vmatpush1.bf16.msra.mxu0 %v14294_v54  ;;  %11849 = vmatprep.subr.bf16.mxu1 %v14299_v60  ;;  %v14380_v54 = vld [vmem:[%s16814_s18 + $0x10c4] ss:$8 sps:$4 sm:$0xff]   ;;  %v14375_v60 = vld [vmem:[%s16814_s18 + $0x4c0] ss:$8 sps:$4 sm:$0xff]  }
 0x2aa   : > { %12341 = vmatprep.subr.bf16.mxu0 %v14302_v61  ;;  %v14378_v61 = vld [vmem:[%s16814_s18 + $0x10c0] ss:$8 sps:$4 sm:$0xff]  }
 0x2ac   : > { %11850 = vmatpush1.bf16.msra.mxu1 %v14297_v41  ;;  %v14383_v41 = vld [vmem:[%s16814_s18 + $0x4d4] ss:$8 sps:$4 sm:$0xff]  }
 0x2ad   : > { %12342 = vmatpush1.bf16.msra.mxu0 %v14300_v62  ;;  %11860 = vmatprep.subr.bf16.mxu1 %v14305_v42  ;;  %v14386_v62 = vld [vmem:[%s16814_s18 + $0x10d4] ss:$8 sps:$4 sm:$0xff]   ;;  %v14381_v42 = vld [vmem:[%s16814_s18 + $0x4d0] ss:$8 sps:$4 sm:$0xff]  }
 0x2ae   : > { %12352 = vmatprep.subr.bf16.mxu0 %v14308_v63  ;;  %v14384_v63 = vld [vmem:[%s16814_s18 + $0x10d0] ss:$8 sps:$4 sm:$0xff]  }
 0x2af   : > { %11852 = vmatmul.mubr.bf16.vlgmr.msra.gmra.mrb[0].mxu1 %v7465_v3  ;;  %v14395_v3 = vld [vmem:[%s16814_s18 + $0x4f4] ss:$8 sps:$4 sm:$0xff]  }
 0x2b0   : > { %12344 = vmatmul.mubr.bf16.vlgmr.msra.gmra.mrb[0].mxu0 %v7612_v4  ;;  %11861 = vmatpush1.bf16.msra.mxu1 %v14303_v33  ;;  %v14387_v33 = vld [vmem:[%s16814_s18 + $0x4e0] ss:$8 sps:$4 sm:$0xff]   ;;  %v14398_v4 = vld [vmem:[%s16814_s18 + $0x10f4] ss:$8 sps:$4 sm:$0xff]  }
 0x2b1   : > { %12353 = vmatpush1.bf16.msra.mxu0 %v14306_v1  ;;  %11862 = vmatprep.subr.bf16.mxu1 %v14311_v6  ;;  %v14390_v1 = vld [vmem:[%s16814_s18 + $0x10e0] ss:$8 sps:$4 sm:$0xff]   ;;  %v14393_v6 = vld [vmem:[%s16814_s18 + $0x4f0] ss:$8 sps:$4 sm:$0xff]  }
 0x2b2   : > { %12354 = vmatprep.subr.bf16.mxu0 %v14314_v7  ;;  %11892 = vmatprep.mubr.bf16.mxu1 %v17170_v8  ;;  %v14396_v7 = vld [vmem:[%s16814_s18 + $0x10f0] ss:$8 sps:$4 sm:$0xff]  }
 0x2b3   : > { %12384 = vmatprep.mubr.bf16.mxu0 %v17173_v10 }
 0x2b4   : > { %11863 = vmatpush1.bf16.msra.mxu1 %v14309_v55  ;;  %v14401_v55 = vld [vmem:[%s16814_s18 + $0x504] ss:$8 sps:$4 sm:$0xff]  }
 0x2b5   : > { %12355 = vmatpush1.bf16.msra.mxu0 %v14312_v56  ;;  %11864 = vmatprep.subr.bf16.mxu1 %v14317_v11  ;;  %v14404_v56 = vld [vmem:[%s16814_s18 + $0x1104] ss:$8 sps:$4 sm:$0xff]   ;;  %v17239_v11 = vrot.slane %v17144_v57, %v16867_v2  ;;  %v7515_v57 = vcombine.high %v17170_v8, %v17170_v8 }
 0x2b6   : > { %12356 = vmatprep.subr.bf16.mxu0 %v14320_v12  ;;  %v17243_v12 = vrot.slane %v17149_v58, %v16867_v2  ;;  %v14405_v58 = vld [vmem:[%s16814_s18 + $0x510] ss:$8 sps:$4 sm:$0xff]   ;;  %v14413_v8 = vld [vmem:[%s16814_s18 + $0x524] ss:$8 sps:$4 sm:$0xff]  }
 0x2b8   : > { %11865 = vmatpush1.bf16.msra.mxu1 %v14315_v13  ;;  %v14399_v13 = vld [vmem:[%s16814_s18 + $0x500] ss:$8 sps:$4 sm:$0xff]  }
 0x2b9   : > { %12357 = vmatpush1.bf16.msra.mxu0 %v14318_v14  ;;  %11866 = vmatprep.subr.bf16.mxu1 %v14323_v15  ;;  %v14402_v14 = vld [vmem:[%s16814_s18 + $0x1100] ss:$8 sps:$4 sm:$0xff]   ;;  %v14407_v15 = vld [vmem:[%s16814_s18 + $0x514] ss:$8 sps:$4 sm:$0xff]  }
 0x2ba   : > { %12358 = vmatprep.subr.bf16.mxu0 %v14326_v16  ;;  %v14410_v16 = vld [vmem:[%s16814_s18 + $0x1114] ss:$8 sps:$4 sm:$0xff]  }
 0x2bc   : > { %11867 = vmatpush1.bf16.msra.mxu1 %v14321_v17  ;;  %v7662_v17 = vcombine.high %v17173_v10, %v17173_v10  ;;  %v14411_v10 = vld [vmem:[%s16814_s18 + $0x520] ss:$8 sps:$4 sm:$0xff]  }
 0x2bd   : > { %12359 = vmatpush1.bf16.msra.mxu0 %v14324_v18  ;;  %11868 = vmatprep.subr.bf16.mxu1 %v14329_v19  ;;  %v14408_v18 = vld [vmem:[%s16814_s18 + $0x1110] ss:$8 sps:$4 sm:$0xff]   ;;  %v14416_v19 = vld [vmem:[%s16814_s18 + $0x1124] ss:$8 sps:$4 sm:$0xff]  }
 0x2be   : > { %12360 = vmatprep.subr.bf16.mxu0 %v14332_v20  ;;  %v14414_v20 = vld [vmem:[%s16814_s18 + $0x1120] ss:$8 sps:$4 sm:$0xff]  }
 0x2c0   : > { %11869 = vmatpush1.bf16.msra.mxu1 %v14327_v21  ;;  %v14419_v21 = vld [vmem:[%s16814_s18 + $0x534] ss:$8 sps:$4 sm:$0xff]  }
 0x2c1   : > { %12361 = vmatpush1.bf16.msra.mxu0 %v14330_v22  ;;  %11870 = vmatprep.subr.bf16.mxu1 %v14335_v23  ;;  %v14422_v22 = vld [vmem:[%s16814_s18 + $0x1134] ss:$8 sps:$4 sm:$0xff]   ;;  %v14417_v23 = vld [vmem:[%s16814_s18 + $0x530] ss:$8 sps:$4 sm:$0xff]  }
 0x2c2   : > { %12362 = vmatprep.subr.bf16.mxu0 %v14338_v24  ;;  %v14420_v24 = vld [vmem:[%s16814_s18 + $0x1130] ss:$8 sps:$4 sm:$0xff]  }
 0x2c4   : > { %11871 = vmatpush1.bf16.msra.mxu1 %v14333_v25  ;;  %v14425_v25 = vld [vmem:[%s16814_s18 + $0x544] ss:$8 sps:$4 sm:$0xff]  }
 0x2c5   : > { %12363 = vmatpush1.bf16.msra.mxu0 %v14336_v26  ;;  %11872 = vmatprep.subr.bf16.mxu1 %v14341_v27  ;;  %v14428_v26 = vld [vmem:[%s16814_s18 + $0x1144] ss:$8 sps:$4 sm:$0xff]   ;;  %v14423_v27 = vld [vmem:[%s16814_s18 + $0x540] ss:$8 sps:$4 sm:$0xff]  }
 0x2c6   : > { %12364 = vmatprep.subr.bf16.mxu0 %v14344_v28  ;;  %v14426_v28 = vld [vmem:[%s16814_s18 + $0x1140] ss:$8 sps:$4 sm:$0xff]  }
 0x2c8   : > { %11873 = vmatpush1.bf16.msra.mxu1 %v14339_v29  ;;  %v14431_v29 = vld [vmem:[%s16814_s18 + $0x554] ss:$8 sps:$4 sm:$0xff]  }
 0x2c9   : > { %12365 = vmatpush1.bf16.msra.mxu0 %v14342_v30  ;;  %11874 = vmatprep.subr.bf16.mxu1 %v14347_v31  ;;  %v14434_v30 = vld [vmem:[%s16814_s18 + $0x1154] ss:$8 sps:$4 sm:$0xff]   ;;  %v14429_v31 = vld [vmem:[%s16814_s18 + $0x550] ss:$8 sps:$4 sm:$0xff]  }
 0x2ca   : > { %12366 = vmatprep.subr.bf16.mxu0 %v14350_v32  ;;  %v14432_v32 = vld [vmem:[%s16814_s18 + $0x1150] ss:$8 sps:$4 sm:$0xff]  }
 0x2cc   : > { %11875 = vmatpush1.bf16.msra.mxu1 %v14345_v35  ;;  %v14437_v35 = vld [vmem:[%s16814_s18 + $0x564] ss:$8 sps:$4 sm:$0xff]  }
 0x2cd   : > { %12367 = vmatpush1.bf16.msra.mxu0 %v14348_v36  ;;  %11876 = vmatprep.subr.bf16.mxu1 %v14353_v37  ;;  %v14440_v36 = vld [vmem:[%s16814_s18 + $0x1164] ss:$8 sps:$4 sm:$0xff]   ;;  %v14435_v37 = vld [vmem:[%s16814_s18 + $0x560] ss:$8 sps:$4 sm:$0xff]  }
 0x2ce   : > { %12368 = vmatprep.subr.bf16.mxu0 %v14356_v38  ;;  %v14438_v38 = vld [vmem:[%s16814_s18 + $0x1160] ss:$8 sps:$4 sm:$0xff]  }
 0x2d0   : > { %11877 = vmatpush1.bf16.msra.mxu1 %v14351_v39  ;;  %v14443_v39 = vld [vmem:[%s16814_s18 + $0x574] ss:$8 sps:$4 sm:$0xff]  }
 0x2d1   : > { %12369 = vmatpush1.bf16.msra.mxu0 %v14354_v40  ;;  %11878 = vmatprep.subr.bf16.mxu1 %v14359_v5  ;;  %v14446_v40 = vld [vmem:[%s16814_s18 + $0x1174] ss:$8 sps:$4 sm:$0xff]   ;;  %v14441_v5 = vld [vmem:[%s16814_s18 + $0x570] ss:$8 sps:$4 sm:$0xff]  }
 0x2d2   : > { %12370 = vmatprep.subr.bf16.mxu0 %v14362_v9  ;;  %v14444_v9 = vld [vmem:[%s16814_s18 + $0x1170] ss:$8 sps:$4 sm:$0xff]  }
 0x2d4   : > { %11879 = vmatpush1.bf16.msra.mxu1 %v14357_v43  ;;  %v14449_v43 = vld [vmem:[%s16814_s18 + $0x584] ss:$8 sps:$4 sm:$0xff]  }
 0x2d5   : > { %12371 = vmatpush1.bf16.msra.mxu0 %v14360_v44  ;;  %11880 = vmatprep.subr.bf16.mxu1 %v14365_v45  ;;  %v14452_v44 = vld [vmem:[%s16814_s18 + $0x1184] ss:$8 sps:$4 sm:$0xff]   ;;  %v14447_v45 = vld [vmem:[%s16814_s18 + $0x580] ss:$8 sps:$4 sm:$0xff]  }
 0x2d6   : > { %12372 = vmatprep.subr.bf16.mxu0 %v14368_v46  ;;  %v14450_v46 = vld [vmem:[%s16814_s18 + $0x1180] ss:$8 sps:$4 sm:$0xff]  }
 0x2d8   : > { %11881 = vmatpush1.bf16.msra.mxu1 %v14363_v47  ;;  %v14455_v47 = vld [vmem:[%s16814_s18 + $0x594] ss:$8 sps:$4 sm:$0xff]  }
 0x2d9   : > { %12373 = vmatpush1.bf16.msra.mxu0 %v14366_v48  ;;  %11882 = vmatprep.subr.bf16.mxu1 %v14371_v49  ;;  %v14458_v48 = vld [vmem:[%s16814_s18 + $0x1194] ss:$8 sps:$4 sm:$0xff]   ;;  %v14453_v49 = vld [vmem:[%s16814_s18 + $0x590] ss:$8 sps:$4 sm:$0xff]  }
 0x2da   : > { %12374 = vmatprep.subr.bf16.mxu0 %v14374_v50  ;;  %v14456_v50 = vld [vmem:[%s16814_s18 + $0x1190] ss:$8 sps:$4 sm:$0xff]  }
 0x2dc   : > { %11883 = vmatpush1.bf16.msra.mxu1 %v14369_v51  ;;  %v14461_v51 = vld [vmem:[%s16814_s18 + $0x5a4] ss:$8 sps:$4 sm:$0xff]  }
 0x2dd   : > { %12375 = vmatpush1.bf16.msra.mxu0 %v14372_v52  ;;  %11884 = vmatprep.subr.bf16.mxu1 %v14377_v34  ;;  %v14464_v52 = vld [vmem:[%s16814_s18 + $0x11a4] ss:$8 sps:$4 sm:$0xff]   ;;  %v14459_v34 = vld [vmem:[%s16814_s18 + $0x5a0] ss:$8 sps:$4 sm:$0xff]  }
 0x2de   : > { %12376 = vmatprep.subr.bf16.mxu0 %v14380_v54  ;;  %v14462_v54 = vld [vmem:[%s16814_s18 + $0x11a0] ss:$8 sps:$4 sm:$0xff]  }
 0x2e0   : > { %11885 = vmatpush1.bf16.msra.mxu1 %v14375_v60  ;;  %v14467_v60 = vld [vmem:[%s16814_s18 + $0x5b4] ss:$8 sps:$4 sm:$0xff]  }
 0x2e1   : > { %12377 = vmatpush1.bf16.msra.mxu0 %v14378_v61  ;;  %11886 = vmatprep.subr.bf16.mxu1 %v14383_v41  ;;  %v14470_v61 = vld [vmem:[%s16814_s18 + $0x11b4] ss:$8 sps:$4 sm:$0xff]   ;;  %v14465_v41 = vld [vmem:[%s16814_s18 + $0x5b0] ss:$8 sps:$4 sm:$0xff]  }
 0x2e2   : > { %12378 = vmatprep.subr.bf16.mxu0 %v14386_v62  ;;  %v14468_v62 = vld [vmem:[%s16814_s18 + $0x11b0] ss:$8 sps:$4 sm:$0xff]  }
 0x2e4   : > { %11887 = vmatpush1.bf16.msra.mxu1 %v14381_v42  ;;  %v14473_v42 = vld [vmem:[%s16814_s18 + $0x5c4] ss:$8 sps:$4 sm:$0xff]  }
 0x2e5   : > { %12379 = vmatpush1.bf16.msra.mxu0 %v14384_v63  ;;  %11888 = vmatprep.subr.bf16.mxu1 %v14389_v53  ;;  %v14476_v63 = vld [vmem:[%s16814_s18 + $0x11c4] ss:$8 sps:$4 sm:$0xff]   ;;  %v14471_v53 = vld [vmem:[%s16814_s18 + $0x5c0] ss:$8 sps:$4 sm:$0xff]  }
 0x2e6   : > { %12380 = vmatprep.subr.bf16.mxu0 %v14392_v0  ;;  %v14474_v0 = vld [vmem:[%s16814_s18 + $0x11c0] ss:$8 sps:$4 sm:$0xff]  }
 0x2e8   : > { %11889 = vmatpush1.bf16.msra.mxu1 %v14387_v33  ;;  %v14479_v33 = vld [vmem:[%s16814_s18 + $0x5d4] ss:$8 sps:$4 sm:$0xff]  }
 0x2e9   : > { %12381 = vmatpush1.bf16.msra.mxu0 %v14390_v1  ;;  %11890 = vmatprep.subr.bf16.mxu1 %v14395_v3  ;;  %v14482_v1 = vld [vmem:[%s16814_s18 + $0x11d4] ss:$8 sps:$4 sm:$0xff]   ;;  %v14477_v3 = vld [vmem:[%s16814_s18 + $0x5d0] ss:$8 sps:$4 sm:$0xff]  }
 0x2ea   : > { %12382 = vmatprep.subr.bf16.mxu0 %v14398_v4  ;;  %v14480_v4 = vld [vmem:[%s16814_s18 + $0x11d0] ss:$8 sps:$4 sm:$0xff]  }
 0x2ec   : > { %11891 = vmatpush1.bf16.msra.mxu1 %v14393_v6  ;;  %v14485_v6 = vld [vmem:[%s16814_s18 + $0x5e4] ss:$8 sps:$4 sm:$0xff]  }
 0x2ed   : > { %12383 = vmatpush1.bf16.msra.mxu0 %v14396_v7  ;;  %11901 = vmatprep.subr.bf16.mxu1 %v14401_v55  ;;  %v14488_v7 = vld [vmem:[%s16814_s18 + $0x11e4] ss:$8 sps:$4 sm:$0xff]  }
 0x2ee   : > { %12393 = vmatprep.subr.bf16.mxu0 %v14404_v56  ;;  %v15099_v55 = vld [vmem:[%s17924_s0 + $0x8] sm:$0xff] }
 0x2ef   : > { %11893 = vmatmul.mubr.bf16.vlgmr.msra.gmra.mrb[0].mxu1 %v17239_v11  ;;  %v7468_v56 = vcombine.high %v15099_v55, %v15099_v55  ;;  %v14563_v55 = vld [vmem:[%s16814_s18 + $0x6b4] ss:$8 sps:$4 sm:$0xff]  }
 0x2f0   : > { %12385 = vmatmul.mubr.bf16.vlgmr.msra.gmra.mrb[0].mxu0 %v17243_v12  ;;  %11902 = vmatpush1.bf16.msra.mxu1 %v14399_v13  ;;  %v15100_v13 = vld [vmem:[%s17924_s0 + $0x20] sm:$0xff] }
 0x2f1   : > { %12394 = vmatpush1.bf16.msra.mxu0 %v14402_v14  ;;  %11903 = vmatprep.subr.bf16.mxu1 %v14407_v15  ;;  %v7615_v14 = vcombine.high %v15100_v13, %v15100_v13  ;;  %v14483_v15 = vld [vmem:[%s16814_s18 + $0x5e0] ss:$8 sps:$4 sm:$0xff]   ;;  %v14561_v13 = vld [vmem:[%s16814_s18 + $0x6b0] ss:$8 sps:$4 sm:$0xff]  }
 0x2f2   : > { %12395 = vmatprep.subr.bf16.mxu0 %v14410_v16  ;;  %11933 = vmatprep.mubr.bf16.mxu1 %v7515_v57  ;;  %v14486_v16 = vld [vmem:[%s16814_s18 + $0x11e0] ss:$8 sps:$4 sm:$0xff]   ;;  %v14491_v57 = vld [vmem:[%s16814_s18 + $0x5f4] ss:$8 sps:$4 sm:$0xff]  }
 0x2f3   : > { %12425 = vmatprep.mubr.bf16.mxu0 %v7662_v17  ;;  %v14494_v17 = vld [vmem:[%s16814_s18 + $0x11f4] ss:$8 sps:$4 sm:$0xff]  }
 0x2f4   : > { %11904 = vmatpush1.bf16.msra.mxu1 %v14405_v58  ;;  %v17318_v58 = vrot.slane %v7468_v56, %v16867_v2  ;;  %v14566_v56 = vld [vmem:[%s16814_s18 + $0x12b4] ss:$8 sps:$4 sm:$0xff]  }
 0x2f5   : > { %12396 = vmatpush1.bf16.msra.mxu0 %v14408_v18  ;;  %11905 = vmatprep.subr.bf16.mxu1 %v14413_v8  ;;  %v17321_v18 = vrot.slane %v7615_v14, %v16867_v2  ;;  %v14489_v8 = vld [vmem:[%s16814_s18 + $0x5f0] ss:$8 sps:$4 sm:$0xff]  }
 0x2f6   : > { %12397 = vmatprep.subr.bf16.mxu0 %v14416_v19  ;;  %v14492_v19 = vld [vmem:[%s16814_s18 + $0x11f0] ss:$8 sps:$4 sm:$0xff]  }
 0x2f7   : > { %v14564_v14 = vld [vmem:[%s16814_s18 + $0x12b0] ss:$8 sps:$4 sm:$0xff]  }
 0x2f8   : > { %11906 = vmatpush1.bf16.msra.mxu1 %v14411_v10  ;;  %v14497_v10 = vld [vmem:[%s16814_s18 + $0x604] ss:$8 sps:$4 sm:$0xff]  }
 0x2f9   : > { %12398 = vmatpush1.bf16.msra.mxu0 %v14414_v20  ;;  %11907 = vmatprep.subr.bf16.mxu1 %v14419_v21  ;;  %v14500_v20 = vld [vmem:[%s16814_s18 + $0x1204] ss:$8 sps:$4 sm:$0xff]   ;;  %v7484_v21 = vcombine.high %v17318_v58, %v17318_v58 }
 0x2fa   : > { %12399 = vmatprep.subr.bf16.mxu0 %v14422_v22  ;;  %v7631_v22 = vcombine.high %v17321_v18, %v17321_v18 }
 0x2fc   : > { %11908 = vmatpush1.bf16.msra.mxu1 %v14417_v23  ;;  %v7513_v23 = vcombine.high %v17239_v11, %v17239_v11  ;;  %v17343_v11 = vrot.slane %v7631_v22, %v16867_v2  ;;  %v14584_v22 = vld [vmem:[%s16814_s18 + $0x12e4] ss:$8 sps:$4 sm:$0xff]  }
 0x2fd   : > { %12400 = vmatpush1.bf16.msra.mxu0 %v14420_v24  ;;  %11909 = vmatprep.subr.bf16.mxu1 %v14425_v25  ;;  %v7660_v24 = vcombine.high %v17243_v12, %v17243_v12  ;;  %v14495_v25 = vld [vmem:[%s16814_s18 + $0x600] ss:$8 sps:$4 sm:$0xff]   ;;  %v14501_v12 = vld [vmem:[%s16814_s18 + $0x610] ss:$8 sps:$4 sm:$0xff]  }
 0x2fe   : > { %12401 = vmatprep.subr.bf16.mxu0 %v14428_v26  ;;  %v14498_v26 = vld [vmem:[%s16814_s18 + $0x1200] ss:$8 sps:$4 sm:$0xff]  }
 0x300   : > { %11910 = vmatpush1.bf16.msra.mxu1 %v14423_v27  ;;  %v14503_v27 = vld [vmem:[%s16814_s18 + $0x614] ss:$8 sps:$4 sm:$0xff]  }
 0x301   : > { %12402 = vmatpush1.bf16.msra.mxu0 %v14426_v28  ;;  %11911 = vmatprep.subr.bf16.mxu1 %v14431_v29  ;;  %v14506_v28 = vld [vmem:[%s16814_s18 + $0x1214] ss:$8 sps:$4 sm:$0xff]   ;;  %v17340_v29 = vrot.slane %v7484_v21, %v16867_v2  ;;  %v14581_v21 = vld [vmem:[%s16814_s18 + $0x6e4] ss:$8 sps:$4 sm:$0xff]  }
 0x302   : > { %12403 = vmatprep.subr.bf16.mxu0 %v14434_v30  ;;  %v14504_v30 = vld [vmem:[%s16814_s18 + $0x1210] ss:$8 sps:$4 sm:$0xff]  }
 0x304   : > { %11912 = vmatpush1.bf16.msra.mxu1 %v14429_v31  ;;  %v14509_v31 = vld [vmem:[%s16814_s18 + $0x624] ss:$8 sps:$4 sm:$0xff]  }
 0x305   : > { %12404 = vmatpush1.bf16.msra.mxu0 %v14432_v32  ;;  %11913 = vmatprep.subr.bf16.mxu1 %v14437_v35  ;;  %v14512_v32 = vld [vmem:[%s16814_s18 + $0x1224] ss:$8 sps:$4 sm:$0xff]   ;;  %v14507_v35 = vld [vmem:[%s16814_s18 + $0x620] ss:$8 sps:$4 sm:$0xff]  }
 0x306   : > { %12405 = vmatprep.subr.bf16.mxu0 %v14440_v36  ;;  %v14510_v36 = vld [vmem:[%s16814_s18 + $0x1220] ss:$8 sps:$4 sm:$0xff]  }
 0x308   : > { %11914 = vmatpush1.bf16.msra.mxu1 %v14435_v37  ;;  %v14515_v37 = vld [vmem:[%s16814_s18 + $0x634] ss:$8 sps:$4 sm:$0xff]  }
 0x309   : > { %12406 = vmatpush1.bf16.msra.mxu0 %v14438_v38  ;;  %11915 = vmatprep.subr.bf16.mxu1 %v14443_v39  ;;  %v14518_v38 = vld [vmem:[%s16814_s18 + $0x1234] ss:$8 sps:$4 sm:$0xff]   ;;  %v14513_v39 = vld [vmem:[%s16814_s18 + $0x630] ss:$8 sps:$4 sm:$0xff]  }
 0x30a   : > { %12407 = vmatprep.subr.bf16.mxu0 %v14446_v40  ;;  %v14516_v40 = vld [vmem:[%s16814_s18 + $0x1230] ss:$8 sps:$4 sm:$0xff]  }
 0x30c   : > { %11916 = vmatpush1.bf16.msra.mxu1 %v14441_v5  ;;  %v14521_v5 = vld [vmem:[%s16814_s18 + $0x644] ss:$8 sps:$4 sm:$0xff]  }
 0x30d   : > { %12408 = vmatpush1.bf16.msra.mxu0 %v14444_v9  ;;  %11917 = vmatprep.subr.bf16.mxu1 %v14449_v43  ;;  %v14524_v9 = vld [vmem:[%s16814_s18 + $0x1244] ss:$8 sps:$4 sm:$0xff]   ;;  %v14519_v43 = vld [vmem:[%s16814_s18 + $0x640] ss:$8 sps:$4 sm:$0xff]  }
 0x30e   : > { %12409 = vmatprep.subr.bf16.mxu0 %v14452_v44  ;;  %v14522_v44 = vld [vmem:[%s16814_s18 + $0x1240] ss:$8 sps:$4 sm:$0xff]  }
 0x310   : > { %11918 = vmatpush1.bf16.msra.mxu1 %v14447_v45  ;;  %v14527_v45 = vld [vmem:[%s16814_s18 + $0x654] ss:$8 sps:$4 sm:$0xff]  }
 0x311   : > { %12410 = vmatpush1.bf16.msra.mxu0 %v14450_v46  ;;  %11919 = vmatprep.subr.bf16.mxu1 %v14455_v47  ;;  %v14530_v46 = vld [vmem:[%s16814_s18 + $0x1254] ss:$8 sps:$4 sm:$0xff]   ;;  %v14525_v47 = vld [vmem:[%s16814_s18 + $0x650] ss:$8 sps:$4 sm:$0xff]  }
 0x312   : > { %12411 = vmatprep.subr.bf16.mxu0 %v14458_v48  ;;  %v14528_v48 = vld [vmem:[%s16814_s18 + $0x1250] ss:$8 sps:$4 sm:$0xff]  }
 0x314   : > { %11920 = vmatpush1.bf16.msra.mxu1 %v14453_v49  ;;  %v14533_v49 = vld [vmem:[%s16814_s18 + $0x664] ss:$8 sps:$4 sm:$0xff]  }
 0x315   : > { %12412 = vmatpush1.bf16.msra.mxu0 %v14456_v50  ;;  %11921 = vmatprep.subr.bf16.mxu1 %v14461_v51  ;;  %v14536_v50 = vld [vmem:[%s16814_s18 + $0x1264] ss:$8 sps:$4 sm:$0xff]   ;;  %v14531_v51 = vld [vmem:[%s16814_s18 + $0x660] ss:$8 sps:$4 sm:$0xff]  }
 0x316   : > { %12413 = vmatprep.subr.bf16.mxu0 %v14464_v52  ;;  %v14534_v52 = vld [vmem:[%s16814_s18 + $0x1260] ss:$8 sps:$4 sm:$0xff]  }
 0x318   : > { %11922 = vmatpush1.bf16.msra.mxu1 %v14459_v34  ;;  %v14539_v34 = vld [vmem:[%s16814_s18 + $0x674] ss:$8 sps:$4 sm:$0xff]  }
 0x319   : > { %12414 = vmatpush1.bf16.msra.mxu0 %v14462_v54  ;;  %11923 = vmatprep.subr.bf16.mxu1 %v14467_v60  ;;  %v14542_v54 = vld [vmem:[%s16814_s18 + $0x1274] ss:$8 sps:$4 sm:$0xff]   ;;  %v14537_v60 = vld [vmem:[%s16814_s18 + $0x670] ss:$8 sps:$4 sm:$0xff]  }
 0x31a   : > { %12415 = vmatprep.subr.bf16.mxu0 %v14470_v61  ;;  %v14540_v61 = vld [vmem:[%s16814_s18 + $0x1270] ss:$8 sps:$4 sm:$0xff]  }
 0x31c   : > { %11924 = vmatpush1.bf16.msra.mxu1 %v14465_v41  ;;  %v14545_v41 = vld [vmem:[%s16814_s18 + $0x684] ss:$8 sps:$4 sm:$0xff]  }
 0x31d   : > { %12416 = vmatpush1.bf16.msra.mxu0 %v14468_v62  ;;  %11925 = vmatprep.subr.bf16.mxu1 %v14473_v42  ;;  %v14548_v62 = vld [vmem:[%s16814_s18 + $0x1284] ss:$8 sps:$4 sm:$0xff]   ;;  %v14543_v42 = vld [vmem:[%s16814_s18 + $0x680] ss:$8 sps:$4 sm:$0xff]  }
 0x31e   : > { %12417 = vmatprep.subr.bf16.mxu0 %v14476_v63  ;;  %v14546_v63 = vld [vmem:[%s16814_s18 + $0x1280] ss:$8 sps:$4 sm:$0xff]  }
 0x320   : > { %11926 = vmatpush1.bf16.msra.mxu1 %v14471_v53  ;;  %v14551_v53 = vld [vmem:[%s16814_s18 + $0x694] ss:$8 sps:$4 sm:$0xff]  }
 0x321   : > { %12418 = vmatpush1.bf16.msra.mxu0 %v14474_v0  ;;  %11927 = vmatprep.subr.bf16.mxu1 %v14479_v33  ;;  %v14554_v0 = vld [vmem:[%s16814_s18 + $0x1294] ss:$8 sps:$4 sm:$0xff]   ;;  %v14549_v33 = vld [vmem:[%s16814_s18 + $0x690] ss:$8 sps:$4 sm:$0xff]  }
 0x322   : > { %12419 = vmatprep.subr.bf16.mxu0 %v14482_v1  ;;  %v14552_v1 = vld [vmem:[%s16814_s18 + $0x1290] ss:$8 sps:$4 sm:$0xff]  }
 0x324   : > { %11928 = vmatpush1.bf16.msra.mxu1 %v14477_v3  ;;  %v14557_v3 = vld [vmem:[%s16814_s18 + $0x6a4] ss:$8 sps:$4 sm:$0xff]  }
 0x325   : > { %12420 = vmatpush1.bf16.msra.mxu0 %v14480_v4  ;;  %11929 = vmatprep.subr.bf16.mxu1 %v14485_v6  ;;  %v14560_v4 = vld [vmem:[%s16814_s18 + $0x12a4] ss:$8 sps:$4 sm:$0xff]   ;;  %v14555_v6 = vld [vmem:[%s16814_s18 + $0x6a0] ss:$8 sps:$4 sm:$0xff]  }
 0x326   : > { %12421 = vmatprep.subr.bf16.mxu0 %v14488_v7  ;;  %v14558_v7 = vld [vmem:[%s16814_s18 + $0x12a0] ss:$8 sps:$4 sm:$0xff]  }
 0x328   : > { %11930 = vmatpush1.bf16.msra.mxu1 %v14483_v15  ;;  %v14569_v15 = vld [vmem:[%s16814_s18 + $0x6c4] ss:$8 sps:$4 sm:$0xff]  }
 0x329   : > { %12422 = vmatpush1.bf16.msra.mxu0 %v14486_v16  ;;  %11931 = vmatprep.subr.bf16.mxu1 %v14491_v57  ;;  %v14572_v16 = vld [vmem:[%s16814_s18 + $0x12c4] ss:$8 sps:$4 sm:$0xff]   ;;  %v14567_v57 = vld [vmem:[%s16814_s18 + $0x6c0] ss:$8 sps:$4 sm:$0xff]  }
 0x32a   : > { %12423 = vmatprep.subr.bf16.mxu0 %v14494_v17  ;;  %v14570_v17 = vld [vmem:[%s16814_s18 + $0x12c0] ss:$8 sps:$4 sm:$0xff]  }
 0x32c   : > { %11932 = vmatpush1.bf16.msra.mxu1 %v14489_v8  ;;  %v14575_v8 = vld [vmem:[%s16814_s18 + $0x6d4] ss:$8 sps:$4 sm:$0xff]  }
 0x32d   : > { %12424 = vmatpush1.bf16.msra.mxu0 %v14492_v19  ;;  %11942 = vmatprep.subr.bf16.mxu1 %v14497_v10  ;;  %v14578_v19 = vld [vmem:[%s16814_s18 + $0x12d4] ss:$8 sps:$4 sm:$0xff]   ;;  %v14573_v10 = vld [vmem:[%s16814_s18 + $0x6d0] ss:$8 sps:$4 sm:$0xff]  }
 0x32e   : > { %12434 = vmatprep.subr.bf16.mxu0 %v14500_v20  ;;  %v14576_v20 = vld [vmem:[%s16814_s18 + $0x12d0] ss:$8 sps:$4 sm:$0xff]  }
 0x32f   : > { %11934 = vmatmul.mubr.bf16.vlgmr.msra.gmra.mrb[0].mxu1 %v7513_v23  ;;  %v14579_v23 = vld [vmem:[%s16814_s18 + $0x6e0] ss:$8 sps:$4 sm:$0xff]  }
 0x330   : > { %12426 = vmatmul.mubr.bf16.vlgmr.msra.gmra.mrb[0].mxu0 %v7660_v24  ;;  %11943 = vmatpush1.bf16.msra.mxu1 %v14495_v25  ;;  %v14582_v24 = vld [vmem:[%s16814_s18 + $0x12e0] ss:$8 sps:$4 sm:$0xff]   ;;  %v14587_v25 = vld [vmem:[%s16814_s18 + $0x6f4] ss:$8 sps:$4 sm:$0xff]  }
 0x331   : > { %12435 = vmatpush1.bf16.msra.mxu0 %v14498_v26  ;;  %11944 = vmatprep.subr.bf16.mxu1 %v14503_v27  ;;  %v14590_v26 = vld [vmem:[%s16814_s18 + $0x12f4] ss:$8 sps:$4 sm:$0xff]   ;;  %v14585_v27 = vld [vmem:[%s16814_s18 + $0x6f0] ss:$8 sps:$4 sm:$0xff]  }
 0x332   : > { %12436 = vmatprep.subr.bf16.mxu0 %v14506_v28  ;;  %11974 = vmatprep.mubr.bf16.mxu1 %v17340_v29  ;;  %v14588_v28 = vld [vmem:[%s16814_s18 + $0x12f0] ss:$8 sps:$4 sm:$0xff]  }
 0x333   : > { %12466 = vmatprep.mubr.bf16.mxu0 %v17343_v11 }
 0x334   : > { %11945 = vmatpush1.bf16.msra.mxu1 %v14501_v12  ;;  %v14594_v12 = vld [vmem:[%s16814_s18 + $0x704] ss:$8 sps:$4 sm:$0xff]  }
 0x335   : > { %12437 = vmatpush1.bf16.msra.mxu0 %v14504_v30  ;;  %11946 = vmatprep.subr.bf16.mxu1 %v14509_v31  ;;  %v14598_v30 = vld [vmem:[%s16814_s18 + $0x1304] ss:$8 sps:$4 sm:$0xff]   ;;  %v17409_v31 = vrot.slane %v17318_v58, %v16867_v2  ;;  %v7516_v58 = vcombine.high %v17340_v29, %v17340_v29 }
 0x336   : > { %12438 = vmatprep.subr.bf16.mxu0 %v14512_v32  ;;  %v17413_v32 = vrot.slane %v17321_v18, %v16867_v2  ;;  %v14599_v18 = vld [vmem:[%s16814_s18 + $0x710] ss:$8 sps:$4 sm:$0xff]   ;;  %v14607_v29 = vld [vmem:[%s16814_s18 + $0x724] ss:$8 sps:$4 sm:$0xff]  }
 0x338   : > { %11947 = vmatpush1.bf16.msra.mxu1 %v14507_v35  ;;  %v14592_v35 = vld [vmem:[%s16814_s18 + $0x700] ss:$8 sps:$4 sm:$0xff]  }
 0x339   : > { %12439 = vmatpush1.bf16.msra.mxu0 %v14510_v36  ;;  %11948 = vmatprep.subr.bf16.mxu1 %v14515_v37  ;;  %v14596_v36 = vld [vmem:[%s16814_s18 + $0x1300] ss:$8 sps:$4 sm:$0xff]   ;;  %v14601_v37 = vld [vmem:[%s16814_s18 + $0x714] ss:$8 sps:$4 sm:$0xff]  }
 0x33a   : > { %12440 = vmatprep.subr.bf16.mxu0 %v14518_v38  ;;  %v14604_v38 = vld [vmem:[%s16814_s18 + $0x1314] ss:$8 sps:$4 sm:$0xff]  }
 0x33c   : > { %11949 = vmatpush1.bf16.msra.mxu1 %v14513_v39  ;;  %v7663_v39 = vcombine.high %v17343_v11, %v17343_v11  ;;  %v14605_v11 = vld [vmem:[%s16814_s18 + $0x720] ss:$8 sps:$4 sm:$0xff]  }
 0x33d   : > { %12441 = vmatpush1.bf16.msra.mxu0 %v14516_v40  ;;  %11950 = vmatprep.subr.bf16.mxu1 %v14521_v5  ;;  %v14602_v40 = vld [vmem:[%s16814_s18 + $0x1310] ss:$8 sps:$4 sm:$0xff]   ;;  %v14610_v5 = vld [vmem:[%s16814_s18 + $0x1324] ss:$8 sps:$4 sm:$0xff]  }
 0x33e   : > { %12442 = vmatprep.subr.bf16.mxu0 %v14524_v9  ;;  %v14608_v9 = vld [vmem:[%s16814_s18 + $0x1320] ss:$8 sps:$4 sm:$0xff]  }
 0x340   : > { %11951 = vmatpush1.bf16.msra.mxu1 %v14519_v43  ;;  %v14613_v43 = vld [vmem:[%s16814_s18 + $0x734] ss:$8 sps:$4 sm:$0xff]  }
 0x341   : > { %12443 = vmatpush1.bf16.msra.mxu0 %v14522_v44  ;;  %11952 = vmatprep.subr.bf16.mxu1 %v14527_v45  ;;  %v14616_v44 = vld [vmem:[%s16814_s18 + $0x1334] ss:$8 sps:$4 sm:$0xff]   ;;  %v14611_v45 = vld [vmem:[%s16814_s18 + $0x730] ss:$8 sps:$4 sm:$0xff]  }
 0x342   : > { %12444 = vmatprep.subr.bf16.mxu0 %v14530_v46  ;;  %v14614_v46 = vld [vmem:[%s16814_s18 + $0x1330] ss:$8 sps:$4 sm:$0xff]  }
 0x344   : > { %11953 = vmatpush1.bf16.msra.mxu1 %v14525_v47  ;;  %v14619_v47 = vld [vmem:[%s16814_s18 + $0x744] ss:$8 sps:$4 sm:$0xff]  }
 0x345   : > { %12445 = vmatpush1.bf16.msra.mxu0 %v14528_v48  ;;  %11954 = vmatprep.subr.bf16.mxu1 %v14533_v49  ;;  %v14622_v48 = vld [vmem:[%s16814_s18 + $0x1344] ss:$8 sps:$4 sm:$0xff]   ;;  %v14617_v49 = vld [vmem:[%s16814_s18 + $0x740] ss:$8 sps:$4 sm:$0xff]  }
 0x346   : > { %12446 = vmatprep.subr.bf16.mxu0 %v14536_v50  ;;  %v14620_v50 = vld [vmem:[%s16814_s18 + $0x1340] ss:$8 sps:$4 sm:$0xff]  }
 0x348   : > { %11955 = vmatpush1.bf16.msra.mxu1 %v14531_v51  ;;  %v14625_v51 = vld [vmem:[%s16814_s18 + $0x754] ss:$8 sps:$4 sm:$0xff]  }
 0x349   : > { %12447 = vmatpush1.bf16.msra.mxu0 %v14534_v52  ;;  %11956 = vmatprep.subr.bf16.mxu1 %v14539_v34  ;;  %v14628_v52 = vld [vmem:[%s16814_s18 + $0x1354] ss:$8 sps:$4 sm:$0xff]   ;;  %v14623_v34 = vld [vmem:[%s16814_s18 + $0x750] ss:$8 sps:$4 sm:$0xff]  }
 0x34a   : > { %12448 = vmatprep.subr.bf16.mxu0 %v14542_v54  ;;  %v14626_v54 = vld [vmem:[%s16814_s18 + $0x1350] ss:$8 sps:$4 sm:$0xff]  }
 0x34c   : > { %11957 = vmatpush1.bf16.msra.mxu1 %v14537_v60  ;;  %v14631_v60 = vld [vmem:[%s16814_s18 + $0x764] ss:$8 sps:$4 sm:$0xff]  }
 0x34d   : > { %12449 = vmatpush1.bf16.msra.mxu0 %v14540_v61  ;;  %11958 = vmatprep.subr.bf16.mxu1 %v14545_v41  ;;  %v14634_v61 = vld [vmem:[%s16814_s18 + $0x1364] ss:$8 sps:$4 sm:$0xff]   ;;  %v14629_v41 = vld [vmem:[%s16814_s18 + $0x760] ss:$8 sps:$4 sm:$0xff]  }
 0x34e   : > { %12450 = vmatprep.subr.bf16.mxu0 %v14548_v62  ;;  %v14632_v62 = vld [vmem:[%s16814_s18 + $0x1360] ss:$8 sps:$4 sm:$0xff]  }
 0x350   : > { %11959 = vmatpush1.bf16.msra.mxu1 %v14543_v42  ;;  %v14637_v42 = vld [vmem:[%s16814_s18 + $0x774] ss:$8 sps:$4 sm:$0xff]  }
 0x351   : > { %12451 = vmatpush1.bf16.msra.mxu0 %v14546_v63  ;;  %11960 = vmatprep.subr.bf16.mxu1 %v14551_v53  ;;  %v14640_v63 = vld [vmem:[%s16814_s18 + $0x1374] ss:$8 sps:$4 sm:$0xff]   ;;  %v14635_v53 = vld [vmem:[%s16814_s18 + $0x770] ss:$8 sps:$4 sm:$0xff]  }
 0x352   : > { %12452 = vmatprep.subr.bf16.mxu0 %v14554_v0  ;;  %v14638_v0 = vld [vmem:[%s16814_s18 + $0x1370] ss:$8 sps:$4 sm:$0xff]  }
 0x354   : > { %11961 = vmatpush1.bf16.msra.mxu1 %v14549_v33  ;;  %v14643_v33 = vld [vmem:[%s16814_s18 + $0x784] ss:$8 sps:$4 sm:$0xff]  }
 0x355   : > { %12453 = vmatpush1.bf16.msra.mxu0 %v14552_v1  ;;  %11962 = vmatprep.subr.bf16.mxu1 %v14557_v3  ;;  %v14646_v1 = vld [vmem:[%s16814_s18 + $0x1384] ss:$8 sps:$4 sm:$0xff]   ;;  %v14641_v3 = vld [vmem:[%s16814_s18 + $0x780] ss:$8 sps:$4 sm:$0xff]  }
 0x356   : > { %12454 = vmatprep.subr.bf16.mxu0 %v14560_v4  ;;  %v14644_v4 = vld [vmem:[%s16814_s18 + $0x1380] ss:$8 sps:$4 sm:$0xff]  }
 0x358   : > { %11963 = vmatpush1.bf16.msra.mxu1 %v14555_v6  ;;  %v14649_v6 = vld [vmem:[%s16814_s18 + $0x794] ss:$8 sps:$4 sm:$0xff]  }
 0x359   : > { %12455 = vmatpush1.bf16.msra.mxu0 %v14558_v7  ;;  %11964 = vmatprep.subr.bf16.mxu1 %v14563_v55  ;;  %v14652_v7 = vld [vmem:[%s16814_s18 + $0x1394] ss:$8 sps:$4 sm:$0xff]   ;;  %v14647_v55 = vld [vmem:[%s16814_s18 + $0x790] ss:$8 sps:$4 sm:$0xff]  }
 0x35a   : > { %12456 = vmatprep.subr.bf16.mxu0 %v14566_v56  ;;  %v14650_v56 = vld [vmem:[%s16814_s18 + $0x1390] ss:$8 sps:$4 sm:$0xff]  }
 0x35c   : > { %11965 = vmatpush1.bf16.msra.mxu1 %v14561_v13  ;;  %v14655_v13 = vld [vmem:[%s16814_s18 + $0x7a4] ss:$8 sps:$4 sm:$0xff]  }
 0x35d   : > { %12457 = vmatpush1.bf16.msra.mxu0 %v14564_v14  ;;  %11966 = vmatprep.subr.bf16.mxu1 %v14569_v15  ;;  %v14658_v14 = vld [vmem:[%s16814_s18 + $0x13a4] ss:$8 sps:$4 sm:$0xff]   ;;  %v14653_v15 = vld [vmem:[%s16814_s18 + $0x7a0] ss:$8 sps:$4 sm:$0xff]  }
 0x35e   : > { %12458 = vmatprep.subr.bf16.mxu0 %v14572_v16  ;;  %v14656_v16 = vld [vmem:[%s16814_s18 + $0x13a0] ss:$8 sps:$4 sm:$0xff]  }
 0x360   : > { %11967 = vmatpush1.bf16.msra.mxu1 %v14567_v57  ;;  %v14661_v57 = vld [vmem:[%s16814_s18 + $0x7b4] ss:$8 sps:$4 sm:$0xff]  }
 0x361   : > { %12459 = vmatpush1.bf16.msra.mxu0 %v14570_v17  ;;  %11968 = vmatprep.subr.bf16.mxu1 %v14575_v8  ;;  %v14664_v17 = vld [vmem:[%s16814_s18 + $0x13b4] ss:$8 sps:$4 sm:$0xff]   ;;  %v14659_v8 = vld [vmem:[%s16814_s18 + $0x7b0] ss:$8 sps:$4 sm:$0xff]  }
 0x362   : > { %12460 = vmatprep.subr.bf16.mxu0 %v14578_v19  ;;  %v14662_v19 = vld [vmem:[%s16814_s18 + $0x13b0] ss:$8 sps:$4 sm:$0xff]  }
 0x364   : > { %11969 = vmatpush1.bf16.msra.mxu1 %v14573_v10  ;;  %v14667_v10 = vld [vmem:[%s16814_s18 + $0x7c4] ss:$8 sps:$4 sm:$0xff]  }
 0x365   : > { %12461 = vmatpush1.bf16.msra.mxu0 %v14576_v20  ;;  %11970 = vmatprep.subr.bf16.mxu1 %v14581_v21  ;;  %v14670_v20 = vld [vmem:[%s16814_s18 + $0x13c4] ss:$8 sps:$4 sm:$0xff]   ;;  %v14665_v21 = vld [vmem:[%s16814_s18 + $0x7c0] ss:$8 sps:$4 sm:$0xff]  }
 0x366   : > { %12462 = vmatprep.subr.bf16.mxu0 %v14584_v22  ;;  %v14668_v22 = vld [vmem:[%s16814_s18 + $0x13c0] ss:$8 sps:$4 sm:$0xff]  }
 0x368   : > { %11971 = vmatpush1.bf16.msra.mxu1 %v14579_v23  ;;  %v14673_v23 = vld [vmem:[%s16814_s18 + $0x7d4] ss:$8 sps:$4 sm:$0xff]  }
 0x369   : > { %12463 = vmatpush1.bf16.msra.mxu0 %v14582_v24  ;;  %11972 = vmatprep.subr.bf16.mxu1 %v14587_v25  ;;  %v14676_v24 = vld [vmem:[%s16814_s18 + $0x13d4] ss:$8 sps:$4 sm:$0xff]   ;;  %v14671_v25 = vld [vmem:[%s16814_s18 + $0x7d0] ss:$8 sps:$4 sm:$0xff]  }
 0x36a   : > { %12464 = vmatprep.subr.bf16.mxu0 %v14590_v26  ;;  %v14674_v26 = vld [vmem:[%s16814_s18 + $0x13d0] ss:$8 sps:$4 sm:$0xff]  }
 0x36c   : > { %11973 = vmatpush1.bf16.msra.mxu1 %v14585_v27  ;;  %v14679_v27 = vld [vmem:[%s16814_s18 + $0x7e4] ss:$8 sps:$4 sm:$0xff]  }
 0x36d   : > { %12465 = vmatpush1.bf16.msra.mxu0 %v14588_v28  ;;  %11983 = vmatprep.subr.bf16.mxu1 %v14594_v12  ;;  %v14682_v28 = vld [vmem:[%s16814_s18 + $0x13e4] ss:$8 sps:$4 sm:$0xff]  }
 0x36e   : > { %12475 = vmatprep.subr.bf16.mxu0 %v14598_v30  ;;  %v17480_v12 = vld [vmem:[%s17924_s0 + $0x10] sm:$0xff]  ;;  %v17485_v30 = vld [vmem:[%s17924_s0 + $0x28] sm:$0xff] }
 0x36f   : > { %11975 = vmatmul.mubr.bf16.vlgmr.msra.gmra.mrb[0].mxu1 %v17409_v31 }
 0x370   : > { %12467 = vmatmul.mubr.bf16.vlgmr.msra.gmra.mrb[0].mxu0 %v17413_v32  ;;  %11984 = vmatpush1.bf16.msra.mxu1 %v14592_v35  ;;  %v14677_v35 = vld [vmem:[%s16814_s18 + $0x7e0] ss:$8 sps:$4 sm:$0xff]  }
 0x371   : > { %12476 = vmatpush1.bf16.msra.mxu0 %v14596_v36  ;;  %11985 = vmatprep.subr.bf16.mxu1 %v14601_v37  ;;  %v14680_v36 = vld [vmem:[%s16814_s18 + $0x13e0] ss:$8 sps:$4 sm:$0xff]   ;;  %v14685_v37 = vld [vmem:[%s16814_s18 + $0x7f4] ss:$8 sps:$4 sm:$0xff]  }
 0x372   : > { %12477 = vmatprep.subr.bf16.mxu0 %v14604_v38  ;;  %12015 = vmatprep.mubr.bf16.mxu1 %v7516_v58  ;;  %v14688_v38 = vld [vmem:[%s16814_s18 + $0x13f4] ss:$8 sps:$4 sm:$0xff]   ;;  %v17493_v58 = vrot.slane %v17480_v12, %v16867_v2 }
 0x373   : > { %12507 = vmatprep.mubr.bf16.mxu0 %v7663_v39  ;;  %v17497_v39 = vrot.slane %v17485_v30, %v16867_v2 }
 0x374   : > { %11986 = vmatpush1.bf16.msra.mxu1 %v14599_v18  ;;  %v14683_v18 = vld [vmem:[%s16814_s18 + $0x7f0] ss:$8 sps:$4 sm:$0xff]  }
 0x375   : > { %12478 = vmatpush1.bf16.msra.mxu0 %v14602_v40  ;;  %11987 = vmatprep.subr.bf16.mxu1 %v14607_v29  ;;  %v14686_v40 = vld [vmem:[%s16814_s18 + $0x13f0] ss:$8 sps:$4 sm:$0xff]   ;;  %v14691_v29 = vld [vmem:[%s16814_s18 + $0x804] ss:$8 sps:$4 sm:$0xff]  }
 0x376   : > { %12479 = vmatprep.subr.bf16.mxu0 %v14610_v5  ;;  %v14694_v5 = vld [vmem:[%s16814_s18 + $0x1404] ss:$8 sps:$4 sm:$0xff]  }
 0x378   : > { %11988 = vmatpush1.bf16.msra.mxu1 %v14605_v11  ;;  %v7532_v11 = vcombine.high %v17493_v58, %v17493_v58 }
 0x379   : > { %12480 = vmatpush1.bf16.msra.mxu0 %v14608_v9  ;;  %11989 = vmatprep.subr.bf16.mxu1 %v14613_v43  ;;  %v7679_v9 = vcombine.high %v17497_v39, %v17497_v39  ;;  %v7514_v43 = vcombine.high %v17409_v31, %v17409_v31 }
 0x37a   : > { %12481 = vmatprep.subr.bf16.mxu0 %v14616_v44  ;;  %v7661_v44 = vcombine.high %v17413_v32, %v17413_v32  ;;  %v14695_v32 = vld [vmem:[%s16814_s18 + $0x810] ss:$8 sps:$4 sm:$0xff]  }
 0x37b   : > { %v17519_v31 = vrot.slane %v7679_v9, %v16867_v2  ;;  %v14770_v9 = vld [vmem:[%s16814_s18 + $0x14d0] ss:$8 sps:$4 sm:$0xff]  }
 0x37c   : > { %11990 = vmatpush1.bf16.msra.mxu1 %v14611_v45  ;;  %v14689_v45 = vld [vmem:[%s16814_s18 + $0x800] ss:$8 sps:$4 sm:$0xff]  }
 0x37d   : > { %12482 = vmatpush1.bf16.msra.mxu0 %v14614_v46  ;;  %11991 = vmatprep.subr.bf16.mxu1 %v14619_v47  ;;  %v14692_v46 = vld [vmem:[%s16814_s18 + $0x1400] ss:$8 sps:$4 sm:$0xff]   ;;  %v14697_v47 = vld [vmem:[%s16814_s18 + $0x814] ss:$8 sps:$4 sm:$0xff]  }
 0x37e   : > { %12483 = vmatprep.subr.bf16.mxu0 %v14622_v48  ;;  %v14700_v48 = vld [vmem:[%s16814_s18 + $0x1414] ss:$8 sps:$4 sm:$0xff]  }
 0x380   : > { %11992 = vmatpush1.bf16.msra.mxu1 %v14617_v49  ;;  %v17516_v49 = vrot.slane %v7532_v11, %v16867_v2  ;;  %v14767_v11 = vld [vmem:[%s16814_s18 + $0x8d0] ss:$8 sps:$4 sm:$0xff]  }
 0x381   : > { %12484 = vmatpush1.bf16.msra.mxu0 %v14620_v50  ;;  %11993 = vmatprep.subr.bf16.mxu1 %v14625_v51  ;;  %v14698_v50 = vld [vmem:[%s16814_s18 + $0x1410] ss:$8 sps:$4 sm:$0xff]   ;;  %v14703_v51 = vld [vmem:[%s16814_s18 + $0x824] ss:$8 sps:$4 sm:$0xff]  }
 0x382   : > { %12485 = vmatprep.subr.bf16.mxu0 %v14628_v52  ;;  %v14706_v52 = vld [vmem:[%s16814_s18 + $0x1424] ss:$8 sps:$4 sm:$0xff]  }
 0x384   : > { %11994 = vmatpush1.bf16.msra.mxu1 %v14623_v34  ;;  %v14701_v34 = vld [vmem:[%s16814_s18 + $0x820] ss:$8 sps:$4 sm:$0xff]  }
 0x385   : > { %12486 = vmatpush1.bf16.msra.mxu0 %v14626_v54  ;;  %11995 = vmatprep.subr.bf16.mxu1 %v14631_v60  ;;  %v14704_v54 = vld [vmem:[%s16814_s18 + $0x1420] ss:$8 sps:$4 sm:$0xff]   ;;  %v14709_v60 = vld [vmem:[%s16814_s18 + $0x834] ss:$8 sps:$4 sm:$0xff]  }
 0x386   : > { %12487 = vmatprep.subr.bf16.mxu0 %v14634_v61  ;;  %v14712_v61 = vld [vmem:[%s16814_s18 + $0x1434] ss:$8 sps:$4 sm:$0xff]  }
 0x388   : > { %11996 = vmatpush1.bf16.msra.mxu1 %v14629_v41  ;;  %v14707_v41 = vld [vmem:[%s16814_s18 + $0x830] ss:$8 sps:$4 sm:$0xff]  }
 0x389   : > { %12488 = vmatpush1.bf16.msra.mxu0 %v14632_v62  ;;  %11997 = vmatprep.subr.bf16.mxu1 %v14637_v42  ;;  %v14710_v62 = vld [vmem:[%s16814_s18 + $0x1430] ss:$8 sps:$4 sm:$0xff]   ;;  %v14715_v42 = vld [vmem:[%s16814_s18 + $0x844] ss:$8 sps:$4 sm:$0xff]  }
 0x38a   : > { %12489 = vmatprep.subr.bf16.mxu0 %v14640_v63  ;;  %v14718_v63 = vld [vmem:[%s16814_s18 + $0x1444] ss:$8 sps:$4 sm:$0xff]  }
 0x38c   : > { %11998 = vmatpush1.bf16.msra.mxu1 %v14635_v53  ;;  %v14713_v53 = vld [vmem:[%s16814_s18 + $0x840] ss:$8 sps:$4 sm:$0xff]  }
 0x38d   : > { %12490 = vmatpush1.bf16.msra.mxu0 %v14638_v0  ;;  %11999 = vmatprep.subr.bf16.mxu1 %v14643_v33  ;;  %v14716_v0 = vld [vmem:[%s16814_s18 + $0x1440] ss:$8 sps:$4 sm:$0xff]   ;;  %v14721_v33 = vld [vmem:[%s16814_s18 + $0x854] ss:$8 sps:$4 sm:$0xff]  }
 0x38e   : > { %12491 = vmatprep.subr.bf16.mxu0 %v14646_v1  ;;  %v14724_v1 = vld [vmem:[%s16814_s18 + $0x1454] ss:$8 sps:$4 sm:$0xff]  }
 0x390   : > { %12000 = vmatpush1.bf16.msra.mxu1 %v14641_v3  ;;  %v14719_v3 = vld [vmem:[%s16814_s18 + $0x850] ss:$8 sps:$4 sm:$0xff]  }
 0x391   : > { %12492 = vmatpush1.bf16.msra.mxu0 %v14644_v4  ;;  %12001 = vmatprep.subr.bf16.mxu1 %v14649_v6  ;;  %v14722_v4 = vld [vmem:[%s16814_s18 + $0x1450] ss:$8 sps:$4 sm:$0xff]   ;;  %v14727_v6 = vld [vmem:[%s16814_s18 + $0x864] ss:$8 sps:$4 sm:$0xff]  }
 0x392   : > { %12493 = vmatprep.subr.bf16.mxu0 %v14652_v7  ;;  %v14730_v7 = vld [vmem:[%s16814_s18 + $0x1464] ss:$8 sps:$4 sm:$0xff]  }
 0x394   : > { %12002 = vmatpush1.bf16.msra.mxu1 %v14647_v55  ;;  %v14725_v55 = vld [vmem:[%s16814_s18 + $0x860] ss:$8 sps:$4 sm:$0xff]  }
 0x395   : > { %12494 = vmatpush1.bf16.msra.mxu0 %v14650_v56  ;;  %12003 = vmatprep.subr.bf16.mxu1 %v14655_v13  ;;  %v14728_v56 = vld [vmem:[%s16814_s18 + $0x1460] ss:$8 sps:$4 sm:$0xff]   ;;  %v14733_v13 = vld [vmem:[%s16814_s18 + $0x874] ss:$8 sps:$4 sm:$0xff]  }
 0x396   : > { %12495 = vmatprep.subr.bf16.mxu0 %v14658_v14  ;;  %v14736_v14 = vld [vmem:[%s16814_s18 + $0x1474] ss:$8 sps:$4 sm:$0xff]  }
 0x398   : > { %12004 = vmatpush1.bf16.msra.mxu1 %v14653_v15  ;;  %v14731_v15 = vld [vmem:[%s16814_s18 + $0x870] ss:$8 sps:$4 sm:$0xff]  }
 0x399   : > { %12496 = vmatpush1.bf16.msra.mxu0 %v14656_v16  ;;  %12005 = vmatprep.subr.bf16.mxu1 %v14661_v57  ;;  %v14734_v16 = vld [vmem:[%s16814_s18 + $0x1470] ss:$8 sps:$4 sm:$0xff]   ;;  %v14739_v57 = vld [vmem:[%s16814_s18 + $0x884] ss:$8 sps:$4 sm:$0xff]  }
 0x39a   : > { %12497 = vmatprep.subr.bf16.mxu0 %v14664_v17  ;;  %v14742_v17 = vld [vmem:[%s16814_s18 + $0x1484] ss:$8 sps:$4 sm:$0xff]  }
 0x39c   : > { %12006 = vmatpush1.bf16.msra.mxu1 %v14659_v8  ;;  %v14737_v8 = vld [vmem:[%s16814_s18 + $0x880] ss:$8 sps:$4 sm:$0xff]  }
 0x39d   : > { %12498 = vmatpush1.bf16.msra.mxu0 %v14662_v19  ;;  %12007 = vmatprep.subr.bf16.mxu1 %v14667_v10  ;;  %v14740_v19 = vld [vmem:[%s16814_s18 + $0x1480] ss:$8 sps:$4 sm:$0xff]   ;;  %v14745_v10 = vld [vmem:[%s16814_s18 + $0x894] ss:$8 sps:$4 sm:$0xff]  }
 0x39e   : > { %12499 = vmatprep.subr.bf16.mxu0 %v14670_v20  ;;  %v14748_v20 = vld [vmem:[%s16814_s18 + $0x1494] ss:$8 sps:$4 sm:$0xff]  }
 0x3a0   : > { %12008 = vmatpush1.bf16.msra.mxu1 %v14665_v21  ;;  %v14743_v21 = vld [vmem:[%s16814_s18 + $0x890] ss:$8 sps:$4 sm:$0xff]  }
 0x3a1   : > { %12500 = vmatpush1.bf16.msra.mxu0 %v14668_v22  ;;  %12009 = vmatprep.subr.bf16.mxu1 %v14673_v23  ;;  %v14746_v22 = vld [vmem:[%s16814_s18 + $0x1490] ss:$8 sps:$4 sm:$0xff]   ;;  %v14751_v23 = vld [vmem:[%s16814_s18 + $0x8a4] ss:$8 sps:$4 sm:$0xff]  }
 0x3a2   : > { %12501 = vmatprep.subr.bf16.mxu0 %v14676_v24  ;;  %v14754_v24 = vld [vmem:[%s16814_s18 + $0x14a4] ss:$8 sps:$4 sm:$0xff]  }
 0x3a4   : > { %12010 = vmatpush1.bf16.msra.mxu1 %v14671_v25  ;;  %v14749_v25 = vld [vmem:[%s16814_s18 + $0x8a0] ss:$8 sps:$4 sm:$0xff]  }
 0x3a5   : > { %12502 = vmatpush1.bf16.msra.mxu0 %v14674_v26  ;;  %12011 = vmatprep.subr.bf16.mxu1 %v14679_v27  ;;  %v14752_v26 = vld [vmem:[%s16814_s18 + $0x14a0] ss:$8 sps:$4 sm:$0xff]   ;;  %v14757_v27 = vld [vmem:[%s16814_s18 + $0x8b4] ss:$8 sps:$4 sm:$0xff]  }
 0x3a6   : > { %12503 = vmatprep.subr.bf16.mxu0 %v14682_v28  ;;  %v14760_v28 = vld [vmem:[%s16814_s18 + $0x14b4] ss:$8 sps:$4 sm:$0xff]  }
 0x3a8   : > { %12012 = vmatpush1.bf16.msra.mxu1 %v14677_v35  ;;  %v14755_v35 = vld [vmem:[%s16814_s18 + $0x8b0] ss:$8 sps:$4 sm:$0xff]  }
 0x3a9   : > { %12504 = vmatpush1.bf16.msra.mxu0 %v14680_v36  ;;  %12013 = vmatprep.subr.bf16.mxu1 %v14685_v37  ;;  %v14758_v36 = vld [vmem:[%s16814_s18 + $0x14b0] ss:$8 sps:$4 sm:$0xff]   ;;  %v14763_v37 = vld [vmem:[%s16814_s18 + $0x8c4] ss:$8 sps:$4 sm:$0xff]  }
 0x3aa   : > { %12505 = vmatprep.subr.bf16.mxu0 %v14688_v38  ;;  %v14766_v38 = vld [vmem:[%s16814_s18 + $0x14c4] ss:$8 sps:$4 sm:$0xff]  }
 0x3ac   : > { %12014 = vmatpush1.bf16.msra.mxu1 %v14683_v18  ;;  %v14761_v18 = vld [vmem:[%s16814_s18 + $0x8c0] ss:$8 sps:$4 sm:$0xff]  }
 0x3ad   : > { %12506 = vmatpush1.bf16.msra.mxu0 %v14686_v40  ;;  %12024 = vmatprep.subr.bf16.mxu1 %v14691_v29  ;;  %v14764_v40 = vld [vmem:[%s16814_s18 + $0x14c0] ss:$8 sps:$4 sm:$0xff]   ;;  %v14769_v29 = vld [vmem:[%s16814_s18 + $0x8d4] ss:$8 sps:$4 sm:$0xff]  }
 0x3ae   : > { %12516 = vmatprep.subr.bf16.mxu0 %v14694_v5  ;;  %v14772_v5 = vld [vmem:[%s16814_s18 + $0x14d4] ss:$8 sps:$4 sm:$0xff]  }
 0x3af   : > { %12016 = vmatmul.mubr.bf16.vlgmr.msra.gmra.mrb[0].mxu1 %v7514_v43  ;;  %v14775_v43 = vld [vmem:[%s16814_s18 + $0x8e4] ss:$8 sps:$4 sm:$0xff]  }
 0x3b0   : > { %12508 = vmatmul.mubr.bf16.vlgmr.msra.gmra.mrb[0].mxu0 %v7661_v44  ;;  %12025 = vmatpush1.bf16.msra.mxu1 %v14689_v45  ;;  %v14778_v44 = vld [vmem:[%s16814_s18 + $0x14e4] ss:$8 sps:$4 sm:$0xff]   ;;  %v14773_v45 = vld [vmem:[%s16814_s18 + $0x8e0] ss:$8 sps:$4 sm:$0xff]  }
 0x3b1   : > { %12517 = vmatpush1.bf16.msra.mxu0 %v14692_v46  ;;  %12026 = vmatprep.subr.bf16.mxu1 %v14697_v47  ;;  %v14776_v46 = vld [vmem:[%s16814_s18 + $0x14e0] ss:$8 sps:$4 sm:$0xff]   ;;  %v14781_v47 = vld [vmem:[%s16814_s18 + $0x8f4] ss:$8 sps:$4 sm:$0xff]  }
 0x3b2   : > { %12518 = vmatprep.subr.bf16.mxu0 %v14700_v48  ;;  %12056 = vmatprep.mubr.bf16.mxu1 %v17516_v49  ;;  %v14784_v48 = vld [vmem:[%s16814_s18 + $0x14f4] ss:$8 sps:$4 sm:$0xff]  }
 0x3b3   : > { %12548 = vmatprep.mubr.bf16.mxu0 %v17519_v31 }
 0x3b4   : > { %12027 = vmatpush1.bf16.msra.mxu1 %v14695_v32  ;;  %v14779_v32 = vld [vmem:[%s16814_s18 + $0x8f0] ss:$8 sps:$4 sm:$0xff]  }
 0x3b5   : > { %12519 = vmatpush1.bf16.msra.mxu0 %v14698_v50  ;;  %12028 = vmatprep.subr.bf16.mxu1 %v14703_v51  ;;  %v14782_v50 = vld [vmem:[%s16814_s18 + $0x14f0] ss:$8 sps:$4 sm:$0xff]   ;;  %v14787_v51 = vld [vmem:[%s16814_s18 + $0x904] ss:$8 sps:$4 sm:$0xff]  }
 0x3b6   : > { %12520 = vmatprep.subr.bf16.mxu0 %v14706_v52  ;;  %v14790_v52 = vld [vmem:[%s16814_s18 + $0x1504] ss:$8 sps:$4 sm:$0xff]  }
 0x3b8   : > { %12029 = vmatpush1.bf16.msra.mxu1 %v14701_v34  ;;  %v17585_v34 = vrot.slane %v17493_v58, %v16867_v2  ;;  %v7564_v58 = vcombine.high %v17516_v49, %v17516_v49  ;;  %v14799_v49 = vld [vmem:[%s16814_s18 + $0x924] ss:$8 sps:$4 sm:$0xff]  }
 0x3b9   : > { %12521 = vmatpush1.bf16.msra.mxu0 %v14704_v54  ;;  %12030 = vmatprep.subr.bf16.mxu1 %v14709_v60  ;;  %v17589_v54 = vrot.slane %v17497_v39, %v16867_v2  ;;  %v14785_v60 = vld [vmem:[%s16814_s18 + $0x900] ss:$8 sps:$4 sm:$0xff]   ;;  %v14791_v39 = vld [vmem:[%s16814_s18 + $0x910] ss:$8 sps:$4 sm:$0xff]  }
 0x3ba   : > { %12522 = vmatprep.subr.bf16.mxu0 %v14712_v61  ;;  %v14788_v61 = vld [vmem:[%s16814_s18 + $0x1500] ss:$8 sps:$4 sm:$0xff]  }
 0x3bc   : > { %12031 = vmatpush1.bf16.msra.mxu1 %v14707_v41  ;;  %v14793_v41 = vld [vmem:[%s16814_s18 + $0x914] ss:$8 sps:$4 sm:$0xff]  }
 0x3bd   : > { %12523 = vmatpush1.bf16.msra.mxu0 %v14710_v62  ;;  %12032 = vmatprep.subr.bf16.mxu1 %v14715_v42  ;;  %v14796_v62 = vld [vmem:[%s16814_s18 + $0x1514] ss:$8 sps:$4 sm:$0xff]   ;;  %v7711_v42 = vcombine.high %v17519_v31, %v17519_v31  ;;  %v14797_v31 = vld [vmem:[%s16814_s18 + $0x920] ss:$8 sps:$4 sm:$0xff]  }
 0x3be   : > { %12524 = vmatprep.subr.bf16.mxu0 %v14718_v63  ;;  %v14794_v63 = vld [vmem:[%s16814_s18 + $0x1510] ss:$8 sps:$4 sm:$0xff]  }
 0x3c0   : > { %12033 = vmatpush1.bf16.msra.mxu1 %v14713_v53  ;;  %v14802_v53 = vld [vmem:[%s16814_s18 + $0x1524] ss:$8 sps:$4 sm:$0xff]  }
 0x3c1   : > { %12525 = vmatpush1.bf16.msra.mxu0 %v14716_v0  ;;  %12034 = vmatprep.subr.bf16.mxu1 %v14721_v33  ;;  %v14800_v0 = vld [vmem:[%s16814_s18 + $0x1520] ss:$8 sps:$4 sm:$0xff]   ;;  %v14805_v33 = vld [vmem:[%s16814_s18 + $0x934] ss:$8 sps:$4 sm:$0xff]  }
 0x3c2   : > { %12526 = vmatprep.subr.bf16.mxu0 %v14724_v1  ;;  %v14808_v1 = vld [vmem:[%s16814_s18 + $0x1534] ss:$8 sps:$4 sm:$0xff]  }
 0x3c4   : > { %12035 = vmatpush1.bf16.msra.mxu1 %v14719_v3  ;;  %v14803_v3 = vld [vmem:[%s16814_s18 + $0x930] ss:$8 sps:$4 sm:$0xff]  }
 0x3c5   : > { %12527 = vmatpush1.bf16.msra.mxu0 %v14722_v4  ;;  %12036 = vmatprep.subr.bf16.mxu1 %v14727_v6  ;;  %v14806_v4 = vld [vmem:[%s16814_s18 + $0x1530] ss:$8 sps:$4 sm:$0xff]   ;;  %v14811_v6 = vld [vmem:[%s16814_s18 + $0x944] ss:$8 sps:$4 sm:$0xff]  }
 0x3c6   : > { %12528 = vmatprep.subr.bf16.mxu0 %v14730_v7  ;;  %v14814_v7 = vld [vmem:[%s16814_s18 + $0x1544] ss:$8 sps:$4 sm:$0xff]  }
 0x3c8   : > { %12037 = vmatpush1.bf16.msra.mxu1 %v14725_v55  ;;  %v14809_v55 = vld [vmem:[%s16814_s18 + $0x940] ss:$8 sps:$4 sm:$0xff]  }
 0x3c9   : > { %12529 = vmatpush1.bf16.msra.mxu0 %v14728_v56  ;;  %12038 = vmatprep.subr.bf16.mxu1 %v14733_v13  ;;  %v14812_v56 = vld [vmem:[%s16814_s18 + $0x1540] ss:$8 sps:$4 sm:$0xff]   ;;  %v14817_v13 = vld [vmem:[%s16814_s18 + $0x954] ss:$8 sps:$4 sm:$0xff]  }
 0x3ca   : > { %12530 = vmatprep.subr.bf16.mxu0 %v14736_v14  ;;  %v14820_v14 = vld [vmem:[%s16814_s18 + $0x1554] ss:$8 sps:$4 sm:$0xff]  }
 0x3cc   : > { %12039 = vmatpush1.bf16.msra.mxu1 %v14731_v15  ;;  %v14815_v15 = vld [vmem:[%s16814_s18 + $0x950] ss:$8 sps:$4 sm:$0xff]  }
 0x3cd   : > { %12531 = vmatpush1.bf16.msra.mxu0 %v14734_v16  ;;  %12040 = vmatprep.subr.bf16.mxu1 %v14739_v57  ;;  %v14818_v16 = vld [vmem:[%s16814_s18 + $0x1550] ss:$8 sps:$4 sm:$0xff]   ;;  %v14823_v57 = vld [vmem:[%s16814_s18 + $0x964] ss:$8 sps:$4 sm:$0xff]  }
 0x3ce   : > { %12532 = vmatprep.subr.bf16.mxu0 %v14742_v17  ;;  %v14826_v17 = vld [vmem:[%s16814_s18 + $0x1564] ss:$8 sps:$4 sm:$0xff]  }
 0x3d0   : > { %12041 = vmatpush1.bf16.msra.mxu1 %v14737_v8  ;;  %v14821_v8 = vld [vmem:[%s16814_s18 + $0x960] ss:$8 sps:$4 sm:$0xff]  }
 0x3d1   : > { %12533 = vmatpush1.bf16.msra.mxu0 %v14740_v19  ;;  %12042 = vmatprep.subr.bf16.mxu1 %v14745_v10  ;;  %v14824_v19 = vld [vmem:[%s16814_s18 + $0x1560] ss:$8 sps:$4 sm:$0xff]   ;;  %v14829_v10 = vld [vmem:[%s16814_s18 + $0x974] ss:$8 sps:$4 sm:$0xff]  }
 0x3d2   : > { %12534 = vmatprep.subr.bf16.mxu0 %v14748_v20  ;;  %v14832_v20 = vld [vmem:[%s16814_s18 + $0x1574] ss:$8 sps:$4 sm:$0xff]  }
 0x3d4   : > { %12043 = vmatpush1.bf16.msra.mxu1 %v14743_v21  ;;  %v14827_v21 = vld [vmem:[%s16814_s18 + $0x970] ss:$8 sps:$4 sm:$0xff]  }
 0x3d5   : > { %12535 = vmatpush1.bf16.msra.mxu0 %v14746_v22  ;;  %12044 = vmatprep.subr.bf16.mxu1 %v14751_v23  ;;  %v14830_v22 = vld [vmem:[%s16814_s18 + $0x1570] ss:$8 sps:$4 sm:$0xff]   ;;  %v14835_v23 = vld [vmem:[%s16814_s18 + $0x984] ss:$8 sps:$4 sm:$0xff]  }
 0x3d6   : > { %12536 = vmatprep.subr.bf16.mxu0 %v14754_v24  ;;  %v14838_v24 = vld [vmem:[%s16814_s18 + $0x1584] ss:$8 sps:$4 sm:$0xff]  }
 0x3d8   : > { %12045 = vmatpush1.bf16.msra.mxu1 %v14749_v25  ;;  %v14833_v25 = vld [vmem:[%s16814_s18 + $0x980] ss:$8 sps:$4 sm:$0xff]  }
 0x3d9   : > { %12537 = vmatpush1.bf16.msra.mxu0 %v14752_v26  ;;  %12046 = vmatprep.subr.bf16.mxu1 %v14757_v27  ;;  %v14836_v26 = vld [vmem:[%s16814_s18 + $0x1580] ss:$8 sps:$4 sm:$0xff]   ;;  %v14841_v27 = vld [vmem:[%s16814_s18 + $0x994] ss:$8 sps:$4 sm:$0xff]  }
 0x3da   : > { %12538 = vmatprep.subr.bf16.mxu0 %v14760_v28  ;;  %v14844_v28 = vld [vmem:[%s16814_s18 + $0x1594] ss:$8 sps:$4 sm:$0xff]  }
 0x3dc   : > { %12047 = vmatpush1.bf16.msra.mxu1 %v14755_v35  ;;  %v14839_v35 = vld [vmem:[%s16814_s18 + $0x990] ss:$8 sps:$4 sm:$0xff]  }
 0x3dd   : > { %12539 = vmatpush1.bf16.msra.mxu0 %v14758_v36  ;;  %12048 = vmatprep.subr.bf16.mxu1 %v14763_v37  ;;  %v14842_v36 = vld [vmem:[%s16814_s18 + $0x1590] ss:$8 sps:$4 sm:$0xff]   ;;  %v14847_v37 = vld [vmem:[%s16814_s18 + $0x9a4] ss:$8 sps:$4 sm:$0xff]  }
 0x3de   : > { %12540 = vmatprep.subr.bf16.mxu0 %v14766_v38  ;;  %v14850_v38 = vld [vmem:[%s16814_s18 + $0x15a4] ss:$8 sps:$4 sm:$0xff]  }
 0x3e0   : > { %12049 = vmatpush1.bf16.msra.mxu1 %v14761_v18  ;;  %v14845_v18 = vld [vmem:[%s16814_s18 + $0x9a0] ss:$8 sps:$4 sm:$0xff]  }
 0x3e1   : > { %12541 = vmatpush1.bf16.msra.mxu0 %v14764_v40  ;;  %12050 = vmatprep.subr.bf16.mxu1 %v14769_v29  ;;  %v14848_v40 = vld [vmem:[%s16814_s18 + $0x15a0] ss:$8 sps:$4 sm:$0xff]   ;;  %v14853_v29 = vld [vmem:[%s16814_s18 + $0x9b4] ss:$8 sps:$4 sm:$0xff]  }
 0x3e2   : > { %12542 = vmatprep.subr.bf16.mxu0 %v14772_v5  ;;  %v14856_v5 = vld [vmem:[%s16814_s18 + $0x15b4] ss:$8 sps:$4 sm:$0xff]  }
 0x3e4   : > { %12051 = vmatpush1.bf16.msra.mxu1 %v14767_v11  ;;  %v14851_v11 = vld [vmem:[%s16814_s18 + $0x9b0] ss:$8 sps:$4 sm:$0xff]  }
 0x3e5   : > { %12543 = vmatpush1.bf16.msra.mxu0 %v14770_v9  ;;  %12052 = vmatprep.subr.bf16.mxu1 %v14775_v43  ;;  %v14854_v9 = vld [vmem:[%s16814_s18 + $0x15b0] ss:$8 sps:$4 sm:$0xff]   ;;  %v14859_v43 = vld [vmem:[%s16814_s18 + $0x9c4] ss:$8 sps:$4 sm:$0xff]  }
 0x3e6   : > { %12544 = vmatprep.subr.bf16.mxu0 %v14778_v44  ;;  %v14862_v44 = vld [vmem:[%s16814_s18 + $0x15c4] ss:$8 sps:$4 sm:$0xff]  }
 0x3e8   : > { %12053 = vmatpush1.bf16.msra.mxu1 %v14773_v45  ;;  %v14857_v45 = vld [vmem:[%s16814_s18 + $0x9c0] ss:$8 sps:$4 sm:$0xff]  }
 0x3e9   : > { %12545 = vmatpush1.bf16.msra.mxu0 %v14776_v46  ;;  %12054 = vmatprep.subr.bf16.mxu1 %v14781_v47  ;;  %v14860_v46 = vld [vmem:[%s16814_s18 + $0x15c0] ss:$8 sps:$4 sm:$0xff]   ;;  %v14865_v47 = vld [vmem:[%s16814_s18 + $0x9d4] ss:$8 sps:$4 sm:$0xff]  }
 0x3ea   : > { %12546 = vmatprep.subr.bf16.mxu0 %v14784_v48  ;;  %v14868_v48 = vld [vmem:[%s16814_s18 + $0x15d4] ss:$8 sps:$4 sm:$0xff]  }
 0x3ec   : > { %12055 = vmatpush1.bf16.msra.mxu1 %v14779_v32  ;;  %v14863_v32 = vld [vmem:[%s16814_s18 + $0x9d0] ss:$8 sps:$4 sm:$0xff]  }
 0x3ed   : > { %12547 = vmatpush1.bf16.msra.mxu0 %v14782_v50  ;;  %12065 = vmatprep.subr.bf16.mxu1 %v14787_v51  ;;  %v14866_v50 = vld [vmem:[%s16814_s18 + $0x15d0] ss:$8 sps:$4 sm:$0xff]   ;;  %v14871_v51 = vld [vmem:[%s16814_s18 + $0x9e4] ss:$8 sps:$4 sm:$0xff]  }
 0x3ee   : > { %12557 = vmatprep.subr.bf16.mxu0 %v14790_v52  ;;  %v14874_v52 = vld [vmem:[%s16814_s18 + $0x15e4] ss:$8 sps:$4 sm:$0xff]  }
 0x3ef   : > { %12057 = vmatmul.mubr.bf16.vlgmr.msra.gmra.mrb[0].mxu1 %v17585_v34 }
 0x3f0   : > { %12549 = vmatmul.mubr.bf16.vlgmr.msra.gmra.mrb[0].mxu0 %v17589_v54  ;;  %12066 = vmatpush1.bf16.msra.mxu1 %v14785_v60  ;;  %v7517_v60 = vcombine.high %v17480_v12, %v17480_v12  ;;  %v14875_v12 = vld [vmem:[%s16814_s18 + $0x9f0] ss:$8 sps:$4 sm:$0xff]  }
 0x3f1   : > { %12558 = vmatpush1.bf16.msra.mxu0 %v14788_v61  ;;  %12067 = vmatprep.subr.bf16.mxu1 %v14793_v41  ;;  %v7664_v61 = vcombine.high %v17485_v30, %v17485_v30  ;;  %v14869_v41 = vld [vmem:[%s16814_s18 + $0x9e0] ss:$8 sps:$4 sm:$0xff]   ;;  %v14878_v30 = vld [vmem:[%s16814_s18 + $0x15f0] ss:$8 sps:$4 sm:$0xff]  }
 0x3f2   : > { %12559 = vmatprep.subr.bf16.mxu0 %v14796_v62  ;;  %12097 = vmatprep.mubr.bf16.mxu1 %v7564_v58  ;;  %v14872_v62 = vld [vmem:[%s16814_s18 + $0x15e0] ss:$8 sps:$4 sm:$0xff]   ;;  %v14877_v58 = vld [vmem:[%s16814_s18 + $0x9f4] ss:$8 sps:$4 sm:$0xff]  }
 0x3f3   : > { %12589 = vmatprep.mubr.bf16.mxu0 %v7711_v42  ;;  %v14880_v42 = vld [vmem:[%s16814_s18 + $0x15f4] ss:$8 sps:$4 sm:$0xff]  }
 0x3f4   : > { %12068 = vmatpush1.bf16.msra.mxu1 %v14791_v39  ;;  %v17662_v39 = vrot.slane %v7517_v60, %v16867_v2  ;;  %v14947_v60 = vld [vmem:[%s16814_s18 + $0xab0] ss:$8 sps:$4 sm:$0xff]  }
 0x3f5   : > { %12560 = vmatpush1.bf16.msra.mxu0 %v14794_v63  ;;  %12069 = vmatprep.subr.bf16.mxu1 %v14799_v49  ;;  %v17665_v63 = vrot.slane %v7664_v61, %v16867_v2  ;;  %v14883_v49 = vld [vmem:[%s16814_s18 + $0xa04] ss:$8 sps:$4 sm:$0xff]   ;;  %v14950_v61 = vld [vmem:[%s16814_s18 + $0x16b0] ss:$8 sps:$4 sm:$0xff]  }
 0x3f6   : > { %12561 = vmatprep.subr.bf16.mxu0 %v14802_v53  ;;  %v14886_v53 = vld [vmem:[%s16814_s18 + $0x1604] ss:$8 sps:$4 sm:$0xff]  }
 0x3f8   : > { %12070 = vmatpush1.bf16.msra.mxu1 %v14797_v31  ;;  %v7533_v31 = vcombine.high %v17662_v39, %v17662_v39 }
 0x3f9   : > { %12562 = vmatpush1.bf16.msra.mxu0 %v14800_v0  ;;  %12071 = vmatprep.subr.bf16.mxu1 %v14805_v33  ;;  %v7680_v0 = vcombine.high %v17665_v63, %v17665_v63  ;;  %v7562_v33 = vcombine.high %v17585_v34, %v17585_v34 }
 0x3fa   : > { %12563 = vmatprep.subr.bf16.mxu0 %v14808_v1  ;;  %v7709_v1 = vcombine.high %v17589_v54, %v17589_v54  ;;  %v14887_v54 = vld [vmem:[%s16814_s18 + $0xa10] ss:$8 sps:$4 sm:$0xff]  }
 0x3fb   : > { %v17687_v34 = vrot.slane %v7680_v0, %v16867_v2  ;;  %v14970_v0 = vld [vmem:[%s16814_s18 + $0x16e4] ss:$8 sps:$4 sm:$0xff]  }
 0x3fc   : > { %12072 = vmatpush1.bf16.msra.mxu1 %v14803_v3  ;;  %v14881_v3 = vld [vmem:[%s16814_s18 + $0xa00] ss:$8 sps:$4 sm:$0xff]  }
 0x3fd   : > { %12564 = vmatpush1.bf16.msra.mxu0 %v14806_v4  ;;  %12073 = vmatprep.subr.bf16.mxu1 %v14811_v6  ;;  %v14884_v4 = vld [vmem:[%s16814_s18 + $0x1600] ss:$8 sps:$4 sm:$0xff]   ;;  %v14889_v6 = vld [vmem:[%s16814_s18 + $0xa14] ss:$8 sps:$4 sm:$0xff]  }
 0x3fe   : > { %12565 = vmatprep.subr.bf16.mxu0 %v14814_v7  ;;  %v14892_v7 = vld [vmem:[%s16814_s18 + $0x1614] ss:$8 sps:$4 sm:$0xff]  }
 0x400   : > { %12074 = vmatpush1.bf16.msra.mxu1 %v14809_v55  ;;  %v17684_v55 = vrot.slane %v7533_v31, %v16867_v2  ;;  %v14967_v31 = vld [vmem:[%s16814_s18 + $0xae4] ss:$8 sps:$4 sm:$0xff]  }
 0x401   : > { %12566 = vmatpush1.bf16.msra.mxu0 %v14812_v56  ;;  %12075 = vmatprep.subr.bf16.mxu1 %v14817_v13  ;;  %v14890_v56 = vld [vmem:[%s16814_s18 + $0x1610] ss:$8 sps:$4 sm:$0xff]   ;;  %v14895_v13 = vld [vmem:[%s16814_s18 + $0xa24] ss:$8 sps:$4 sm:$0xff]  }
 0x402   : > { %12567 = vmatprep.subr.bf16.mxu0 %v14820_v14  ;;  %v14898_v14 = vld [vmem:[%s16814_s18 + $0x1624] ss:$8 sps:$4 sm:$0xff]  }
 0x404   : > { %12076 = vmatpush1.bf16.msra.mxu1 %v14815_v15  ;;  %v14893_v15 = vld [vmem:[%s16814_s18 + $0xa20] ss:$8 sps:$4 sm:$0xff]  }
 0x405   : > { %12568 = vmatpush1.bf16.msra.mxu0 %v14818_v16  ;;  %12077 = vmatprep.subr.bf16.mxu1 %v14823_v57  ;;  %v14896_v16 = vld [vmem:[%s16814_s18 + $0x1620] ss:$8 sps:$4 sm:$0xff]   ;;  %v14901_v57 = vld [vmem:[%s16814_s18 + $0xa34] ss:$8 sps:$4 sm:$0xff]  }
 0x406   : > { %12569 = vmatprep.subr.bf16.mxu0 %v14826_v17  ;;  %v14904_v17 = vld [vmem:[%s16814_s18 + $0x1634] ss:$8 sps:$4 sm:$0xff]  }
 0x408   : > { %12078 = vmatpush1.bf16.msra.mxu1 %v14821_v8  ;;  %v14899_v8 = vld [vmem:[%s16814_s18 + $0xa30] ss:$8 sps:$4 sm:$0xff]  }
 0x409   : > { %12570 = vmatpush1.bf16.msra.mxu0 %v14824_v19  ;;  %12079 = vmatprep.subr.bf16.mxu1 %v14829_v10  ;;  %v14902_v19 = vld [vmem:[%s16814_s18 + $0x1630] ss:$8 sps:$4 sm:$0xff]   ;;  %v14907_v10 = vld [vmem:[%s16814_s18 + $0xa44] ss:$8 sps:$4 sm:$0xff]  }
 0x40a   : > { %12571 = vmatprep.subr.bf16.mxu0 %v14832_v20  ;;  %v14910_v20 = vld [vmem:[%s16814_s18 + $0x1644] ss:$8 sps:$4 sm:$0xff]  }
 0x40c   : > { %12080 = vmatpush1.bf16.msra.mxu1 %v14827_v21  ;;  %v14905_v21 = vld [vmem:[%s16814_s18 + $0xa40] ss:$8 sps:$4 sm:$0xff]  }
 0x40d   : > { %12572 = vmatpush1.bf16.msra.mxu0 %v14830_v22  ;;  %12081 = vmatprep.subr.bf16.mxu1 %v14835_v23  ;;  %v14908_v22 = vld [vmem:[%s16814_s18 + $0x1640] ss:$8 sps:$4 sm:$0xff]   ;;  %v14913_v23 = vld [vmem:[%s16814_s18 + $0xa54] ss:$8 sps:$4 sm:$0xff]  }
 0x40e   : > { %12573 = vmatprep.subr.bf16.mxu0 %v14838_v24  ;;  %v14916_v24 = vld [vmem:[%s16814_s18 + $0x1654] ss:$8 sps:$4 sm:$0xff]  }
 0x410   : > { %12082 = vmatpush1.bf16.msra.mxu1 %v14833_v25  ;;  %v14911_v25 = vld [vmem:[%s16814_s18 + $0xa50] ss:$8 sps:$4 sm:$0xff]  }
 0x411   : > { %12574 = vmatpush1.bf16.msra.mxu0 %v14836_v26  ;;  %12083 = vmatprep.subr.bf16.mxu1 %v14841_v27  ;;  %v14914_v26 = vld [vmem:[%s16814_s18 + $0x1650] ss:$8 sps:$4 sm:$0xff]   ;;  %v14919_v27 = vld [vmem:[%s16814_s18 + $0xa64] ss:$8 sps:$4 sm:$0xff]  }
 0x412   : > { %12575 = vmatprep.subr.bf16.mxu0 %v14844_v28  ;;  %v14922_v28 = vld [vmem:[%s16814_s18 + $0x1664] ss:$8 sps:$4 sm:$0xff]  }
 0x414   : > { %12084 = vmatpush1.bf16.msra.mxu1 %v14839_v35  ;;  %v14917_v35 = vld [vmem:[%s16814_s18 + $0xa60] ss:$8 sps:$4 sm:$0xff]  }
 0x415   : > { %12576 = vmatpush1.bf16.msra.mxu0 %v14842_v36  ;;  %12085 = vmatprep.subr.bf16.mxu1 %v14847_v37  ;;  %v14920_v36 = vld [vmem:[%s16814_s18 + $0x1660] ss:$8 sps:$4 sm:$0xff]   ;;  %v14925_v37 = vld [vmem:[%s16814_s18 + $0xa74] ss:$8 sps:$4 sm:$0xff]  }
 0x416   : > { %12577 = vmatprep.subr.bf16.mxu0 %v14850_v38  ;;  %v14928_v38 = vld [vmem:[%s16814_s18 + $0x1674] ss:$8 sps:$4 sm:$0xff]  }
 0x418   : > { %12086 = vmatpush1.bf16.msra.mxu1 %v14845_v18  ;;  %v14923_v18 = vld [vmem:[%s16814_s18 + $0xa70] ss:$8 sps:$4 sm:$0xff]  }
 0x419   : > { %12578 = vmatpush1.bf16.msra.mxu0 %v14848_v40  ;;  %12087 = vmatprep.subr.bf16.mxu1 %v14853_v29  ;;  %v14926_v40 = vld [vmem:[%s16814_s18 + $0x1670] ss:$8 sps:$4 sm:$0xff]   ;;  %v14931_v29 = vld [vmem:[%s16814_s18 + $0xa84] ss:$8 sps:$4 sm:$0xff]  }
 0x41a   : > { %12579 = vmatprep.subr.bf16.mxu0 %v14856_v5  ;;  %v14934_v5 = vld [vmem:[%s16814_s18 + $0x1684] ss:$8 sps:$4 sm:$0xff]  }
 0x41c   : > { %12088 = vmatpush1.bf16.msra.mxu1 %v14851_v11  ;;  %v14929_v11 = vld [vmem:[%s16814_s18 + $0xa80] ss:$8 sps:$4 sm:$0xff]  }
 0x41d   : > { %12580 = vmatpush1.bf16.msra.mxu0 %v14854_v9  ;;  %12089 = vmatprep.subr.bf16.mxu1 %v14859_v43  ;;  %v14932_v9 = vld [vmem:[%s16814_s18 + $0x1680] ss:$8 sps:$4 sm:$0xff]   ;;  %v14937_v43 = vld [vmem:[%s16814_s18 + $0xa94] ss:$8 sps:$4 sm:$0xff]  }
 0x41e   : > { %12581 = vmatprep.subr.bf16.mxu0 %v14862_v44  ;;  %v14940_v44 = vld [vmem:[%s16814_s18 + $0x1694] ss:$8 sps:$4 sm:$0xff]  }
 0x420   : > { %12090 = vmatpush1.bf16.msra.mxu1 %v14857_v45  ;;  %v14935_v45 = vld [vmem:[%s16814_s18 + $0xa90] ss:$8 sps:$4 sm:$0xff]  }
 0x421   : > { %12582 = vmatpush1.bf16.msra.mxu0 %v14860_v46  ;;  %12091 = vmatprep.subr.bf16.mxu1 %v14865_v47  ;;  %v14938_v46 = vld [vmem:[%s16814_s18 + $0x1690] ss:$8 sps:$4 sm:$0xff]   ;;  %v14943_v47 = vld [vmem:[%s16814_s18 + $0xaa4] ss:$8 sps:$4 sm:$0xff]  }
 0x422   : > { %12583 = vmatprep.subr.bf16.mxu0 %v14868_v48  ;;  %v14946_v48 = vld [vmem:[%s16814_s18 + $0x16a4] ss:$8 sps:$4 sm:$0xff]  }
 0x424   : > { %12092 = vmatpush1.bf16.msra.mxu1 %v14863_v32  ;;  %v14941_v32 = vld [vmem:[%s16814_s18 + $0xaa0] ss:$8 sps:$4 sm:$0xff]  }
 0x425   : > { %12584 = vmatpush1.bf16.msra.mxu0 %v14866_v50  ;;  %12093 = vmatprep.subr.bf16.mxu1 %v14871_v51  ;;  %v14944_v50 = vld [vmem:[%s16814_s18 + $0x16a0] ss:$8 sps:$4 sm:$0xff]   ;;  %v14949_v51 = vld [vmem:[%s16814_s18 + $0xab4] ss:$8 sps:$4 sm:$0xff]  }
 0x426   : > { %12585 = vmatprep.subr.bf16.mxu0 %v14874_v52  ;;  %v14952_v52 = vld [vmem:[%s16814_s18 + $0x16b4] ss:$8 sps:$4 sm:$0xff]  }
 0x428   : > { %12094 = vmatpush1.bf16.msra.mxu1 %v14869_v41  ;;  %v14955_v41 = vld [vmem:[%s16814_s18 + $0xac4] ss:$8 sps:$4 sm:$0xff]  }
 0x429   : > { %12586 = vmatpush1.bf16.msra.mxu0 %v14872_v62  ;;  %12095 = vmatprep.subr.bf16.mxu1 %v14877_v58  ;;  %v14958_v62 = vld [vmem:[%s16814_s18 + $0x16c4] ss:$8 sps:$4 sm:$0xff]   ;;  %v14953_v58 = vld [vmem:[%s16814_s18 + $0xac0] ss:$8 sps:$4 sm:$0xff]  }
 0x42a   : > { %12587 = vmatprep.subr.bf16.mxu0 %v14880_v42  ;;  %v14956_v42 = vld [vmem:[%s16814_s18 + $0x16c0] ss:$8 sps:$4 sm:$0xff]  }
 0x42c   : > { %12096 = vmatpush1.bf16.msra.mxu1 %v14875_v12  ;;  %v14961_v12 = vld [vmem:[%s16814_s18 + $0xad4] ss:$8 sps:$4 sm:$0xff]  }
 0x42d   : > { %12588 = vmatpush1.bf16.msra.mxu0 %v14878_v30  ;;  %12106 = vmatprep.subr.bf16.mxu1 %v14883_v49  ;;  %v14964_v30 = vld [vmem:[%s16814_s18 + $0x16d4] ss:$8 sps:$4 sm:$0xff]   ;;  %v14959_v49 = vld [vmem:[%s16814_s18 + $0xad0] ss:$8 sps:$4 sm:$0xff]  }
 0x42e   : > { %12598 = vmatprep.subr.bf16.mxu0 %v14886_v53  ;;  %v14962_v53 = vld [vmem:[%s16814_s18 + $0x16d0] ss:$8 sps:$4 sm:$0xff]  }
 0x42f   : > { %12098 = vmatmul.mubr.bf16.vlgmr.msra.gmra.mrb[0].mxu1 %v7562_v33  ;;  %v14965_v33 = vld [vmem:[%s16814_s18 + $0xae0] ss:$8 sps:$4 sm:$0xff]  }
 0x430   : > { %12590 = vmatmul.mubr.bf16.vlgmr.msra.gmra.mrb[0].mxu0 %v7709_v1  ;;  %12107 = vmatpush1.bf16.msra.mxu1 %v14881_v3  ;;  %v14968_v1 = vld [vmem:[%s16814_s18 + $0x16e0] ss:$8 sps:$4 sm:$0xff]   ;;  %v14973_v3 = vld [vmem:[%s16814_s18 + $0xaf4] ss:$8 sps:$4 sm:$0xff]  }
 0x431   : > { %12599 = vmatpush1.bf16.msra.mxu0 %v14884_v4  ;;  %12108 = vmatprep.subr.bf16.mxu1 %v14889_v6  ;;  %v14976_v4 = vld [vmem:[%s16814_s18 + $0x16f4] ss:$8 sps:$4 sm:$0xff]   ;;  %v14971_v6 = vld [vmem:[%s16814_s18 + $0xaf0] ss:$8 sps:$4 sm:$0xff]  }
 0x432   : > { %12600 = vmatprep.subr.bf16.mxu0 %v14892_v7  ;;  %12138 = vmatprep.mubr.bf16.mxu1 %v17684_v55  ;;  %v14974_v7 = vld [vmem:[%s16814_s18 + $0x16f0] ss:$8 sps:$4 sm:$0xff]  }
 0x433   : > { %12630 = vmatprep.mubr.bf16.mxu0 %v17687_v34 }
 0x434   : > { %12109 = vmatpush1.bf16.msra.mxu1 %v14887_v54  ;;  %v14980_v54 = vld [vmem:[%s16814_s18 + $0xb04] ss:$8 sps:$4 sm:$0xff]  }
 0x435   : > { %12601 = vmatpush1.bf16.msra.mxu0 %v14890_v56  ;;  %12110 = vmatprep.subr.bf16.mxu1 %v14895_v13  ;;  %v14984_v56 = vld [vmem:[%s16814_s18 + $0x1704] ss:$8 sps:$4 sm:$0xff]   ;;  %v17753_v13 = vrot.slane %v17662_v39, %v16867_v2  ;;  %v7565_v39 = vcombine.high %v17684_v55, %v17684_v55 }
 0x436   : > { %12602 = vmatprep.subr.bf16.mxu0 %v14898_v14  ;;  %v17757_v14 = vrot.slane %v17665_v63, %v16867_v2  ;;  %v14985_v63 = vld [vmem:[%s16814_s18 + $0xb10] ss:$8 sps:$4 sm:$0xff]   ;;  %v14993_v55 = vld [vmem:[%s16814_s18 + $0xb24] ss:$8 sps:$4 sm:$0xff]  }
 0x438   : > { %12111 = vmatpush1.bf16.msra.mxu1 %v14893_v15  ;;  %v14978_v15 = vld [vmem:[%s16814_s18 + $0xb00] ss:$8 sps:$4 sm:$0xff]  }
 0x439   : > { %12603 = vmatpush1.bf16.msra.mxu0 %v14896_v16  ;;  %12112 = vmatprep.subr.bf16.mxu1 %v14901_v57  ;;  %v14982_v16 = vld [vmem:[%s16814_s18 + $0x1700] ss:$8 sps:$4 sm:$0xff]   ;;  %v14987_v57 = vld [vmem:[%s16814_s18 + $0xb14] ss:$8 sps:$4 sm:$0xff]  }
 0x43a   : > { %12604 = vmatprep.subr.bf16.mxu0 %v14904_v17  ;;  %v14990_v17 = vld [vmem:[%s16814_s18 + $0x1714] ss:$8 sps:$4 sm:$0xff]  }
 0x43c   : > { %12113 = vmatpush1.bf16.msra.mxu1 %v14899_v8  ;;  %v7712_v8 = vcombine.high %v17687_v34, %v17687_v34  ;;  %v14991_v34 = vld [vmem:[%s16814_s18 + $0xb20] ss:$8 sps:$4 sm:$0xff]  }
 0x43d   : > { %12605 = vmatpush1.bf16.msra.mxu0 %v14902_v19  ;;  %12114 = vmatprep.subr.bf16.mxu1 %v14907_v10  ;;  %v14988_v19 = vld [vmem:[%s16814_s18 + $0x1710] ss:$8 sps:$4 sm:$0xff]   ;;  %v14996_v10 = vld [vmem:[%s16814_s18 + $0x1724] ss:$8 sps:$4 sm:$0xff]  }
 0x43e   : > { %12606 = vmatprep.subr.bf16.mxu0 %v14910_v20  ;;  %v14994_v20 = vld [vmem:[%s16814_s18 + $0x1720] ss:$8 sps:$4 sm:$0xff]  }
 0x440   : > { %12115 = vmatpush1.bf16.msra.mxu1 %v14905_v21  ;;  %v14999_v21 = vld [vmem:[%s16814_s18 + $0xb34] ss:$8 sps:$4 sm:$0xff]  }
 0x441   : > { %12607 = vmatpush1.bf16.msra.mxu0 %v14908_v22  ;;  %12116 = vmatprep.subr.bf16.mxu1 %v14913_v23  ;;  %v15002_v22 = vld [vmem:[%s16814_s18 + $0x1734] ss:$8 sps:$4 sm:$0xff]   ;;  %v14997_v23 = vld [vmem:[%s16814_s18 + $0xb30] ss:$8 sps:$4 sm:$0xff]  }
 0x442   : > { %12608 = vmatprep.subr.bf16.mxu0 %v14916_v24  ;;  %v15000_v24 = vld [vmem:[%s16814_s18 + $0x1730] ss:$8 sps:$4 sm:$0xff]  }
 0x444   : > { %12117 = vmatpush1.bf16.msra.mxu1 %v14911_v25  ;;  %v15005_v25 = vld [vmem:[%s16814_s18 + $0xb44] ss:$8 sps:$4 sm:$0xff]  }
 0x445   : > { %12609 = vmatpush1.bf16.msra.mxu0 %v14914_v26  ;;  %12118 = vmatprep.subr.bf16.mxu1 %v14919_v27  ;;  %v15008_v26 = vld [vmem:[%s16814_s18 + $0x1744] ss:$8 sps:$4 sm:$0xff]   ;;  %v15003_v27 = vld [vmem:[%s16814_s18 + $0xb40] ss:$8 sps:$4 sm:$0xff]  }
 0x446   : > { %12610 = vmatprep.subr.bf16.mxu0 %v14922_v28  ;;  %v15006_v28 = vld [vmem:[%s16814_s18 + $0x1740] ss:$8 sps:$4 sm:$0xff]  }
 0x448   : > { %12119 = vmatpush1.bf16.msra.mxu1 %v14917_v35  ;;  %v15011_v35 = vld [vmem:[%s16814_s18 + $0xb54] ss:$8 sps:$4 sm:$0xff]  }
 0x449   : > { %12611 = vmatpush1.bf16.msra.mxu0 %v14920_v36  ;;  %12120 = vmatprep.subr.bf16.mxu1 %v14925_v37  ;;  %v15014_v36 = vld [vmem:[%s16814_s18 + $0x1754] ss:$8 sps:$4 sm:$0xff]   ;;  %v15009_v37 = vld [vmem:[%s16814_s18 + $0xb50] ss:$8 sps:$4 sm:$0xff]  }
 0x44a   : > { %12612 = vmatprep.subr.bf16.mxu0 %v14928_v38  ;;  %v15012_v38 = vld [vmem:[%s16814_s18 + $0x1750] ss:$8 sps:$4 sm:$0xff]  }
 0x44c   : > { %12121 = vmatpush1.bf16.msra.mxu1 %v14923_v18  ;;  %v15017_v18 = vld [vmem:[%s16814_s18 + $0xb64] ss:$8 sps:$4 sm:$0xff]  }
 0x44d   : > { %12613 = vmatpush1.bf16.msra.mxu0 %v14926_v40  ;;  %12122 = vmatprep.subr.bf16.mxu1 %v14931_v29  ;;  %v15020_v40 = vld [vmem:[%s16814_s18 + $0x1764] ss:$8 sps:$4 sm:$0xff]   ;;  %v15015_v29 = vld [vmem:[%s16814_s18 + $0xb60] ss:$8 sps:$4 sm:$0xff]  }
 0x44e   : > { %12614 = vmatprep.subr.bf16.mxu0 %v14934_v5  ;;  %v15018_v5 = vld [vmem:[%s16814_s18 + $0x1760] ss:$8 sps:$4 sm:$0xff]  }
 0x450   : > { %12123 = vmatpush1.bf16.msra.mxu1 %v14929_v11  ;;  %v15023_v11 = vld [vmem:[%s16814_s18 + $0xb74] ss:$8 sps:$4 sm:$0xff]  }
 0x451   : > { %12615 = vmatpush1.bf16.msra.mxu0 %v14932_v9  ;;  %12124 = vmatprep.subr.bf16.mxu1 %v14937_v43  ;;  %v15026_v9 = vld [vmem:[%s16814_s18 + $0x1774] ss:$8 sps:$4 sm:$0xff]   ;;  %v15021_v43 = vld [vmem:[%s16814_s18 + $0xb70] ss:$8 sps:$4 sm:$0xff]  }
 0x452   : > { %12616 = vmatprep.subr.bf16.mxu0 %v14940_v44  ;;  %v15024_v44 = vld [vmem:[%s16814_s18 + $0x1770] ss:$8 sps:$4 sm:$0xff]  }
 0x454   : > { %12125 = vmatpush1.bf16.msra.mxu1 %v14935_v45  ;;  %v15029_v45 = vld [vmem:[%s16814_s18 + $0xb84] ss:$8 sps:$4 sm:$0xff]  }
 0x455   : > { %12617 = vmatpush1.bf16.msra.mxu0 %v14938_v46  ;;  %12126 = vmatprep.subr.bf16.mxu1 %v14943_v47  ;;  %v15032_v46 = vld [vmem:[%s16814_s18 + $0x1784] ss:$8 sps:$4 sm:$0xff]   ;;  %v15027_v47 = vld [vmem:[%s16814_s18 + $0xb80] ss:$8 sps:$4 sm:$0xff]  }
 0x456   : > { %12618 = vmatprep.subr.bf16.mxu0 %v14946_v48  ;;  %v15030_v48 = vld [vmem:[%s16814_s18 + $0x1780] ss:$8 sps:$4 sm:$0xff]  }
 0x458   : > { %12127 = vmatpush1.bf16.msra.mxu1 %v14941_v32  ;;  %v15035_v32 = vld [vmem:[%s16814_s18 + $0xb94] ss:$8 sps:$4 sm:$0xff]  }
 0x459   : > { %12619 = vmatpush1.bf16.msra.mxu0 %v14944_v50  ;;  %12128 = vmatprep.subr.bf16.mxu1 %v14949_v51  ;;  %v15038_v50 = vld [vmem:[%s16814_s18 + $0x1794] ss:$8 sps:$4 sm:$0xff]   ;;  %v15033_v51 = vld [vmem:[%s16814_s18 + $0xb90] ss:$8 sps:$4 sm:$0xff]  }
 0x45a   : > { %12620 = vmatprep.subr.bf16.mxu0 %v14952_v52  ;;  %v15036_v52 = vld [vmem:[%s16814_s18 + $0x1790] ss:$8 sps:$4 sm:$0xff]  }
 0x45c   : > { %12129 = vmatpush1.bf16.msra.mxu1 %v14947_v60  ;;  %v15041_v60 = vld [vmem:[%s16814_s18 + $0xba4] ss:$8 sps:$4 sm:$0xff]  }
 0x45d   : > { %12621 = vmatpush1.bf16.msra.mxu0 %v14950_v61  ;;  %12130 = vmatprep.subr.bf16.mxu1 %v14955_v41  ;;  %v15044_v61 = vld [vmem:[%s16814_s18 + $0x17a4] ss:$8 sps:$4 sm:$0xff]   ;;  %v15039_v41 = vld [vmem:[%s16814_s18 + $0xba0] ss:$8 sps:$4 sm:$0xff]  }
 0x45e   : > { %12622 = vmatprep.subr.bf16.mxu0 %v14958_v62  ;;  %v15042_v62 = vld [vmem:[%s16814_s18 + $0x17a0] ss:$8 sps:$4 sm:$0xff]  }
 0x460   : > { %12131 = vmatpush1.bf16.msra.mxu1 %v14953_v58  ;;  %v15047_v58 = vld [vmem:[%s16814_s18 + $0xbb4] ss:$8 sps:$4 sm:$0xff]  }
 0x461   : > { %12623 = vmatpush1.bf16.msra.mxu0 %v14956_v42  ;;  %12132 = vmatprep.subr.bf16.mxu1 %v14961_v12  ;;  %v15050_v42 = vld [vmem:[%s16814_s18 + $0x17b4] ss:$8 sps:$4 sm:$0xff]   ;;  %v15045_v12 = vld [vmem:[%s16814_s18 + $0xbb0] ss:$8 sps:$4 sm:$0xff]  }
 0x462   : > { %12624 = vmatprep.subr.bf16.mxu0 %v14964_v30  ;;  %v15048_v30 = vld [vmem:[%s16814_s18 + $0x17b0] ss:$8 sps:$4 sm:$0xff]  }
 0x464   : > { %12133 = vmatpush1.bf16.msra.mxu1 %v14959_v49  ;;  %v15053_v49 = vld [vmem:[%s16814_s18 + $0xbc4] ss:$8 sps:$4 sm:$0xff]  }
 0x465   : > { %12625 = vmatpush1.bf16.msra.mxu0 %v14962_v53  ;;  %12134 = vmatprep.subr.bf16.mxu1 %v14967_v31  ;;  %v15056_v53 = vld [vmem:[%s16814_s18 + $0x17c4] ss:$8 sps:$4 sm:$0xff]   ;;  %v15051_v31 = vld [vmem:[%s16814_s18 + $0xbc0] ss:$8 sps:$4 sm:$0xff]  }
 0x466   : > { %12626 = vmatprep.subr.bf16.mxu0 %v14970_v0  ;;  %v15054_v0 = vld [vmem:[%s16814_s18 + $0x17c0] ss:$8 sps:$4 sm:$0xff]  }
 0x468   : > { %12135 = vmatpush1.bf16.msra.mxu1 %v14965_v33  ;;  %v15059_v33 = vld [vmem:[%s16814_s18 + $0xbd4] ss:$8 sps:$4 sm:$0xff]  }
 0x469   : > { %12627 = vmatpush1.bf16.msra.mxu0 %v14968_v1  ;;  %12136 = vmatprep.subr.bf16.mxu1 %v14973_v3  ;;  %v15062_v1 = vld [vmem:[%s16814_s18 + $0x17d4] ss:$8 sps:$4 sm:$0xff]   ;;  %v15057_v3 = vld [vmem:[%s16814_s18 + $0xbd0] ss:$8 sps:$4 sm:$0xff]  }
 0x46a   : > { %12628 = vmatprep.subr.bf16.mxu0 %v14976_v4  ;;  %v15060_v4 = vld [vmem:[%s16814_s18 + $0x17d0] ss:$8 sps:$4 sm:$0xff]  }
 0x46c   : > { %12137 = vmatpush1.bf16.msra.mxu1 %v14971_v6  ;;  %v15065_v6 = vld [vmem:[%s16814_s18 + $0xbe4] ss:$8 sps:$4 sm:$0xff]  }
 0x46d   : > { %12629 = vmatpush1.bf16.msra.mxu0 %v14974_v7  ;;  %12147 = vmatprep.subr.bf16.mxu1 %v14980_v54  ;;  %v15068_v7 = vld [vmem:[%s16814_s18 + $0x17e4] ss:$8 sps:$4 sm:$0xff]   ;;  %v15063_v54 = vld [vmem:[%s16814_s18 + $0xbe0] ss:$8 sps:$4 sm:$0xff]  }
 0x46e   : > { %12639 = vmatprep.subr.bf16.mxu0 %v14984_v56  ;;  %v15066_v56 = vld [vmem:[%s16814_s18 + $0x17e0] ss:$8 sps:$4 sm:$0xff]  }
 0x46f   : > { %12139 = vmatmul.mubr.bf16.vlgmr.msra.gmra.mrb[0].mxu1 %v17753_v13 }
 0x470   : > { %12631 = vmatmul.mubr.bf16.vlgmr.msra.gmra.mrb[0].mxu0 %v17757_v14  ;;  %12148 = vmatpush1.bf16.msra.mxu1 %v14978_v15  ;;  %v15071_v15 = vld [vmem:[%s16814_s18 + $0xbf4] ss:$8 sps:$4 sm:$0xff]  }
 0x471   : > { %12640 = vmatpush1.bf16.msra.mxu0 %v14982_v16  ;;  %12149 = vmatprep.subr.bf16.mxu1 %v14987_v57  ;;  %v15074_v16 = vld [vmem:[%s16814_s18 + $0x17f4] ss:$8 sps:$4 sm:$0xff]   ;;  %v15069_v57 = vld [vmem:[%s16814_s18 + $0xbf0] ss:$8 sps:$4 sm:$0xff]  }
 0x472   : > { %12641 = vmatprep.subr.bf16.mxu0 %v14990_v17  ;;  %12179 = vmatprep.mubr.bf16.mxu1 %v7565_v39  ;;  %v15072_v17 = vld [vmem:[%s16814_s18 + $0x17f0] ss:$8 sps:$4 sm:$0xff]   ;;  %v15077_v39 = vld [vmem:[%s16814_s18 + $0x1804] ss:$8 sps:$4 sm:$0xff]  }
 0x473   : > { %12671 = vmatprep.mubr.bf16.mxu0 %v7712_v8  ;;  %v7563_v8 = vcombine.high %v17753_v13, %v17753_v13  ;;  %v15083_v13 = vld [vmem:[%s16814_s18 + $0x1824] ss:$8 sps:$4 sm:$0xff]  }
 0x474   : > { %12150 = vmatpush1.bf16.msra.mxu1 %v14985_v63  ;;  %v7710_v63 = vcombine.high %v17757_v14, %v17757_v14  ;;  %v15081_v14 = vld [vmem:[%s16814_s18 + $0x1820] ss:$8 sps:$4 sm:$0xff]  }
 0x475   : > { %12642 = vmatpush1.bf16.msra.mxu0 %v14988_v19  ;;  %12151 = vmatprep.subr.bf16.mxu1 %v14993_v55  ;;  %v15075_v19 = vld [vmem:[%s16814_s18 + $0x1800] ss:$8 sps:$4 sm:$0xff]   ;;  %v15080_v55 = vld [vmem:[%s16814_s18 + $0x1814] ss:$8 sps:$4 sm:$0xff]  }
 0x476   : > { %12643 = vmatprep.subr.bf16.mxu0 %v14996_v10  ;;  %v15078_v10 = vld [vmem:[%s16814_s18 + $0x1810] ss:$8 sps:$4 sm:$0xff]  }
 0x478   : > { %12152 = vmatpush1.bf16.msra.mxu1 %v14991_v34  ;;  %v15158_v34 = vmov 0  }
 0x479   : > { %12644 = vmatpush1.bf16.msra.mxu0 %v14994_v20  ;;  %12153 = vmatprep.subr.bf16.mxu1 %v14999_v21  ;;  %v15086_v20 = vld [vmem:[%s16814_s18 + $0x1834] ss:$8 sps:$4 sm:$0xff]   ;;  %v15084_v21 = vld [vmem:[%s16814_s18 + $0x1830] ss:$8 sps:$4 sm:$0xff]  }
 0x47a   : > { %12645 = vmatprep.subr.bf16.mxu0 %v15002_v22  ;;  %v15089_v22 = vld [vmem:[%s16814_s18 + $0x1844] ss:$8 sps:$4 sm:$0xff]  }
 0x47c   : > { %12154 = vmatpush1.bf16.msra.mxu1 %v14997_v23  ;;  %v15087_v23 = vld [vmem:[%s16814_s18 + $0x1840] ss:$8 sps:$4 sm:$0xff]  }
 0x47d   : > { %12646 = vmatpush1.bf16.msra.mxu0 %v15000_v24  ;;  %12155 = vmatprep.subr.bf16.mxu1 %v15005_v25  ;;  %v15092_v24 = vld [vmem:[%s16814_s18 + $0x1854] ss:$8 sps:$4 sm:$0xff]   ;;  %v15090_v25 = vld [vmem:[%s16814_s18 + $0x1850] ss:$8 sps:$4 sm:$0xff]  }
 0x47e   : > { %12647 = vmatprep.subr.bf16.mxu0 %v15008_v26  ;;  %v15095_v26 = vld [vmem:[%s16814_s18 + $0x1864] ss:$8 sps:$4 sm:$0xff]  }
 0x480   : > { %12156 = vmatpush1.bf16.msra.mxu1 %v15003_v27  ;;  %v15093_v27 = vld [vmem:[%s16814_s18 + $0x1860] ss:$8 sps:$4 sm:$0xff]  }
 0x481   : > { %12648 = vmatpush1.bf16.msra.mxu0 %v15006_v28  ;;  %12157 = vmatprep.subr.bf16.mxu1 %v15011_v35  ;;  %v15098_v28 = vld [vmem:[%s16814_s18 + $0x1874] ss:$8 sps:$4 sm:$0xff]   ;;  %v15096_v35 = vld [vmem:[%s16814_s18 + $0x1870] ss:$8 sps:$4 sm:$0xff]  }
 0x482   : > { %12649 = vmatprep.subr.bf16.mxu0 %v15014_v36  ;;  %v12928_v36 = vld.sshfl [vmem:[%s17924_s0 + $0x30] sm:$0x1 pattern:$0x75316420] }
 0x484   : > { %12158 = vmatpush1.bf16.msra.mxu1 %v15009_v37  ;;  %v7726_v37 = vrot.slane %v12928_v36, %v16867_v2  ;;  %v12744_v2 = vld [vmem:[%s16812_s20 + $0xa0] sm:$0xff] }
 0x485   : > { %12650 = vmatpush1.bf16.msra.mxu0 %v15012_v38  ;;  %12159 = vmatprep.subr.bf16.mxu1 %v15017_v18  ;;  %v12740_v38 = vld [vmem:[%s16812_s20 + $0x80] sm:$0xff]  ;;  %v12741_v18 = vld [vmem:[%s16812_s20 + $0x88] sm:$0xff] }
 0x486   : > { %12651 = vmatprep.subr.bf16.mxu0 %v15020_v40  ;;  %v12724_v40 = vld [vmem:[%s16812_s20] sm:$0xff] }
 0x488   : > { %12160 = vmatpush1.bf16.msra.mxu1 %v15015_v29  ;;  %v13754_v29 = vpack.c.bf16 %v12741_v18, %v12740_v38 }
 0x489   : > { %12652 = vmatpush1.bf16.msra.mxu0 %v15018_v5  ;;  %12161 = vmatprep.subr.bf16.mxu1 %v15023_v11  ;;  %v12725_v5 = vld [vmem:[%s16812_s20 + $0x8] sm:$0xff]  ;;  %v12742_v11 = vld [vmem:[%s16812_s20 + $0x90] sm:$0xff] }
 0x48a   : > { %12653 = vmatprep.subr.bf16.mxu0 %v15026_v9  ;;  %v12743_v9 = vld [vmem:[%s16812_s20 + $0x98] sm:$0xff] }
 0x48c   : > { %12162 = vmatpush1.bf16.msra.mxu1 %v15021_v43  ;;  %v13756_v43 = vpack.c.bf16 %v12725_v5, %v12724_v40 }
 0x48d   : > { %12654 = vmatpush1.bf16.msra.mxu0 %v15024_v44  ;;  %12163 = vmatprep.subr.bf16.mxu1 %v15029_v45  ;;  %v13758_v44 = vpack.c.bf16 %v12743_v9, %v12742_v11  ;;  %v12726_v45 = vld [vmem:[%s16812_s20 + $0x10] sm:$0xff]  ;;  %v12723_v11 = vld [vmem:[#allocation2] sm:$0x3] }
 0x48e   : > { %12655 = vmatprep.subr.bf16.mxu0 %v15032_v46  ;;  %v12727_v46 = vld [vmem:[%s16812_s20 + $0x18] sm:$0xff] }
 0x490   : > { %12164 = vmatpush1.bf16.msra.mxu1 %v15027_v47  ;;  %v12745_v47 = vld [vmem:[%s16812_s20 + $0xa8] sm:$0xff] }
 0x491   : > { %12656 = vmatpush1.bf16.msra.mxu0 %v15030_v48  ;;  %12165 = vmatprep.subr.bf16.mxu1 %v15035_v32  ;;  %v13760_v48 = vpack.c.bf16 %v12727_v46, %v12726_v45  ;;  %v13762_v32 = vpack.c.bf16 %v12745_v47, %v12744_v2 }
 0x492   : > { %12657 = vmatprep.subr.bf16.mxu0 %v15038_v50  ;;  %v12728_v50 = vld [vmem:[%s16812_s20 + $0x20] sm:$0xff] }
 0x494   : > { %12166 = vmatpush1.bf16.msra.mxu1 %v15033_v51  ;;  %v12729_v51 = vld [vmem:[%s16812_s20 + $0x28] sm:$0xff] }
 0x495   : > { %12658 = vmatpush1.bf16.msra.mxu0 %v15036_v52  ;;  %12167 = vmatprep.subr.bf16.mxu1 %v15041_v60  ;;  %v12746_v52 = vld [vmem:[%s16812_s20 + $0xb0] sm:$0xff]  ;;  %v12747_v60 = vld [vmem:[%s16812_s20 + $0xb8] sm:$0xff] }
 0x496   : > { %12659 = vmatprep.subr.bf16.mxu0 %v15044_v61  ;;  %v13764_v61 = vpack.c.bf16 %v12729_v51, %v12728_v50 }
 0x498   : > { %12168 = vmatpush1.bf16.msra.mxu1 %v15039_v41  ;;  %v13766_v41 = vpack.c.bf16 %v12747_v60, %v12746_v52 }
 0x499   : > { %12660 = vmatpush1.bf16.msra.mxu0 %v15042_v62  ;;  %12169 = vmatprep.subr.bf16.mxu1 %v15047_v58  ;;  %v12730_v62 = vld [vmem:[%s16812_s20 + $0x30] sm:$0xff]  ;;  %v12731_v58 = vld [vmem:[%s16812_s20 + $0x38] sm:$0xff] }
 0x49a   : > { %12661 = vmatprep.subr.bf16.mxu0 %v15050_v42  ;;  %v12748_v42 = vld [vmem:[%s16812_s20 + $0xc0] sm:$0xff] }
 0x49c   : > { %12170 = vmatpush1.bf16.msra.mxu1 %v15045_v12  ;;  %v12749_v12 = vld [vmem:[%s16812_s20 + $0xc8] sm:$0xff] }
 0x49d   : > { %12662 = vmatpush1.bf16.msra.mxu0 %v15048_v30  ;;  %12171 = vmatprep.subr.bf16.mxu1 %v15053_v49  ;;  %v13768_v30 = vpack.c.bf16 %v12731_v58, %v12730_v62  ;;  %v13770_v49 = vpack.c.bf16 %v12749_v12, %v12748_v42 }
 0x49e   : > { %12663 = vmatprep.subr.bf16.mxu0 %v15056_v53  ;;  %v12732_v53 = vld [vmem:[%s16812_s20 + $0x40] sm:$0xff] }
 0x4a0   : > { %12172 = vmatpush1.bf16.msra.mxu1 %v15051_v31  ;;  %v12733_v31 = vld [vmem:[%s16812_s20 + $0x48] sm:$0xff] }
 0x4a1   : > { %12664 = vmatpush1.bf16.msra.mxu0 %v15054_v0  ;;  %12173 = vmatprep.subr.bf16.mxu1 %v15059_v33  ;;  %v12750_v0 = vld [vmem:[%s16812_s20 + $0xd0] sm:$0xff]  ;;  %v12751_v33 = vld [vmem:[%s16812_s20 + $0xd8] sm:$0xff] }
 0x4a2   : > { %12665 = vmatprep.subr.bf16.mxu0 %v15062_v1  ;;  %v13772_v1 = vpack.c.bf16 %v12733_v31, %v12732_v53 }
 0x4a4   : > { %12174 = vmatpush1.bf16.msra.mxu1 %v15057_v3  ;;  %v13774_v3 = vpack.c.bf16 %v12751_v33, %v12750_v0 }
 0x4a5   : > { %12666 = vmatpush1.bf16.msra.mxu0 %v15060_v4  ;;  %12175 = vmatprep.subr.bf16.mxu1 %v15065_v6  ;;  %v12734_v4 = vld [vmem:[%s16812_s20 + $0x50] sm:$0xff]  ;;  %v12735_v6 = vld [vmem:[%s16812_s20 + $0x58] sm:$0xff] }
 0x4a6   : > { %12667 = vmatprep.subr.bf16.mxu0 %v15068_v7  ;;  %v12752_v7 = vld [vmem:[%s16812_s20 + $0xe0] sm:$0xff] }
 0x4a8   : > { %12176 = vmatpush1.bf16.msra.mxu1 %v15063_v54  ;;  %v12753_v54 = vld [vmem:[%s16812_s20 + $0xe8] sm:$0xff] }
 0x4a9   : > { %12668 = vmatpush1.bf16.msra.mxu0 %v15066_v56  ;;  %12177 = vmatprep.subr.bf16.mxu1 %v15071_v15  ;;  %v13776_v56 = vpack.c.bf16 %v12735_v6, %v12734_v4  ;;  %v13778_v15 = vpack.c.bf16 %v12753_v54, %v12752_v7 }
 0x4aa   : > { %12669 = vmatprep.subr.bf16.mxu0 %v15074_v16  ;;  %v12736_v16 = vld [vmem:[%s16812_s20 + $0x60] sm:$0xff] }
 0x4ac   : > { %12178 = vmatpush1.bf16.msra.mxu1 %v15069_v57  ;;  %v12737_v57 = vld [vmem:[%s16812_s20 + $0x68] sm:$0xff] }
 0x4ad   : > { %12670 = vmatpush1.bf16.msra.mxu0 %v15072_v17  ;;  %13755 = vmatprep.subr.bf16.mxu1 %v13754_v29  ;;  %v13780_v17 = vpack.c.bf16 %v12737_v57, %v12736_v16 }
 0x4ae   : > { %12680 = vmatprep.subr.bf16.mxu0 %v15077_v39  ;;  %v12754_v39 = vld [vmem:[%s16812_s20 + $0xf0] sm:$0xff] }
 0x4af   : > { %12180 = vmatmul.mubr.bf16.vlgmr.msra.gmra.mrb[0].mxu1 %v7563_v8  ;;  %v12755_v8 = vld [vmem:[%s16812_s20 + $0xf8] sm:$0xff] }
 0x4b0   : > { %12672 = vmatmul.mubr.bf16.vlgmr.msra.gmra.mrb[0].mxu0 %v7710_v63  ;;  %13757 = vmatpush3.bf16.msra.mxu1 %v13756_v43  ;;  %v13782_v63 = vpack.c.bf16 %v12755_v8, %v12754_v39 }
 0x4b1   : > { %12681 = vmatpush1.bf16.msra.mxu0 %v15075_v19  ;;  %12712 = vmatprep.mubr.bf16.mxu0 %v15158_v34  ;;  %v12738_v19 = vld [vmem:[%s16812_s20 + $0x70] sm:$0xff] }
 0x4b2   : > { %12682 = vmatprep.subr.bf16.mxu0 %v15080_v55  ;;  %13759 = vmatprep.subr.bf16.mxu1 %v13758_v44  ;;  %v12739_v55 = vld [vmem:[%s16812_s20 + $0x78] sm:$0xff] }
 0x4b4   : > { %13761 = vmatpush3.bf16.msra.mxu1 %v13760_v48 }
 0x4b5   : > { %12683 = vmatpush1.bf16.msra.mxu0 %v15078_v10  ;;  %13763 = vmatprep.subr.bf16.mxu1 %v13762_v32  ;;  %v13784_v10 = vpack.c.bf16 %v12739_v55, %v12738_v19 }
 0x4b6   : > { %12684 = vmatprep.subr.bf16.mxu0 %v15083_v13 }
 0x4b8   : > { %13765 = vmatpush3.bf16.msra.mxu1 %v13764_v61 }
 0x4b9   : > { %12685 = vmatpush1.bf16.msra.mxu0 %v15081_v14  ;;  %13767 = vmatprep.subr.bf16.mxu1 %v13766_v41 }
 0x4ba   : > { %12686 = vmatprep.subr.bf16.mxu0 %v15086_v20 }
 0x4bc   : > { %13769 = vmatpush3.bf16.msra.mxu1 %v13768_v30 }
 0x4bd   : > { %12687 = vmatpush1.bf16.msra.mxu0 %v15084_v21  ;;  %13771 = vmatprep.subr.bf16.mxu1 %v13770_v49  ;;  %v7404_v21 = vsub.s32 0, %v16859_v59 }
 0x4be   : > { %12688 = vmatprep.subr.bf16.mxu0 %v15089_v22  ;;  %v7400_v22 = vld [vmem:[%s6587_s14] sm:$0x3] }
 0x4c0   : > { %13773 = vmatpush3.bf16.msra.mxu1 %v13772_v1 }
 0x4c1   : > { %12689 = vmatpush1.bf16.msra.mxu0 %v15087_v23  ;;  %13775 = vmatprep.subr.bf16.mxu1 %v13774_v3  ;;  %v7408_v23 = vsub.s32 1, %v16859_v59 }
 0x4c2   : > { %12690 = vmatprep.subr.bf16.mxu0 %v15092_v24  ;;  %v7405_v24 = vrot.slane %v7400_v22, %v7404_v21 }
 0x4c4   : > { %13777 = vmatpush3.bf16.msra.mxu1 %v13776_v56 }
 0x4c5   : > { %12691 = vmatpush1.bf16.msra.mxu0 %v15090_v25  ;;  %13779 = vmatprep.subr.bf16.mxu1 %v13778_v15  ;;  %v7409_v25 = vrot.slane %v7400_v22, %v7408_v23 }
 0x4c6   : > { %12692 = vmatprep.subr.bf16.mxu0 %v15095_v26 }
 0x4c8   : > { %13781 = vmatpush3.bf16.msra.mxu1 %v13780_v17 }
 0x4c9   : > { %12693 = vmatpush1.bf16.msra.mxu0 %v15093_v27  ;;  %13783 = vmatprep.subr.bf16.mxu1 %v13782_v63 }
 0x4ca   : > { %12694 = vmatprep.subr.bf16.mxu0 %v15098_v28 }
 0x4cc   : > { %13785 = vmatpush3.bf16.msra.mxu1 %v13784_v10 }
 0x4cd   : > { %12695 = vmatpush1.bf16.msra.mxu0 %v15096_v35 }
 0x4d0   : > { %12713 = vmatmul.mubr.bf16.vlgmr.msra.gmra.mrb[0].mxu0 %v7726_v37 }
 0x582   : > { %v12181_v34 = vpop.f32.mrb[0].mxu1 }
 0x583   : > { %v12183_v13 = vpop.f32.mrb[1].mxu1  ;;  %v13786_v26 = vadd.f32 %v12181_v34, %v7405_v24 }
 0x584   : > { %v12185_v14 = vpop.f32.mrb[2].mxu1  ;;  %v13788_v27 = vadd.f32 %v12183_v13, %v7409_v25 }
 0x585   : > { %v12186_v20 = vpop.f32.mrb[3].mxu1 }
 0x5a3   : > { %v12714_v28 = vpop.f32.mrb[0].mxu0 }
 0x5a4   : > { %v13787_v35 = vadd.f32 %v13786_v26, %v12714_v28  ;;  %v12716_v36 = vpop.f32.mrb[1].mxu0 }
 0x5a5   : > { %v13789_v37 = vadd.f32 %v13788_v27, %v12716_v36  ;;  %v12718_v38 = vpop.f32.mrb[2].mxu0 }
 0x5a6   : > { %v12719_v18 = vpop.f32.mrb[3].mxu0  ;;  %v12721_v29 = vmax.f32 %v13787_v35, 0.0 }
 0x5a7   : > { %v12722_v40 = vmax.f32 %v13789_v37, 0.0 }
 0x5a9   : > { %12820 = vmatprep.mubr.f32.mxu1 %v12722_v40 }
 0x5aa   : > { %12821 = vmatmul.mubr.f32.vlgmr.msra.gmra.mrb[4].mxu1 %v12721_v29 }
 0x67d   : > { %v13751_v5 = vpop.f32.mrb[4].mxu1  ;;  %12832 = sbr.rel (%p13713_p11) target bundleno = 1676 (0x68c), region = 100 }
 0x67e   : > { %v13752_v9 = vpop.f32.mrb[5].mxu1 }
 0x67f   : > { %v13753_v43 = vadd.f32 %v13752_v9, %v13751_v5 }
 0x681   : > { %v12826_v59 = vadd.f32 %v13753_v43, %v12723_v11 }
 0x683   : > { %12828 = vst.msk [vmem:[#allocation2] sm:$0x3] %vm12827_vm1, %v12826_v59 }
 0x68a   : > { %v12833_v44 = vld [vmem:[#allocation2] sm:$0x3] }
 0x68b   : > { %12834 = vst.msk [vmem:[#allocation4] sm:$0x3] %vm12827_vm1, %v12833_v44 }
 0x68c PF: > { %p13888_p12 = scmp.eq.s32.totalorder %s15206_s21, 1  ;;  %s15159_s9 = smov [#allocation4]  }
 0x68d   : > { %s12842_s14 = sshll.u32 %s15159_s9, 4  ;;  %s12843_s14 = int_to_ptr.vmem [resolvable:$true] %s12842_s14 }
 0x68e   : > { %s15103_s20 = scalar_lea.vmem %s12843_s14, 32  ;;  %p15110_p2 = scmp.lt.s32.totalorder %s12843_s14, %s12843_s14 }
 0x68f   : > { %p15104_p13 = scmp.ne.s32.totalorder %s12843_s14, %s15103_s20  ;;  %p15111_p3 = scmp.lt.s32.totalorder %s15103_s20, %s15103_s20 }
 0x691   : > { %p15105_p0 = pnand %p15104_p13, %p13888_p12  ;;  %p15112_p4 = por %p15111_p3, %p15110_p2 }
 0x693   : > { %p15106_p1 = pneg %p15105_p0 }
 0x695   : > { %p15113_p5 = pnand %p15112_p4, %p15106_p1 }
 0x697   : > { %15116 = shalt.err (!%p15113_p5)
}
 0x698   : > { %s15117_s30 = scalar_lea.hbm %s17929_s5, 32 }
 0x699   : > { %p15118_p6 = scmp.ne.s32.totalorder %s17929_s5, %s15117_s30  ;;  %p15123_p9 = scmp.lt.u32.totalorder %s15117_s30, %s17929_s5 }
 0x69b   : > { %p15119_p7 = pnand %p15118_p6, %p13888_p12 }
 0x69d   : > { %p15120_p8 = pneg %p15119_p7 }
 0x69f   : > { %p15125_p10 = pnand %p15123_p9, %p15120_p8 }
 0x6a1   : > { %15128 = shalt.err (!%p15125_p10)
}
 0x6a2   : > { %13885 = dma.vmem_to_hbm [thread:$0]  (%p13888_p12), %s12843_s14, 32, %s17929_s5, [#allocation5]  }
 0x6a3   : > { %15142 = dma.done.wait (%p13888_p12), [#allocation5], 32  }
 0x6a4   : > { %15144 = vsyncadd (%p13888_p12), [#allocation5], 4294967264 }
 0x6a5 PF: > { %p13_p11 = scmp.ge.s32.totalorder %s15209_s22, 4   ;;  %s17930_s18 = smov %s15151_s19 }
 0x6a6   : > { %s17931_s19 = smov %s15218_s25  ;;  %s17932_s20 = smov %s15209_s22 }
 0x6a7   :  { %15 = sbr.rel (!%p13_p11) target bundleno = 2 (0x2), region = 144 }
 0x6ae   :  { %12855 = vsyncpa [#allocation5], 1 }
 0x6af   :  { %12857 = vsyncpa [#allocation5 + $0x1], 1 }

</bundles_post_ra>
